<compile_context>
chip_gen: v5e
topology: v5e:2x2
jax: 0.10.0
libtpu: 0.0.40
codegen_flags: <defaults>
</compile_context>

<pallas_src>
import functools
import math

import jax
import jax.numpy as jnp
from jax import lax
from jax.experimental import pallas as pl
from jax.experimental.pallas import tpu as pltpu

# ---------------------------------------------------------------------------
# Module-level constants from the reference script.
# ---------------------------------------------------------------------------
d_model = 128
nhead = 8
num_layers = 2
DIM_FEEDFORWARD = 2048      # nn.Transformer default
MAX_LEN = 5000              # PositionalEncoding default max_len
LN_EPS = 1e-5               # nn.LayerNorm default eps
VMEM_LIMIT = 32 * 1024 * 1024   # safe scoped-VMEM ceiling on v5e/v6e/v7x

sample_text = (
    "\nOnce upon a time, in a land far, far away, there was a kingdom where magic thrived.\n"
    "The people lived in harmony with the mystical creatures that roamed the forests and mountains.\n"
    "Among them was a young wizard named Arin, who sought to master the ancient arts.\n"
    "He ventured into the deepest parts of the enchanted woods, discovering secrets lost to time.\n"
    "With each passing day, his power grew, and so did his understanding of the world's mysteries.\n"
)


def tokenize(text):
    return text.lower().split()


# ---------------------------------------------------------------------------
# PositionalEncoding buffer (same math as the torch module), stored as (L, D).
# ---------------------------------------------------------------------------
def make_positional_encoding_table(dm, max_len=MAX_LEN):
    position = jnp.arange(0, max_len, dtype=jnp.float32)[:, None]
    div_term = jnp.exp(jnp.arange(0, dm, 2, dtype=jnp.float32)
                       * (-math.log(10000.0) / dm))
    pe = jnp.zeros((max_len, dm), dtype=jnp.float32)
    pe = pe.at[:, 0::2].set(jnp.sin(position * div_term))
    pe = pe.at[:, 1::2].set(jnp.cos(position * div_term))
    return pe


# ---------------------------------------------------------------------------
# Tiling helpers.
# ---------------------------------------------------------------------------
def _row_tile(M, target=256):
    """Largest multiple of 8 dividing M (<= target); prefer >=2 tiles for megacore."""
    if M % 8 != 0:
        return M                    # full-block fallback (block == full dim is legal)
    best, t, limit = 8, 8, min(M, target)
    while t <= limit:
        if M % t == 0:
            best = t
        t += 8
    if best == M and M >= 16 and (M // 2) % 8 == 0:
        best = M // 2               # ensure >=2 row tiles so both v7x TCs get work
    return best


def _col_tile(N, target=512):
    """Largest multiple of 128 dividing N (<= target); full N if not 128-aligned."""
    if N % 128 != 0:
        return N
    best, t, limit = 128, 128, min(N, target)
    while t <= limit:
        if N % t == 0:
            best = t
        t += 128
    return best


def _pick_tile_seq(S, target=512):
    assert S % 8 == 0, "sequence length must be a multiple of 8"
    t = min(S, target)
    t -= t % 8
    while t >= 8:
        if S % t == 0:
            return t
        t -= 8
    return 8


# ---------------------------------------------------------------------------
# Kernel 1: fused   emb * sqrt(d_model) + pe   on a dense 2D (B*S, D) slab.
# ---------------------------------------------------------------------------
def _scale_pe_kernel(x_ref, pe_ref, o_ref, *, scale):
    o_ref[...] = x_ref[...] * scale + pe_ref[...]


def embed_scale_pe(emb_bsd, pe_s, scale, use_pallas=True):
    """emb_bsd: (B, S, D). Returns (B*S, D) = emb*scale + pe, rows ordered (b, s)."""
    B, S, D = emb_bsd.shape
    if not use_pallas:
        return (emb_bsd * scale + pe_s[None, :, :]).reshape(B * S, D)

    x2d = emb_bsd.reshape(B * S, D)          # free row-major view, lane-dense
    tile_seq = _pick_tile_seq(S)
    num_tiles = S // tile_seq

    return pl.pallas_call(
        functools.partial(_scale_pe_kernel, scale=scale),
        out_shape=jax.ShapeDtypeStruct((B * S, D), emb_bsd.dtype),
        grid=(num_tiles, B),                 # seq tiles outer, batch inner
        in_specs=[
            pl.BlockSpec((tile_seq, D), lambda i, b: (b * num_tiles + i, 0)),
            # pe block depends only on the seq tile -> stays resident across batch.
            pl.BlockSpec((tile_seq, D), lambda i, b: (i, 0)),
        ],
        out_specs=pl.BlockSpec((tile_seq, D), lambda i, b: (b * num_tiles + i, 0)),
        compiler_params=pltpu.CompilerParams(
            dimension_semantics=("parallel", "parallel"),
            vmem_limit_bytes=VMEM_LIMIT),
    )(x2d, pe_s)


# ---------------------------------------------------------------------------
# Kernel 2: tiled linear (MXU matmul + bias + optional ReLU).
# ---------------------------------------------------------------------------
def _linear_kernel(x_ref, w_ref, b_ref, o_ref, *, activation):
    acc = jnp.dot(x_ref[...], w_ref[...], preferred_element_type=jnp.float32)
    acc = acc + b_ref[...]
    if activation == "relu":
        acc = jnp.maximum(acc, 0.0)
    o_ref[...] = acc.astype(o_ref.dtype)


def linear(x, w, b, activation=None, use_pallas=True):
    if not use_pallas:
        y = jnp.dot(x, w, preferred_element_type=jnp.float32) + b
        if activation == "relu":
            y = jnp.maximum(y, 0.0)
        return y.astype(x.dtype)
    M, K = x.shape
    N = w.shape[1]
    tm, tn = _row_tile(M), _col_tile(N)
    gm, gn = M // tm, N // tn
    return pl.pallas_call(
        functools.partial(_linear_kernel, activation=activation),
        out_shape=jax.ShapeDtypeStruct((M, N), x.dtype),
        # N-tiles outer, M-tiles inner: the (K, tn) weight block stays resident
        # in VMEM while the M axis iterates.
        grid=(gn, gm),
        in_specs=[
            pl.BlockSpec((tm, K), lambda j, i: (i, 0)),
            pl.BlockSpec((K, tn), lambda j, i: (0, j)),
            pl.BlockSpec((1, tn), lambda j, i: (0, j)),
        ],
        out_specs=pl.BlockSpec((tm, tn), lambda j, i: (i, j)),
        compiler_params=pltpu.CompilerParams(
            dimension_semantics=("parallel", "parallel"),
            vmem_limit_bytes=VMEM_LIMIT),
        cost_estimate=pl.CostEstimate(
            flops=int(2 * M * K * N), transcendentals=0,
            bytes_accessed=int(4 * (M * K + K * N + M * N + N))),
    )(x, w, b)


# ---------------------------------------------------------------------------
# Kernel 3: linear (w_o projection) with fused residual-add + LayerNorm epilogue.
# ---------------------------------------------------------------------------
def _linear_add_ln_kernel(x_ref, w_ref, b_ref, res_ref, g_ref, beta_ref, o_ref, *, eps):
    y = jnp.dot(x_ref[...], w_ref[...], preferred_element_type=jnp.float32)
    y = y + b_ref[...] + res_ref[...]
    mu = jnp.mean(y, axis=-1, keepdims=True)
    yc = y - mu
    var = jnp.mean(yc * yc, axis=-1, keepdims=True)
    o_ref[...] = ((yc * lax.rsqrt(var + eps)) * g_ref[...] + beta_ref[...]).astype(o_ref.dtype)


def linear_add_ln(x, w, b, res, gamma, beta, use_pallas=True, eps=LN_EPS):
    """LayerNorm(res + x @ w + b) — post-LN residual block, one kernel."""
    if not use_pallas:
        y = jnp.dot(x, w, preferred_element_type=jnp.float32) + b + res
        mu = jnp.mean(y, axis=-1, keepdims=True)
        yc = y - mu
        var = jnp.mean(yc * yc, axis=-1, keepdims=True)
        return ((yc * lax.rsqrt(var + eps)) * gamma + beta).astype(x.dtype)
    M, K = x.shape
    N = w.shape[1]                 # == d_model; LN needs the full row -> N whole
    tm = _row_tile(M)
    gm = M // tm
    return pl.pallas_call(
        functools.partial(_linear_add_ln_kernel, eps=eps),
        out_shape=jax.ShapeDtypeStruct((M, N), x.dtype),
        grid=(gm,),
        in_specs=[
            pl.BlockSpec((tm, K), lambda i: (i, 0)),
            pl.BlockSpec((K, N), lambda i: (0, 0)),      # weight resident
            pl.BlockSpec((1, N), lambda i: (0, 0)),
            pl.BlockSpec((tm, N), lambda i: (i, 0)),
            pl.BlockSpec((1, N), lambda i: (0, 0)),
            pl.BlockSpec((1, N), lambda i: (0, 0)),
        ],
        out_specs=pl.BlockSpec((tm, N), lambda i: (i, 0)),
        compiler_params=pltpu.CompilerParams(
            dimension_semantics=("parallel",),
            vmem_limit_bytes=VMEM_LIMIT),
        cost_estimate=pl.CostEstimate(
            flops=int(2 * M * K * N + 8 * M * N),
            transcendentals=int(M),
            bytes_accessed=int(4 * (M * K + K * N + 2 * M * N + 3 * N))),
    )(x, w, b, res, gamma, beta)


# ---------------------------------------------------------------------------
# Kernel 4: fused FFN  relu(x@W1+b1)@W2+b2  + residual-add + LayerNorm.
# The (tm, 2048) intermediate lives in a VMEM scratch (no HBM round trip).
# ---------------------------------------------------------------------------
def _ffn_add_ln_kernel(x_ref, w1_ref, b1_ref, w2_ref, b2_ref, res_ref, g_ref, beta_ref,
                       o_ref, h_ref, *, eps):
    h = jnp.dot(x_ref[...], w1_ref[...], preferred_element_type=jnp.float32) + b1_ref[...]
    h_ref[...] = jnp.maximum(h, 0.0)                 # (tm, FF) stays in VMEM
    y = jnp.dot(h_ref[...], w2_ref[...], preferred_element_type=jnp.float32) + b2_ref[...]
    y = y + res_ref[...]
    mu = jnp.mean(y, axis=-1, keepdims=True)
    yc = y - mu
    var = jnp.mean(yc * yc, axis=-1, keepdims=True)
    o_ref[...] = ((yc * lax.rsqrt(var + eps)) * g_ref[...] + beta_ref[...]).astype(o_ref.dtype)


def ffn_add_ln(x, w1, b1, w2, b2, res, gamma, beta, use_pallas=True, eps=LN_EPS):
    if not use_pallas:
        h = jnp.maximum(jnp.dot(x, w1, preferred_element_type=jnp.float32) + b1, 0.0)
        y = jnp.dot(h, w2, preferred_element_type=jnp.float32) + b2 + res
        mu = jnp.mean(y, axis=-1, keepdims=True)
        yc = y - mu
        var = jnp.mean(yc * yc, axis=-1, keepdims=True)
        return ((yc * lax.rsqrt(var + eps)) * gamma + beta).astype(x.dtype)
    M, D = x.shape
    FF = w1.shape[1]
    tm = _row_tile(M)
    gm = M // tm
    return pl.pallas_call(
        functools.partial(_ffn_add_ln_kernel, eps=eps),
        out_shape=jax.ShapeDtypeStruct((M, D), x.dtype),
        grid=(gm,),
        in_specs=[
            pl.BlockSpec((tm, D), lambda i: (i, 0)),
            pl.BlockSpec((D, FF), lambda i: (0, 0)),     # weights resident
            pl.BlockSpec((1, FF), lambda i: (0, 0)),
            pl.BlockSpec((FF, D), lambda i: (0, 0)),
            pl.BlockSpec((1, D), lambda i: (0, 0)),
            pl.BlockSpec((tm, D), lambda i: (i, 0)),
            pl.BlockSpec((1, D), lambda i: (0, 0)),
            pl.BlockSpec((1, D), lambda i: (0, 0)),
        ],
        out_specs=pl.BlockSpec((tm, D), lambda i: (i, 0)),
        scratch_shapes=[pltpu.VMEM((tm, FF), jnp.float32)],
        compiler_params=pltpu.CompilerParams(
            dimension_semantics=("parallel",),
            vmem_limit_bytes=VMEM_LIMIT),
        cost_estimate=pl.CostEstimate(
            flops=int(4 * M * D * FF + 8 * M * D),
            transcendentals=int(M),
            bytes_accessed=int(4 * (3 * M * D + 2 * D * FF + FF + 3 * D))),
    )(x, w1, b1, w2, b2, res, gamma, beta)


# ---------------------------------------------------------------------------
# Kernel 5: multi-head attention, gridded over batch with lane-dense blocks.
# Heads are split in-kernel (static lane slices of the 128-wide rows).
# ---------------------------------------------------------------------------
def _mha_heads(q, k, v, mask, scale, nheads):
    """q:(Sq,D) k,v:(Sk,D). Returns list of per-head (Sq, Dh) outputs."""
    Dh = q.shape[-1] // nheads
    outs = []
    for h in range(nheads):
        sl = slice(h * Dh, (h + 1) * Dh)
        qh, kh, vh = q[:, sl], k[:, sl], v[:, sl]
        s = lax.dot_general(qh, kh, (((1,), (1,)), ((), ())),
                            preferred_element_type=jnp.float32) * scale
        if mask is not None:
            s = s + mask
        m = jnp.max(s, axis=-1, keepdims=True)
        p = jnp.exp(s - m)
        # EUP reciprocal instead of a VPU divide (denominator >= 1, never 0:
        # the causal mask always leaves the diagonal unmasked).
        p = p * pl.reciprocal(jnp.sum(p, axis=-1, keepdims=True), approx=True)
        outs.append(jnp.dot(p, vh, preferred_element_type=jnp.float32))
    return outs


def _self_attn_kernel(qkv_ref, mask_ref, o_ref, *, scale, nheads, dm):
    qkv = qkv_ref[0]                                       # (S, 3*dm), lane-dense
    q, k, v = qkv[:, :dm], qkv[:, dm:2 * dm], qkv[:, 2 * dm:]
    outs = _mha_heads(q, k, v, mask_ref[...], scale, nheads)
    dh = dm // nheads
    for h, oh in enumerate(outs):
        o_ref[0, :, h * dh:(h + 1) * dh] = oh.astype(o_ref.dtype)


def _cross_attn_kernel(q_ref, kv_ref, o_ref, *, scale, nheads, dm):
    q = q_ref[0]                                           # (Sq, dm)
    kv = kv_ref[0]                                         # (Sk, 2*dm)
    k, v = kv[:, :dm], kv[:, dm:]
    outs = _mha_heads(q, k, v, None, scale, nheads)        # memory_mask=None -> no mask
    dh = dm // nheads
    for h, oh in enumerate(outs):
        o_ref[0, :, h * dh:(h + 1) * dh] = oh.astype(o_ref.dtype)


def _mha_ref(q_bsd, k_bsd, v_bsd, mask, scale, nheads):
    B, Sq, D = q_bsd.shape
    Sk = k_bsd.shape[1]
    Dh = D // nheads
    qh = q_bsd.reshape(B, Sq, nheads, Dh).transpose(0, 2, 1, 3)
    kh = k_bsd.reshape(B, Sk, nheads, Dh).transpose(0, 2, 1, 3)
    vh = v_bsd.reshape(B, Sk, nheads, Dh).transpose(0, 2, 1, 3)
    s = jnp.einsum("bhqd,bhkd->bhqk", qh, kh, preferred_element_type=jnp.float32) * scale
    if mask is not None:
        s = s + mask
    m = jnp.max(s, axis=-1, keepdims=True)
    p = jnp.exp(s - m)
    p = p / jnp.sum(p, axis=-1, keepdims=True)
    o = jnp.einsum("bhqk,bhkd->bhqd", p, vh, preferred_element_type=jnp.float32)
    return o.transpose(0, 2, 1, 3).reshape(B, Sq, D).astype(q_bsd.dtype)


def self_attention(qkv_bsd, mask, scale, nheads, use_pallas=True):
    """qkv_bsd: (B, S, 3D) packed from the fused QKV matmul; mask: (S, S)."""
    B, S, threeD = qkv_bsd.shape
    D = threeD // 3
    if not use_pallas:
        q, k, v = qkv_bsd[..., :D], qkv_bsd[..., D:2 * D], qkv_bsd[..., 2 * D:]
        return _mha_ref(q, k, v, mask, scale, nheads)
    return pl.pallas_call(
        functools.partial(_self_attn_kernel, scale=scale, nheads=nheads, dm=D),
        out_shape=jax.ShapeDtypeStruct((B, S, D), qkv_bsd.dtype),
        grid=(B,),
        in_specs=[
            pl.BlockSpec((1, S, threeD), lambda b: (b, 0, 0)),
            pl.BlockSpec((S, S), lambda b: (0, 0)),          # mask stays resident
        ],
        out_specs=pl.BlockSpec((1, S, D), lambda b: (b, 0, 0)),
        compiler_params=pltpu.CompilerParams(
            dimension_semantics=("parallel",),
            vmem_limit_bytes=VMEM_LIMIT),
        cost_estimate=pl.CostEstimate(
            flops=int(4 * B * S * S * D),
            transcendentals=int(B * nheads * S * S),
            bytes_accessed=int(4 * (B * S * threeD + S * S + B * S * D))),
    )(qkv_bsd, mask)


def cross_attention(q_bsd, kv_bsd, scale, nheads, use_pallas=True):
    """q_bsd: (B, Sq, D); kv_bsd: (B, Sk, 2D). No mask (memory_mask=None)."""
    B, Sq, D = q_bsd.shape
    Sk = kv_bsd.shape[1]
    if not use_pallas:
        k, v = kv_bsd[..., :D], kv_bsd[..., D:]
        return _mha_ref(q_bsd, k, v, None, scale, nheads)
    return pl.pallas_call(
        functools.partial(_cross_attn_kernel, scale=scale, nheads=nheads, dm=D),
        out_shape=jax.ShapeDtypeStruct((B, Sq, D), q_bsd.dtype),
        grid=(B,),
        in_specs=[
            pl.BlockSpec((1, Sq, D), lambda b: (b, 0, 0)),
            pl.BlockSpec((1, Sk, 2 * D), lambda b: (b, 0, 0)),
        ],
        out_specs=pl.BlockSpec((1, Sq, D), lambda b: (b, 0, 0)),
        compiler_params=pltpu.CompilerParams(
            dimension_semantics=("parallel",),
            vmem_limit_bytes=VMEM_LIMIT),
        cost_estimate=pl.CostEstimate(
            flops=int(4 * B * Sq * Sk * D),
            transcendentals=int(B * nheads * Sq * Sk),
            bytes_accessed=int(4 * (2 * B * Sq * D + 2 * B * Sk * D))),
    )(q_bsd, kv_bsd)


# ---------------------------------------------------------------------------
# Full TransformerModel.forward (eval mode): (S, B) token ids in, (S, B, V) logits out.
# ---------------------------------------------------------------------------
def forward(params, src_ids, tgt_ids, *, use_pallas=True):
    S_src, B = src_ids.shape
    S_tgt = tgt_ids.shape[0]
    assert S_src == S_tgt, "module reuses the tgt-length causal mask for the encoder"
    D, H = d_model, nhead
    emb_scale = math.sqrt(D)
    attn_scale = 1.0 / math.sqrt(D // H)

    # generate_square_subsequent_mask(len(tgt)); the module (bug and all) uses it for
    # BOTH encoder self-attn (src_mask) and decoder self-attn (tgt_mask). The diagonal
    # is never masked, so no softmax row is fully -inf.
    causal = jnp.triu(jnp.full((S_tgt, S_tgt), -jnp.inf, dtype=jnp.float32), k=1)

    def embed(ids_sb, S):
        # TODO(synk): embedding gather stays in XLA (jnp.take); a scalar-prefetch
        # DMA-gather kernel could fuse it into the scale+pe kernel as well.
        emb = jnp.take(params["embedding"], ids_sb.T, axis=0)                # (B, S, D)
        return embed_scale_pe(emb, params["pe"][:S], emb_scale, use_pallas)  # (B*S, D)

    x = embed(src_ids, S_src)          # encoder stream, rows ordered (b, s)
    y = embed(tgt_ids, S_tgt)          # decoder stream

    # Encoder (post-LN): residual+LN fused into the w_o / FFN epilogues.
    for lp in params["encoder"]:
        a = lp["self_attn"]
        qkv = linear(x, a["w_qkv"], a["b_qkv"], None, use_pallas)            # (B*S, 3D)
        att = self_attention(qkv.reshape(B, S_src, 3 * D), causal, attn_scale, H, use_pallas)
        x = linear_add_ln(att.reshape(B * S_src, D), a["w_o"], a["b_o"],
                          x, lp["ln1_g"], lp["ln1_b"], use_pallas)
        x = ffn_add_ln(x, lp["ffn_w1"], lp["ffn_b1"], lp["ffn_w2"], lp["ffn_b2"],
                       x, lp["ln2_g"], lp["ln2_b"], use_pallas)
    memory = x

    # Decoder.
    for lp in params["decoder"]:
        a = lp["self_attn"]
        qkv = linear(y, a["w_qkv"], a["b_qkv"], None, use_pallas)
        att = self_attention(qkv.reshape(B, S_tgt, 3 * D), causal, attn_scale, H, use_pallas)
        y = linear_add_ln(att.reshape(B * S_tgt, D), a["w_o"], a["b_o"],
                          y, lp["ln1_g"], lp["ln1_b"], use_pallas)
        c = lp["cross_attn"]
        q = linear(y, c["w_q"], c["b_q"], None, use_pallas)                  # (B*S, D)
        kv = linear(memory, c["w_kv"], c["b_kv"], None, use_pallas)          # (B*S, 2D)
        att = cross_attention(q.reshape(B, S_tgt, D), kv.reshape(B, S_src, 2 * D),
                              attn_scale, H, use_pallas)
        y = linear_add_ln(att.reshape(B * S_tgt, D), c["w_o"], c["b_o"],
                          y, lp["ln2_g"], lp["ln2_b"], use_pallas)
        y = ffn_add_ln(y, lp["ffn_w1"], lp["ffn_b1"], lp["ffn_w2"], lp["ffn_b2"],
                       y, lp["ln3_g"], lp["ln3_b"], use_pallas)

    logits2d = linear(y, params["fc_w"], params["fc_b"], None, use_pallas)   # (B*S, V)
    V = logits2d.shape[-1]
    return logits2d.reshape(B, S_tgt, V).transpose(1, 0, 2)                  # (S, B, V)


# ---------------------------------------------------------------------------
# Deterministic parameter init.
# ---------------------------------------------------------------------------
def init_params(key, vocab_size):
    keys = iter(jax.random.split(key, 64))

    def dense(shape, std=0.02):
        return jax.random.normal(next(keys), shape, dtype=jnp.float32) * std

    def zeros(*shape):
        return jnp.zeros(shape, dtype=jnp.float32)

    def ones(*shape):
        return jnp.ones(shape, dtype=jnp.float32)

    def self_attn():
        return dict(w_qkv=dense((d_model, 3 * d_model)), b_qkv=zeros(1, 3 * d_model),
                    w_o=dense((d_model, d_model)), b_o=zeros(1, d_model))

    def cross_attn():
        return dict(w_q=dense((d_model, d_model)), b_q=zeros(1, d_model),
                    w_kv=dense((d_model, 2 * d_model)), b_kv=zeros(1, 2 * d_model),
                    w_o=dense((d_model, d_model)), b_o=zeros(1, d_model))

    def enc_layer():
        return dict(self_attn=self_attn(),
                    ln1_g=ones(1, d_model), ln1_b=zeros(1, d_model),
                    ffn_w1=dense((d_model, DIM_FEEDFORWARD)), ffn_b1=zeros(1, DIM_FEEDFORWARD),
                    ffn_w2=dense((DIM_FEEDFORWARD, d_model)), ffn_b2=zeros(1, d_model),
                    ln2_g=ones(1, d_model), ln2_b=zeros(1, d_model))

    def dec_layer():
        lp = enc_layer()
        lp["cross_attn"] = cross_attn()
        lp["ln3_g"] = ones(1, d_model)
        lp["ln3_b"] = zeros(1, d_model)
        return lp

    return dict(
        embedding=dense((vocab_size, d_model), std=0.1),
        pe=make_positional_encoding_table(d_model, MAX_LEN),
        encoder=[enc_layer() for _ in range(num_layers)],
        decoder=[dec_layer() for _ in range(num_layers)],
        fc_w=dense((d_model, vocab_size)),
        fc_b=zeros(1, vocab_size),
    )


# ---------------------------------------------------------------------------
# Demo / self-check.
# ---------------------------------------------------------------------------
if __name__ == "__main__":
    tokens = tokenize(sample_text)
    vocab = sorted(set(tokens))
    vocab_size = len(vocab)

    S, B = 8, 2                       # small demo shapes (seq-first like torch)
    key = jax.random.PRNGKey(0)
    kp, ksrc, ktgt = jax.random.split(key, 3)
    params = init_params(kp, vocab_size)
    src = jax.random.randint(ksrc, (S, B), 0, vocab_size, dtype=jnp.int32)
    tgt = jax.random.randint(ktgt, (S, B), 0, vocab_size, dtype=jnp.int32)

    fwd_pallas = jax.jit(functools.partial(forward, use_pallas=True))
    fwd_ref = jax.jit(functools.partial(forward, use_pallas=False))

    out = jax.block_until_ready(fwd_pallas(params, src, tgt))
    ref = jax.block_until_ready(fwd_ref(params, src, tgt))

    # Tight check of the fused embed*sqrt(d_model)+pe kernel (pure elementwise, f32).
    emb = jnp.take(params["embedding"], src.T, axis=0)
    got = jax.block_until_ready(
        embed_scale_pe(emb, params["pe"][:S], math.sqrt(d_model), use_pallas=True))
    want = embed_scale_pe(emb, params["pe"][:S], math.sqrt(d_model), use_pallas=False)
    assert jnp.allclose(got, want, atol=1e-5, rtol=1e-5)

    # End-to-end check (loose tolerance: MXU vs XLA matmul rounding + approx recip).
    assert out.shape == (S, B, vocab_size)
    assert out.dtype == jnp.float32
    assert bool(jnp.all(jnp.isfinite(out)))
    assert jnp.allclose(out, ref, atol=3e-2, rtol=3e-2), float(jnp.max(jnp.abs(out - ref)))

    print("KERNEL_OK")
</pallas_src>

<mosaic_0001>
module attributes {stable_mosaic.version = 11 : i64} {
  func.func @_scale_pe_kernel(%arg0: i32, %arg1: i32, %arg2: memref<8x128xf32, #tpu.memory_space<vmem>>, %arg3: memref<8x128xf32, #tpu.memory_space<vmem>>, %arg4: memref<8x128xf32, #tpu.memory_space<vmem>>) attributes {dimension_semantics = [#tpu.dimension_semantics<parallel>, #tpu.dimension_semantics<parallel>], iteration_bounds = array<i64: 1, 2>, scalar_prefetch = 0 : i64, scratch_operands = 0 : i64, tpu.core_type = #tpu.core_type<tc>, window_params = [{transform_indices = @transform_0, window_bounds = array<i64: 8, 128>}, {transform_indices = @transform_1, window_bounds = array<i64: 8, 128>}, {transform_indices = @transform_2, window_bounds = array<i64: 8, 128>}]} {
    %c0 = arith.constant 0 : index
    %c0_0 = arith.constant 0 : index
    %0 = vector.load %arg2[%c0, %c0_0] : memref<8x128xf32, #tpu.memory_space<vmem>>, vector<8x128xf32>
    %cst = arith.constant 11.3137083 : f32
    %1 = vector.broadcast %cst : f32 to vector<8x128xf32>
    %2 = arith.mulf %0, %1 : vector<8x128xf32>
    %c0_1 = arith.constant 0 : index
    %c0_2 = arith.constant 0 : index
    %3 = vector.load %arg3[%c0_1, %c0_2] : memref<8x128xf32, #tpu.memory_space<vmem>>, vector<8x128xf32>
    %4 = arith.addf %2, %3 : vector<8x128xf32>
    %c0_3 = arith.constant 0 : index
    %c0_4 = arith.constant 0 : index
    %5 = vector.load %arg4[%c0_3, %c0_4] : memref<8x128xf32, #tpu.memory_space<vmem>>, vector<8x128xf32>
    tpu.vector_store %arg4[%c0_3, %c0_4], %4 {strides = array<i32>} : memref<8x128xf32, #tpu.memory_space<vmem>>, vector<8x128xf32>,
    return
  }
  func.func @transform_0(%arg0: i32, %arg1: i32) -> (i32, i32) {
    %c1_i32 = arith.constant 1 : i32
    %0 = arith.muli %arg1, %c1_i32 : i32
    %1 = arith.addi %0, %arg0 : i32
    %c0_i32 = arith.constant 0 : i32
    %c0_i32_0 = arith.constant 0 : i32
    return %1, %c0_i32 : i32, i32
  }
  func.func @transform_1(%arg0: i32, %arg1: i32) -> (i32, i32) {
    %c0_i32 = arith.constant 0 : i32
    %c0_i32_0 = arith.constant 0 : i32
    return %arg0, %c0_i32 : i32, i32
  }
  func.func @transform_2(%arg0: i32, %arg1: i32) -> (i32, i32) {
    %c1_i32 = arith.constant 1 : i32
    %0 = arith.muli %arg1, %c1_i32 : i32
    %1 = arith.addi %0, %arg0 : i32
    %c0_i32 = arith.constant 0 : i32
    %c0_i32_0 = arith.constant 0 : i32
    return %1, %c0_i32 : i32, i32
  }
}

module attributes {stable_mosaic.version = 11 : i64} {
  func.func @_linear_kernel(%arg0: i32, %arg1: i32, %arg2: memref<8x128xf32, #tpu.memory_space<vmem>>, %arg3: memref<128x384xf32, #tpu.memory_space<vmem>>, %arg4: memref<1x384xf32, #tpu.memory_space<vmem>>, %arg5: memref<8x384xf32, #tpu.memory_space<vmem>>) attributes {dimension_semantics = [#tpu.dimension_semantics<parallel>, #tpu.dimension_semantics<parallel>], iteration_bounds = array<i64: 1, 2>, scalar_prefetch = 0 : i64, scratch_operands = 0 : i64, tpu.core_type = #tpu.core_type<tc>, window_params = [{transform_indices = @transform_0, window_bounds = array<i64: 8, 128>}, {transform_indices = @transform_1, window_bounds = array<i64: 128, 384>}, {transform_indices = @transform_2, window_bounds = array<i64: 1, 384>}, {transform_indices = @transform_3, window_bounds = array<i64: 8, 384>}]} {
    %c0 = arith.constant 0 : index
    %c0_0 = arith.constant 0 : index
    %0 = vector.load %arg2[%c0, %c0_0] : memref<8x128xf32, #tpu.memory_space<vmem>>, vector<8x128xf32>
    %c0_1 = arith.constant 0 : index
    %c0_2 = arith.constant 0 : index
    %1 = vector.load %arg3[%c0_1, %c0_2] : memref<128x384xf32, #tpu.memory_space<vmem>>, vector<128x384xf32>
    %cst = arith.constant dense<0.000000e+00> : vector<8x384xf32>
    %2 = tpu.matmul %0, %1, %cst {dimension_numbers = #tpu.dot_dimension_numbers<[1], [0], [0], [1], [0, 0, 1, 1], [], []>} : vector<8x128xf32>, vector<128x384xf32>, vector<8x384xf32> -> vector<8x384xf32>
    %c0_3 = arith.constant 0 : index
    %c0_4 = arith.constant 0 : index
    %3 = vector.load %arg4[%c0_3, %c0_4] : memref<1x384xf32, #tpu.memory_space<vmem>>, vector<1x384xf32>
    %4 = vector.broadcast %3 : vector<1x384xf32> to vector<8x384xf32>
    %5 = arith.addf %2, %4 : vector<8x384xf32>
    %c0_5 = arith.constant 0 : index
    %c0_6 = arith.constant 0 : index
    %6 = vector.load %arg5[%c0_5, %c0_6] : memref<8x384xf32, #tpu.memory_space<vmem>>, vector<8x384xf32>
    tpu.vector_store %arg5[%c0_5, %c0_6], %5 {strides = array<i32>} : memref<8x384xf32, #tpu.memory_space<vmem>>, vector<8x384xf32>,
    return
  }
  func.func @transform_0(%arg0: i32, %arg1: i32) -> (i32, i32) {
    %c0_i32 = arith.constant 0 : i32
    %c0_i32_0 = arith.constant 0 : i32
    return %arg1, %c0_i32 : i32, i32
  }
  func.func @transform_1(%arg0: i32, %arg1: i32) -> (i32, i32) {
    %c0_i32 = arith.constant 0 : i32
    %c0_i32_0 = arith.constant 0 : i32
    return %c0_i32, %arg0 : i32, i32
  }
  func.func @transform_2(%arg0: i32, %arg1: i32) -> (i32, i32) {
    %c0_i32 = arith.constant 0 : i32
    %c0_i32_0 = arith.constant 0 : i32
    return %c0_i32, %arg0 : i32, i32
  }
  func.func @transform_3(%arg0: i32, %arg1: i32) -> (i32, i32) {
    %c0_i32 = arith.constant 0 : i32
    return %arg1, %arg0 : i32, i32
  }
}

module attributes {stable_mosaic.version = 11 : i64} {
  func.func @_self_attn_kernel(%arg0: i32, %arg1: memref<1x8x384xf32, #tpu.memory_space<vmem>>, %arg2: memref<8x8xf32, #tpu.memory_space<vmem>>, %arg3: memref<1x8x128xf32, #tpu.memory_space<vmem>>) attributes {dimension_semantics = [#tpu.dimension_semantics<parallel>], iteration_bounds = array<i64: 2>, scalar_prefetch = 0 : i64, scratch_operands = 0 : i64, tpu.core_type = #tpu.core_type<tc>, window_params = [{transform_indices = @transform_0, window_bounds = array<i64: 1, 8, 384>}, {pipeline_mode = #tpu.pipeline_mode<synchronous>, transform_indices = @transform_1, window_bounds = array<i64: 8, 8>}, {transform_indices = @transform_2, window_bounds = array<i64: 1, 8, 128>}]} {
    %c0 = arith.constant 0 : index
    %c0_0 = arith.constant 0 : index
    %c0_1 = arith.constant 0 : index
    %0 = vector.load %arg1[%c0, %c0_0, %c0_1] : memref<1x8x384xf32, #tpu.memory_space<vmem>>, vector<1x8x384xf32>
    %1 = vector.shape_cast %0 : vector<1x8x384xf32> to vector<8x384xf32>
    %2 = vector.extract_strided_slice %1 {offsets = [0, 0], sizes = [8, 128], strides = [1, 1]} : vector<8x384xf32> to vector<8x128xf32>
    %3 = vector.extract_strided_slice %1 {offsets = [0, 128], sizes = [8, 128], strides = [1, 1]} : vector<8x384xf32> to vector<8x128xf32>
    %4 = vector.extract_strided_slice %1 {offsets = [0, 256], sizes = [8, 128], strides = [1, 1]} : vector<8x384xf32> to vector<8x128xf32>
    %c0_2 = arith.constant 0 : index
    %c0_3 = arith.constant 0 : index
    %5 = vector.load %arg2[%c0_2, %c0_3] : memref<8x8xf32, #tpu.memory_space<vmem>>, vector<8x8xf32>
    %6 = vector.extract_strided_slice %2 {offsets = [0, 0], sizes = [8, 16], strides = [1, 1]} : vector<8x128xf32> to vector<8x16xf32>
    %7 = vector.extract_strided_slice %3 {offsets = [0, 0], sizes = [8, 16], strides = [1, 1]} : vector<8x128xf32> to vector<8x16xf32>
    %8 = vector.extract_strided_slice %4 {offsets = [0, 0], sizes = [8, 16], strides = [1, 1]} : vector<8x128xf32> to vector<8x16xf32>
    %cst = arith.constant dense<0.000000e+00> : vector<8x8xf32>
    %9 = tpu.matmul %6, %7, %cst {dimension_numbers = #tpu.dot_dimension_numbers<[1], [1], [0], [0], [0, 0, 1, 0], [], []>} : vector<8x16xf32>, vector<8x16xf32>, vector<8x8xf32> -> vector<8x8xf32>
    %cst_4 = arith.constant 2.500000e-01 : f32
    %10 = vector.broadcast %cst_4 : f32 to vector<8x8xf32>
    %11 = arith.mulf %9, %10 : vector<8x8xf32>
    %12 = arith.addf %11, %5 : vector<8x8xf32>
    %cst_5 = arith.constant dense<0xFF800000> : vector<8xf32>
    %13 = vector.multi_reduction <maximumf>, %12, %cst_5 [1] : vector<8x8xf32> to vector<8xf32>
    %14 = vector.shape_cast %13 : vector<8xf32> to vector<8x1xf32>
    %15 = vector.broadcast %14 : vector<8x1xf32> to vector<8x8xf32>
    %16 = arith.subf %12, %15 : vector<8x8xf32>
    %17 = math.exp %16 : vector<8x8xf32>
    %cst_6 = arith.constant dense<0.000000e+00> : vector<8xf32>
    %18 = vector.multi_reduction <add>, %17, %cst_6 [1] : vector<8x8xf32> to vector<8xf32>
    %19 = vector.shape_cast %18 : vector<8xf32> to vector<8x1xf32>
    %20 = tpu.reciprocal %19 {approx = true} : vector<8x1xf32> -> vector<8x1xf32>
    %21 = vector.broadcast %20 : vector<8x1xf32> to vector<8x8xf32>
    %22 = arith.mulf %17, %21 : vector<8x8xf32>
    %cst_7 = arith.constant dense<0.000000e+00> : vector<8x16xf32>
    %23 = tpu.matmul %22, %8, %cst_7 {dimension_numbers = #tpu.dot_dimension_numbers<[1], [0], [0], [1], [0, 0, 1, 1], [], []>} : vector<8x8xf32>, vector<8x16xf32>, vector<8x16xf32> -> vector<8x16xf32>
    %24 = vector.extract_strided_slice %2 {offsets = [0, 16], sizes = [8, 16], strides = [1, 1]} : vector<8x128xf32> to vector<8x16xf32>
    %25 = vector.extract_strided_slice %3 {offsets = [0, 16], sizes = [8, 16], strides = [1, 1]} : vector<8x128xf32> to vector<8x16xf32>
    %26 = vector.extract_strided_slice %4 {offsets = [0, 16], sizes = [8, 16], strides = [1, 1]} : vector<8x128xf32> to vector<8x16xf32>
    %cst_8 = arith.constant dense<0.000000e+00> : vector<8x8xf32>
    %27 = tpu.matmul %24, %25, %cst_8 {dimension_numbers = #tpu.dot_dimension_numbers<[1], [1], [0], [0], [0, 0, 1, 0], [], []>} : vector<8x16xf32>, vector<8x16xf32>, vector<8x8xf32> -> vector<8x8xf32>
    %cst_9 = arith.constant 2.500000e-01 : f32
    %28 = vector.broadcast %cst_9 : f32 to vector<8x8xf32>
    %29 = arith.mulf %27, %28 : vector<8x8xf32>
    %30 = arith.addf %29, %5 : vector<8x8xf32>
    %cst_10 = arith.constant dense<0xFF800000> : vector<8xf32>
    %31 = vector.multi_reduction <maximumf>, %30, %cst_10 [1] : vector<8x8xf32> to vector<8xf32>
    %32 = vector.shape_cast %31 : vector<8xf32> to vector<8x1xf32>
    %33 = vector.broadcast %32 : vector<8x1xf32> to vector<8x8xf32>
    %34 = arith.subf %30, %33 : vector<8x8xf32>
    %35 = math.exp %34 : vector<8x8xf32>
    %cst_11 = arith.constant dense<0.000000e+00> : vector<8xf32>
    %36 = vector.multi_reduction <add>, %35, %cst_11 [1] : vector<8x8xf32> to vector<8xf32>
    %37 = vector.shape_cast %36 : vector<8xf32> to vector<8x1xf32>
    %38 = tpu.reciprocal %37 {approx = true} : vector<8x1xf32> -> vector<8x1xf32>
    %39 = vector.broadcast %38 : vector<8x1xf32> to vector<8x8xf32>
    %40 = arith.mulf %35, %39 : vector<8x8xf32>
    %cst_12 = arith.constant dense<0.000000e+00> : vector<8x16xf32>
    %41 = tpu.matmul %40, %26, %cst_12 {dimension_numbers = #tpu.dot_dimension_numbers<[1], [0], [0], [1], [0, 0, 1, 1], [], []>} : vector<8x8xf32>, vector<8x16xf32>, vector<8x16xf32> -> vector<8x16xf32>
    %42 = vector.extract_strided_slice %2 {offsets = [0, 32], sizes = [8, 16], strides = [1, 1]} : vector<8x128xf32> to vector<8x16xf32>
    %43 = vector.extract_strided_slice %3 {offsets = [0, 32], sizes = [8, 16], strides = [1, 1]} : vector<8x128xf32> to vector<8x16xf32>
    %44 = vector.extract_strided_slice %4 {offsets = [0, 32], sizes = [8, 16], strides = [1, 1]} : vector<8x128xf32> to vector<8x16xf32>
    %cst_13 = arith.constant dense<0.000000e+00> : vector<8x8xf32>
    %45 = tpu.matmul %42, %43, %cst_13 {dimension_numbers = #tpu.dot_dimension_numbers<[1], [1], [0], [0], [0, 0, 1, 0], [], []>} : vector<8x16xf32>, vector<8x16xf32>, vector<8x8xf32> -> vector<8x8xf32>
    %cst_14 = arith.constant 2.500000e-01 : f32
    %46 = vector.broadcast %cst_14 : f32 to vector<8x8xf32>
    %47 = arith.mulf %45, %46 : vector<8x8xf32>
    %48 = arith.addf %47, %5 : vector<8x8xf32>
    %cst_15 = arith.constant dense<0xFF800000> : vector<8xf32>
    %49 = vector.multi_reduction <maximumf>, %48, %cst_15 [1] : vector<8x8xf32> to vector<8xf32>
    %50 = vector.shape_cast %49 : vector<8xf32> to vector<8x1xf32>
    %51 = vector.broadcast %50 : vector<8x1xf32> to vector<8x8xf32>
    %52 = arith.subf %48, %51 : vector<8x8xf32>
    %53 = math.exp %52 : vector<8x8xf32>
    %cst_16 = arith.constant dense<0.000000e+00> : vector<8xf32>
    %54 = vector.multi_reduction <add>, %53, %cst_16 [1] : vector<8x8xf32> to vector<8xf32>
    %55 = vector.shape_cast %54 : vector<8xf32> to vector<8x1xf32>
    %56 = tpu.reciprocal %55 {approx = true} : vector<8x1xf32> -> vector<8x1xf32>
    %57 = vector.broadcast %56 : vector<8x1xf32> to vector<8x8xf32>
    %58 = arith.mulf %53, %57 : vector<8x8xf32>
    %cst_17 = arith.constant dense<0.000000e+00> : vector<8x16xf32>
    %59 = tpu.matmul %58, %44, %cst_17 {dimension_numbers = #tpu.dot_dimension_numbers<[1], [0], [0], [1], [0, 0, 1, 1], [], []>} : vector<8x8xf32>, vector<8x16xf32>, vector<8x16xf32> -> vector<8x16xf32>
    %60 = vector.extract_strided_slice %2 {offsets = [0, 48], sizes = [8, 16], strides = [1, 1]} : vector<8x128xf32> to vector<8x16xf32>
    %61 = vector.extract_strided_slice %3 {offsets = [0, 48], sizes = [8, 16], strides = [1, 1]} : vector<8x128xf32> to vector<8x16xf32>
    %62 = vector.extract_strided_slice %4 {offsets = [0, 48], sizes = [8, 16], strides = [1, 1]} : vector<8x128xf32> to vector<8x16xf32>
    %cst_18 = arith.constant dense<0.000000e+00> : vector<8x8xf32>
    %63 = tpu.matmul %60, %61, %cst_18 {dimension_numbers = #tpu.dot_dimension_numbers<[1], [1], [0], [0], [0, 0, 1, 0], [], []>} : vector<8x16xf32>, vector<8x16xf32>, vector<8x8xf32> -> vector<8x8xf32>
    %cst_19 = arith.constant 2.500000e-01 : f32
    %64 = vector.broadcast %cst_19 : f32 to vector<8x8xf32>
    %65 = arith.mulf %63, %64 : vector<8x8xf32>
    %66 = arith.addf %65, %5 : vector<8x8xf32>
    %cst_20 = arith.constant dense<0xFF800000> : vector<8xf32>
    %67 = vector.multi_reduction <maximumf>, %66, %cst_20 [1] : vector<8x8xf32> to vector<8xf32>
    %68 = vector.shape_cast %67 : vector<8xf32> to vector<8x1xf32>
    %69 = vector.broadcast %68 : vector<8x1xf32> to vector<8x8xf32>
    %70 = arith.subf %66, %69 : vector<8x8xf32>
    %71 = math.exp %70 : vector<8x8xf32>
    %cst_21 = arith.constant dense<0.000000e+00> : vector<8xf32>
    %72 = vector.multi_reduction <add>, %71, %cst_21 [1] : vector<8x8xf32> to vector<8xf32>
    %73 = vector.shape_cast %72 : vector<8xf32> to vector<8x1xf32>
    %74 = tpu.reciprocal %73 {approx = true} : vector<8x1xf32> -> vector<8x1xf32>
    %75 = vector.broadcast %74 : vector<8x1xf32> to vector<8x8xf32>
    %76 = arith.mulf %71, %75 : vector<8x8xf32>
    %cst_22 = arith.constant dense<0.000000e+00> : vector<8x16xf32>
    %77 = tpu.matmul %76, %62, %cst_22 {dimension_numbers = #tpu.dot_dimension_numbers<[1], [0], [0], [1], [0, 0, 1, 1], [], []>} : vector<8x8xf32>, vector<8x16xf32>, vector<8x16xf32> -> vector<8x16xf32>
    %78 = vector.extract_strided_slice %2 {offsets = [0, 64], sizes = [8, 16], strides = [1, 1]} : vector<8x128xf32> to vector<8x16xf32>
    %79 = vector.extract_strided_slice %3 {offsets = [0, 64], sizes = [8, 16], strides = [1, 1]} : vector<8x128xf32> to vector<8x16xf32>
    %80 = vector.extract_strided_slice %4 {offsets = [0, 64], sizes = [8, 16], strides = [1, 1]} : vector<8x128xf32> to vector<8x16xf32>
    %cst_23 = arith.constant dense<0.000000e+00> : vector<8x8xf32>
    %81 = tpu.matmul %78, %79, %cst_23 {dimension_numbers = #tpu.dot_dimension_numbers<[1], [1], [0], [0], [0, 0, 1, 0], [], []>} : vector<8x16xf32>, vector<8x16xf32>, vector<8x8xf32> -> vector<8x8xf32>
    %cst_24 = arith.constant 2.500000e-01 : f32
    %82 = vector.broadcast %cst_24 : f32 to vector<8x8xf32>
    %83 = arith.mulf %81, %82 : vector<8x8xf32>
    %84 = arith.addf %83, %5 : vector<8x8xf32>
    %cst_25 = arith.constant dense<0xFF800000> : vector<8xf32>
    %85 = vector.multi_reduction <maximumf>, %84, %cst_25 [1] : vector<8x8xf32> to vector<8xf32>
    %86 = vector.shape_cast %85 : vector<8xf32> to vector<8x1xf32>
    %87 = vector.broadcast %86 : vector<8x1xf32> to vector<8x8xf32>
    %88 = arith.subf %84, %87 : vector<8x8xf32>
    %89 = math.exp %88 : vector<8x8xf32>
    %cst_26 = arith.constant dense<0.000000e+00> : vector<8xf32>
    %90 = vector.multi_reduction <add>, %89, %cst_26 [1] : vector<8x8xf32> to vector<8xf32>
    %91 = vector.shape_cast %90 : vector<8xf32> to vector<8x1xf32>
    %92 = tpu.reciprocal %91 {approx = true} : vector<8x1xf32> -> vector<8x1xf32>
    %93 = vector.broadcast %92 : vector<8x1xf32> to vector<8x8xf32>
    %94 = arith.mulf %89, %93 : vector<8x8xf32>
    %cst_27 = arith.constant dense<0.000000e+00> : vector<8x16xf32>
    %95 = tpu.matmul %94, %80, %cst_27 {dimension_numbers = #tpu.dot_dimension_numbers<[1], [0], [0], [1], [0, 0, 1, 1], [], []>} : vector<8x8xf32>, vector<8x16xf32>, vector<8x16xf32> -> vector<8x16xf32>
    %96 = vector.extract_strided_slice %2 {offsets = [0, 80], sizes = [8, 16], strides = [1, 1]} : vector<8x128xf32> to vector<8x16xf32>
    %97 = vector.extract_strided_slice %3 {offsets = [0, 80], sizes = [8, 16], strides = [1, 1]} : vector<8x128xf32> to vector<8x16xf32>
    %98 = vector.extract_strided_slice %4 {offsets = [0, 80], sizes = [8, 16], strides = [1, 1]} : vector<8x128xf32> to vector<8x16xf32>
    %cst_28 = arith.constant dense<0.000000e+00> : vector<8x8xf32>
    %99 = tpu.matmul %96, %97, %cst_28 {dimension_numbers = #tpu.dot_dimension_numbers<[1], [1], [0], [0], [0, 0, 1, 0], [], []>} : vector<8x16xf32>, vector<8x16xf32>, vector<8x8xf32> -> vector<8x8xf32>
    %cst_29 = arith.constant 2.500000e-01 : f32
    %100 = vector.broadcast %cst_29 : f32 to vector<8x8xf32>
    %101 = arith.mulf %99, %100 : vector<8x8xf32>
    %102 = arith.addf %101, %5 : vector<8x8xf32>
    %cst_30 = arith.constant dense<0xFF800000> : vector<8xf32>
    %103 = vector.multi_reduction <maximumf>, %102, %cst_30 [1] : vector<8x8xf32> to vector<8xf32>
    %104 = vector.shape_cast %103 : vector<8xf32> to vector<8x1xf32>
    %105 = vector.broadcast %104 : vector<8x1xf32> to vector<8x8xf32>
    %106 = arith.subf %102, %105 : vector<8x8xf32>
    %107 = math.exp %106 : vector<8x8xf32>
    %cst_31 = arith.constant dense<0.000000e+00> : vector<8xf32>
    %108 = vector.multi_reduction <add>, %107, %cst_31 [1] : vector<8x8xf32> to vector<8xf32>
    %109 = vector.shape_cast %108 : vector<8xf32> to vector<8x1xf32>
    %110 = tpu.reciprocal %109 {approx = true} : vector<8x1xf32> -> vector<8x1xf32>
    %111 = vector.broadcast %110 : vector<8x1xf32> to vector<8x8xf32>
    %112 = arith.mulf %107, %111 : vector<8x8xf32>
    %cst_32 = arith.constant dense<0.000000e+00> : vector<8x16xf32>
    %113 = tpu.matmul %112, %98, %cst_32 {dimension_numbers = #tpu.dot_dimension_numbers<[1], [0], [0], [1], [0, 0, 1, 1], [], []>} : vector<8x8xf32>, vector<8x16xf32>, vector<8x16xf32> -> vector<8x16xf32>
    %114 = vector.extract_strided_slice %2 {offsets = [0, 96], sizes = [8, 16], strides = [1, 1]} : vector<8x128xf32> to vector<8x16xf32>
    %115 = vector.extract_strided_slice %3 {offsets = [0, 96], sizes = [8, 16], strides = [1, 1]} : vector<8x128xf32> to vector<8x16xf32>
    %116 = vector.extract_strided_slice %4 {offsets = [0, 96], sizes = [8, 16], strides = [1, 1]} : vector<8x128xf32> to vector<8x16xf32>
    %cst_33 = arith.constant dense<0.000000e+00> : vector<8x8xf32>
    %117 = tpu.matmul %114, %115, %cst_33 {dimension_numbers = #tpu.dot_dimension_numbers<[1], [1], [0], [0], [0, 0, 1, 0], [], []>} : vector<8x16xf32>, vector<8x16xf32>, vector<8x8xf32> -> vector<8x8xf32>
    %cst_34 = arith.constant 2.500000e-01 : f32
    %118 = vector.broadcast %cst_34 : f32 to vector<8x8xf32>
    %119 = arith.mulf %117, %118 : vector<8x8xf32>
    %120 = arith.addf %119, %5 : vector<8x8xf32>
    %cst_35 = arith.constant dense<0xFF800000> : vector<8xf32>
    %121 = vector.multi_reduction <maximumf>, %120, %cst_35 [1] : vector<8x8xf32> to vector<8xf32>
    %122 = vector.shape_cast %121 : vector<8xf32> to vector<8x1xf32>
    %123 = vector.broadcast %122 : vector<8x1xf32> to vector<8x8xf32>
    %124 = arith.subf %120, %123 : vector<8x8xf32>
    %125 = math.exp %124 : vector<8x8xf32>
    %cst_36 = arith.constant dense<0.000000e+00> : vector<8xf32>
    %126 = vector.multi_reduction <add>, %125, %cst_36 [1] : vector<8x8xf32> to vector<8xf32>
    %127 = vector.shape_cast %126 : vector<8xf32> to vector<8x1xf32>
    %128 = tpu.reciprocal %127 {approx = true} : vector<8x1xf32> -> vector<8x1xf32>
    %129 = vector.broadcast %128 : vector<8x1xf32> to vector<8x8xf32>
    %130 = arith.mulf %125, %129 : vector<8x8xf32>
    %cst_37 = arith.constant dense<0.000000e+00> : vector<8x16xf32>
    %131 = tpu.matmul %130, %116, %cst_37 {dimension_numbers = #tpu.dot_dimension_numbers<[1], [0], [0], [1], [0, 0, 1, 1], [], []>} : vector<8x8xf32>, vector<8x16xf32>, vector<8x16xf32> -> vector<8x16xf32>
    %132 = vector.extract_strided_slice %2 {offsets = [0, 112], sizes = [8, 16], strides = [1, 1]} : vector<8x128xf32> to vector<8x16xf32>
    %133 = vector.extract_strided_slice %3 {offsets = [0, 112], sizes = [8, 16], strides = [1, 1]} : vector<8x128xf32> to vector<8x16xf32>
    %134 = vector.extract_strided_slice %4 {offsets = [0, 112], sizes = [8, 16], strides = [1, 1]} : vector<8x128xf32> to vector<8x16xf32>
    %cst_38 = arith.constant dense<0.000000e+00> : vector<8x8xf32>
    %135 = tpu.matmul %132, %133, %cst_38 {dimension_numbers = #tpu.dot_dimension_numbers<[1], [1], [0], [0], [0, 0, 1, 0], [], []>} : vector<8x16xf32>, vector<8x16xf32>, vector<8x8xf32> -> vector<8x8xf32>
    %cst_39 = arith.constant 2.500000e-01 : f32
    %136 = vector.broadcast %cst_39 : f32 to vector<8x8xf32>
    %137 = arith.mulf %135, %136 : vector<8x8xf32>
    %138 = arith.addf %137, %5 : vector<8x8xf32>
    %cst_40 = arith.constant dense<0xFF800000> : vector<8xf32>
    %139 = vector.multi_reduction <maximumf>, %138, %cst_40 [1] : vector<8x8xf32> to vector<8xf32>
    %140 = vector.shape_cast %139 : vector<8xf32> to vector<8x1xf32>
    %141 = vector.broadcast %140 : vector<8x1xf32> to vector<8x8xf32>
    %142 = arith.subf %138, %141 : vector<8x8xf32>
    %143 = math.exp %142 : vector<8x8xf32>
    %cst_41 = arith.constant dense<0.000000e+00> : vector<8xf32>
    %144 = vector.multi_reduction <add>, %143, %cst_41 [1] : vector<8x8xf32> to vector<8xf32>
    %145 = vector.shape_cast %144 : vector<8xf32> to vector<8x1xf32>
    %146 = tpu.reciprocal %145 {approx = true} : vector<8x1xf32> -> vector<8x1xf32>
    %147 = vector.broadcast %146 : vector<8x1xf32> to vector<8x8xf32>
    %148 = arith.mulf %143, %147 : vector<8x8xf32>
    %cst_42 = arith.constant dense<0.000000e+00> : vector<8x16xf32>
    %149 = tpu.matmul %148, %134, %cst_42 {dimension_numbers = #tpu.dot_dimension_numbers<[1], [0], [0], [1], [0, 0, 1, 1], [], []>} : vector<8x8xf32>, vector<8x16xf32>, vector<8x16xf32> -> vector<8x16xf32>
    %c0_43 = arith.constant 0 : index
    %c0_44 = arith.constant 0 : index
    %c0_45 = arith.constant 0 : index
    %150 = vector.load %arg3[%c0_43, %c0_44, %c0_45] : memref<1x8x128xf32, #tpu.memory_space<vmem>>, vector<1x8x16xf32>
    %151 = vector.shape_cast %150 : vector<1x8x16xf32> to vector<8x16xf32>
    %152 = vector.shape_cast %23 : vector<8x16xf32> to vector<1x8x16xf32>
    tpu.vector_store %arg3[%c0_43, %c0_44, %c0_45], %152 {strides = array<i32>} : memref<1x8x128xf32, #tpu.memory_space<vmem>>, vector<1x8x16xf32>,
    %c0_46 = arith.constant 0 : index
    %c0_47 = arith.constant 0 : index
    %c16 = arith.constant 16 : index
    %153 = vector.load %arg3[%c0_46, %c0_47, %c16] : memref<1x8x128xf32, #tpu.memory_space<vmem>>, vector<1x8x16xf32>
    %154 = vector.shape_cast %153 : vector<1x8x16xf32> to vector<8x16xf32>
    %155 = vector.shape_cast %41 : vector<8x16xf32> to vector<1x8x16xf32>
    tpu.vector_store %arg3[%c0_46, %c0_47, %c16], %155 {strides = array<i32>} : memref<1x8x128xf32, #tpu.memory_space<vmem>>, vector<1x8x16xf32>,
    %c0_48 = arith.constant 0 : index
    %c0_49 = arith.constant 0 : index
    %c32 = arith.constant 32 : index
    %156 = vector.load %arg3[%c0_48, %c0_49, %c32] : memref<1x8x128xf32, #tpu.memory_space<vmem>>, vector<1x8x16xf32>
    %157 = vector.shape_cast %156 : vector<1x8x16xf32> to vector<8x16xf32>
    %158 = vector.shape_cast %59 : vector<8x16xf32> to vector<1x8x16xf32>
    tpu.vector_store %arg3[%c0_48, %c0_49, %c32], %158 {strides = array<i32>} : memref<1x8x128xf32, #tpu.memory_space<vmem>>, vector<1x8x16xf32>,
    %c0_50 = arith.constant 0 : index
    %c0_51 = arith.constant 0 : index
    %c48 = arith.constant 48 : index
    %159 = vector.load %arg3[%c0_50, %c0_51, %c48] : memref<1x8x128xf32, #tpu.memory_space<vmem>>, vector<1x8x16xf32>
    %160 = vector.shape_cast %159 : vector<1x8x16xf32> to vector<8x16xf32>
    %161 = vector.shape_cast %77 : vector<8x16xf32> to vector<1x8x16xf32>
    tpu.vector_store %arg3[%c0_50, %c0_51, %c48], %161 {strides = array<i32>} : memref<1x8x128xf32, #tpu.memory_space<vmem>>, vector<1x8x16xf32>,
    %c0_52 = arith.constant 0 : index
    %c0_53 = arith.constant 0 : index
    %c64 = arith.constant 64 : index
    %162 = vector.load %arg3[%c0_52, %c0_53, %c64] : memref<1x8x128xf32, #tpu.memory_space<vmem>>, vector<1x8x16xf32>
    %163 = vector.shape_cast %162 : vector<1x8x16xf32> to vector<8x16xf32>
    %164 = vector.shape_cast %95 : vector<8x16xf32> to vector<1x8x16xf32>
    tpu.vector_store %arg3[%c0_52, %c0_53, %c64], %164 {strides = array<i32>} : memref<1x8x128xf32, #tpu.memory_space<vmem>>, vector<1x8x16xf32>,
    %c0_54 = arith.constant 0 : index
    %c0_55 = arith.constant 0 : index
    %c80 = arith.constant 80 : index
    %165 = vector.load %arg3[%c0_54, %c0_55, %c80] : memref<1x8x128xf32, #tpu.memory_space<vmem>>, vector<1x8x16xf32>
    %166 = vector.shape_cast %165 : vector<1x8x16xf32> to vector<8x16xf32>
    %167 = vector.shape_cast %113 : vector<8x16xf32> to vector<1x8x16xf32>
    tpu.vector_store %arg3[%c0_54, %c0_55, %c80], %167 {strides = array<i32>} : memref<1x8x128xf32, #tpu.memory_space<vmem>>, vector<1x8x16xf32>,
    %c0_56 = arith.constant 0 : index
    %c0_57 = arith.constant 0 : index
    %c96 = arith.constant 96 : index
    %168 = vector.load %arg3[%c0_56, %c0_57, %c96] : memref<1x8x128xf32, #tpu.memory_space<vmem>>, vector<1x8x16xf32>
    %169 = vector.shape_cast %168 : vector<1x8x16xf32> to vector<8x16xf32>
    %170 = vector.shape_cast %131 : vector<8x16xf32> to vector<1x8x16xf32>
    tpu.vector_store %arg3[%c0_56, %c0_57, %c96], %170 {strides = array<i32>} : memref<1x8x128xf32, #tpu.memory_space<vmem>>, vector<1x8x16xf32>,
    %c0_58 = arith.constant 0 : index
    %c0_59 = arith.constant 0 : index
    %c112 = arith.constant 112 : index
    %171 = vector.load %arg3[%c0_58, %c0_59, %c112] : memref<1x8x128xf32, #tpu.memory_space<vmem>>, vector<1x8x16xf32>
    %172 = vector.shape_cast %171 : vector<1x8x16xf32> to vector<8x16xf32>
    %173 = vector.shape_cast %149 : vector<8x16xf32> to vector<1x8x16xf32>
    tpu.vector_store %arg3[%c0_58, %c0_59, %c112], %173 {strides = array<i32>} : memref<1x8x128xf32, #tpu.memory_space<vmem>>, vector<1x8x16xf32>,
    return
  }
  func.func @transform_0(%arg0: i32) -> (i32, i32, i32) {
    %c0_i32 = arith.constant 0 : i32
    %c0_i32_0 = arith.constant 0 : i32
    %c0_i32_1 = arith.constant 0 : i32
    return %arg0, %c0_i32, %c0_i32_0 : i32, i32, i32
  }
  func.func @transform_1(%arg0: i32) -> (i32, i32) {
    %c0_i32 = arith.constant 0 : i32
    %c0_i32_0 = arith.constant 0 : i32
    %c0_i32_1 = arith.constant 0 : i32
    return %c0_i32, %c0_i32_0 : i32, i32
  }
  func.func @transform_2(%arg0: i32) -> (i32, i32, i32) {
    %c0_i32 = arith.constant 0 : i32
    %c0_i32_0 = arith.constant 0 : i32
    %c0_i32_1 = arith.constant 0 : i32
    return %arg0, %c0_i32, %c0_i32_0 : i32, i32, i32
  }
}

module attributes {stable_mosaic.version = 11 : i64} {
  func.func @_linear_add_ln_kernel(%arg0: i32, %arg1: memref<8x128xf32, #tpu.memory_space<vmem>>, %arg2: memref<128x128xf32, #tpu.memory_space<vmem>>, %arg3: memref<1x128xf32, #tpu.memory_space<vmem>>, %arg4: memref<8x128xf32, #tpu.memory_space<vmem>>, %arg5: memref<1x128xf32, #tpu.memory_space<vmem>>, %arg6: memref<1x128xf32, #tpu.memory_space<vmem>>, %arg7: memref<8x128xf32, #tpu.memory_space<vmem>>) attributes {dimension_semantics = [#tpu.dimension_semantics<parallel>], iteration_bounds = array<i64: 2>, scalar_prefetch = 0 : i64, scratch_operands = 0 : i64, tpu.core_type = #tpu.core_type<tc>, window_params = [{transform_indices = @transform_0, window_bounds = array<i64: 8, 128>}, {pipeline_mode = #tpu.pipeline_mode<synchronous>, transform_indices = @transform_1, window_bounds = array<i64: 128, 128>}, {pipeline_mode = #tpu.pipeline_mode<synchronous>, transform_indices = @transform_2, window_bounds = array<i64: 1, 128>}, {transform_indices = @transform_3, window_bounds = array<i64: 8, 128>}, {pipeline_mode = #tpu.pipeline_mode<synchronous>, transform_indices = @transform_4, window_bounds = array<i64: 1, 128>}, {pipeline_mode = #tpu.pipeline_mode<synchronous>, transform_indices = @transform_5, window_bounds = array<i64: 1, 128>}, {transform_indices = @transform_6, window_bounds = array<i64: 8, 128>}]} {
    %c0 = arith.constant 0 : index
    %c0_0 = arith.constant 0 : index
    %0 = vector.load %arg1[%c0, %c0_0] : memref<8x128xf32, #tpu.memory_space<vmem>>, vector<8x128xf32>
    %c0_1 = arith.constant 0 : index
    %c0_2 = arith.constant 0 : index
    %1 = vector.load %arg2[%c0_1, %c0_2] : memref<128x128xf32, #tpu.memory_space<vmem>>, vector<128x128xf32>
    %cst = arith.constant dense<0.000000e+00> : vector<8x128xf32>
    %2 = tpu.matmul %0, %1, %cst {dimension_numbers = #tpu.dot_dimension_numbers<[1], [0], [0], [1], [0, 0, 1, 1], [], []>} : vector<8x128xf32>, vector<128x128xf32>, vector<8x128xf32> -> vector<8x128xf32>
    %c0_3 = arith.constant 0 : index
    %c0_4 = arith.constant 0 : index
    %3 = vector.load %arg3[%c0_3, %c0_4] : memref<1x128xf32, #tpu.memory_space<vmem>>, vector<1x128xf32>
    %4 = vector.broadcast %3 : vector<1x128xf32> to vector<8x128xf32>
    %5 = arith.addf %2, %4 : vector<8x128xf32>
    %c0_5 = arith.constant 0 : index
    %c0_6 = arith.constant 0 : index
    %6 = vector.load %arg4[%c0_5, %c0_6] : memref<8x128xf32, #tpu.memory_space<vmem>>, vector<8x128xf32>
    %7 = arith.addf %5, %6 : vector<8x128xf32>
    %cst_7 = arith.constant dense<0.000000e+00> : vector<8xf32>
    %8 = vector.multi_reduction <add>, %7, %cst_7 [1] : vector<8x128xf32> to vector<8xf32>
    %9 = vector.shape_cast %8 : vector<8xf32> to vector<8x1xf32>
    %cst_8 = arith.constant 1.280000e+02 : f32
    %10 = vector.broadcast %cst_8 : f32 to vector<8x1xf32>
    %11 = arith.divf %9, %10 : vector<8x1xf32>
    %12 = vector.broadcast %11 : vector<8x1xf32> to vector<8x128xf32>
    %13 = arith.subf %7, %12 : vector<8x128xf32>
    %14 = arith.mulf %13, %13 : vector<8x128xf32>
    %cst_9 = arith.constant dense<0.000000e+00> : vector<8xf32>
    %15 = vector.multi_reduction <add>, %14, %cst_9 [1] : vector<8x128xf32> to vector<8xf32>
    %16 = vector.shape_cast %15 : vector<8xf32> to vector<8x1xf32>
    %cst_10 = arith.constant 1.280000e+02 : f32
    %17 = vector.broadcast %cst_10 : f32 to vector<8x1xf32>
    %18 = arith.divf %16, %17 : vector<8x1xf32>
    %cst_11 = arith.constant 9.99999974E-6 : f32
    %19 = vector.broadcast %cst_11 : f32 to vector<8x1xf32>
    %20 = arith.addf %18, %19 : vector<8x1xf32>
    %21 = math.rsqrt %20 : vector<8x1xf32>
    %22 = vector.broadcast %21 : vector<8x1xf32> to vector<8x128xf32>
    %23 = arith.mulf %13, %22 : vector<8x128xf32>
    %c0_12 = arith.constant 0 : index
    %c0_13 = arith.constant 0 : index
    %24 = vector.load %arg5[%c0_12, %c0_13] : memref<1x128xf32, #tpu.memory_space<vmem>>, vector<1x128xf32>
    %25 = vector.broadcast %24 : vector<1x128xf32> to vector<8x128xf32>
    %26 = arith.mulf %23, %25 : vector<8x128xf32>
    %c0_14 = arith.constant 0 : index
    %c0_15 = arith.constant 0 : index
    %27 = vector.load %arg6[%c0_14, %c0_15] : memref<1x128xf32, #tpu.memory_space<vmem>>, vector<1x128xf32>
    %28 = vector.broadcast %27 : vector<1x128xf32> to vector<8x128xf32>
    %29 = arith.addf %26, %28 : vector<8x128xf32>
    %c0_16 = arith.constant 0 : index
    %c0_17 = arith.constant 0 : index
    %30 = vector.load %arg7[%c0_16, %c0_17] : memref<8x128xf32, #tpu.memory_space<vmem>>, vector<8x128xf32>
    tpu.vector_store %arg7[%c0_16, %c0_17], %29 {strides = array<i32>} : memref<8x128xf32, #tpu.memory_space<vmem>>, vector<8x128xf32>,
    return
  }
  func.func @transform_0(%arg0: i32) -> (i32, i32) {
    %c0_i32 = arith.constant 0 : i32
    %c0_i32_0 = arith.constant 0 : i32
    return %arg0, %c0_i32 : i32, i32
  }
  func.func @transform_1(%arg0: i32) -> (i32, i32) {
    %c0_i32 = arith.constant 0 : i32
    %c0_i32_0 = arith.constant 0 : i32
    %c0_i32_1 = arith.constant 0 : i32
    return %c0_i32, %c0_i32_0 : i32, i32
  }
  func.func @transform_2(%arg0: i32) -> (i32, i32) {
    %c0_i32 = arith.constant 0 : i32
    %c0_i32_0 = arith.constant 0 : i32
    %c0_i32_1 = arith.constant 0 : i32
    return %c0_i32, %c0_i32_0 : i32, i32
  }
  func.func @transform_3(%arg0: i32) -> (i32, i32) {
    %c0_i32 = arith.constant 0 : i32
    %c0_i32_0 = arith.constant 0 : i32
    return %arg0, %c0_i32 : i32, i32
  }
  func.func @transform_4(%arg0: i32) -> (i32, i32) {
    %c0_i32 = arith.constant 0 : i32
    %c0_i32_0 = arith.constant 0 : i32
    %c0_i32_1 = arith.constant 0 : i32
    return %c0_i32, %c0_i32_0 : i32, i32
  }
  func.func @transform_5(%arg0: i32) -> (i32, i32) {
    %c0_i32 = arith.constant 0 : i32
    %c0_i32_0 = arith.constant 0 : i32
    %c0_i32_1 = arith.constant 0 : i32
    return %c0_i32, %c0_i32_0 : i32, i32
  }
  func.func @transform_6(%arg0: i32) -> (i32, i32) {
    %c0_i32 = arith.constant 0 : i32
    %c0_i32_0 = arith.constant 0 : i32
    return %arg0, %c0_i32 : i32, i32
  }
}

module attributes {stable_mosaic.version = 11 : i64} {
  func.func @_linear_kernel(%arg0: i32, %arg1: i32, %arg2: memref<8x128xf32, #tpu.memory_space<vmem>>, %arg3: memref<128x128xf32, #tpu.memory_space<vmem>>, %arg4: memref<1x128xf32, #tpu.memory_space<vmem>>, %arg5: memref<8x128xf32, #tpu.memory_space<vmem>>) attributes {dimension_semantics = [#tpu.dimension_semantics<parallel>, #tpu.dimension_semantics<parallel>], iteration_bounds = array<i64: 1, 2>, scalar_prefetch = 0 : i64, scratch_operands = 0 : i64, tpu.core_type = #tpu.core_type<tc>, window_params = [{transform_indices = @transform_0, window_bounds = array<i64: 8, 128>}, {transform_indices = @transform_1, window_bounds = array<i64: 128, 128>}, {transform_indices = @transform_2, window_bounds = array<i64: 1, 128>}, {transform_indices = @transform_3, window_bounds = array<i64: 8, 128>}]} {
    %c0 = arith.constant 0 : index
    %c0_0 = arith.constant 0 : index
    %0 = vector.load %arg2[%c0, %c0_0] : memref<8x128xf32, #tpu.memory_space<vmem>>, vector<8x128xf32>
    %c0_1 = arith.constant 0 : index
    %c0_2 = arith.constant 0 : index
    %1 = vector.load %arg3[%c0_1, %c0_2] : memref<128x128xf32, #tpu.memory_space<vmem>>, vector<128x128xf32>
    %cst = arith.constant dense<0.000000e+00> : vector<8x128xf32>
    %2 = tpu.matmul %0, %1, %cst {dimension_numbers = #tpu.dot_dimension_numbers<[1], [0], [0], [1], [0, 0, 1, 1], [], []>} : vector<8x128xf32>, vector<128x128xf32>, vector<8x128xf32> -> vector<8x128xf32>
    %c0_3 = arith.constant 0 : index
    %c0_4 = arith.constant 0 : index
    %3 = vector.load %arg4[%c0_3, %c0_4] : memref<1x128xf32, #tpu.memory_space<vmem>>, vector<1x128xf32>
    %4 = vector.broadcast %3 : vector<1x128xf32> to vector<8x128xf32>
    %5 = arith.addf %2, %4 : vector<8x128xf32>
    %c0_5 = arith.constant 0 : index
    %c0_6 = arith.constant 0 : index
    %6 = vector.load %arg5[%c0_5, %c0_6] : memref<8x128xf32, #tpu.memory_space<vmem>>, vector<8x128xf32>
    tpu.vector_store %arg5[%c0_5, %c0_6], %5 {strides = array<i32>} : memref<8x128xf32, #tpu.memory_space<vmem>>, vector<8x128xf32>,
    return
  }
  func.func @transform_0(%arg0: i32, %arg1: i32) -> (i32, i32) {
    %c0_i32 = arith.constant 0 : i32
    %c0_i32_0 = arith.constant 0 : i32
    return %arg1, %c0_i32 : i32, i32
  }
  func.func @transform_1(%arg0: i32, %arg1: i32) -> (i32, i32) {
    %c0_i32 = arith.constant 0 : i32
    %c0_i32_0 = arith.constant 0 : i32
    return %c0_i32, %arg0 : i32, i32
  }
  func.func @transform_2(%arg0: i32, %arg1: i32) -> (i32, i32) {
    %c0_i32 = arith.constant 0 : i32
    %c0_i32_0 = arith.constant 0 : i32
    return %c0_i32, %arg0 : i32, i32
  }
  func.func @transform_3(%arg0: i32, %arg1: i32) -> (i32, i32) {
    %c0_i32 = arith.constant 0 : i32
    return %arg1, %arg0 : i32, i32
  }
}

module attributes {stable_mosaic.version = 11 : i64} {
  func.func @_linear_kernel(%arg0: i32, %arg1: i32, %arg2: memref<8x128xf32, #tpu.memory_space<vmem>>, %arg3: memref<128x384xf32, #tpu.memory_space<vmem>>, %arg4: memref<1x384xf32, #tpu.memory_space<vmem>>, %arg5: memref<8x384xf32, #tpu.memory_space<vmem>>) attributes {dimension_semantics = [#tpu.dimension_semantics<parallel>, #tpu.dimension_semantics<parallel>], iteration_bounds = array<i64: 1, 2>, scalar_prefetch = 0 : i64, scratch_operands = 0 : i64, tpu.core_type = #tpu.core_type<tc>, window_params = [{transform_indices = @transform_0, window_bounds = array<i64: 8, 128>}, {transform_indices = @transform_1, window_bounds = array<i64: 128, 384>}, {transform_indices = @transform_2, window_bounds = array<i64: 1, 384>}, {transform_indices = @transform_3, window_bounds = array<i64: 8, 384>}]} {
    %c0 = arith.constant 0 : index
    %c0_0 = arith.constant 0 : index
    %0 = vector.load %arg2[%c0, %c0_0] : memref<8x128xf32, #tpu.memory_space<vmem>>, vector<8x128xf32>
    %c0_1 = arith.constant 0 : index
    %c0_2 = arith.constant 0 : index
    %1 = vector.load %arg3[%c0_1, %c0_2] : memref<128x384xf32, #tpu.memory_space<vmem>>, vector<128x384xf32>
    %cst = arith.constant dense<0.000000e+00> : vector<8x384xf32>
    %2 = tpu.matmul %0, %1, %cst {dimension_numbers = #tpu.dot_dimension_numbers<[1], [0], [0], [1], [0, 0, 1, 1], [], []>} : vector<8x128xf32>, vector<128x384xf32>, vector<8x384xf32> -> vector<8x384xf32>
    %c0_3 = arith.constant 0 : index
    %c0_4 = arith.constant 0 : index
    %3 = vector.load %arg4[%c0_3, %c0_4] : memref<1x384xf32, #tpu.memory_space<vmem>>, vector<1x384xf32>
    %4 = vector.broadcast %3 : vector<1x384xf32> to vector<8x384xf32>
    %5 = arith.addf %2, %4 : vector<8x384xf32>
    %c0_5 = arith.constant 0 : index
    %c0_6 = arith.constant 0 : index
    %6 = vector.load %arg5[%c0_5, %c0_6] : memref<8x384xf32, #tpu.memory_space<vmem>>, vector<8x384xf32>
    tpu.vector_store %arg5[%c0_5, %c0_6], %5 {strides = array<i32>} : memref<8x384xf32, #tpu.memory_space<vmem>>, vector<8x384xf32>,
    return
  }
  func.func @transform_0(%arg0: i32, %arg1: i32) -> (i32, i32) {
    %c0_i32 = arith.constant 0 : i32
    %c0_i32_0 = arith.constant 0 : i32
    return %arg1, %c0_i32 : i32, i32
  }
  func.func @transform_1(%arg0: i32, %arg1: i32) -> (i32, i32) {
    %c0_i32 = arith.constant 0 : i32
    %c0_i32_0 = arith.constant 0 : i32
    return %c0_i32, %arg0 : i32, i32
  }
  func.func @transform_2(%arg0: i32, %arg1: i32) -> (i32, i32) {
    %c0_i32 = arith.constant 0 : i32
    %c0_i32_0 = arith.constant 0 : i32
    return %c0_i32, %arg0 : i32, i32
  }
  func.func @transform_3(%arg0: i32, %arg1: i32) -> (i32, i32) {
    %c0_i32 = arith.constant 0 : i32
    return %arg1, %arg0 : i32, i32
  }
}

module attributes {stable_mosaic.version = 11 : i64} {
  func.func @_linear_add_ln_kernel(%arg0: i32, %arg1: memref<8x128xf32, #tpu.memory_space<vmem>>, %arg2: memref<128x128xf32, #tpu.memory_space<vmem>>, %arg3: memref<1x128xf32, #tpu.memory_space<vmem>>, %arg4: memref<8x128xf32, #tpu.memory_space<vmem>>, %arg5: memref<1x128xf32, #tpu.memory_space<vmem>>, %arg6: memref<1x128xf32, #tpu.memory_space<vmem>>, %arg7: memref<8x128xf32, #tpu.memory_space<vmem>>) attributes {dimension_semantics = [#tpu.dimension_semantics<parallel>], iteration_bounds = array<i64: 2>, scalar_prefetch = 0 : i64, scratch_operands = 0 : i64, tpu.core_type = #tpu.core_type<tc>, window_params = [{transform_indices = @transform_0, window_bounds = array<i64: 8, 128>}, {pipeline_mode = #tpu.pipeline_mode<synchronous>, transform_indices = @transform_1, window_bounds = array<i64: 128, 128>}, {pipeline_mode = #tpu.pipeline_mode<synchronous>, transform_indices = @transform_2, window_bounds = array<i64: 1, 128>}, {transform_indices = @transform_3, window_bounds = array<i64: 8, 128>}, {pipeline_mode = #tpu.pipeline_mode<synchronous>, transform_indices = @transform_4, window_bounds = array<i64: 1, 128>}, {pipeline_mode = #tpu.pipeline_mode<synchronous>, transform_indices = @transform_5, window_bounds = array<i64: 1, 128>}, {transform_indices = @transform_6, window_bounds = array<i64: 8, 128>}]} {
    %c0 = arith.constant 0 : index
    %c0_0 = arith.constant 0 : index
    %0 = vector.load %arg1[%c0, %c0_0] : memref<8x128xf32, #tpu.memory_space<vmem>>, vector<8x128xf32>
    %c0_1 = arith.constant 0 : index
    %c0_2 = arith.constant 0 : index
    %1 = vector.load %arg2[%c0_1, %c0_2] : memref<128x128xf32, #tpu.memory_space<vmem>>, vector<128x128xf32>
    %cst = arith.constant dense<0.000000e+00> : vector<8x128xf32>
    %2 = tpu.matmul %0, %1, %cst {dimension_numbers = #tpu.dot_dimension_numbers<[1], [0], [0], [1], [0, 0, 1, 1], [], []>} : vector<8x128xf32>, vector<128x128xf32>, vector<8x128xf32> -> vector<8x128xf32>
    %c0_3 = arith.constant 0 : index
    %c0_4 = arith.constant 0 : index
    %3 = vector.load %arg3[%c0_3, %c0_4] : memref<1x128xf32, #tpu.memory_space<vmem>>, vector<1x128xf32>
    %4 = vector.broadcast %3 : vector<1x128xf32> to vector<8x128xf32>
    %5 = arith.addf %2, %4 : vector<8x128xf32>
    %c0_5 = arith.constant 0 : index
    %c0_6 = arith.constant 0 : index
    %6 = vector.load %arg4[%c0_5, %c0_6] : memref<8x128xf32, #tpu.memory_space<vmem>>, vector<8x128xf32>
    %7 = arith.addf %5, %6 : vector<8x128xf32>
    %cst_7 = arith.constant dense<0.000000e+00> : vector<8xf32>
    %8 = vector.multi_reduction <add>, %7, %cst_7 [1] : vector<8x128xf32> to vector<8xf32>
    %9 = vector.shape_cast %8 : vector<8xf32> to vector<8x1xf32>
    %cst_8 = arith.constant 1.280000e+02 : f32
    %10 = vector.broadcast %cst_8 : f32 to vector<8x1xf32>
    %11 = arith.divf %9, %10 : vector<8x1xf32>
    %12 = vector.broadcast %11 : vector<8x1xf32> to vector<8x128xf32>
    %13 = arith.subf %7, %12 : vector<8x128xf32>
    %14 = arith.mulf %13, %13 : vector<8x128xf32>
    %cst_9 = arith.constant dense<0.000000e+00> : vector<8xf32>
    %15 = vector.multi_reduction <add>, %14, %cst_9 [1] : vector<8x128xf32> to vector<8xf32>
    %16 = vector.shape_cast %15 : vector<8xf32> to vector<8x1xf32>
    %cst_10 = arith.constant 1.280000e+02 : f32
    %17 = vector.broadcast %cst_10 : f32 to vector<8x1xf32>
    %18 = arith.divf %16, %17 : vector<8x1xf32>
    %cst_11 = arith.constant 9.99999974E-6 : f32
    %19 = vector.broadcast %cst_11 : f32 to vector<8x1xf32>
    %20 = arith.addf %18, %19 : vector<8x1xf32>
    %21 = math.rsqrt %20 : vector<8x1xf32>
    %22 = vector.broadcast %21 : vector<8x1xf32> to vector<8x128xf32>
    %23 = arith.mulf %13, %22 : vector<8x128xf32>
    %c0_12 = arith.constant 0 : index
    %c0_13 = arith.constant 0 : index
    %24 = vector.load %arg5[%c0_12, %c0_13] : memref<1x128xf32, #tpu.memory_space<vmem>>, vector<1x128xf32>
    %25 = vector.broadcast %24 : vector<1x128xf32> to vector<8x128xf32>
    %26 = arith.mulf %23, %25 : vector<8x128xf32>
    %c0_14 = arith.constant 0 : index
    %c0_15 = arith.constant 0 : index
    %27 = vector.load %arg6[%c0_14, %c0_15] : memref<1x128xf32, #tpu.memory_space<vmem>>, vector<1x128xf32>
    %28 = vector.broadcast %27 : vector<1x128xf32> to vector<8x128xf32>
    %29 = arith.addf %26, %28 : vector<8x128xf32>
    %c0_16 = arith.constant 0 : index
    %c0_17 = arith.constant 0 : index
    %30 = vector.load %arg7[%c0_16, %c0_17] : memref<8x128xf32, #tpu.memory_space<vmem>>, vector<8x128xf32>
    tpu.vector_store %arg7[%c0_16, %c0_17], %29 {strides = array<i32>} : memref<8x128xf32, #tpu.memory_space<vmem>>, vector<8x128xf32>,
    return
  }
  func.func @transform_0(%arg0: i32) -> (i32, i32) {
    %c0_i32 = arith.constant 0 : i32
    %c0_i32_0 = arith.constant 0 : i32
    return %arg0, %c0_i32 : i32, i32
  }
  func.func @transform_1(%arg0: i32) -> (i32, i32) {
    %c0_i32 = arith.constant 0 : i32
    %c0_i32_0 = arith.constant 0 : i32
    %c0_i32_1 = arith.constant 0 : i32
    return %c0_i32, %c0_i32_0 : i32, i32
  }
  func.func @transform_2(%arg0: i32) -> (i32, i32) {
    %c0_i32 = arith.constant 0 : i32
    %c0_i32_0 = arith.constant 0 : i32
    %c0_i32_1 = arith.constant 0 : i32
    return %c0_i32, %c0_i32_0 : i32, i32
  }
  func.func @transform_3(%arg0: i32) -> (i32, i32) {
    %c0_i32 = arith.constant 0 : i32
    %c0_i32_0 = arith.constant 0 : i32
    return %arg0, %c0_i32 : i32, i32
  }
  func.func @transform_4(%arg0: i32) -> (i32, i32) {
    %c0_i32 = arith.constant 0 : i32
    %c0_i32_0 = arith.constant 0 : i32
    %c0_i32_1 = arith.constant 0 : i32
    return %c0_i32, %c0_i32_0 : i32, i32
  }
  func.func @transform_5(%arg0: i32) -> (i32, i32) {
    %c0_i32 = arith.constant 0 : i32
    %c0_i32_0 = arith.constant 0 : i32
    %c0_i32_1 = arith.constant 0 : i32
    return %c0_i32, %c0_i32_0 : i32, i32
  }
  func.func @transform_6(%arg0: i32) -> (i32, i32) {
    %c0_i32 = arith.constant 0 : i32
    %c0_i32_0 = arith.constant 0 : i32
    return %arg0, %c0_i32 : i32, i32
  }
}

module attributes {stable_mosaic.version = 11 : i64} {
  func.func @_ffn_add_ln_kernel(%arg0: i32, %arg1: memref<8x128xf32, #tpu.memory_space<vmem>>, %arg2: memref<128x2048xf32, #tpu.memory_space<vmem>>, %arg3: memref<1x2048xf32, #tpu.memory_space<vmem>>, %arg4: memref<2048x128xf32, #tpu.memory_space<vmem>>, %arg5: memref<1x128xf32, #tpu.memory_space<vmem>>, %arg6: memref<8x128xf32, #tpu.memory_space<vmem>>, %arg7: memref<1x128xf32, #tpu.memory_space<vmem>>, %arg8: memref<1x128xf32, #tpu.memory_space<vmem>>, %arg9: memref<8x128xf32, #tpu.memory_space<vmem>>, %arg10: memref<8x2048xf32, #tpu.memory_space<vmem>>) attributes {dimension_semantics = [#tpu.dimension_semantics<parallel>], iteration_bounds = array<i64: 2>, scalar_prefetch = 0 : i64, scratch_operands = 1 : i64, tpu.core_type = #tpu.core_type<tc>, window_params = [{transform_indices = @transform_0, window_bounds = array<i64: 8, 128>}, {pipeline_mode = #tpu.pipeline_mode<synchronous>, transform_indices = @transform_1, window_bounds = array<i64: 128, 2048>}, {pipeline_mode = #tpu.pipeline_mode<synchronous>, transform_indices = @transform_2, window_bounds = array<i64: 1, 2048>}, {pipeline_mode = #tpu.pipeline_mode<synchronous>, transform_indices = @transform_3, window_bounds = array<i64: 2048, 128>}, {pipeline_mode = #tpu.pipeline_mode<synchronous>, transform_indices = @transform_4, window_bounds = array<i64: 1, 128>}, {transform_indices = @transform_5, window_bounds = array<i64: 8, 128>}, {pipeline_mode = #tpu.pipeline_mode<synchronous>, transform_indices = @transform_6, window_bounds = array<i64: 1, 128>}, {pipeline_mode = #tpu.pipeline_mode<synchronous>, transform_indices = @transform_7, window_bounds = array<i64: 1, 128>}, {transform_indices = @transform_8, window_bounds = array<i64: 8, 128>}]} {
    %c0 = arith.constant 0 : index
    %c0_0 = arith.constant 0 : index
    %0 = vector.load %arg1[%c0, %c0_0] : memref<8x128xf32, #tpu.memory_space<vmem>>, vector<8x128xf32>
    %c0_1 = arith.constant 0 : index
    %c0_2 = arith.constant 0 : index
    %1 = vector.load %arg2[%c0_1, %c0_2] : memref<128x2048xf32, #tpu.memory_space<vmem>>, vector<128x2048xf32>
    %cst = arith.constant dense<0.000000e+00> : vector<8x2048xf32>
    %2 = tpu.matmul %0, %1, %cst {dimension_numbers = #tpu.dot_dimension_numbers<[1], [0], [0], [1], [0, 0, 1, 1], [], []>} : vector<8x128xf32>, vector<128x2048xf32>, vector<8x2048xf32> -> vector<8x2048xf32>
    %c0_3 = arith.constant 0 : index
    %c0_4 = arith.constant 0 : index
    %3 = vector.load %arg3[%c0_3, %c0_4] : memref<1x2048xf32, #tpu.memory_space<vmem>>, vector<1x2048xf32>
    %4 = vector.broadcast %3 : vector<1x2048xf32> to vector<8x2048xf32>
    %5 = arith.addf %2, %4 : vector<8x2048xf32>
    %cst_5 = arith.constant 0.000000e+00 : f32
    %6 = vector.broadcast %cst_5 : f32 to vector<8x2048xf32>
    %7 = arith.maximumf %5, %6 : vector<8x2048xf32>
    %c0_6 = arith.constant 0 : index
    %c0_7 = arith.constant 0 : index
    %8 = vector.load %arg10[%c0_6, %c0_7] : memref<8x2048xf32, #tpu.memory_space<vmem>>, vector<8x2048xf32>
    tpu.vector_store %arg10[%c0_6, %c0_7], %7 {strides = array<i32>} : memref<8x2048xf32, #tpu.memory_space<vmem>>, vector<8x2048xf32>,
    %c0_8 = arith.constant 0 : index
    %c0_9 = arith.constant 0 : index
    %9 = vector.load %arg10[%c0_8, %c0_9] : memref<8x2048xf32, #tpu.memory_space<vmem>>, vector<8x2048xf32>
    %c0_10 = arith.constant 0 : index
    %c0_11 = arith.constant 0 : index
    %10 = vector.load %arg4[%c0_10, %c0_11] : memref<2048x128xf32, #tpu.memory_space<vmem>>, vector<2048x128xf32>
    %cst_12 = arith.constant dense<0.000000e+00> : vector<8x128xf32>
    %11 = tpu.matmul %9, %10, %cst_12 {dimension_numbers = #tpu.dot_dimension_numbers<[1], [0], [0], [1], [0, 0, 1, 1], [], []>} : vector<8x2048xf32>, vector<2048x128xf32>, vector<8x128xf32> -> vector<8x128xf32>
    %c0_13 = arith.constant 0 : index
    %c0_14 = arith.constant 0 : index
    %12 = vector.load %arg5[%c0_13, %c0_14] : memref<1x128xf32, #tpu.memory_space<vmem>>, vector<1x128xf32>
    %13 = vector.broadcast %12 : vector<1x128xf32> to vector<8x128xf32>
    %14 = arith.addf %11, %13 : vector<8x128xf32>
    %c0_15 = arith.constant 0 : index
    %c0_16 = arith.constant 0 : index
    %15 = vector.load %arg6[%c0_15, %c0_16] : memref<8x128xf32, #tpu.memory_space<vmem>>, vector<8x128xf32>
    %16 = arith.addf %14, %15 : vector<8x128xf32>
    %cst_17 = arith.constant dense<0.000000e+00> : vector<8xf32>
    %17 = vector.multi_reduction <add>, %16, %cst_17 [1] : vector<8x128xf32> to vector<8xf32>
    %18 = vector.shape_cast %17 : vector<8xf32> to vector<8x1xf32>
    %cst_18 = arith.constant 1.280000e+02 : f32
    %19 = vector.broadcast %cst_18 : f32 to vector<8x1xf32>
    %20 = arith.divf %18, %19 : vector<8x1xf32>
    %21 = vector.broadcast %20 : vector<8x1xf32> to vector<8x128xf32>
    %22 = arith.subf %16, %21 : vector<8x128xf32>
    %23 = arith.mulf %22, %22 : vector<8x128xf32>
    %cst_19 = arith.constant dense<0.000000e+00> : vector<8xf32>
    %24 = vector.multi_reduction <add>, %23, %cst_19 [1] : vector<8x128xf32> to vector<8xf32>
    %25 = vector.shape_cast %24 : vector<8xf32> to vector<8x1xf32>
    %cst_20 = arith.constant 1.280000e+02 : f32
    %26 = vector.broadcast %cst_20 : f32 to vector<8x1xf32>
    %27 = arith.divf %25, %26 : vector<8x1xf32>
    %cst_21 = arith.constant 9.99999974E-6 : f32
    %28 = vector.broadcast %cst_21 : f32 to vector<8x1xf32>
    %29 = arith.addf %27, %28 : vector<8x1xf32>
    %30 = math.rsqrt %29 : vector<8x1xf32>
    %31 = vector.broadcast %30 : vector<8x1xf32> to vector<8x128xf32>
    %32 = arith.mulf %22, %31 : vector<8x128xf32>
    %c0_22 = arith.constant 0 : index
    %c0_23 = arith.constant 0 : index
    %33 = vector.load %arg7[%c0_22, %c0_23] : memref<1x128xf32, #tpu.memory_space<vmem>>, vector<1x128xf32>
    %34 = vector.broadcast %33 : vector<1x128xf32> to vector<8x128xf32>
    %35 = arith.mulf %32, %34 : vector<8x128xf32>
    %c0_24 = arith.constant 0 : index
    %c0_25 = arith.constant 0 : index
    %36 = vector.load %arg8[%c0_24, %c0_25] : memref<1x128xf32, #tpu.memory_space<vmem>>, vector<1x128xf32>
    %37 = vector.broadcast %36 : vector<1x128xf32> to vector<8x128xf32>
    %38 = arith.addf %35, %37 : vector<8x128xf32>
    %c0_26 = arith.constant 0 : index
    %c0_27 = arith.constant 0 : index
    %39 = vector.load %arg9[%c0_26, %c0_27] : memref<8x128xf32, #tpu.memory_space<vmem>>, vector<8x128xf32>
    tpu.vector_store %arg9[%c0_26, %c0_27], %38 {strides = array<i32>} : memref<8x128xf32, #tpu.memory_space<vmem>>, vector<8x128xf32>,
    return
  }
  func.func @transform_0(%arg0: i32) -> (i32, i32) {
    %c0_i32 = arith.constant 0 : i32
    %c0_i32_0 = arith.constant 0 : i32
    return %arg0, %c0_i32 : i32, i32
  }
  func.func @transform_1(%arg0: i32) -> (i32, i32) {
    %c0_i32 = arith.constant 0 : i32
    %c0_i32_0 = arith.constant 0 : i32
    %c0_i32_1 = arith.constant 0 : i32
    return %c0_i32, %c0_i32_0 : i32, i32
  }
  func.func @transform_2(%arg0: i32) -> (i32, i32) {
    %c0_i32 = arith.constant 0 : i32
    %c0_i32_0 = arith.constant 0 : i32
    %c0_i32_1 = arith.constant 0 : i32
    return %c0_i32, %c0_i32_0 : i32, i32
  }
  func.func @transform_3(%arg0: i32) -> (i32, i32) {
    %c0_i32 = arith.constant 0 : i32
    %c0_i32_0 = arith.constant 0 : i32
    %c0_i32_1 = arith.constant 0 : i32
    return %c0_i32, %c0_i32_0 : i32, i32
  }
  func.func @transform_4(%arg0: i32) -> (i32, i32) {
    %c0_i32 = arith.constant 0 : i32
    %c0_i32_0 = arith.constant 0 : i32
    %c0_i32_1 = arith.constant 0 : i32
    return %c0_i32, %c0_i32_0 : i32, i32
  }
  func.func @transform_5(%arg0: i32) -> (i32, i32) {
    %c0_i32 = arith.constant 0 : i32
    %c0_i32_0 = arith.constant 0 : i32
    return %arg0, %c0_i32 : i32, i32
  }
  func.func @transform_6(%arg0: i32) -> (i32, i32) {
    %c0_i32 = arith.constant 0 : i32
    %c0_i32_0 = arith.constant 0 : i32
    %c0_i32_1 = arith.constant 0 : i32
    return %c0_i32, %c0_i32_0 : i32, i32
  }
  func.func @transform_7(%arg0: i32) -> (i32, i32) {
    %c0_i32 = arith.constant 0 : i32
    %c0_i32_0 = arith.constant 0 : i32
    %c0_i32_1 = arith.constant 0 : i32
    return %c0_i32, %c0_i32_0 : i32, i32
  }
  func.func @transform_8(%arg0: i32) -> (i32, i32) {
    %c0_i32 = arith.constant 0 : i32
    %c0_i32_0 = arith.constant 0 : i32
    return %arg0, %c0_i32 : i32, i32
  }
}

module attributes {stable_mosaic.version = 11 : i64} {
  func.func @_ffn_add_ln_kernel(%arg0: i32, %arg1: memref<8x128xf32, #tpu.memory_space<vmem>>, %arg2: memref<128x2048xf32, #tpu.memory_space<vmem>>, %arg3: memref<1x2048xf32, #tpu.memory_space<vmem>>, %arg4: memref<2048x128xf32, #tpu.memory_space<vmem>>, %arg5: memref<1x128xf32, #tpu.memory_space<vmem>>, %arg6: memref<8x128xf32, #tpu.memory_space<vmem>>, %arg7: memref<1x128xf32, #tpu.memory_space<vmem>>, %arg8: memref<1x128xf32, #tpu.memory_space<vmem>>, %arg9: memref<8x128xf32, #tpu.memory_space<vmem>>, %arg10: memref<8x2048xf32, #tpu.memory_space<vmem>>) attributes {dimension_semantics = [#tpu.dimension_semantics<parallel>], iteration_bounds = array<i64: 2>, scalar_prefetch = 0 : i64, scratch_operands = 1 : i64, tpu.core_type = #tpu.core_type<tc>, window_params = [{transform_indices = @transform_0, window_bounds = array<i64: 8, 128>}, {pipeline_mode = #tpu.pipeline_mode<synchronous>, transform_indices = @transform_1, window_bounds = array<i64: 128, 2048>}, {pipeline_mode = #tpu.pipeline_mode<synchronous>, transform_indices = @transform_2, window_bounds = array<i64: 1, 2048>}, {pipeline_mode = #tpu.pipeline_mode<synchronous>, transform_indices = @transform_3, window_bounds = array<i64: 2048, 128>}, {pipeline_mode = #tpu.pipeline_mode<synchronous>, transform_indices = @transform_4, window_bounds = array<i64: 1, 128>}, {transform_indices = @transform_5, window_bounds = array<i64: 8, 128>}, {pipeline_mode = #tpu.pipeline_mode<synchronous>, transform_indices = @transform_6, window_bounds = array<i64: 1, 128>}, {pipeline_mode = #tpu.pipeline_mode<synchronous>, transform_indices = @transform_7, window_bounds = array<i64: 1, 128>}, {transform_indices = @transform_8, window_bounds = array<i64: 8, 128>}]} {
    %c0 = arith.constant 0 : index
    %c0_0 = arith.constant 0 : index
    %0 = vector.load %arg1[%c0, %c0_0] : memref<8x128xf32, #tpu.memory_space<vmem>>, vector<8x128xf32>
    %c0_1 = arith.constant 0 : index
    %c0_2 = arith.constant 0 : index
    %1 = vector.load %arg2[%c0_1, %c0_2] : memref<128x2048xf32, #tpu.memory_space<vmem>>, vector<128x2048xf32>
    %cst = arith.constant dense<0.000000e+00> : vector<8x2048xf32>
    %2 = tpu.matmul %0, %1, %cst {dimension_numbers = #tpu.dot_dimension_numbers<[1], [0], [0], [1], [0, 0, 1, 1], [], []>} : vector<8x128xf32>, vector<128x2048xf32>, vector<8x2048xf32> -> vector<8x2048xf32>
    %c0_3 = arith.constant 0 : index
    %c0_4 = arith.constant 0 : index
    %3 = vector.load %arg3[%c0_3, %c0_4] : memref<1x2048xf32, #tpu.memory_space<vmem>>, vector<1x2048xf32>
    %4 = vector.broadcast %3 : vector<1x2048xf32> to vector<8x2048xf32>
    %5 = arith.addf %2, %4 : vector<8x2048xf32>
    %cst_5 = arith.constant 0.000000e+00 : f32
    %6 = vector.broadcast %cst_5 : f32 to vector<8x2048xf32>
    %7 = arith.maximumf %5, %6 : vector<8x2048xf32>
    %c0_6 = arith.constant 0 : index
    %c0_7 = arith.constant 0 : index
    %8 = vector.load %arg10[%c0_6, %c0_7] : memref<8x2048xf32, #tpu.memory_space<vmem>>, vector<8x2048xf32>
    tpu.vector_store %arg10[%c0_6, %c0_7], %7 {strides = array<i32>} : memref<8x2048xf32, #tpu.memory_space<vmem>>, vector<8x2048xf32>,
    %c0_8 = arith.constant 0 : index
    %c0_9 = arith.constant 0 : index
    %9 = vector.load %arg10[%c0_8, %c0_9] : memref<8x2048xf32, #tpu.memory_space<vmem>>, vector<8x2048xf32>
    %c0_10 = arith.constant 0 : index
    %c0_11 = arith.constant 0 : index
    %10 = vector.load %arg4[%c0_10, %c0_11] : memref<2048x128xf32, #tpu.memory_space<vmem>>, vector<2048x128xf32>
    %cst_12 = arith.constant dense<0.000000e+00> : vector<8x128xf32>
    %11 = tpu.matmul %9, %10, %cst_12 {dimension_numbers = #tpu.dot_dimension_numbers<[1], [0], [0], [1], [0, 0, 1, 1], [], []>} : vector<8x2048xf32>, vector<2048x128xf32>, vector<8x128xf32> -> vector<8x128xf32>
    %c0_13 = arith.constant 0 : index
    %c0_14 = arith.constant 0 : index
    %12 = vector.load %arg5[%c0_13, %c0_14] : memref<1x128xf32, #tpu.memory_space<vmem>>, vector<1x128xf32>
    %13 = vector.broadcast %12 : vector<1x128xf32> to vector<8x128xf32>
    %14 = arith.addf %11, %13 : vector<8x128xf32>
    %c0_15 = arith.constant 0 : index
    %c0_16 = arith.constant 0 : index
    %15 = vector.load %arg6[%c0_15, %c0_16] : memref<8x128xf32, #tpu.memory_space<vmem>>, vector<8x128xf32>
    %16 = arith.addf %14, %15 : vector<8x128xf32>
    %cst_17 = arith.constant dense<0.000000e+00> : vector<8xf32>
    %17 = vector.multi_reduction <add>, %16, %cst_17 [1] : vector<8x128xf32> to vector<8xf32>
    %18 = vector.shape_cast %17 : vector<8xf32> to vector<8x1xf32>
    %cst_18 = arith.constant 1.280000e+02 : f32
    %19 = vector.broadcast %cst_18 : f32 to vector<8x1xf32>
    %20 = arith.divf %18, %19 : vector<8x1xf32>
    %21 = vector.broadcast %20 : vector<8x1xf32> to vector<8x128xf32>
    %22 = arith.subf %16, %21 : vector<8x128xf32>
    %23 = arith.mulf %22, %22 : vector<8x128xf32>
    %cst_19 = arith.constant dense<0.000000e+00> : vector<8xf32>
    %24 = vector.multi_reduction <add>, %23, %cst_19 [1] : vector<8x128xf32> to vector<8xf32>
    %25 = vector.shape_cast %24 : vector<8xf32> to vector<8x1xf32>
    %cst_20 = arith.constant 1.280000e+02 : f32
    %26 = vector.broadcast %cst_20 : f32 to vector<8x1xf32>
    %27 = arith.divf %25, %26 : vector<8x1xf32>
    %cst_21 = arith.constant 9.99999974E-6 : f32
    %28 = vector.broadcast %cst_21 : f32 to vector<8x1xf32>
    %29 = arith.addf %27, %28 : vector<8x1xf32>
    %30 = math.rsqrt %29 : vector<8x1xf32>
    %31 = vector.broadcast %30 : vector<8x1xf32> to vector<8x128xf32>
    %32 = arith.mulf %22, %31 : vector<8x128xf32>
    %c0_22 = arith.constant 0 : index
    %c0_23 = arith.constant 0 : index
    %33 = vector.load %arg7[%c0_22, %c0_23] : memref<1x128xf32, #tpu.memory_space<vmem>>, vector<1x128xf32>
    %34 = vector.broadcast %33 : vector<1x128xf32> to vector<8x128xf32>
    %35 = arith.mulf %32, %34 : vector<8x128xf32>
    %c0_24 = arith.constant 0 : index
    %c0_25 = arith.constant 0 : index
    %36 = vector.load %arg8[%c0_24, %c0_25] : memref<1x128xf32, #tpu.memory_space<vmem>>, vector<1x128xf32>
    %37 = vector.broadcast %36 : vector<1x128xf32> to vector<8x128xf32>
    %38 = arith.addf %35, %37 : vector<8x128xf32>
    %c0_26 = arith.constant 0 : index
    %c0_27 = arith.constant 0 : index
    %39 = vector.load %arg9[%c0_26, %c0_27] : memref<8x128xf32, #tpu.memory_space<vmem>>, vector<8x128xf32>
    tpu.vector_store %arg9[%c0_26, %c0_27], %38 {strides = array<i32>} : memref<8x128xf32, #tpu.memory_space<vmem>>, vector<8x128xf32>,
    return
  }
  func.func @transform_0(%arg0: i32) -> (i32, i32) {
    %c0_i32 = arith.constant 0 : i32
    %c0_i32_0 = arith.constant 0 : i32
    return %arg0, %c0_i32 : i32, i32
  }
  func.func @transform_1(%arg0: i32) -> (i32, i32) {
    %c0_i32 = arith.constant 0 : i32
    %c0_i32_0 = arith.constant 0 : i32
    %c0_i32_1 = arith.constant 0 : i32
    return %c0_i32, %c0_i32_0 : i32, i32
  }
  func.func @transform_2(%arg0: i32) -> (i32, i32) {
    %c0_i32 = arith.constant 0 : i32
    %c0_i32_0 = arith.constant 0 : i32
    %c0_i32_1 = arith.constant 0 : i32
    return %c0_i32, %c0_i32_0 : i32, i32
  }
  func.func @transform_3(%arg0: i32) -> (i32, i32) {
    %c0_i32 = arith.constant 0 : i32
    %c0_i32_0 = arith.constant 0 : i32
    %c0_i32_1 = arith.constant 0 : i32
    return %c0_i32, %c0_i32_0 : i32, i32
  }
  func.func @transform_4(%arg0: i32) -> (i32, i32) {
    %c0_i32 = arith.constant 0 : i32
    %c0_i32_0 = arith.constant 0 : i32
    %c0_i32_1 = arith.constant 0 : i32
    return %c0_i32, %c0_i32_0 : i32, i32
  }
  func.func @transform_5(%arg0: i32) -> (i32, i32) {
    %c0_i32 = arith.constant 0 : i32
    %c0_i32_0 = arith.constant 0 : i32
    return %arg0, %c0_i32 : i32, i32
  }
  func.func @transform_6(%arg0: i32) -> (i32, i32) {
    %c0_i32 = arith.constant 0 : i32
    %c0_i32_0 = arith.constant 0 : i32
    %c0_i32_1 = arith.constant 0 : i32
    return %c0_i32, %c0_i32_0 : i32, i32
  }
  func.func @transform_7(%arg0: i32) -> (i32, i32) {
    %c0_i32 = arith.constant 0 : i32
    %c0_i32_0 = arith.constant 0 : i32
    %c0_i32_1 = arith.constant 0 : i32
    return %c0_i32, %c0_i32_0 : i32, i32
  }
  func.func @transform_8(%arg0: i32) -> (i32, i32) {
    %c0_i32 = arith.constant 0 : i32
    %c0_i32_0 = arith.constant 0 : i32
    return %arg0, %c0_i32 : i32, i32
  }
}

module attributes {stable_mosaic.version = 11 : i64} {
  func.func @_linear_kernel(%arg0: i32, %arg1: i32, %arg2: memref<8x128xf32, #tpu.memory_space<vmem>>, %arg3: memref<128x256xf32, #tpu.memory_space<vmem>>, %arg4: memref<1x256xf32, #tpu.memory_space<vmem>>, %arg5: memref<8x256xf32, #tpu.memory_space<vmem>>) attributes {dimension_semantics = [#tpu.dimension_semantics<parallel>, #tpu.dimension_semantics<parallel>], iteration_bounds = array<i64: 1, 2>, scalar_prefetch = 0 : i64, scratch_operands = 0 : i64, tpu.core_type = #tpu.core_type<tc>, window_params = [{transform_indices = @transform_0, window_bounds = array<i64: 8, 128>}, {transform_indices = @transform_1, window_bounds = array<i64: 128, 256>}, {transform_indices = @transform_2, window_bounds = array<i64: 1, 256>}, {transform_indices = @transform_3, window_bounds = array<i64: 8, 256>}]} {
    %c0 = arith.constant 0 : index
    %c0_0 = arith.constant 0 : index
    %0 = vector.load %arg2[%c0, %c0_0] : memref<8x128xf32, #tpu.memory_space<vmem>>, vector<8x128xf32>
    %c0_1 = arith.constant 0 : index
    %c0_2 = arith.constant 0 : index
    %1 = vector.load %arg3[%c0_1, %c0_2] : memref<128x256xf32, #tpu.memory_space<vmem>>, vector<128x256xf32>
    %cst = arith.constant dense<0.000000e+00> : vector<8x256xf32>
    %2 = tpu.matmul %0, %1, %cst {dimension_numbers = #tpu.dot_dimension_numbers<[1], [0], [0], [1], [0, 0, 1, 1], [], []>} : vector<8x128xf32>, vector<128x256xf32>, vector<8x256xf32> -> vector<8x256xf32>
    %c0_3 = arith.constant 0 : index
    %c0_4 = arith.constant 0 : index
    %3 = vector.load %arg4[%c0_3, %c0_4] : memref<1x256xf32, #tpu.memory_space<vmem>>, vector<1x256xf32>
    %4 = vector.broadcast %3 : vector<1x256xf32> to vector<8x256xf32>
    %5 = arith.addf %2, %4 : vector<8x256xf32>
    %c0_5 = arith.constant 0 : index
    %c0_6 = arith.constant 0 : index
    %6 = vector.load %arg5[%c0_5, %c0_6] : memref<8x256xf32, #tpu.memory_space<vmem>>, vector<8x256xf32>
    tpu.vector_store %arg5[%c0_5, %c0_6], %5 {strides = array<i32>} : memref<8x256xf32, #tpu.memory_space<vmem>>, vector<8x256xf32>,
    return
  }
  func.func @transform_0(%arg0: i32, %arg1: i32) -> (i32, i32) {
    %c0_i32 = arith.constant 0 : i32
    %c0_i32_0 = arith.constant 0 : i32
    return %arg1, %c0_i32 : i32, i32
  }
  func.func @transform_1(%arg0: i32, %arg1: i32) -> (i32, i32) {
    %c0_i32 = arith.constant 0 : i32
    %c0_i32_0 = arith.constant 0 : i32
    return %c0_i32, %arg0 : i32, i32
  }
  func.func @transform_2(%arg0: i32, %arg1: i32) -> (i32, i32) {
    %c0_i32 = arith.constant 0 : i32
    %c0_i32_0 = arith.constant 0 : i32
    return %c0_i32, %arg0 : i32, i32
  }
  func.func @transform_3(%arg0: i32, %arg1: i32) -> (i32, i32) {
    %c0_i32 = arith.constant 0 : i32
    return %arg1, %arg0 : i32, i32
  }
}

module attributes {stable_mosaic.version = 11 : i64} {
  func.func @_cross_attn_kernel(%arg0: i32, %arg1: memref<1x8x128xf32, #tpu.memory_space<vmem>>, %arg2: memref<1x8x256xf32, #tpu.memory_space<vmem>>, %arg3: memref<1x8x128xf32, #tpu.memory_space<vmem>>) attributes {dimension_semantics = [#tpu.dimension_semantics<parallel>], iteration_bounds = array<i64: 2>, scalar_prefetch = 0 : i64, scratch_operands = 0 : i64, tpu.core_type = #tpu.core_type<tc>, window_params = [{transform_indices = @transform_0, window_bounds = array<i64: 1, 8, 128>}, {transform_indices = @transform_1, window_bounds = array<i64: 1, 8, 256>}, {transform_indices = @transform_2, window_bounds = array<i64: 1, 8, 128>}]} {
    %c0 = arith.constant 0 : index
    %c0_0 = arith.constant 0 : index
    %c0_1 = arith.constant 0 : index
    %0 = vector.load %arg1[%c0, %c0_0, %c0_1] : memref<1x8x128xf32, #tpu.memory_space<vmem>>, vector<1x8x128xf32>
    %1 = vector.shape_cast %0 : vector<1x8x128xf32> to vector<8x128xf32>
    %c0_2 = arith.constant 0 : index
    %c0_3 = arith.constant 0 : index
    %c0_4 = arith.constant 0 : index
    %2 = vector.load %arg2[%c0_2, %c0_3, %c0_4] : memref<1x8x256xf32, #tpu.memory_space<vmem>>, vector<1x8x256xf32>
    %3 = vector.shape_cast %2 : vector<1x8x256xf32> to vector<8x256xf32>
    %4 = vector.extract_strided_slice %3 {offsets = [0, 0], sizes = [8, 128], strides = [1, 1]} : vector<8x256xf32> to vector<8x128xf32>
    %5 = vector.extract_strided_slice %3 {offsets = [0, 128], sizes = [8, 128], strides = [1, 1]} : vector<8x256xf32> to vector<8x128xf32>
    %6 = vector.extract_strided_slice %1 {offsets = [0, 0], sizes = [8, 16], strides = [1, 1]} : vector<8x128xf32> to vector<8x16xf32>
    %7 = vector.extract_strided_slice %4 {offsets = [0, 0], sizes = [8, 16], strides = [1, 1]} : vector<8x128xf32> to vector<8x16xf32>
    %8 = vector.extract_strided_slice %5 {offsets = [0, 0], sizes = [8, 16], strides = [1, 1]} : vector<8x128xf32> to vector<8x16xf32>
    %cst = arith.constant dense<0.000000e+00> : vector<8x8xf32>
    %9 = tpu.matmul %6, %7, %cst {dimension_numbers = #tpu.dot_dimension_numbers<[1], [1], [0], [0], [0, 0, 1, 0], [], []>} : vector<8x16xf32>, vector<8x16xf32>, vector<8x8xf32> -> vector<8x8xf32>
    %cst_5 = arith.constant 2.500000e-01 : f32
    %10 = vector.broadcast %cst_5 : f32 to vector<8x8xf32>
    %11 = arith.mulf %9, %10 : vector<8x8xf32>
    %cst_6 = arith.constant dense<0xFF800000> : vector<8xf32>
    %12 = vector.multi_reduction <maximumf>, %11, %cst_6 [1] : vector<8x8xf32> to vector<8xf32>
    %13 = vector.shape_cast %12 : vector<8xf32> to vector<8x1xf32>
    %14 = vector.broadcast %13 : vector<8x1xf32> to vector<8x8xf32>
    %15 = arith.subf %11, %14 : vector<8x8xf32>
    %16 = math.exp %15 : vector<8x8xf32>
    %cst_7 = arith.constant dense<0.000000e+00> : vector<8xf32>
    %17 = vector.multi_reduction <add>, %16, %cst_7 [1] : vector<8x8xf32> to vector<8xf32>
    %18 = vector.shape_cast %17 : vector<8xf32> to vector<8x1xf32>
    %19 = tpu.reciprocal %18 {approx = true} : vector<8x1xf32> -> vector<8x1xf32>
    %20 = vector.broadcast %19 : vector<8x1xf32> to vector<8x8xf32>
    %21 = arith.mulf %16, %20 : vector<8x8xf32>
    %cst_8 = arith.constant dense<0.000000e+00> : vector<8x16xf32>
    %22 = tpu.matmul %21, %8, %cst_8 {dimension_numbers = #tpu.dot_dimension_numbers<[1], [0], [0], [1], [0, 0, 1, 1], [], []>} : vector<8x8xf32>, vector<8x16xf32>, vector<8x16xf32> -> vector<8x16xf32>
    %23 = vector.extract_strided_slice %1 {offsets = [0, 16], sizes = [8, 16], strides = [1, 1]} : vector<8x128xf32> to vector<8x16xf32>
    %24 = vector.extract_strided_slice %4 {offsets = [0, 16], sizes = [8, 16], strides = [1, 1]} : vector<8x128xf32> to vector<8x16xf32>
    %25 = vector.extract_strided_slice %5 {offsets = [0, 16], sizes = [8, 16], strides = [1, 1]} : vector<8x128xf32> to vector<8x16xf32>
    %cst_9 = arith.constant dense<0.000000e+00> : vector<8x8xf32>
    %26 = tpu.matmul %23, %24, %cst_9 {dimension_numbers = #tpu.dot_dimension_numbers<[1], [1], [0], [0], [0, 0, 1, 0], [], []>} : vector<8x16xf32>, vector<8x16xf32>, vector<8x8xf32> -> vector<8x8xf32>
    %cst_10 = arith.constant 2.500000e-01 : f32
    %27 = vector.broadcast %cst_10 : f32 to vector<8x8xf32>
    %28 = arith.mulf %26, %27 : vector<8x8xf32>
    %cst_11 = arith.constant dense<0xFF800000> : vector<8xf32>
    %29 = vector.multi_reduction <maximumf>, %28, %cst_11 [1] : vector<8x8xf32> to vector<8xf32>
    %30 = vector.shape_cast %29 : vector<8xf32> to vector<8x1xf32>
    %31 = vector.broadcast %30 : vector<8x1xf32> to vector<8x8xf32>
    %32 = arith.subf %28, %31 : vector<8x8xf32>
    %33 = math.exp %32 : vector<8x8xf32>
    %cst_12 = arith.constant dense<0.000000e+00> : vector<8xf32>
    %34 = vector.multi_reduction <add>, %33, %cst_12 [1] : vector<8x8xf32> to vector<8xf32>
    %35 = vector.shape_cast %34 : vector<8xf32> to vector<8x1xf32>
    %36 = tpu.reciprocal %35 {approx = true} : vector<8x1xf32> -> vector<8x1xf32>
    %37 = vector.broadcast %36 : vector<8x1xf32> to vector<8x8xf32>
    %38 = arith.mulf %33, %37 : vector<8x8xf32>
    %cst_13 = arith.constant dense<0.000000e+00> : vector<8x16xf32>
    %39 = tpu.matmul %38, %25, %cst_13 {dimension_numbers = #tpu.dot_dimension_numbers<[1], [0], [0], [1], [0, 0, 1, 1], [], []>} : vector<8x8xf32>, vector<8x16xf32>, vector<8x16xf32> -> vector<8x16xf32>
    %40 = vector.extract_strided_slice %1 {offsets = [0, 32], sizes = [8, 16], strides = [1, 1]} : vector<8x128xf32> to vector<8x16xf32>
    %41 = vector.extract_strided_slice %4 {offsets = [0, 32], sizes = [8, 16], strides = [1, 1]} : vector<8x128xf32> to vector<8x16xf32>
    %42 = vector.extract_strided_slice %5 {offsets = [0, 32], sizes = [8, 16], strides = [1, 1]} : vector<8x128xf32> to vector<8x16xf32>
    %cst_14 = arith.constant dense<0.000000e+00> : vector<8x8xf32>
    %43 = tpu.matmul %40, %41, %cst_14 {dimension_numbers = #tpu.dot_dimension_numbers<[1], [1], [0], [0], [0, 0, 1, 0], [], []>} : vector<8x16xf32>, vector<8x16xf32>, vector<8x8xf32> -> vector<8x8xf32>
    %cst_15 = arith.constant 2.500000e-01 : f32
    %44 = vector.broadcast %cst_15 : f32 to vector<8x8xf32>
    %45 = arith.mulf %43, %44 : vector<8x8xf32>
    %cst_16 = arith.constant dense<0xFF800000> : vector<8xf32>
    %46 = vector.multi_reduction <maximumf>, %45, %cst_16 [1] : vector<8x8xf32> to vector<8xf32>
    %47 = vector.shape_cast %46 : vector<8xf32> to vector<8x1xf32>
    %48 = vector.broadcast %47 : vector<8x1xf32> to vector<8x8xf32>
    %49 = arith.subf %45, %48 : vector<8x8xf32>
    %50 = math.exp %49 : vector<8x8xf32>
    %cst_17 = arith.constant dense<0.000000e+00> : vector<8xf32>
    %51 = vector.multi_reduction <add>, %50, %cst_17 [1] : vector<8x8xf32> to vector<8xf32>
    %52 = vector.shape_cast %51 : vector<8xf32> to vector<8x1xf32>
    %53 = tpu.reciprocal %52 {approx = true} : vector<8x1xf32> -> vector<8x1xf32>
    %54 = vector.broadcast %53 : vector<8x1xf32> to vector<8x8xf32>
    %55 = arith.mulf %50, %54 : vector<8x8xf32>
    %cst_18 = arith.constant dense<0.000000e+00> : vector<8x16xf32>
    %56 = tpu.matmul %55, %42, %cst_18 {dimension_numbers = #tpu.dot_dimension_numbers<[1], [0], [0], [1], [0, 0, 1, 1], [], []>} : vector<8x8xf32>, vector<8x16xf32>, vector<8x16xf32> -> vector<8x16xf32>
    %57 = vector.extract_strided_slice %1 {offsets = [0, 48], sizes = [8, 16], strides = [1, 1]} : vector<8x128xf32> to vector<8x16xf32>
    %58 = vector.extract_strided_slice %4 {offsets = [0, 48], sizes = [8, 16], strides = [1, 1]} : vector<8x128xf32> to vector<8x16xf32>
    %59 = vector.extract_strided_slice %5 {offsets = [0, 48], sizes = [8, 16], strides = [1, 1]} : vector<8x128xf32> to vector<8x16xf32>
    %cst_19 = arith.constant dense<0.000000e+00> : vector<8x8xf32>
    %60 = tpu.matmul %57, %58, %cst_19 {dimension_numbers = #tpu.dot_dimension_numbers<[1], [1], [0], [0], [0, 0, 1, 0], [], []>} : vector<8x16xf32>, vector<8x16xf32>, vector<8x8xf32> -> vector<8x8xf32>
    %cst_20 = arith.constant 2.500000e-01 : f32
    %61 = vector.broadcast %cst_20 : f32 to vector<8x8xf32>
    %62 = arith.mulf %60, %61 : vector<8x8xf32>
    %cst_21 = arith.constant dense<0xFF800000> : vector<8xf32>
    %63 = vector.multi_reduction <maximumf>, %62, %cst_21 [1] : vector<8x8xf32> to vector<8xf32>
    %64 = vector.shape_cast %63 : vector<8xf32> to vector<8x1xf32>
    %65 = vector.broadcast %64 : vector<8x1xf32> to vector<8x8xf32>
    %66 = arith.subf %62, %65 : vector<8x8xf32>
    %67 = math.exp %66 : vector<8x8xf32>
    %cst_22 = arith.constant dense<0.000000e+00> : vector<8xf32>
    %68 = vector.multi_reduction <add>, %67, %cst_22 [1] : vector<8x8xf32> to vector<8xf32>
    %69 = vector.shape_cast %68 : vector<8xf32> to vector<8x1xf32>
    %70 = tpu.reciprocal %69 {approx = true} : vector<8x1xf32> -> vector<8x1xf32>
    %71 = vector.broadcast %70 : vector<8x1xf32> to vector<8x8xf32>
    %72 = arith.mulf %67, %71 : vector<8x8xf32>
    %cst_23 = arith.constant dense<0.000000e+00> : vector<8x16xf32>
    %73 = tpu.matmul %72, %59, %cst_23 {dimension_numbers = #tpu.dot_dimension_numbers<[1], [0], [0], [1], [0, 0, 1, 1], [], []>} : vector<8x8xf32>, vector<8x16xf32>, vector<8x16xf32> -> vector<8x16xf32>
    %74 = vector.extract_strided_slice %1 {offsets = [0, 64], sizes = [8, 16], strides = [1, 1]} : vector<8x128xf32> to vector<8x16xf32>
    %75 = vector.extract_strided_slice %4 {offsets = [0, 64], sizes = [8, 16], strides = [1, 1]} : vector<8x128xf32> to vector<8x16xf32>
    %76 = vector.extract_strided_slice %5 {offsets = [0, 64], sizes = [8, 16], strides = [1, 1]} : vector<8x128xf32> to vector<8x16xf32>
    %cst_24 = arith.constant dense<0.000000e+00> : vector<8x8xf32>
    %77 = tpu.matmul %74, %75, %cst_24 {dimension_numbers = #tpu.dot_dimension_numbers<[1], [1], [0], [0], [0, 0, 1, 0], [], []>} : vector<8x16xf32>, vector<8x16xf32>, vector<8x8xf32> -> vector<8x8xf32>
    %cst_25 = arith.constant 2.500000e-01 : f32
    %78 = vector.broadcast %cst_25 : f32 to vector<8x8xf32>
    %79 = arith.mulf %77, %78 : vector<8x8xf32>
    %cst_26 = arith.constant dense<0xFF800000> : vector<8xf32>
    %80 = vector.multi_reduction <maximumf>, %79, %cst_26 [1] : vector<8x8xf32> to vector<8xf32>
    %81 = vector.shape_cast %80 : vector<8xf32> to vector<8x1xf32>
    %82 = vector.broadcast %81 : vector<8x1xf32> to vector<8x8xf32>
    %83 = arith.subf %79, %82 : vector<8x8xf32>
    %84 = math.exp %83 : vector<8x8xf32>
    %cst_27 = arith.constant dense<0.000000e+00> : vector<8xf32>
    %85 = vector.multi_reduction <add>, %84, %cst_27 [1] : vector<8x8xf32> to vector<8xf32>
    %86 = vector.shape_cast %85 : vector<8xf32> to vector<8x1xf32>
    %87 = tpu.reciprocal %86 {approx = true} : vector<8x1xf32> -> vector<8x1xf32>
    %88 = vector.broadcast %87 : vector<8x1xf32> to vector<8x8xf32>
    %89 = arith.mulf %84, %88 : vector<8x8xf32>
    %cst_28 = arith.constant dense<0.000000e+00> : vector<8x16xf32>
    %90 = tpu.matmul %89, %76, %cst_28 {dimension_numbers = #tpu.dot_dimension_numbers<[1], [0], [0], [1], [0, 0, 1, 1], [], []>} : vector<8x8xf32>, vector<8x16xf32>, vector<8x16xf32> -> vector<8x16xf32>
    %91 = vector.extract_strided_slice %1 {offsets = [0, 80], sizes = [8, 16], strides = [1, 1]} : vector<8x128xf32> to vector<8x16xf32>
    %92 = vector.extract_strided_slice %4 {offsets = [0, 80], sizes = [8, 16], strides = [1, 1]} : vector<8x128xf32> to vector<8x16xf32>
    %93 = vector.extract_strided_slice %5 {offsets = [0, 80], sizes = [8, 16], strides = [1, 1]} : vector<8x128xf32> to vector<8x16xf32>
    %cst_29 = arith.constant dense<0.000000e+00> : vector<8x8xf32>
    %94 = tpu.matmul %91, %92, %cst_29 {dimension_numbers = #tpu.dot_dimension_numbers<[1], [1], [0], [0], [0, 0, 1, 0], [], []>} : vector<8x16xf32>, vector<8x16xf32>, vector<8x8xf32> -> vector<8x8xf32>
    %cst_30 = arith.constant 2.500000e-01 : f32
    %95 = vector.broadcast %cst_30 : f32 to vector<8x8xf32>
    %96 = arith.mulf %94, %95 : vector<8x8xf32>
    %cst_31 = arith.constant dense<0xFF800000> : vector<8xf32>
    %97 = vector.multi_reduction <maximumf>, %96, %cst_31 [1] : vector<8x8xf32> to vector<8xf32>
    %98 = vector.shape_cast %97 : vector<8xf32> to vector<8x1xf32>
    %99 = vector.broadcast %98 : vector<8x1xf32> to vector<8x8xf32>
    %100 = arith.subf %96, %99 : vector<8x8xf32>
    %101 = math.exp %100 : vector<8x8xf32>
    %cst_32 = arith.constant dense<0.000000e+00> : vector<8xf32>
    %102 = vector.multi_reduction <add>, %101, %cst_32 [1] : vector<8x8xf32> to vector<8xf32>
    %103 = vector.shape_cast %102 : vector<8xf32> to vector<8x1xf32>
    %104 = tpu.reciprocal %103 {approx = true} : vector<8x1xf32> -> vector<8x1xf32>
    %105 = vector.broadcast %104 : vector<8x1xf32> to vector<8x8xf32>
    %106 = arith.mulf %101, %105 : vector<8x8xf32>
    %cst_33 = arith.constant dense<0.000000e+00> : vector<8x16xf32>
    %107 = tpu.matmul %106, %93, %cst_33 {dimension_numbers = #tpu.dot_dimension_numbers<[1], [0], [0], [1], [0, 0, 1, 1], [], []>} : vector<8x8xf32>, vector<8x16xf32>, vector<8x16xf32> -> vector<8x16xf32>
    %108 = vector.extract_strided_slice %1 {offsets = [0, 96], sizes = [8, 16], strides = [1, 1]} : vector<8x128xf32> to vector<8x16xf32>
    %109 = vector.extract_strided_slice %4 {offsets = [0, 96], sizes = [8, 16], strides = [1, 1]} : vector<8x128xf32> to vector<8x16xf32>
    %110 = vector.extract_strided_slice %5 {offsets = [0, 96], sizes = [8, 16], strides = [1, 1]} : vector<8x128xf32> to vector<8x16xf32>
    %cst_34 = arith.constant dense<0.000000e+00> : vector<8x8xf32>
    %111 = tpu.matmul %108, %109, %cst_34 {dimension_numbers = #tpu.dot_dimension_numbers<[1], [1], [0], [0], [0, 0, 1, 0], [], []>} : vector<8x16xf32>, vector<8x16xf32>, vector<8x8xf32> -> vector<8x8xf32>
    %cst_35 = arith.constant 2.500000e-01 : f32
    %112 = vector.broadcast %cst_35 : f32 to vector<8x8xf32>
    %113 = arith.mulf %111, %112 : vector<8x8xf32>
    %cst_36 = arith.constant dense<0xFF800000> : vector<8xf32>
    %114 = vector.multi_reduction <maximumf>, %113, %cst_36 [1] : vector<8x8xf32> to vector<8xf32>
    %115 = vector.shape_cast %114 : vector<8xf32> to vector<8x1xf32>
    %116 = vector.broadcast %115 : vector<8x1xf32> to vector<8x8xf32>
    %117 = arith.subf %113, %116 : vector<8x8xf32>
    %118 = math.exp %117 : vector<8x8xf32>
    %cst_37 = arith.constant dense<0.000000e+00> : vector<8xf32>
    %119 = vector.multi_reduction <add>, %118, %cst_37 [1] : vector<8x8xf32> to vector<8xf32>
    %120 = vector.shape_cast %119 : vector<8xf32> to vector<8x1xf32>
    %121 = tpu.reciprocal %120 {approx = true} : vector<8x1xf32> -> vector<8x1xf32>
    %122 = vector.broadcast %121 : vector<8x1xf32> to vector<8x8xf32>
    %123 = arith.mulf %118, %122 : vector<8x8xf32>
    %cst_38 = arith.constant dense<0.000000e+00> : vector<8x16xf32>
    %124 = tpu.matmul %123, %110, %cst_38 {dimension_numbers = #tpu.dot_dimension_numbers<[1], [0], [0], [1], [0, 0, 1, 1], [], []>} : vector<8x8xf32>, vector<8x16xf32>, vector<8x16xf32> -> vector<8x16xf32>
    %125 = vector.extract_strided_slice %1 {offsets = [0, 112], sizes = [8, 16], strides = [1, 1]} : vector<8x128xf32> to vector<8x16xf32>
    %126 = vector.extract_strided_slice %4 {offsets = [0, 112], sizes = [8, 16], strides = [1, 1]} : vector<8x128xf32> to vector<8x16xf32>
    %127 = vector.extract_strided_slice %5 {offsets = [0, 112], sizes = [8, 16], strides = [1, 1]} : vector<8x128xf32> to vector<8x16xf32>
    %cst_39 = arith.constant dense<0.000000e+00> : vector<8x8xf32>
    %128 = tpu.matmul %125, %126, %cst_39 {dimension_numbers = #tpu.dot_dimension_numbers<[1], [1], [0], [0], [0, 0, 1, 0], [], []>} : vector<8x16xf32>, vector<8x16xf32>, vector<8x8xf32> -> vector<8x8xf32>
    %cst_40 = arith.constant 2.500000e-01 : f32
    %129 = vector.broadcast %cst_40 : f32 to vector<8x8xf32>
    %130 = arith.mulf %128, %129 : vector<8x8xf32>
    %cst_41 = arith.constant dense<0xFF800000> : vector<8xf32>
    %131 = vector.multi_reduction <maximumf>, %130, %cst_41 [1] : vector<8x8xf32> to vector<8xf32>
    %132 = vector.shape_cast %131 : vector<8xf32> to vector<8x1xf32>
    %133 = vector.broadcast %132 : vector<8x1xf32> to vector<8x8xf32>
    %134 = arith.subf %130, %133 : vector<8x8xf32>
    %135 = math.exp %134 : vector<8x8xf32>
    %cst_42 = arith.constant dense<0.000000e+00> : vector<8xf32>
    %136 = vector.multi_reduction <add>, %135, %cst_42 [1] : vector<8x8xf32> to vector<8xf32>
    %137 = vector.shape_cast %136 : vector<8xf32> to vector<8x1xf32>
    %138 = tpu.reciprocal %137 {approx = true} : vector<8x1xf32> -> vector<8x1xf32>
    %139 = vector.broadcast %138 : vector<8x1xf32> to vector<8x8xf32>
    %140 = arith.mulf %135, %139 : vector<8x8xf32>
    %cst_43 = arith.constant dense<0.000000e+00> : vector<8x16xf32>
    %141 = tpu.matmul %140, %127, %cst_43 {dimension_numbers = #tpu.dot_dimension_numbers<[1], [0], [0], [1], [0, 0, 1, 1], [], []>} : vector<8x8xf32>, vector<8x16xf32>, vector<8x16xf32> -> vector<8x16xf32>
    %c0_44 = arith.constant 0 : index
    %c0_45 = arith.constant 0 : index
    %c0_46 = arith.constant 0 : index
    %142 = vector.load %arg3[%c0_44, %c0_45, %c0_46] : memref<1x8x128xf32, #tpu.memory_space<vmem>>, vector<1x8x16xf32>
    %143 = vector.shape_cast %142 : vector<1x8x16xf32> to vector<8x16xf32>
    %144 = vector.shape_cast %22 : vector<8x16xf32> to vector<1x8x16xf32>
    tpu.vector_store %arg3[%c0_44, %c0_45, %c0_46], %144 {strides = array<i32>} : memref<1x8x128xf32, #tpu.memory_space<vmem>>, vector<1x8x16xf32>,
    %c0_47 = arith.constant 0 : index
    %c0_48 = arith.constant 0 : index
    %c16 = arith.constant 16 : index
    %145 = vector.load %arg3[%c0_47, %c0_48, %c16] : memref<1x8x128xf32, #tpu.memory_space<vmem>>, vector<1x8x16xf32>
    %146 = vector.shape_cast %145 : vector<1x8x16xf32> to vector<8x16xf32>
    %147 = vector.shape_cast %39 : vector<8x16xf32> to vector<1x8x16xf32>
    tpu.vector_store %arg3[%c0_47, %c0_48, %c16], %147 {strides = array<i32>} : memref<1x8x128xf32, #tpu.memory_space<vmem>>, vector<1x8x16xf32>,
    %c0_49 = arith.constant 0 : index
    %c0_50 = arith.constant 0 : index
    %c32 = arith.constant 32 : index
    %148 = vector.load %arg3[%c0_49, %c0_50, %c32] : memref<1x8x128xf32, #tpu.memory_space<vmem>>, vector<1x8x16xf32>
    %149 = vector.shape_cast %148 : vector<1x8x16xf32> to vector<8x16xf32>
    %150 = vector.shape_cast %56 : vector<8x16xf32> to vector<1x8x16xf32>
    tpu.vector_store %arg3[%c0_49, %c0_50, %c32], %150 {strides = array<i32>} : memref<1x8x128xf32, #tpu.memory_space<vmem>>, vector<1x8x16xf32>,
    %c0_51 = arith.constant 0 : index
    %c0_52 = arith.constant 0 : index
    %c48 = arith.constant 48 : index
    %151 = vector.load %arg3[%c0_51, %c0_52, %c48] : memref<1x8x128xf32, #tpu.memory_space<vmem>>, vector<1x8x16xf32>
    %152 = vector.shape_cast %151 : vector<1x8x16xf32> to vector<8x16xf32>
    %153 = vector.shape_cast %73 : vector<8x16xf32> to vector<1x8x16xf32>
    tpu.vector_store %arg3[%c0_51, %c0_52, %c48], %153 {strides = array<i32>} : memref<1x8x128xf32, #tpu.memory_space<vmem>>, vector<1x8x16xf32>,
    %c0_53 = arith.constant 0 : index
    %c0_54 = arith.constant 0 : index
    %c64 = arith.constant 64 : index
    %154 = vector.load %arg3[%c0_53, %c0_54, %c64] : memref<1x8x128xf32, #tpu.memory_space<vmem>>, vector<1x8x16xf32>
    %155 = vector.shape_cast %154 : vector<1x8x16xf32> to vector<8x16xf32>
    %156 = vector.shape_cast %90 : vector<8x16xf32> to vector<1x8x16xf32>
    tpu.vector_store %arg3[%c0_53, %c0_54, %c64], %156 {strides = array<i32>} : memref<1x8x128xf32, #tpu.memory_space<vmem>>, vector<1x8x16xf32>,
    %c0_55 = arith.constant 0 : index
    %c0_56 = arith.constant 0 : index
    %c80 = arith.constant 80 : index
    %157 = vector.load %arg3[%c0_55, %c0_56, %c80] : memref<1x8x128xf32, #tpu.memory_space<vmem>>, vector<1x8x16xf32>
    %158 = vector.shape_cast %157 : vector<1x8x16xf32> to vector<8x16xf32>
    %159 = vector.shape_cast %107 : vector<8x16xf32> to vector<1x8x16xf32>
    tpu.vector_store %arg3[%c0_55, %c0_56, %c80], %159 {strides = array<i32>} : memref<1x8x128xf32, #tpu.memory_space<vmem>>, vector<1x8x16xf32>,
    %c0_57 = arith.constant 0 : index
    %c0_58 = arith.constant 0 : index
    %c96 = arith.constant 96 : index
    %160 = vector.load %arg3[%c0_57, %c0_58, %c96] : memref<1x8x128xf32, #tpu.memory_space<vmem>>, vector<1x8x16xf32>
    %161 = vector.shape_cast %160 : vector<1x8x16xf32> to vector<8x16xf32>
    %162 = vector.shape_cast %124 : vector<8x16xf32> to vector<1x8x16xf32>
    tpu.vector_store %arg3[%c0_57, %c0_58, %c96], %162 {strides = array<i32>} : memref<1x8x128xf32, #tpu.memory_space<vmem>>, vector<1x8x16xf32>,
    %c0_59 = arith.constant 0 : index
    %c0_60 = arith.constant 0 : index
    %c112 = arith.constant 112 : index
    %163 = vector.load %arg3[%c0_59, %c0_60, %c112] : memref<1x8x128xf32, #tpu.memory_space<vmem>>, vector<1x8x16xf32>
    %164 = vector.shape_cast %163 : vector<1x8x16xf32> to vector<8x16xf32>
    %165 = vector.shape_cast %141 : vector<8x16xf32> to vector<1x8x16xf32>
    tpu.vector_store %arg3[%c0_59, %c0_60, %c112], %165 {strides = array<i32>} : memref<1x8x128xf32, #tpu.memory_space<vmem>>, vector<1x8x16xf32>,
    return
  }
  func.func @transform_0(%arg0: i32) -> (i32, i32, i32) {
    %c0_i32 = arith.constant 0 : i32
    %c0_i32_0 = arith.constant 0 : i32
    %c0_i32_1 = arith.constant 0 : i32
    return %arg0, %c0_i32, %c0_i32_0 : i32, i32, i32
  }
  func.func @transform_1(%arg0: i32) -> (i32, i32, i32) {
    %c0_i32 = arith.constant 0 : i32
    %c0_i32_0 = arith.constant 0 : i32
    %c0_i32_1 = arith.constant 0 : i32
    return %arg0, %c0_i32, %c0_i32_0 : i32, i32, i32
  }
  func.func @transform_2(%arg0: i32) -> (i32, i32, i32) {
    %c0_i32 = arith.constant 0 : i32
    %c0_i32_0 = arith.constant 0 : i32
    %c0_i32_1 = arith.constant 0 : i32
    return %arg0, %c0_i32, %c0_i32_0 : i32, i32, i32
  }
}

module attributes {stable_mosaic.version = 11 : i64} {
  func.func @_linear_add_ln_kernel(%arg0: i32, %arg1: memref<8x128xf32, #tpu.memory_space<vmem>>, %arg2: memref<128x128xf32, #tpu.memory_space<vmem>>, %arg3: memref<1x128xf32, #tpu.memory_space<vmem>>, %arg4: memref<8x128xf32, #tpu.memory_space<vmem>>, %arg5: memref<1x128xf32, #tpu.memory_space<vmem>>, %arg6: memref<1x128xf32, #tpu.memory_space<vmem>>, %arg7: memref<8x128xf32, #tpu.memory_space<vmem>>) attributes {dimension_semantics = [#tpu.dimension_semantics<parallel>], iteration_bounds = array<i64: 2>, scalar_prefetch = 0 : i64, scratch_operands = 0 : i64, tpu.core_type = #tpu.core_type<tc>, window_params = [{transform_indices = @transform_0, window_bounds = array<i64: 8, 128>}, {pipeline_mode = #tpu.pipeline_mode<synchronous>, transform_indices = @transform_1, window_bounds = array<i64: 128, 128>}, {pipeline_mode = #tpu.pipeline_mode<synchronous>, transform_indices = @transform_2, window_bounds = array<i64: 1, 128>}, {transform_indices = @transform_3, window_bounds = array<i64: 8, 128>}, {pipeline_mode = #tpu.pipeline_mode<synchronous>, transform_indices = @transform_4, window_bounds = array<i64: 1, 128>}, {pipeline_mode = #tpu.pipeline_mode<synchronous>, transform_indices = @transform_5, window_bounds = array<i64: 1, 128>}, {transform_indices = @transform_6, window_bounds = array<i64: 8, 128>}]} {
    %c0 = arith.constant 0 : index
    %c0_0 = arith.constant 0 : index
    %0 = vector.load %arg1[%c0, %c0_0] : memref<8x128xf32, #tpu.memory_space<vmem>>, vector<8x128xf32>
    %c0_1 = arith.constant 0 : index
    %c0_2 = arith.constant 0 : index
    %1 = vector.load %arg2[%c0_1, %c0_2] : memref<128x128xf32, #tpu.memory_space<vmem>>, vector<128x128xf32>
    %cst = arith.constant dense<0.000000e+00> : vector<8x128xf32>
    %2 = tpu.matmul %0, %1, %cst {dimension_numbers = #tpu.dot_dimension_numbers<[1], [0], [0], [1], [0, 0, 1, 1], [], []>} : vector<8x128xf32>, vector<128x128xf32>, vector<8x128xf32> -> vector<8x128xf32>
    %c0_3 = arith.constant 0 : index
    %c0_4 = arith.constant 0 : index
    %3 = vector.load %arg3[%c0_3, %c0_4] : memref<1x128xf32, #tpu.memory_space<vmem>>, vector<1x128xf32>
    %4 = vector.broadcast %3 : vector<1x128xf32> to vector<8x128xf32>
    %5 = arith.addf %2, %4 : vector<8x128xf32>
    %c0_5 = arith.constant 0 : index
    %c0_6 = arith.constant 0 : index
    %6 = vector.load %arg4[%c0_5, %c0_6] : memref<8x128xf32, #tpu.memory_space<vmem>>, vector<8x128xf32>
    %7 = arith.addf %5, %6 : vector<8x128xf32>
    %cst_7 = arith.constant dense<0.000000e+00> : vector<8xf32>
    %8 = vector.multi_reduction <add>, %7, %cst_7 [1] : vector<8x128xf32> to vector<8xf32>
    %9 = vector.shape_cast %8 : vector<8xf32> to vector<8x1xf32>
    %cst_8 = arith.constant 1.280000e+02 : f32
    %10 = vector.broadcast %cst_8 : f32 to vector<8x1xf32>
    %11 = arith.divf %9, %10 : vector<8x1xf32>
    %12 = vector.broadcast %11 : vector<8x1xf32> to vector<8x128xf32>
    %13 = arith.subf %7, %12 : vector<8x128xf32>
    %14 = arith.mulf %13, %13 : vector<8x128xf32>
    %cst_9 = arith.constant dense<0.000000e+00> : vector<8xf32>
    %15 = vector.multi_reduction <add>, %14, %cst_9 [1] : vector<8x128xf32> to vector<8xf32>
    %16 = vector.shape_cast %15 : vector<8xf32> to vector<8x1xf32>
    %cst_10 = arith.constant 1.280000e+02 : f32
    %17 = vector.broadcast %cst_10 : f32 to vector<8x1xf32>
    %18 = arith.divf %16, %17 : vector<8x1xf32>
    %cst_11 = arith.constant 9.99999974E-6 : f32
    %19 = vector.broadcast %cst_11 : f32 to vector<8x1xf32>
    %20 = arith.addf %18, %19 : vector<8x1xf32>
    %21 = math.rsqrt %20 : vector<8x1xf32>
    %22 = vector.broadcast %21 : vector<8x1xf32> to vector<8x128xf32>
    %23 = arith.mulf %13, %22 : vector<8x128xf32>
    %c0_12 = arith.constant 0 : index
    %c0_13 = arith.constant 0 : index
    %24 = vector.load %arg5[%c0_12, %c0_13] : memref<1x128xf32, #tpu.memory_space<vmem>>, vector<1x128xf32>
    %25 = vector.broadcast %24 : vector<1x128xf32> to vector<8x128xf32>
    %26 = arith.mulf %23, %25 : vector<8x128xf32>
    %c0_14 = arith.constant 0 : index
    %c0_15 = arith.constant 0 : index
    %27 = vector.load %arg6[%c0_14, %c0_15] : memref<1x128xf32, #tpu.memory_space<vmem>>, vector<1x128xf32>
    %28 = vector.broadcast %27 : vector<1x128xf32> to vector<8x128xf32>
    %29 = arith.addf %26, %28 : vector<8x128xf32>
    %c0_16 = arith.constant 0 : index
    %c0_17 = arith.constant 0 : index
    %30 = vector.load %arg7[%c0_16, %c0_17] : memref<8x128xf32, #tpu.memory_space<vmem>>, vector<8x128xf32>
    tpu.vector_store %arg7[%c0_16, %c0_17], %29 {strides = array<i32>} : memref<8x128xf32, #tpu.memory_space<vmem>>, vector<8x128xf32>,
    return
  }
  func.func @transform_0(%arg0: i32) -> (i32, i32) {
    %c0_i32 = arith.constant 0 : i32
    %c0_i32_0 = arith.constant 0 : i32
    return %arg0, %c0_i32 : i32, i32
  }
  func.func @transform_1(%arg0: i32) -> (i32, i32) {
    %c0_i32 = arith.constant 0 : i32
    %c0_i32_0 = arith.constant 0 : i32
    %c0_i32_1 = arith.constant 0 : i32
    return %c0_i32, %c0_i32_0 : i32, i32
  }
  func.func @transform_2(%arg0: i32) -> (i32, i32) {
    %c0_i32 = arith.constant 0 : i32
    %c0_i32_0 = arith.constant 0 : i32
    %c0_i32_1 = arith.constant 0 : i32
    return %c0_i32, %c0_i32_0 : i32, i32
  }
  func.func @transform_3(%arg0: i32) -> (i32, i32) {
    %c0_i32 = arith.constant 0 : i32
    %c0_i32_0 = arith.constant 0 : i32
    return %arg0, %c0_i32 : i32, i32
  }
  func.func @transform_4(%arg0: i32) -> (i32, i32) {
    %c0_i32 = arith.constant 0 : i32
    %c0_i32_0 = arith.constant 0 : i32
    %c0_i32_1 = arith.constant 0 : i32
    return %c0_i32, %c0_i32_0 : i32, i32
  }
  func.func @transform_5(%arg0: i32) -> (i32, i32) {
    %c0_i32 = arith.constant 0 : i32
    %c0_i32_0 = arith.constant 0 : i32
    %c0_i32_1 = arith.constant 0 : i32
    return %c0_i32, %c0_i32_0 : i32, i32
  }
  func.func @transform_6(%arg0: i32) -> (i32, i32) {
    %c0_i32 = arith.constant 0 : i32
    %c0_i32_0 = arith.constant 0 : i32
    return %arg0, %c0_i32 : i32, i32
  }
}

module attributes {stable_mosaic.version = 11 : i64} {
  func.func @_ffn_add_ln_kernel(%arg0: i32, %arg1: memref<8x128xf32, #tpu.memory_space<vmem>>, %arg2: memref<128x2048xf32, #tpu.memory_space<vmem>>, %arg3: memref<1x2048xf32, #tpu.memory_space<vmem>>, %arg4: memref<2048x128xf32, #tpu.memory_space<vmem>>, %arg5: memref<1x128xf32, #tpu.memory_space<vmem>>, %arg6: memref<8x128xf32, #tpu.memory_space<vmem>>, %arg7: memref<1x128xf32, #tpu.memory_space<vmem>>, %arg8: memref<1x128xf32, #tpu.memory_space<vmem>>, %arg9: memref<8x128xf32, #tpu.memory_space<vmem>>, %arg10: memref<8x2048xf32, #tpu.memory_space<vmem>>) attributes {dimension_semantics = [#tpu.dimension_semantics<parallel>], iteration_bounds = array<i64: 2>, scalar_prefetch = 0 : i64, scratch_operands = 1 : i64, tpu.core_type = #tpu.core_type<tc>, window_params = [{transform_indices = @transform_0, window_bounds = array<i64: 8, 128>}, {pipeline_mode = #tpu.pipeline_mode<synchronous>, transform_indices = @transform_1, window_bounds = array<i64: 128, 2048>}, {pipeline_mode = #tpu.pipeline_mode<synchronous>, transform_indices = @transform_2, window_bounds = array<i64: 1, 2048>}, {pipeline_mode = #tpu.pipeline_mode<synchronous>, transform_indices = @transform_3, window_bounds = array<i64: 2048, 128>}, {pipeline_mode = #tpu.pipeline_mode<synchronous>, transform_indices = @transform_4, window_bounds = array<i64: 1, 128>}, {transform_indices = @transform_5, window_bounds = array<i64: 8, 128>}, {pipeline_mode = #tpu.pipeline_mode<synchronous>, transform_indices = @transform_6, window_bounds = array<i64: 1, 128>}, {pipeline_mode = #tpu.pipeline_mode<synchronous>, transform_indices = @transform_7, window_bounds = array<i64: 1, 128>}, {transform_indices = @transform_8, window_bounds = array<i64: 8, 128>}]} {
    %c0 = arith.constant 0 : index
    %c0_0 = arith.constant 0 : index
    %0 = vector.load %arg1[%c0, %c0_0] : memref<8x128xf32, #tpu.memory_space<vmem>>, vector<8x128xf32>
    %c0_1 = arith.constant 0 : index
    %c0_2 = arith.constant 0 : index
    %1 = vector.load %arg2[%c0_1, %c0_2] : memref<128x2048xf32, #tpu.memory_space<vmem>>, vector<128x2048xf32>
    %cst = arith.constant dense<0.000000e+00> : vector<8x2048xf32>
    %2 = tpu.matmul %0, %1, %cst {dimension_numbers = #tpu.dot_dimension_numbers<[1], [0], [0], [1], [0, 0, 1, 1], [], []>} : vector<8x128xf32>, vector<128x2048xf32>, vector<8x2048xf32> -> vector<8x2048xf32>
    %c0_3 = arith.constant 0 : index
    %c0_4 = arith.constant 0 : index
    %3 = vector.load %arg3[%c0_3, %c0_4] : memref<1x2048xf32, #tpu.memory_space<vmem>>, vector<1x2048xf32>
    %4 = vector.broadcast %3 : vector<1x2048xf32> to vector<8x2048xf32>
    %5 = arith.addf %2, %4 : vector<8x2048xf32>
    %cst_5 = arith.constant 0.000000e+00 : f32
    %6 = vector.broadcast %cst_5 : f32 to vector<8x2048xf32>
    %7 = arith.maximumf %5, %6 : vector<8x2048xf32>
    %c0_6 = arith.constant 0 : index
    %c0_7 = arith.constant 0 : index
    %8 = vector.load %arg10[%c0_6, %c0_7] : memref<8x2048xf32, #tpu.memory_space<vmem>>, vector<8x2048xf32>
    tpu.vector_store %arg10[%c0_6, %c0_7], %7 {strides = array<i32>} : memref<8x2048xf32, #tpu.memory_space<vmem>>, vector<8x2048xf32>,
    %c0_8 = arith.constant 0 : index
    %c0_9 = arith.constant 0 : index
    %9 = vector.load %arg10[%c0_8, %c0_9] : memref<8x2048xf32, #tpu.memory_space<vmem>>, vector<8x2048xf32>
    %c0_10 = arith.constant 0 : index
    %c0_11 = arith.constant 0 : index
    %10 = vector.load %arg4[%c0_10, %c0_11] : memref<2048x128xf32, #tpu.memory_space<vmem>>, vector<2048x128xf32>
    %cst_12 = arith.constant dense<0.000000e+00> : vector<8x128xf32>
    %11 = tpu.matmul %9, %10, %cst_12 {dimension_numbers = #tpu.dot_dimension_numbers<[1], [0], [0], [1], [0, 0, 1, 1], [], []>} : vector<8x2048xf32>, vector<2048x128xf32>, vector<8x128xf32> -> vector<8x128xf32>
    %c0_13 = arith.constant 0 : index
    %c0_14 = arith.constant 0 : index
    %12 = vector.load %arg5[%c0_13, %c0_14] : memref<1x128xf32, #tpu.memory_space<vmem>>, vector<1x128xf32>
    %13 = vector.broadcast %12 : vector<1x128xf32> to vector<8x128xf32>
    %14 = arith.addf %11, %13 : vector<8x128xf32>
    %c0_15 = arith.constant 0 : index
    %c0_16 = arith.constant 0 : index
    %15 = vector.load %arg6[%c0_15, %c0_16] : memref<8x128xf32, #tpu.memory_space<vmem>>, vector<8x128xf32>
    %16 = arith.addf %14, %15 : vector<8x128xf32>
    %cst_17 = arith.constant dense<0.000000e+00> : vector<8xf32>
    %17 = vector.multi_reduction <add>, %16, %cst_17 [1] : vector<8x128xf32> to vector<8xf32>
    %18 = vector.shape_cast %17 : vector<8xf32> to vector<8x1xf32>
    %cst_18 = arith.constant 1.280000e+02 : f32
    %19 = vector.broadcast %cst_18 : f32 to vector<8x1xf32>
    %20 = arith.divf %18, %19 : vector<8x1xf32>
    %21 = vector.broadcast %20 : vector<8x1xf32> to vector<8x128xf32>
    %22 = arith.subf %16, %21 : vector<8x128xf32>
    %23 = arith.mulf %22, %22 : vector<8x128xf32>
    %cst_19 = arith.constant dense<0.000000e+00> : vector<8xf32>
    %24 = vector.multi_reduction <add>, %23, %cst_19 [1] : vector<8x128xf32> to vector<8xf32>
    %25 = vector.shape_cast %24 : vector<8xf32> to vector<8x1xf32>
    %cst_20 = arith.constant 1.280000e+02 : f32
    %26 = vector.broadcast %cst_20 : f32 to vector<8x1xf32>
    %27 = arith.divf %25, %26 : vector<8x1xf32>
    %cst_21 = arith.constant 9.99999974E-6 : f32
    %28 = vector.broadcast %cst_21 : f32 to vector<8x1xf32>
    %29 = arith.addf %27, %28 : vector<8x1xf32>
    %30 = math.rsqrt %29 : vector<8x1xf32>
    %31 = vector.broadcast %30 : vector<8x1xf32> to vector<8x128xf32>
    %32 = arith.mulf %22, %31 : vector<8x128xf32>
    %c0_22 = arith.constant 0 : index
    %c0_23 = arith.constant 0 : index
    %33 = vector.load %arg7[%c0_22, %c0_23] : memref<1x128xf32, #tpu.memory_space<vmem>>, vector<1x128xf32>
    %34 = vector.broadcast %33 : vector<1x128xf32> to vector<8x128xf32>
    %35 = arith.mulf %32, %34 : vector<8x128xf32>
    %c0_24 = arith.constant 0 : index
    %c0_25 = arith.constant 0 : index
    %36 = vector.load %arg8[%c0_24, %c0_25] : memref<1x128xf32, #tpu.memory_space<vmem>>, vector<1x128xf32>
    %37 = vector.broadcast %36 : vector<1x128xf32> to vector<8x128xf32>
    %38 = arith.addf %35, %37 : vector<8x128xf32>
    %c0_26 = arith.constant 0 : index
    %c0_27 = arith.constant 0 : index
    %39 = vector.load %arg9[%c0_26, %c0_27] : memref<8x128xf32, #tpu.memory_space<vmem>>, vector<8x128xf32>
    tpu.vector_store %arg9[%c0_26, %c0_27], %38 {strides = array<i32>} : memref<8x128xf32, #tpu.memory_space<vmem>>, vector<8x128xf32>,
    return
  }
  func.func @transform_0(%arg0: i32) -> (i32, i32) {
    %c0_i32 = arith.constant 0 : i32
    %c0_i32_0 = arith.constant 0 : i32
    return %arg0, %c0_i32 : i32, i32
  }
  func.func @transform_1(%arg0: i32) -> (i32, i32) {
    %c0_i32 = arith.constant 0 : i32
    %c0_i32_0 = arith.constant 0 : i32
    %c0_i32_1 = arith.constant 0 : i32
    return %c0_i32, %c0_i32_0 : i32, i32
  }
  func.func @transform_2(%arg0: i32) -> (i32, i32) {
    %c0_i32 = arith.constant 0 : i32
    %c0_i32_0 = arith.constant 0 : i32
    %c0_i32_1 = arith.constant 0 : i32
    return %c0_i32, %c0_i32_0 : i32, i32
  }
  func.func @transform_3(%arg0: i32) -> (i32, i32) {
    %c0_i32 = arith.constant 0 : i32
    %c0_i32_0 = arith.constant 0 : i32
    %c0_i32_1 = arith.constant 0 : i32
    return %c0_i32, %c0_i32_0 : i32, i32
  }
  func.func @transform_4(%arg0: i32) -> (i32, i32) {
    %c0_i32 = arith.constant 0 : i32
    %c0_i32_0 = arith.constant 0 : i32
    %c0_i32_1 = arith.constant 0 : i32
    return %c0_i32, %c0_i32_0 : i32, i32
  }
  func.func @transform_5(%arg0: i32) -> (i32, i32) {
    %c0_i32 = arith.constant 0 : i32
    %c0_i32_0 = arith.constant 0 : i32
    return %arg0, %c0_i32 : i32, i32
  }
  func.func @transform_6(%arg0: i32) -> (i32, i32) {
    %c0_i32 = arith.constant 0 : i32
    %c0_i32_0 = arith.constant 0 : i32
    %c0_i32_1 = arith.constant 0 : i32
    return %c0_i32, %c0_i32_0 : i32, i32
  }
  func.func @transform_7(%arg0: i32) -> (i32, i32) {
    %c0_i32 = arith.constant 0 : i32
    %c0_i32_0 = arith.constant 0 : i32
    %c0_i32_1 = arith.constant 0 : i32
    return %c0_i32, %c0_i32_0 : i32, i32
  }
  func.func @transform_8(%arg0: i32) -> (i32, i32) {
    %c0_i32 = arith.constant 0 : i32
    %c0_i32_0 = arith.constant 0 : i32
    return %arg0, %c0_i32 : i32, i32
  }
}

module attributes {stable_mosaic.version = 11 : i64} {
  func.func @_linear_kernel(%arg0: i32, %arg1: i32, %arg2: memref<8x128xf32, #tpu.memory_space<vmem>>, %arg3: memref<128x128xf32, #tpu.memory_space<vmem>>, %arg4: memref<1x128xf32, #tpu.memory_space<vmem>>, %arg5: memref<8x128xf32, #tpu.memory_space<vmem>>) attributes {dimension_semantics = [#tpu.dimension_semantics<parallel>, #tpu.dimension_semantics<parallel>], iteration_bounds = array<i64: 1, 2>, scalar_prefetch = 0 : i64, scratch_operands = 0 : i64, tpu.core_type = #tpu.core_type<tc>, window_params = [{transform_indices = @transform_0, window_bounds = array<i64: 8, 128>}, {transform_indices = @transform_1, window_bounds = array<i64: 128, 128>}, {transform_indices = @transform_2, window_bounds = array<i64: 1, 128>}, {transform_indices = @transform_3, window_bounds = array<i64: 8, 128>}]} {
    %c0 = arith.constant 0 : index
    %c0_0 = arith.constant 0 : index
    %0 = vector.load %arg2[%c0, %c0_0] : memref<8x128xf32, #tpu.memory_space<vmem>>, vector<8x128xf32>
    %c0_1 = arith.constant 0 : index
    %c0_2 = arith.constant 0 : index
    %1 = vector.load %arg3[%c0_1, %c0_2] : memref<128x128xf32, #tpu.memory_space<vmem>>, vector<128x128xf32>
    %cst = arith.constant dense<0.000000e+00> : vector<8x128xf32>
    %2 = tpu.matmul %0, %1, %cst {dimension_numbers = #tpu.dot_dimension_numbers<[1], [0], [0], [1], [0, 0, 1, 1], [], []>} : vector<8x128xf32>, vector<128x128xf32>, vector<8x128xf32> -> vector<8x128xf32>
    %c0_3 = arith.constant 0 : index
    %c0_4 = arith.constant 0 : index
    %3 = vector.load %arg4[%c0_3, %c0_4] : memref<1x128xf32, #tpu.memory_space<vmem>>, vector<1x128xf32>
    %4 = vector.broadcast %3 : vector<1x128xf32> to vector<8x128xf32>
    %5 = arith.addf %2, %4 : vector<8x128xf32>
    %c0_5 = arith.constant 0 : index
    %c0_6 = arith.constant 0 : index
    %6 = vector.load %arg5[%c0_5, %c0_6] : memref<8x128xf32, #tpu.memory_space<vmem>>, vector<8x128xf32>
    tpu.vector_store %arg5[%c0_5, %c0_6], %5 {strides = array<i32>} : memref<8x128xf32, #tpu.memory_space<vmem>>, vector<8x128xf32>,
    return
  }
  func.func @transform_0(%arg0: i32, %arg1: i32) -> (i32, i32) {
    %c0_i32 = arith.constant 0 : i32
    %c0_i32_0 = arith.constant 0 : i32
    return %arg1, %c0_i32 : i32, i32
  }
  func.func @transform_1(%arg0: i32, %arg1: i32) -> (i32, i32) {
    %c0_i32 = arith.constant 0 : i32
    %c0_i32_0 = arith.constant 0 : i32
    return %c0_i32, %arg0 : i32, i32
  }
  func.func @transform_2(%arg0: i32, %arg1: i32) -> (i32, i32) {
    %c0_i32 = arith.constant 0 : i32
    %c0_i32_0 = arith.constant 0 : i32
    return %c0_i32, %arg0 : i32, i32
  }
  func.func @transform_3(%arg0: i32, %arg1: i32) -> (i32, i32) {
    %c0_i32 = arith.constant 0 : i32
    return %arg1, %arg0 : i32, i32
  }
}

module attributes {stable_mosaic.version = 11 : i64} {
  func.func @_linear_kernel(%arg0: i32, %arg1: i32, %arg2: memref<8x128xf32, #tpu.memory_space<vmem>>, %arg3: memref<128x62xf32, #tpu.memory_space<vmem>>, %arg4: memref<1x62xf32, #tpu.memory_space<vmem>>, %arg5: memref<8x62xf32, #tpu.memory_space<vmem>>) attributes {dimension_semantics = [#tpu.dimension_semantics<parallel>, #tpu.dimension_semantics<parallel>], iteration_bounds = array<i64: 1, 2>, scalar_prefetch = 0 : i64, scratch_operands = 0 : i64, tpu.core_type = #tpu.core_type<tc>, window_params = [{transform_indices = @transform_0, window_bounds = array<i64: 8, 128>}, {transform_indices = @transform_1, window_bounds = array<i64: 128, 62>}, {transform_indices = @transform_2, window_bounds = array<i64: 1, 62>}, {transform_indices = @transform_3, window_bounds = array<i64: 8, 62>}]} {
    %c0 = arith.constant 0 : index
    %c0_0 = arith.constant 0 : index
    %0 = vector.load %arg2[%c0, %c0_0] : memref<8x128xf32, #tpu.memory_space<vmem>>, vector<8x128xf32>
    %c0_1 = arith.constant 0 : index
    %c0_2 = arith.constant 0 : index
    %1 = vector.load %arg3[%c0_1, %c0_2] : memref<128x62xf32, #tpu.memory_space<vmem>>, vector<128x62xf32>
    %cst = arith.constant dense<0.000000e+00> : vector<8x62xf32>
    %2 = tpu.matmul %0, %1, %cst {dimension_numbers = #tpu.dot_dimension_numbers<[1], [0], [0], [1], [0, 0, 1, 1], [], []>} : vector<8x128xf32>, vector<128x62xf32>, vector<8x62xf32> -> vector<8x62xf32>
    %c0_3 = arith.constant 0 : index
    %c0_4 = arith.constant 0 : index
    %3 = vector.load %arg4[%c0_3, %c0_4] : memref<1x62xf32, #tpu.memory_space<vmem>>, vector<1x62xf32>
    %4 = vector.broadcast %3 : vector<1x62xf32> to vector<8x62xf32>
    %5 = arith.addf %2, %4 : vector<8x62xf32>
    %c0_5 = arith.constant 0 : index
    %c0_6 = arith.constant 0 : index
    %6 = vector.load %arg5[%c0_5, %c0_6] : memref<8x62xf32, #tpu.memory_space<vmem>>, vector<8x62xf32>
    tpu.vector_store %arg5[%c0_5, %c0_6], %5 {strides = array<i32>} : memref<8x62xf32, #tpu.memory_space<vmem>>, vector<8x62xf32>,
    return
  }
  func.func @transform_0(%arg0: i32, %arg1: i32) -> (i32, i32) {
    %c0_i32 = arith.constant 0 : i32
    %c0_i32_0 = arith.constant 0 : i32
    return %arg1, %c0_i32 : i32, i32
  }
  func.func @transform_1(%arg0: i32, %arg1: i32) -> (i32, i32) {
    %c0_i32 = arith.constant 0 : i32
    %c0_i32_0 = arith.constant 0 : i32
    return %c0_i32, %arg0 : i32, i32
  }
  func.func @transform_2(%arg0: i32, %arg1: i32) -> (i32, i32) {
    %c0_i32 = arith.constant 0 : i32
    %c0_i32_0 = arith.constant 0 : i32
    return %c0_i32, %arg0 : i32, i32
  }
  func.func @transform_3(%arg0: i32, %arg1: i32) -> (i32, i32) {
    %c0_i32 = arith.constant 0 : i32
    return %arg1, %arg0 : i32, i32
  }
}

</mosaic_0001>

<bundles_post_ra>
// kernel: forward.27
= control target key start
LH: loop header
LB: loop body
LE: loop exit
PB: predicated region body
PF: predicated region fallthrough
CT: control target
= control target key end

     0   :  { %s338_s9 = smov 0   ;;  %s340_s10 = smov 0   ;;  %s357_s0 = inlined_call_operand.vmem [shape: f32[16,128], index: 0, kind: input, shape index: {}]   ;;  %s358_s1 = inlined_call_operand.vmem [shape: f32[8,128], index: 1, kind: input, shape index: {}]   ;;  %s359_s2 = inlined_call_operand.vmem [shape: f32[16,128], index: 2, kind: output, shape index: {}]  }
   0x1   :  { %s319_s11 = smov 0  }
   0x2 LB: > { %s21_s12 = sadd.s32 1, %s317_s10  ;;  %p270_p0 = scmp.ge.s32.totalorder %s321_s11, 1  ;;  %s321_s11 = sphi %s319_s11, %s12_s11   ;;  %s317_s10 = sphi %s340_s10, %s361_s10   ;;  %s313_s9 = sphi %s338_s9, %s360_s9  }
   0x3   : > { %p22_p1 = scmp.ge.s32.totalorder %s21_s12, 2  ;;  %p138_p2 = scmp.lt.s32.totalorder %s321_s11, 3 }
   0x5   : > { %s363_s12 = smov (%p22_p1, %s21_s12), 0  ;;  %p139_p3 = pnand %p270_p0, %p138_p2 }
   0x6   : > { %p165_p4 = scmp.lt.s32.totalorder (!%p139_p3), %s313_s9, 1 }
   0x7   : > { %142 = sbr.rel (%p139_p3) target bundleno = 21 (0x15), region = 28 }
   0xc   : > { %s365_s9 = smov (!%p165_p4, %s313_s9), 1  ;;  %v182_v1 = vld [vmem:[%s358_s1] sm:$0xff] }
   0xd   : > { %s271_s13 = sshll.u32 %s365_s9, 3 }
   0xe   : > { %s168_s16 = scalar_lea.vmem %s357_s0, %s271_s13  ;;  %s178_s21 = scalar_lea.vmem %s359_s2, %s271_s13 }
   0xf   : > { %v180_v0 = vld [vmem:[%s168_s16] sm:$0xff] }
  0x10   : > { %v181_v2 = vmul.f32 11.313708, %v180_v0 }
  0x12   : > { %v183_v3 = vadd.f32 %v182_v1, %v181_v2 }
  0x14   : > { %184 = vst [vmem:[%s178_s21] sm:$0xff] %v183_v3 }
  0x15 PF: > { %s12_s11 = sadd.s32 1, %s321_s11   ;;  %s360_s9 = smov %s317_s10 }
  0x16   : > { %p9_p5 = scmp.ge.s32.totalorder %s12_s11, 4   ;;  %s361_s10 = smov %s363_s12 }
  0x18   :  { %11 = sbr.rel (!%p9_p5) target bundleno = 2 (0x2), region = 61 }

// kernel: forward.39
= control target key start
LH: loop header
LB: loop body
LE: loop exit
PB: predicated region body
PF: predicated region fallthrough
CT: control target
= control target key end

     0   :  { %11 = vsyncpa [#allocation3], 0  ;;  %s847_s0 = inlined_call_operand.vmem [shape: f32[16,128], index: 0, kind: input, shape index: {}]   ;;  %s848_s1 = inlined_call_operand.hbm [shape: f32[128,128], index: 1, kind: input, shape index: {}]   ;;  %s849_s2 = inlined_call_operand.hbm [shape: f32[1,128], index: 2, kind: input, shape index: {}]   ;;  %s850_s3 = inlined_call_operand.vmem [shape: f32[16,128], index: 3, kind: input, shape index: {}]   ;;  %s851_s4 = inlined_call_operand.hbm [shape: f32[1,128], index: 4, kind: input, shape index: {}]   ;;  %s852_s5 = inlined_call_operand.hbm [shape: f32[1,128], index: 5, kind: input, shape index: {}]   ;;  %s853_s6 = inlined_call_operand.vmem [shape: f32[16,128], index: 6, kind: output, shape index: {}]  }
   0x1   :  { %12 = vsyncpa [#allocation5], 0 }
   0x2   :  { %13 = vsyncpa [#allocation8], 0  ;;  %s771_s21 = smov 0  }
   0x3 LB: > { %s212_s24 = sshll.u32 %s849_s2, 4  ;;  %s780_s25 = sadd.s32 4294967295, %s727_s21   ;;  %s727_s21 = sphi %s771_s21, %s19_s21   ;;  %s213_s24 = int_to_ptr.hbm [resolvable:$true] %s212_s24 }
   0x4   : > { %p514_p0 = scmp.ge.s32.totalorder %s727_s21, 1  ;;  %p186_p1 = scmp.lt.s32.totalorder %s727_s21, 3 }
   0x5   : > { %p559_p2 = scmp.eq.s32.totalorder %s780_s25, 0  ;;  %s729_s27 = smov [#allocation4]  }
   0x6   : > { %p785_p3 = pnand %p514_p0, %p186_p1  ;;  %s214_s28 = sshll.u32 %s729_s27, 4  ;;  %s215_s28 = int_to_ptr.vmem [resolvable:$true] %s214_s28 }
   0x7   : > { %s197_s7 = sshll.u32 %s848_s1, 4  ;;  %s730_s9 = smov [#allocation2]   ;;  %s198_s7 = int_to_ptr.hbm [resolvable:$true] %s197_s7 }
   0x8   : > { %p546_p4 = pneg %p785_p3  ;;  %s199_s10 = sshll.u32 %s730_s9, 4  ;;  %s200_s10 = int_to_ptr.vmem [resolvable:$true] %s199_s10 }
   0x9   : > { %s224_s13 = sshll.u32 %s851_s4, 4  ;;  %s731_s14 = smov 128   ;;  %s225_s13 = int_to_ptr.hbm [resolvable:$true] %s224_s13 }
   0xa   : > { %p796_p5 = pnand %p559_p2, %p546_p4  ;;  %s732_s15 = smov 8  }
   0xb   : > { %s733_s16 = smov [#allocation6]   ;;  %s236_s20 = sshll.u32 %s852_s5, 4  ;;  %s237_s20 = int_to_ptr.hbm [resolvable:$true] %s236_s20 }
   0xc   : > { %552 = dma.hbm_to_vmem [thread:$0]  (!%p796_p5), %s213_s24, 16, %s215_s28, [#allocation5]  }
   0xd   : > { %549 = dma.hbm_to_vmem [thread:$0]  (!%p796_p5), %s198_s7, 2048, %s200_s10, [#allocation3], %s731_s14, %s731_s14, %s732_s15  }
   0xe   : > { %s226_s17 = sshll.u32 %s733_s16, 4  ;;  %s734_s22 = smov [#allocation7]   ;;  %s227_s17 = int_to_ptr.vmem [resolvable:$true] %s226_s17 }
   0xf   : > { %555 = dma.hbm_to_vmem [thread:$0]  (!%p796_p5), %s225_s13, 16, %s227_s17, [#allocation5]  }
  0x10   : > { %s238_s23 = sshll.u32 %s734_s22, 4  ;;  %265 = sbr.rel (%p785_p3) target bundleno = 455 (0x1c7), region = 44  ;;  %s239_s23 = int_to_ptr.vmem [resolvable:$true] %s238_s23 }
  0x11   : > { %558 = dma.hbm_to_vmem [thread:$0]  (!%p796_p5), %s237_s20, 16, %s239_s23, [#allocation8]  }
  0x15   : > { %714 = dma.done.wait (%p559_p2), [#allocation3], 2048  }
  0x16   : > { %716 = vsyncadd (%p559_p2), [#allocation3], 4294965248 }
  0x17   : > { %718 = dma.done.wait (%p559_p2), [#allocation5], 32  }
  0x18   : > { %720 = vsyncadd (%p559_p2), [#allocation5], 4294967264 }
  0x19   : > { %722 = dma.done.wait (%p559_p2), [#allocation8], 16  }
  0x1a   : > { %724 = vsyncadd (%p559_p2), [#allocation8], 4294967280  ;;  %v341_v0 = vld [vmem:[#allocation2 + $0x78] sm:$0xff]  ;;  %v340_v1 = vld [vmem:[#allocation2 + $0x70] sm:$0xff]  ;;  %p313_p6 = scmp.lt.s32.totalorder %s780_s25, 1  ;;  %v735_v22 = vmov 128.0  }
  0x1b   : > { %346 = vmatpush.msra.mxu0 %v341_v0  ;;  %v339_v2 = vld [vmem:[#allocation2 + $0x68] sm:$0xff]  ;;  %v338_v3 = vld [vmem:[#allocation2 + $0x60] sm:$0xff]  ;;  %v337_v4 = vld [vmem:[#allocation2 + $0x58] sm:$0xff]  ;;  %585 = vrcp.f32 %v735_v22 }
  0x1c   : > { %v336_v5 = vld [vmem:[#allocation2 + $0x50] sm:$0xff]  ;;  %v335_v6 = vld [vmem:[#allocation2 + $0x48] sm:$0xff]  ;;  %v334_v7 = vld [vmem:[#allocation2 + $0x40] sm:$0xff]  ;;  %s857_s25 = smov (!%p313_p6, %s780_s25), 1 }
  0x1d   : > { %347 = vmatpush.msra.mxu0 %v340_v1  ;;  %v333_v8 = vld [vmem:[#allocation2 + $0x38] sm:$0xff]  ;;  %v332_v9 = vld [vmem:[#allocation2 + $0x30] sm:$0xff]  ;;  %v331_v10 = vld [vmem:[#allocation2 + $0x28] sm:$0xff]  ;;  %s830_s24 = sshll.u32 %s857_s25, 3 }
  0x1e   : > { %v330_v11 = vld [vmem:[#allocation2 + $0x20] sm:$0xff]  ;;  %v329_v12 = vld [vmem:[#allocation2 + $0x18] sm:$0xff]  ;;  %v328_v13 = vld [vmem:[#allocation2 + $0x10] sm:$0xff]  ;;  %s316_s28 = scalar_lea.vmem %s847_s0, %s830_s24  ;;  %s320_s25 = scalar_lea.vmem %s850_s3, %s830_s24 }
  0x1f   : > { %348 = vmatpush.msra.mxu0 %v339_v2  ;;  %v327_v14 = vld [vmem:[#allocation2 + $0x8] sm:$0xff]  ;;  %v326_v15 = vld [vmem:[#allocation2] sm:$0xff]  ;;  %s324_s9 = scalar_lea.vmem %s853_s6, %s830_s24 }
  0x20   : > { %v325_v16 = vld [vmem:[%s316_s28] sm:$0xff] }
  0x21   : > { %349 = vmatpush.msra.mxu0 %v338_v3  ;;  %v582_v17 = vld [vmem:[#allocation4] ss:$0 sm:$0xff]  ;;  %v586_v23 = vpop.eup %585  ;;  %v583_v42 = vld [vmem:[#allocation6] ss:$0 sm:$0xff]  ;;  %v584_v44 = vld [vmem:[#allocation7] ss:$0 sm:$0xff] }
  0x22   : > { %v366_v19 = vld [vmem:[%s320_s25] sm:$0xff]  ;;  %v371_v24 = vmul.f32 128.0, %v586_v23  ;;  %vm375_vm0 = vweird.f32 %v586_v23 }
  0x23   : > { %350 = vmatpush.msra.mxu0 %v337_v4 }
  0x24   : > { %v372_v25 = vsub.f32 1.0, %v371_v24 }
  0x25   : > { %351 = vmatpush.msra.mxu0 %v336_v5 }
  0x26   : > { %v373_v26 = vmul.f32 %v586_v23, %v372_v25 }
  0x27   : > { %352 = vmatpush.msra.mxu0 %v335_v6 }
  0x28   : > { %v374_v27 = vadd.f32 %v586_v23, %v373_v26 }
  0x29   : > { %353 = vmatpush.msra.mxu0 %v334_v7 }
  0x2a   : > { %v376_v28 = vsel %vm375_vm0, %v586_v23, %v374_v27 }
  0x2b   : > { %354 = vmatpush.msra.mxu0 %v333_v8 }
  0x2d   : > { %355 = vmatpush.msra.mxu0 %v332_v9 }
  0x2f   : > { %356 = vmatpush.msra.mxu0 %v331_v10 }
  0x31   : > { %357 = vmatpush.msra.mxu0 %v330_v11 }
  0x33   : > { %358 = vmatpush.msra.mxu0 %v329_v12 }
  0x35   : > { %359 = vmatpush.msra.mxu0 %v328_v13 }
  0x37   : > { %360 = vmatpush.msra.mxu0 %v327_v14 }
  0x39   : > { %361 = vmatpush.msra.mxu0 %v326_v15 }
  0x3a   : > { %362 = vmatmul.f32.vlgmr.msra.gmra.mxu0 %v325_v16 }
  0xb7   : > { %v363_v18 = vpop.f32.mrf.mxu0 }
  0xb8   : > { %v364_v20 = vadd.f32 %v582_v17, %v363_v18 }
  0xba   : > { %v367_v21 = vadd.f32 %v366_v19, %v364_v20 }
  0xbc   : > { %368 = vadd.xlane.f32.xlu0 %v367_v21 }
 0x12f   : > { %v369_v29 = vpop.xlane.xlu0 %368 }
 0x130   : > { %v377_v30 = vmul.f32 %v376_v28, %v369_v29 }
 0x132   : > { %v378_v31 = vsub.f32 %v367_v21, %v377_v30 }
 0x134   : > { %v379_v32 = vmul.f32 %v378_v31, %v378_v31 }
 0x136   : > { %380 = vadd.xlane.f32.xlu0 %v379_v32 }
 0x1a9   : > { %v381_v33 = vpop.xlane.xlu0 %380 }
 0x1aa   : > { %v382_v34 = vmul.f32 %v381_v33, %v376_v28 }
 0x1ac   : > { %v383_v35 = vadd.f32 1e-05, %v382_v34 }
 0x1ae   : > { %587 = vrsqrt.f32 %v383_v35  ;;  %vm390_vm2 = vweird.f32 %v383_v35 }
 0x1b4   : > { %v588_v36 = vpop.eup %587 }
 0x1b5   : > { %v385_v37 = vmul.f32 %v588_v36, %v383_v35  ;;  %vm391_vm1 = vweird.f32 %v588_v36 }
 0x1b6   : > { %vm392_vm3 = vmor %vm390_vm2, %vm391_vm1 }
 0x1b7   : > { %v386_v38 = vmul.f32 %v588_v36, %v385_v37 }
 0x1b9   : > { %v387_v39 = vmul.f32 0.5, %v386_v38 }
 0x1bb   : > { %v388_v40 = vsub.f32 1.5, %v387_v39 }
 0x1bd   : > { %v389_v41 = vmul.f32 %v588_v36, %v388_v40 }
 0x1bf   : > { %v393_v43 = vsel %vm392_vm3, %v588_v36, %v389_v41 }
 0x1c0   : > { %v394_v45 = vmul.f32 %v393_v43, %v378_v31 }
 0x1c2   : > { %v399_v46 = vmul.f32 %v583_v42, %v394_v45 }
 0x1c4   : > { %v404_v47 = vadd.f32 %v584_v44, %v399_v46 }
 0x1c6   : > { %405 = vst [vmem:[%s324_s9] sm:$0xff] %v404_v47 }
 0x1c7 PF: > { %s19_s21 = sadd.s32 1, %s727_s21  }
 0x1c8   : > { %p16_p7 = scmp.ge.s32.totalorder %s19_s21, 4  }
 0x1ca   :  { %18 = sbr.rel (!%p16_p7) target bundleno = 3 (0x3), region = 94 }
 0x1cf   :  { %425 = vsyncpa [#allocation3], 1 }
 0x1d0   :  { %427 = vsyncpa [#allocation3 + $0x1], 1 }
 0x1d1   :  { %428 = vsyncpa [#allocation5], 1 }
 0x1d2   :  { %429 = vsyncpa [#allocation8], 1 }

// kernel: forward.37
= control target key start
LH: loop header
LB: loop body
LE: loop exit
PB: predicated region body
PF: predicated region fallthrough
CT: control target
= control target key end

     0   :  { %8 = vsyncpa [#allocation3], 0  ;;  %s714_s0 = inlined_call_operand.vmem [shape: f32[16,128], index: 0, kind: input, shape index: {}]   ;;  %s715_s1 = inlined_call_operand.hbm [shape: f32[128,384], index: 1, kind: input, shape index: {}]   ;;  %s716_s2 = inlined_call_operand.hbm [shape: f32[1,384], index: 2, kind: input, shape index: {}]   ;;  %s717_s3 = inlined_call_operand.vmem [shape: f32[16,384], index: 3, kind: output, shape index: {}]  }
   0x1   :  { %9 = vsyncpa [#allocation5], 0  ;;  %s644_s12 = smov 0   ;;  %s646_s13 = smov 0  }
   0x2   :  { %s648_s14 = smov 0  }
   0x3 LB: > { %s467_s15 = sadd.s32 4294967295, %s618_s14   ;;  %s24_s16 = sadd.s32 1, %s614_s13  ;;  %s618_s14 = sphi %s648_s14, %s15_s14   ;;  %s614_s13 = sphi %s646_s13, %s721_s13   ;;  %s610_s12 = sphi %s644_s12, %s720_s12  }
   0x4   : > { %p25_p0 = scmp.ge.s32.totalorder %s24_s16, 2  ;;  %p469_p1 = scmp.ge.s32.totalorder %s618_s14, 1 }
   0x5   : > { %p138_p2 = scmp.lt.s32.totalorder %s618_s14, 3  ;;  %p669_p4 = scmp.eq.s32.totalorder %s467_s15, 0 }
   0x6   : > { %s723_s16 = smov (%p25_p0, %s24_s16), 0  ;;  %s152_s21 = sshll.u32 %s715_s1, 4  ;;  %s153_s21 = int_to_ptr.hbm [resolvable:$true] %s152_s21 }
   0x7   : > { %p665_p3 = pnand %p469_p1, %p138_p2  ;;  %s620_s22 = smov [#allocation2]  }
   0x8   : > { %s154_s23 = sshll.u32 %s620_s22, 4  ;;  %s169_s26 = sshll.u32 %s716_s2, 4  ;;  %s155_s23 = int_to_ptr.vmem [resolvable:$true] %s154_s23  ;;  %s170_s26 = int_to_ptr.hbm [resolvable:$true] %s169_s26 }
   0x9   : > { %p489_p5 = pneg %p665_p3  ;;  %s621_s27 = smov 384  }
   0xa   : > { %s622_s28 = smov 24   ;;  %s623_s29 = smov [#allocation4]  }
   0xb   : > { %p490_p6 = pnand %p669_p4, %p489_p5  ;;  %s171_s30 = sshll.u32 %s623_s29, 4  ;;  %s172_s30 = int_to_ptr.vmem [resolvable:$true] %s171_s30 }
   0xc   : > { %191 = sbr.rel (%p665_p3) target bundleno = 187 (0xbb), region = 32 }
   0xd   : > { %492 = dma.hbm_to_vmem [thread:$0]  (!%p490_p6), %s153_s21, 6144, %s155_s23, [#allocation3], %s621_s27, %s621_s27, %s622_s28  }
   0xe   : > { %495 = dma.hbm_to_vmem [thread:$0]  (!%p490_p6), %s170_s26, 48, %s172_s30, [#allocation5]  }
  0x11   : > { %601 = dma.done.wait (%p669_p4), [#allocation3], 6144  }
  0x12   : > { %603 = vsyncadd (%p669_p4), [#allocation3], 4294961152 }
  0x13   : > { %605 = dma.done.wait (%p669_p4), [#allocation5], 48  }
  0x14   : > { %607 = vsyncadd (%p669_p4), [#allocation5], 4294967248  ;;  %v288_v0 = vld [vmem:[#allocation2 + $0x178] sm:$0xff]  ;;  %v285_v1 = vld [vmem:[#allocation2 + $0x160] sm:$0xff]  ;;  %p224_p7 = scmp.lt.s32.totalorder %s610_s12, 1 }
  0x15   : > { %337 = vmatpush.msra.mxu2 %v288_v0  ;;  %v286_v2 = vld [vmem:[#allocation2 + $0x168] sm:$0xff]  ;;  %v287_v3 = vld [vmem:[#allocation2 + $0x170] sm:$0xff]  ;;  %v284_v6 = vld [vmem:[#allocation2 + $0x158] sm:$0xff] }
  0x16   : > { %v282_v4 = vld [vmem:[#allocation2 + $0x148] sm:$0xff]  ;;  %297 = vmatpush.msra.mxu0 %v286_v2  ;;  %317 = vmatpush.msra.mxu1 %v287_v3  ;;  %v283_v5 = vld [vmem:[#allocation2 + $0x150] sm:$0xff]  ;;  %v280_v7 = vld [vmem:[#allocation2 + $0x138] sm:$0xff]  ;;  %s725_s12 = smov (!%p224_p7, %s610_s12), 1 }
  0x17   : > { %338 = vmatpush.msra.mxu2 %v285_v1  ;;  %v281_v8 = vld [vmem:[#allocation2 + $0x140] sm:$0xff]  ;;  %v279_v9 = vld [vmem:[#allocation2 + $0x130] sm:$0xff]  ;;  %v278_v11 = vld [vmem:[#allocation2 + $0x128] sm:$0xff]  ;;  %s476_s4 = sshll.u32 %s725_s12, 3  ;;  %s480_s8 = smul.u32 24, %s725_s12 }
  0x18   : > { %298 = vmatpush.msra.mxu0 %v283_v5  ;;  %318 = vmatpush.msra.mxu1 %v284_v6  ;;  %v277_v10 = vld [vmem:[#allocation2 + $0x120] sm:$0xff]  ;;  %v276_v12 = vld [vmem:[#allocation2 + $0x118] sm:$0xff]  ;;  %v274_v13 = vld [vmem:[#allocation2 + $0x108] sm:$0xff]  ;;  %s227_s7 = scalar_lea.vmem %s714_s0, %s476_s4 }
  0x19   : > { %339 = vmatpush.msra.mxu2 %v282_v4  ;;  %v275_v14 = vld [vmem:[#allocation2 + $0x110] sm:$0xff]  ;;  %v273_v15 = vld [vmem:[#allocation2 + $0x100] sm:$0xff]  ;;  %v272_v17 = vld [vmem:[#allocation2 + $0xf8] sm:$0xff]  ;;  %s238_s11 = scalar_lea.vmem %s717_s3, %s480_s8 }
  0x1a   : > { %299 = vmatpush.msra.mxu0 %v280_v7  ;;  %319 = vmatpush.msra.mxu1 %v281_v8  ;;  %v271_v16 = vld [vmem:[#allocation2 + $0xf0] sm:$0xff]  ;;  %v270_v18 = vld [vmem:[#allocation2 + $0xe8] sm:$0xff]  ;;  %v268_v19 = vld [vmem:[#allocation2 + $0xd8] sm:$0xff] }
  0x1b   : > { %340 = vmatpush.msra.mxu2 %v279_v9  ;;  %v269_v20 = vld [vmem:[#allocation2 + $0xe0] sm:$0xff]  ;;  %v267_v21 = vld [vmem:[#allocation2 + $0xd0] sm:$0xff]  ;;  %v266_v23 = vld [vmem:[#allocation2 + $0xc8] sm:$0xff] }
  0x1c   : > { %300 = vmatpush.msra.mxu0 %v277_v10  ;;  %320 = vmatpush.msra.mxu1 %v278_v11  ;;  %v265_v22 = vld [vmem:[#allocation2 + $0xc0] sm:$0xff]  ;;  %v264_v24 = vld [vmem:[#allocation2 + $0xb8] sm:$0xff]  ;;  %v262_v25 = vld [vmem:[#allocation2 + $0xa8] sm:$0xff] }
  0x1d   : > { %341 = vmatpush.msra.mxu2 %v276_v12  ;;  %v263_v26 = vld [vmem:[#allocation2 + $0xb0] sm:$0xff]  ;;  %v261_v27 = vld [vmem:[#allocation2 + $0xa0] sm:$0xff]  ;;  %v260_v29 = vld [vmem:[#allocation2 + $0x98] sm:$0xff] }
  0x1e   : > { %301 = vmatpush.msra.mxu0 %v274_v13  ;;  %321 = vmatpush.msra.mxu1 %v275_v14  ;;  %v259_v28 = vld [vmem:[#allocation2 + $0x90] sm:$0xff]  ;;  %v258_v30 = vld [vmem:[#allocation2 + $0x88] sm:$0xff]  ;;  %v256_v31 = vld [vmem:[#allocation2 + $0x78] sm:$0xff] }
  0x1f   : > { %342 = vmatpush.msra.mxu2 %v273_v15  ;;  %v257_v32 = vld [vmem:[#allocation2 + $0x80] sm:$0xff]  ;;  %v255_v33 = vld [vmem:[#allocation2 + $0x70] sm:$0xff]  ;;  %v254_v35 = vld [vmem:[#allocation2 + $0x68] sm:$0xff] }
  0x20   : > { %302 = vmatpush.msra.mxu0 %v271_v16  ;;  %322 = vmatpush.msra.mxu1 %v272_v17  ;;  %v253_v34 = vld [vmem:[#allocation2 + $0x60] sm:$0xff]  ;;  %v252_v36 = vld [vmem:[#allocation2 + $0x58] sm:$0xff]  ;;  %v250_v37 = vld [vmem:[#allocation2 + $0x48] sm:$0xff] }
  0x21   : > { %343 = vmatpush.msra.mxu2 %v270_v18  ;;  %v251_v38 = vld [vmem:[#allocation2 + $0x50] sm:$0xff]  ;;  %v249_v39 = vld [vmem:[#allocation2 + $0x40] sm:$0xff]  ;;  %v248_v41 = vld [vmem:[#allocation2 + $0x38] sm:$0xff] }
  0x22   : > { %303 = vmatpush.msra.mxu0 %v268_v19  ;;  %323 = vmatpush.msra.mxu1 %v269_v20  ;;  %v247_v40 = vld [vmem:[#allocation2 + $0x30] sm:$0xff]  ;;  %v246_v42 = vld [vmem:[#allocation2 + $0x28] sm:$0xff]  ;;  %v244_v43 = vld [vmem:[#allocation2 + $0x18] sm:$0xff] }
  0x23   : > { %344 = vmatpush.msra.mxu2 %v267_v21  ;;  %v245_v44 = vld [vmem:[#allocation2 + $0x20] sm:$0xff]  ;;  %v243_v45 = vld [vmem:[#allocation2 + $0x10] sm:$0xff]  ;;  %v242_v48 = vld [vmem:[#allocation2 + $0x8] sm:$0xff] }
  0x24   : > { %304 = vmatpush.msra.mxu0 %v265_v22  ;;  %324 = vmatpush.msra.mxu1 %v266_v23  ;;  %v240_v46 = vld [vmem:[%s227_s7] sm:$0xff] }
  0x25   : > { %345 = vmatpush.msra.mxu2 %v264_v24  ;;  %v241_v47 = vld [vmem:[#allocation2] sm:$0xff] }
  0x26   : > { %305 = vmatpush.msra.mxu0 %v262_v25  ;;  %325 = vmatpush.msra.mxu1 %v263_v26  ;;  %v289_v49 = vld [vmem:[#allocation4] sm:$0x7] }
  0x27   : > { %346 = vmatpush.msra.mxu2 %v261_v27  ;;  %v291_v50 = vperm.slane %v289_v49, 0  ;;  %v292_v51 = vperm.slane %v289_v49, 1  ;;  %v293_v56 = vperm.slane %v289_v49, 2 }
  0x28   : > { %306 = vmatpush.msra.mxu0 %v259_v28  ;;  %326 = vmatpush.msra.mxu1 %v260_v29 }
  0x29   : > { %347 = vmatpush.msra.mxu2 %v258_v30 }
  0x2a   : > { %307 = vmatpush.msra.mxu0 %v256_v31  ;;  %327 = vmatpush.msra.mxu1 %v257_v32 }
  0x2b   : > { %348 = vmatpush.msra.mxu2 %v255_v33 }
  0x2c   : > { %308 = vmatpush.msra.mxu0 %v253_v34  ;;  %328 = vmatpush.msra.mxu1 %v254_v35 }
  0x2d   : > { %349 = vmatpush.msra.mxu2 %v252_v36 }
  0x2e   : > { %309 = vmatpush.msra.mxu0 %v250_v37  ;;  %329 = vmatpush.msra.mxu1 %v251_v38 }
  0x2f   : > { %350 = vmatpush.msra.mxu2 %v249_v39 }
  0x30   : > { %310 = vmatpush.msra.mxu0 %v247_v40  ;;  %330 = vmatpush.msra.mxu1 %v248_v41 }
  0x31   : > { %351 = vmatpush.msra.mxu2 %v246_v42 }
  0x32   : > { %311 = vmatpush.msra.mxu0 %v244_v43  ;;  %331 = vmatpush.msra.mxu1 %v245_v44 }
  0x33   : > { %352 = vmatpush.msra.mxu2 %v243_v45 }
  0x34   : > { %353 = vmatmul.f32.vlgmr.msra.gmra.mxu2 %v240_v46  ;;  %312 = vmatpush.msra.mxu0 %v241_v47 }
  0x35   : > { %332 = vmatpush.msra.mxu1 %v242_v48  ;;  %313 = vmatmul.f32.vlgmr.msra.gmra.mxu0 %v240_v46 }
  0x36   : > { %333 = vmatmul.f32.vlgmr.msra.gmra.mxu1 %v240_v46 }
  0xb2   : > { %v314_v52 = vpop.f32.mrf.mxu0 }
  0xb3   : > { %v315_v53 = vadd.f32 %v314_v52, %v291_v50  ;;  %v334_v54 = vpop.f32.mrf.mxu1 }
  0xb4   : > { %v335_v55 = vadd.f32 %v334_v54, %v292_v51 }
  0xb5   : > { %357 = vst [vmem:[%s238_s11] sm:$0xff] %v315_v53 }
  0xb6   : > { %358 = vst [vmem:[%s238_s11 + $0x8] sm:$0xff] %v335_v55 }
  0xb7   : > { %v354_v57 = vpop.f32.mrf.mxu2 }
  0xb8   : > { %v355_v58 = vadd.f32 %v354_v57, %v293_v56 }
  0xba   : > { %359 = vst [vmem:[%s238_s11 + $0x10] sm:$0xff] %v355_v58 }
  0xbb PF: > { %s15_s14 = sadd.s32 1, %s618_s14   ;;  %s720_s12 = smov %s614_s13 }
  0xbc   : > { %p12_p8 = scmp.ge.s32.totalorder %s15_s14, 4   ;;  %s721_s13 = smov %s723_s16 }
  0xbe   :  { %14 = sbr.rel (!%p12_p8) target bundleno = 3 (0x3), region = 73 }
  0xc3   :  { %390 = vsyncpa [#allocation3], 1 }
  0xc4   :  { %392 = vsyncpa [#allocation3 + $0x1], 1 }
  0xc5   :  { %393 = vsyncpa [#allocation5], 1 }

// kernel: forward.38
= control target key start
LH: loop header
LB: loop body
LE: loop exit
PB: predicated region body
PF: predicated region fallthrough
CT: control target
= control target key end

     0   :  { %s887_s9 = smov 0   ;;  %s1027_s0 = inlined_call_operand.vmem [shape: f32[2,8,384], index: 0, kind: input, shape index: {}]   ;;  %s1028_s1 = inlined_call_operand.vmem [shape: f32[8,8], index: 1, kind: input, shape index: {}]   ;;  %s1029_s2 = inlined_call_operand.vmem [shape: f32[2,8,128], index: 2, kind: output, shape index: {}]  }
   0x1 LB: > { %s776_s10 = sadd.s32 4294967295, %s863_s9   ;;  %p780_p0 = scmp.ge.s32.totalorder %s863_s9, 1  ;;  %s863_s9 = sphi %s887_s9, %s12_s9  }
   0x2   : > { %p112_p1 = scmp.lt.s32.totalorder %s863_s9, 3 }
   0x4   : > { %p113_p2 = pnand %p780_p0, %p112_p1 }
   0x5   : > { %p133_p3 = scmp.lt.s32.totalorder (!%p113_p2), %s776_s10, 1  ;;  %s865_s15 = smov (!%p113_p2), 112  }
   0x6   : > { %116 = sbr.rel (%p113_p2) target bundleno = 1211 (0x4bb), region = 28  ;;  %s866_s16 = smov (!%p113_p2), 96  }
   0x7   : > { %s867_s17 = smov (!%p113_p2), 80   ;;  %s868_s18 = smov (!%p113_p2), 48  }
   0x8   : > { %s869_s21 = smov (!%p113_p2), 64   ;;  %s870_s22 = smov (!%p113_p2), 32  }
   0x9   : > { %s871_s23 = smov (!%p113_p2), 16  }
   0xb   : > { %s1031_s10 = smov (!%p133_p3, %s776_s10), 1  ;;  %vm146_vm0 = vcmask 130048   ;;  %v920_v7 = vld [vmem:[%s1028_s1] sm:$0xff]  ;;  %vm175_vm1 = vcmask 64512   ;;  %vm685_vm2 = vcmask 261248   ;;  %vm691_vm3 = vcmask 392448  }
   0xc   : > { %s809_s11 = smul.u32 24, %s1031_s10  ;;  %s782_s24 = sshll.u32 %s1031_s10, 3  ;;  %vm697_vm4 = vcmask 523648   ;;  %vm703_vm5 = vcmask 654848   ;;  %vm709_vm6 = vcmask 786048   ;;  %vm715_vm7 = vcmask 917248  }
   0xd   : > { %s969_s27 = scalar_lea.vmem %s1029_s2, %s782_s24  ;;  %vm721_vm8 = vcmask 1048448  }
   0xe   : > { %s901_s14 = scalar_lea.vmem %s1027_s0, %s809_s11 }
   0xf   : > { %v143_v0 = vld [vmem:[%s901_s14 + $0x8] sm:$0xff]  ;;  %v142_v1 = vld [vmem:[%s901_s14] sm:$0xff]  ;;  %v936_v20 = vld [vmem:[%s901_s14 + $0x10] sm:$0xff] }
  0x10   : > { %783 = vmatpush.xpose.msk.msra.mxu0 %vm146_vm0, %v143_v0  ;;  %212 = vrot.lane.b32.xlu1 %v143_v0, %s865_s15 }
  0x11   : > { %280 = vrot.lane.b32.xlu2 %v143_v0, %s866_s16  ;;  %205 = vmatpush.msra.mxu1 %v936_v20 }
  0x13   : > { %784 = vmatmul.msk.f32.vlgmr.msra.gmra.mxu0 %vm146_vm0, %v142_v1 }
  0x18   : > { %210 = vrot.lane.b32.xlu1 %v142_v1, %s865_s15 }
  0x19   : > { %347 = vrot.lane.b32.xlu2 %v143_v0, %s867_s17 }
  0x20   : > { %345 = vrot.lane.b32.xlu1 %v142_v1, %s867_s17 }
  0x21   : > { %414 = vrot.lane.b32.xlu2 %v143_v0, %s869_s21 }
  0x28   : > { %481 = vrot.lane.b32.xlu1 %v143_v0, %s868_s18 }
  0x29   : > { %412 = vrot.lane.b32.xlu2 %v142_v1, %s869_s21 }
  0x30   : > { %479 = vrot.lane.b32.xlu1 %v142_v1, %s868_s18 }
  0x31   : > { %548 = vrot.lane.b32.xlu2 %v143_v0, %s870_s22 }
  0x38   : > { %546 = vrot.lane.b32.xlu1 %v142_v1, %s870_s22 }
  0x39   : > { %613 = vrot.lane.b32.xlu2 %v142_v1, %s871_s23 }
  0x6b   : > { %v281_v2 = vpop.permute.xlu2 %280 }
  0x6c   : > { %789 = vmatpush.xpose.msk.msrb.mxu1 %vm146_vm0, %v281_v2 }
  0x73   : > { %v348_v3 = vpop.permute.xlu2 %347 }
  0x74   : > { %792 = vmatpush.xpose.msk.msrb.mxu0 %vm146_vm0, %v348_v3 }
  0x7b   : > { %v415_v29 = vpop.permute.xlu2 %414 }
  0x82   : > { %v213_v4 = vpop.permute.xlu1 %212 }
  0x83   : > { %786 = vmatpush.xpose.msk.msra.mxu2 %vm146_vm0, %v213_v4  ;;  %v413_v35 = vpop.permute.xlu2 %412 }
  0x8a   : > { %v211_v5 = vpop.permute.xlu1 %210 }
  0x8b   : > { %787 = vmatmul.msk.f32.vlgmr.msra.gmra.mxu2 %vm146_vm0, %v211_v5  ;;  %v549_v38 = vpop.permute.xlu2 %548 }
  0x90   : > { %v170_v6 = vpop.f32.mrf.mxu0 }
  0x91   : > { %v173_v8 = vmul.f32 0.25, %v170_v6 }
  0x92   : > { %v346_v9 = vpop.permute.xlu1 %345 }
  0x93   : > { %v174_v10 = vadd.f32 %v173_v8, %v920_v7  ;;  %793 = vmatmul.msk.f32.vlgmr.msrb.gmra.mxu0 %vm146_vm0, %v346_v9  ;;  %v614_v40 = vpop.permute.xlu2 %613 }
  0x95   : > { %v176_v11 = vsel %vm175_vm1, %v174_v10, -inf }
  0x96   : > { %177 = vmax.xlane.f32.xlu0 %v176_v11 }
  0x9a   : > { %v482_v12 = vpop.permute.xlu1 %481 }
  0x9b   : > { %798 = vmatpush.xpose.msk.msra.mxu0 %vm146_vm0, %v482_v12 }
  0xa2   : > { %v480_v13 = vpop.permute.xlu1 %479 }
  0xa3   : > { %799 = vmatmul.msk.f32.vlgmr.msra.gmra.mxu0 %vm146_vm0, %v480_v13 }
  0xaa   : > { %278 = vrot.lane.b32.xlu0 %v142_v1, %s866_s16  ;;  %v547_v51 = vpop.permute.xlu1 %546 }
 0x109   : > { %v178_v14 = vpop.xlane.xlu0 %177 }
 0x10a   : > { %v179_v15 = vsub.f32 %v174_v10, %v178_v14 }
 0x10c   : > { %v180_v16 = vmul.f32 1.442695, %v179_v15 }
 0x10e   : > { %825 = vpow2.f32 %v180_v16  ;;  %v235_v24 = vpop.f32.mrf.mxu2 }
 0x10f   : > { %v238_v25 = vmul.f32 0.25, %v235_v24 }
 0x110   : > { %v370_v19 = vpop.f32.mrf.mxu0 }
 0x111   : > { %v373_v21 = vmul.f32 0.25, %v370_v19  ;;  %v239_v26 = vadd.f32 %v238_v25, %v920_v7 }
 0x113   : > { %v374_v22 = vadd.f32 %v373_v21, %v920_v7  ;;  %v240_v27 = vsel %vm175_vm1, %v239_v26, -inf }
 0x114   : > { %v826_v17 = vpop.eup %825 }
 0x115   : > { %v182_v18 = vsel %vm175_vm1, %v826_v17, 0.0  ;;  %v375_v23 = vsel %vm175_vm1, %v374_v22, -inf }
 0x116   : > { %183 = vadd.xlane.f32.xlu0 %v182_v18  ;;  %376 = vmax.xlane.f32.xlu2 %v375_v23 }
 0x11c   : > { %v279_v31 = vpop.permute.xlu0 %278 }
 0x120   : > { %v504_v28 = vpop.f32.mrf.mxu0 }
 0x121   : > { %v507_v30 = vmul.f32 0.25, %v504_v28 }
 0x123   : > { %v508_v32 = vadd.f32 %v507_v30, %v920_v7 }
 0x125   : > { %v509_v33 = vsel %vm175_vm1, %v508_v32, -inf }
 0x126   : > { %510 = vmax.xlane.f32.xlu2 %v509_v33 }
 0x12a   : > { %615 = vrot.lane.b32.xlu0 %v143_v0, %s871_s23 }
 0x154   : > { %241 = vmax.xlane.f32.xlu0 %v240_v27 }
 0x189   : > { %v184_v34 = vpop.xlane.xlu0 %183  ;;  %v377_v41 = vpop.xlane.xlu2 %376 }
 0x18a   : > { %827 = vrcp.f32 %v184_v34  ;;  %v378_v44 = vsub.f32 %v374_v22, %v377_v41 }
 0x18c   : > { %v379_v46 = vmul.f32 1.442695, %v378_v44 }
 0x190   : > { %v828_v36 = vpop.eup %827 }
 0x191   : > { %v186_v37 = vmul.f32 %v828_v36, %v826_v17 }
 0x193   : > { %785 = vmatmul.msk.f32.vlgmr.msra.gmra.mxu1 %vm175_vm1, %v186_v37 }
 0x194   : > { %795 = vmatpush.xpose.msk.msra.mxu1 %vm146_vm0, %v415_v29 }
 0x199   : > { %v511_v52 = vpop.xlane.xlu2 %510 }
 0x19a   : > { %v512_v54 = vsub.f32 %v508_v32, %v511_v52 }
 0x19b   : > { %790 = vmatmul.msk.f32.vlgmr.msrb.gmra.mxu1 %vm146_vm0, %v279_v31 }
 0x19c   : > { %801 = vmatpush.xpose.msk.msrb.mxu1 %vm146_vm0, %v549_v38  ;;  %v616_v39 = vpop.permute.xlu0 %615  ;;  %v513_v55 = vmul.f32 1.442695, %v512_v54 }
 0x19d   : > { %804 = vmatpush.xpose.msk.msrb.mxu0 %vm146_vm0, %v616_v39 }
 0x1a0   : > { %805 = vmatmul.msk.f32.vlgmr.msrb.gmra.mxu0 %vm146_vm0, %v614_v40 }
 0x1a3   : > { %796 = vmatmul.msk.f32.vlgmr.msra.gmra.mxu1 %vm146_vm0, %v413_v35 }
 0x1ab   : > { %802 = vmatmul.msk.f32.vlgmr.msrb.gmra.mxu1 %vm146_vm0, %v547_v51 }
 0x1c7   : > { %v242_v42 = vpop.xlane.xlu0 %241 }
 0x1c8   : > { %v243_v43 = vsub.f32 %v239_v26, %v242_v42 }
 0x1ca   : > { %v244_v45 = vmul.f32 1.442695, %v243_v43 }
 0x1cc   : > { %829 = vpow2.f32 %v244_v45 }
 0x1cd   : > { %831 = vpow2.f32 %v379_v46 }
 0x1ce   : > { %833 = vpow2.f32 %v513_v55 }
 0x1d2   : > { %v953_v47 = vpop.eup %829 }
 0x1d3   : > { %v246_v48 = vsel %vm175_vm1, %v953_v47, 0.0  ;;  %v957_v49 = vpop.eup %831 }
 0x1d4   : > { %247 = vadd.xlane.f32.xlu2 %v246_v48  ;;  %v381_v50 = vsel %vm175_vm1, %v957_v49, 0.0  ;;  %v834_v60 = vpop.eup %833 }
 0x1d5   : > { %v515_v1 = vsel %vm175_vm1, %v834_v60, 0.0 }
 0x1dc   : > { %382 = vadd.xlane.f32.xlu2 %v381_v50 }
 0x1f4   : > { %319 = vrot.lane.b32.xlu2 %v936_v20, %s866_s16 }
 0x1fc   : > { %520 = vrot.lane.b32.xlu2 %v936_v20, %s868_s18 }
 0x210   : > { %v207_v53 = vpop.f32.mrf.mxu1 }
 0x211   : > { %680 = vst.msk [vmem:[%s969_s27] sm:$0xff] %vm146_vm0, %v207_v53 }
 0x218   : > { %v303_v56 = vpop.f32.mrf.mxu1 }
 0x219   : > { %v306_v57 = vmul.f32 0.25, %v303_v56 }
 0x21b   : > { %v307_v58 = vadd.f32 %v306_v57, %v920_v7 }
 0x21d   : > { %v308_v59 = vsel %vm175_vm1, %v307_v58, -inf  ;;  %v638_v62 = vpop.f32.mrf.mxu0 }
 0x21e   : > { %309 = vmax.xlane.f32.xlu1 %v308_v59  ;;  %v641_v2 = vmul.f32 0.25, %v638_v62 }
 0x220   : > { %v437_v61 = vpop.f32.mrf.mxu1  ;;  %v642_v4 = vadd.f32 %v641_v2, %v920_v7 }
 0x221   : > { %v440_v63 = vmul.f32 0.25, %v437_v61 }
 0x222   : > { %v643_v5 = vsel %vm175_vm1, %v642_v4, -inf }
 0x223   : > { %v441_v0 = vadd.f32 %v440_v63, %v920_v7 }
 0x225   : > { %v442_v3 = vsel %vm175_vm1, %v441_v0, -inf }
 0x226   : > { %443 = vmax.xlane.f32.xlu0 %v442_v3  ;;  %516 = vadd.xlane.f32.xlu1 %v515_v1 }
 0x228   : > { %v571_v12 = vpop.f32.mrf.mxu1 }
 0x229   : > { %v574_v15 = vmul.f32 0.25, %v571_v12 }
 0x22b   : > { %v575_v19 = vadd.f32 %v574_v15, %v920_v7 }
 0x22d   : > { %v576_v24 = vsel %vm175_vm1, %v575_v19, -inf }
 0x22e   : > { %644 = vmax.xlane.f32.xlu0 %v643_v5 }
 0x242   : > { %252 = vrot.lane.b32.xlu0 %v936_v20, %s865_s15 }
 0x247   : > { %v248_v8 = vpop.xlane.xlu2 %247 }
 0x24a   : > { %386 = vrot.lane.b32.xlu0 %v936_v20, %s867_s17 }
 0x24f   : > { %v383_v14 = vpop.xlane.xlu2 %382 }
 0x252   : > { %453 = vrot.lane.b32.xlu0 %v936_v20, %s869_s21 }
 0x257   : > { %v320_v23 = vpop.permute.xlu2 %319 }
 0x25a   : > { %587 = vrot.lane.b32.xlu0 %v936_v20, %s870_s22 }
 0x25f   : > { %v521_v33 = vpop.permute.xlu2 %520 }
 0x291   : > { %v310_v13 = vpop.xlane.xlu1 %309 }
 0x292   : > { %v311_v17 = vsub.f32 %v307_v58, %v310_v13 }
 0x294   : > { %v312_v21 = vmul.f32 1.442695, %v311_v17 }
 0x299   : > { %v444_v6 = vpop.xlane.xlu0 %443  ;;  %v517_v28 = vpop.xlane.xlu1 %516 }
 0x29a   : > { %v445_v25 = vsub.f32 %v441_v0, %v444_v6 }
 0x29c   : > { %v446_v29 = vmul.f32 1.442695, %v445_v25 }
 0x2a1   : > { %v645_v9 = vpop.xlane.xlu0 %644 }
 0x2a2   : > { %v646_v10 = vsub.f32 %v642_v4, %v645_v9 }
 0x2a4   : > { %v647_v11 = vmul.f32 1.442695, %v646_v10 }
 0x2a6   : > { %835 = vpow2.f32 %v647_v11 }
 0x2a7   : > { %837 = vrcp.f32 %v248_v8 }
 0x2a8   : > { %839 = vrcp.f32 %v383_v14 }
 0x2a9   : > { %841 = vpow2.f32 %v312_v21 }
 0x2aa   : > { %843 = vrcp.f32 %v517_v28 }
 0x2ab   : > { %845 = vpow2.f32 %v446_v29 }
 0x2ac   : > { %v989_v16 = vpop.eup %835 }
 0x2ad   : > { %v649_v18 = vsel %vm175_vm1, %v989_v16, 0.0  ;;  %v838_v22 = vpop.eup %837 }
 0x2ae   : > { %650 = vadd.xlane.f32.xlu1 %v649_v18  ;;  %v250_v27 = vmul.f32 %v838_v22, %v953_v47  ;;  %v840_v30 = vpop.eup %839 }
 0x2af   : > { %v842_v7 = vpop.eup %841  ;;  %v385_v32 = vmul.f32 %v840_v30, %v957_v49 }
 0x2b0   : > { %v314_v34 = vsel %vm175_vm1, %v842_v7, 0.0  ;;  %v844_v35 = vpop.eup %843 }
 0x2b1   : > { %v846_v36 = vpop.eup %845  ;;  %v519_v37 = vmul.f32 %v844_v35, %v834_v60 }
 0x2b2   : > { %v448_v38 = vsel %vm175_vm1, %v846_v36, 0.0 }
 0x2b4   : > { %v253_v26 = vpop.permute.xlu0 %252 }
 0x2b5   : > { %273 = vmatpush.msra.mxu3 %v253_v26 }
 0x2b6   : > { %577 = vmax.xlane.f32.xlu1 %v576_v24  ;;  %788 = vmatmul.msk.f32.vlgmr.msra.gmra.mxu3 %vm175_vm1, %v250_v27 }
 0x2b7   : > { %340 = vmatpush.msrb.mxu3 %v320_v23 }
 0x2bc   : > { %v387_v31 = vpop.permute.xlu0 %386 }
 0x2bd   : > { %407 = vmatpush.msrb.mxu2 %v387_v31 }
 0x2be   : > { %315 = vadd.xlane.f32.xlu1 %v314_v34  ;;  %794 = vmatmul.msk.f32.vlgmr.msrb.gmra.mxu2 %vm175_vm1, %v385_v32 }
 0x2bf   : > { %541 = vmatpush.msra.mxu2 %v521_v33 }
 0x2c4   : > { %v454_v40 = vpop.permute.xlu0 %453 }
 0x2c5   : > { %474 = vmatpush.msra.mxu3 %v454_v40 }
 0x2c6   : > { %449 = vadd.xlane.f32.xlu1 %v448_v38  ;;  %800 = vmatmul.msk.f32.vlgmr.msra.gmra.mxu2 %vm175_vm1, %v519_v37 }
 0x2cc   : > { %v588_v55 = vpop.permute.xlu0 %587 }
 0x321   : > { %v651_v39 = vpop.xlane.xlu1 %650 }
 0x329   : > { %v578_v41 = vpop.xlane.xlu1 %577 }
 0x32a   : > { %v579_v42 = vsub.f32 %v575_v19, %v578_v41 }
 0x32c   : > { %v580_v43 = vmul.f32 1.442695, %v579_v42 }
 0x32e   : > { %847 = vpow2.f32 %v580_v43 }
 0x331   : > { %v316_v44 = vpop.xlane.xlu1 %315 }
 0x332   : > { %849 = vrcp.f32 %v316_v44 }
 0x334   : > { %v848_v45 = vpop.eup %847 }
 0x335   : > { %v582_v46 = vsel %vm175_vm1, %v848_v45, 0.0 }
 0x336   : > { %583 = vadd.xlane.f32.xlu1 %v582_v46 }
 0x338   : > { %v850_v47 = vpop.eup %849 }
 0x339   : > { %v450_v48 = vpop.xlane.xlu1 %449  ;;  %v275_v49 = vpop.f32.mrf.mxu3  ;;  %v318_v50 = vmul.f32 %v850_v47, %v842_v7 }
 0x33a   : > { %851 = vrcp.f32 %v450_v48  ;;  %682 = vrot.lane.b32.xlu2 %v275_v49, %s871_s23 }
 0x33b   : > { %791 = vmatmul.msk.f32.vlgmr.msrb.gmra.mxu3 %vm175_vm1, %v318_v50 }
 0x33c   : > { %608 = vmatpush.msrb.mxu3 %v588_v55 }
 0x340   : > { %v852_v51 = vpop.eup %851 }
 0x341   : > { %v452_v52 = vmul.f32 %v852_v51, %v846_v36  ;;  %v409_v53 = vpop.f32.mrf.mxu2 }
 0x342   : > { %694 = vrot.lane.b32.xlu2 %v409_v53, %s868_s18 }
 0x343   : > { %797 = vmatmul.msk.f32.vlgmr.msra.gmra.mxu3 %vm175_vm1, %v452_v52 }
 0x349   : > { %v543_v54 = vpop.f32.mrf.mxu2 }
 0x34a   : > { %706 = vrot.lane.b32.xlu2 %v543_v54, %s867_s17 }
 0x34f   : > { %654 = vrot.lane.b32.xlu1 %v936_v20, %s871_s23 }
 0x394   : > { %v683_v56 = vpop.permute.xlu2 %682 }
 0x395   : > { %686 = vst.msk [vmem:[%s969_s27] sm:$0xff] %vm685_vm2, %v683_v56 }
 0x39c   : > { %v695_v0 = vpop.permute.xlu2 %694 }
 0x3a4   : > { %v707_v4 = vpop.permute.xlu2 %706 }
 0x3a9   : > { %v584_v57 = vpop.xlane.xlu1 %583 }
 0x3aa   : > { %853 = vrcp.f32 %v584_v57 }
 0x3ab   : > { %855 = vrcp.f32 %v651_v39 }
 0x3b0   : > { %v854_v58 = vpop.eup %853 }
 0x3b1   : > { %v586_v59 = vmul.f32 %v854_v58, %v848_v45  ;;  %v856_v60 = vpop.eup %855 }
 0x3b2   : > { %v653_v20 = vmul.f32 %v856_v60, %v989_v16 }
 0x3b3   : > { %803 = vmatmul.msk.f32.vlgmr.msrb.gmra.mxu3 %vm175_vm1, %v586_v59 }
 0x3be   : > { %v342_v61 = vpop.f32.mrf.mxu3 }
 0x3bf   : > { %688 = vrot.lane.b32.xlu0 %v342_v61, %s870_s22 }
 0x3c1   : > { %v655_v62 = vpop.permute.xlu1 %654 }
 0x3c2   : > { %675 = vmatpush.msrb.mxu2 %v655_v62 }
 0x3c3   : > { %806 = vmatmul.msk.f32.vlgmr.msrb.gmra.mxu2 %vm175_vm1, %v653_v20 }
 0x3c6   : > { %v476_v63 = vpop.f32.mrf.mxu3 }
 0x3c7   : > { %700 = vrot.lane.b32.xlu0 %v476_v63, %s869_s21 }
 0x431   : > { %v689_v1 = vpop.permute.xlu0 %688 }
 0x432   : > { %692 = vst.msk [vmem:[%s969_s27] sm:$0xff] %vm691_vm3, %v689_v1 }
 0x433   : > { %698 = vst.msk [vmem:[%s969_s27] sm:$0xff] %vm697_vm4, %v695_v0 }
 0x436   : > { %v610_v2 = vpop.f32.mrf.mxu3 }
 0x437   : > { %712 = vrot.lane.b32.xlu0 %v610_v2, %s866_s16 }
 0x439   : > { %v701_v3 = vpop.permute.xlu0 %700 }
 0x43a   : > { %704 = vst.msk [vmem:[%s969_s27] sm:$0xff] %vm703_vm5, %v701_v3 }
 0x43b   : > { %710 = vst.msk [vmem:[%s969_s27] sm:$0xff] %vm709_vm6, %v707_v4 }
 0x446   : > { %v677_v5 = vpop.f32.mrf.mxu2 }
 0x447   : > { %718 = vrot.lane.b32.xlu1 %v677_v5, %s865_s15 }
 0x4a9   : > { %v713_v6 = vpop.permute.xlu0 %712 }
 0x4aa   : > { %716 = vst.msk [vmem:[%s969_s27] sm:$0xff] %vm715_vm7, %v713_v6 }
 0x4b9   : > { %v719_v8 = vpop.permute.xlu1 %718 }
 0x4ba   : > { %722 = vst.msk [vmem:[%s969_s27] sm:$0xff] %vm721_vm8, %v719_v8 }
 0x4bb PF: > { %s12_s9 = sadd.s32 1, %s863_s9  }
 0x4bc   : > { %p9_p4 = scmp.ge.s32.totalorder %s12_s9, 4  }
 0x4be   :  { %11 = sbr.rel (!%p9_p4) target bundleno = 1 (0x1), region = 58 }

// kernel: forward.40
= control target key start
LH: loop header
LB: loop body
LE: loop exit
PB: predicated region body
PF: predicated region fallthrough
CT: control target
= control target key end

     0   :  { %8 = vsyncpa [#allocation3], 0  ;;  %s613_s0 = inlined_call_operand.vmem [shape: f32[16,128], index: 0, kind: input, shape index: {}]   ;;  %s614_s1 = inlined_call_operand.hbm [shape: f32[128,128], index: 1, kind: input, shape index: {}]   ;;  %s615_s2 = inlined_call_operand.hbm [shape: f32[1,128], index: 2, kind: input, shape index: {}]   ;;  %s616_s3 = inlined_call_operand.vmem [shape: f32[16,128], index: 3, kind: output, shape index: {}]  }
   0x1   :  { %9 = vsyncpa [#allocation5], 0  ;;  %s547_s12 = smov 0   ;;  %s549_s13 = smov 0  }
   0x2   :  { %s551_s14 = smov 0  }
   0x3 LB: > { %s370_s15 = sadd.s32 4294967295, %s521_s14   ;;  %s24_s16 = sadd.s32 1, %s517_s13  ;;  %s521_s14 = sphi %s551_s14, %s15_s14   ;;  %s517_s13 = sphi %s549_s13, %s620_s13   ;;  %s513_s12 = sphi %s547_s12, %s619_s12  }
   0x4   : > { %p25_p0 = scmp.ge.s32.totalorder %s24_s16, 2  ;;  %p372_p1 = scmp.ge.s32.totalorder %s521_s14, 1 }
   0x5   : > { %p138_p2 = scmp.lt.s32.totalorder %s521_s14, 3  ;;  %p572_p4 = scmp.eq.s32.totalorder %s370_s15, 0 }
   0x6   : > { %s622_s16 = smov (%p25_p0, %s24_s16), 0  ;;  %s151_s21 = sshll.u32 %s614_s1, 4  ;;  %s152_s21 = int_to_ptr.hbm [resolvable:$true] %s151_s21 }
   0x7   : > { %p568_p3 = pnand %p372_p1, %p138_p2  ;;  %s523_s22 = smov [#allocation2]  }
   0x8   : > { %s153_s23 = sshll.u32 %s523_s22, 4  ;;  %s167_s26 = sshll.u32 %s615_s2, 4  ;;  %s154_s23 = int_to_ptr.vmem [resolvable:$true] %s153_s23  ;;  %s168_s26 = int_to_ptr.hbm [resolvable:$true] %s167_s26 }
   0x9   : > { %p391_p5 = pneg %p568_p3  ;;  %s524_s27 = smov 128  }
   0xa   : > { %s525_s28 = smov 8   ;;  %s526_s29 = smov [#allocation4]  }
   0xb   : > { %p392_p6 = pnand %p572_p4, %p391_p5  ;;  %s169_s30 = sshll.u32 %s526_s29, 4  ;;  %s170_s30 = int_to_ptr.vmem [resolvable:$true] %s169_s30 }
   0xc   : > { %189 = sbr.rel (%p568_p3) target bundleno = 181 (0xb5), region = 32 }
   0xd   : > { %394 = dma.hbm_to_vmem [thread:$0]  (!%p392_p6), %s152_s21, 2048, %s154_s23, [#allocation3], %s524_s27, %s524_s27, %s525_s28  }
   0xe   : > { %397 = dma.hbm_to_vmem [thread:$0]  (!%p392_p6), %s168_s26, 16, %s170_s30, [#allocation5]  }
  0x11   : > { %504 = dma.done.wait (%p572_p4), [#allocation3], 2048  }
  0x12   : > { %506 = vsyncadd (%p572_p4), [#allocation3], 4294965248 }
  0x13   : > { %508 = dma.done.wait (%p572_p4), [#allocation5], 16  }
  0x14   : > { %510 = vsyncadd (%p572_p4), [#allocation5], 4294967280  ;;  %v247_v0 = vld [vmem:[#allocation2 + $0x78] sm:$0xff]  ;;  %v246_v1 = vld [vmem:[#allocation2 + $0x70] sm:$0xff]  ;;  %p220_p7 = scmp.lt.s32.totalorder %s513_s12, 1 }
  0x15   : > { %252 = vmatpush.msra.mxu0 %v247_v0  ;;  %v245_v2 = vld [vmem:[#allocation2 + $0x68] sm:$0xff]  ;;  %v244_v3 = vld [vmem:[#allocation2 + $0x60] sm:$0xff]  ;;  %v243_v4 = vld [vmem:[#allocation2 + $0x58] sm:$0xff] }
  0x16   : > { %v242_v5 = vld [vmem:[#allocation2 + $0x50] sm:$0xff]  ;;  %v241_v6 = vld [vmem:[#allocation2 + $0x48] sm:$0xff]  ;;  %v240_v7 = vld [vmem:[#allocation2 + $0x40] sm:$0xff]  ;;  %s624_s12 = smov (!%p220_p7, %s513_s12), 1 }
  0x17   : > { %253 = vmatpush.msra.mxu0 %v246_v1  ;;  %v239_v8 = vld [vmem:[#allocation2 + $0x38] sm:$0xff]  ;;  %v238_v9 = vld [vmem:[#allocation2 + $0x30] sm:$0xff]  ;;  %v237_v10 = vld [vmem:[#allocation2 + $0x28] sm:$0xff]  ;;  %s379_s4 = sshll.u32 %s624_s12, 3 }
  0x18   : > { %v236_v11 = vld [vmem:[#allocation2 + $0x20] sm:$0xff]  ;;  %v235_v12 = vld [vmem:[#allocation2 + $0x18] sm:$0xff]  ;;  %v234_v13 = vld [vmem:[#allocation2 + $0x10] sm:$0xff]  ;;  %s223_s7 = scalar_lea.vmem %s613_s0, %s379_s4  ;;  %s230_s10 = scalar_lea.vmem %s616_s3, %s379_s4 }
  0x19   : > { %254 = vmatpush.msra.mxu0 %v245_v2  ;;  %v233_v14 = vld [vmem:[#allocation2 + $0x8] sm:$0xff]  ;;  %v232_v15 = vld [vmem:[#allocation2] sm:$0xff] }
  0x1a   : > { %v231_v16 = vld [vmem:[%s223_s7] sm:$0xff] }
  0x1b   : > { %255 = vmatpush.msra.mxu0 %v244_v3  ;;  %v430_v17 = vld [vmem:[#allocation4] ss:$0 sm:$0xff] }
  0x1d   : > { %256 = vmatpush.msra.mxu0 %v243_v4 }
  0x1f   : > { %257 = vmatpush.msra.mxu0 %v242_v5 }
  0x21   : > { %258 = vmatpush.msra.mxu0 %v241_v6 }
  0x23   : > { %259 = vmatpush.msra.mxu0 %v240_v7 }
  0x25   : > { %260 = vmatpush.msra.mxu0 %v239_v8 }
  0x27   : > { %261 = vmatpush.msra.mxu0 %v238_v9 }
  0x29   : > { %262 = vmatpush.msra.mxu0 %v237_v10 }
  0x2b   : > { %263 = vmatpush.msra.mxu0 %v236_v11 }
  0x2d   : > { %264 = vmatpush.msra.mxu0 %v235_v12 }
  0x2f   : > { %265 = vmatpush.msra.mxu0 %v234_v13 }
  0x31   : > { %266 = vmatpush.msra.mxu0 %v233_v14 }
  0x33   : > { %267 = vmatpush.msra.mxu0 %v232_v15 }
  0x34   : > { %268 = vmatmul.f32.vlgmr.msra.gmra.mxu0 %v231_v16 }
  0xb1   : > { %v269_v18 = vpop.f32.mrf.mxu0 }
  0xb2   : > { %v270_v19 = vadd.f32 %v430_v17, %v269_v18 }
  0xb4   : > { %272 = vst [vmem:[%s230_s10] sm:$0xff] %v270_v19 }
  0xb5 PF: > { %s15_s14 = sadd.s32 1, %s521_s14   ;;  %s619_s12 = smov %s517_s13 }
  0xb6   : > { %p12_p8 = scmp.ge.s32.totalorder %s15_s14, 4   ;;  %s620_s13 = smov %s622_s16 }
  0xb8   :  { %14 = sbr.rel (!%p12_p8) target bundleno = 3 (0x3), region = 73 }
  0xbd   :  { %298 = vsyncpa [#allocation3], 1 }
  0xbe   :  { %300 = vsyncpa [#allocation3 + $0x1], 1 }
  0xbf   :  { %301 = vsyncpa [#allocation5], 1 }

// kernel: forward.33
= control target key start
LH: loop header
LB: loop body
LE: loop exit
PB: predicated region body
PF: predicated region fallthrough
CT: control target
= control target key end

     0   :  { %s540_s12 = smov 0   ;;  %s542_s13 = smov 0   ;;  %s728_s0 = inlined_call_operand.vmem [shape: f32[16,128], index: 0, kind: input, shape index: {}]   ;;  %s729_s1 = inlined_call_operand.vmem [shape: f32[128,384], index: 1, kind: input, shape index: {}]   ;;  %s730_s2 = inlined_call_operand.vmem [shape: f32[1,384], index: 2, kind: input, shape index: {}]   ;;  %s731_s3 = inlined_call_operand.vmem [shape: f32[16,384], index: 3, kind: output, shape index: {}]  }
   0x1   :  { %s544_s14 = smov 0  }
   0x2 LB: > { %s22_s15 = sadd.s32 1, %s514_s13  ;;  %p466_p0 = scmp.ge.s32.totalorder %s518_s14, 1  ;;  %s518_s14 = sphi %s544_s14, %s13_s14   ;;  %s514_s13 = sphi %s542_s13, %s733_s13   ;;  %s510_s12 = sphi %s540_s12, %s732_s12  }
   0x3   : > { %p23_p1 = scmp.ge.s32.totalorder %s22_s15, 2  ;;  %p171_p2 = scmp.lt.s32.totalorder %s518_s14, 3 }
   0x5   : > { %s735_s15 = smov (%p23_p1, %s22_s15), 0  ;;  %p172_p3 = pnand %p466_p0, %p171_p2 }
   0x6   : > { %p207_p4 = scmp.lt.s32.totalorder (!%p172_p3), %s510_s12, 1 }
   0x7   : > { %175 = sbr.rel (%p172_p3) target bundleno = 179 (0xb3), region = 32 }
   0xc   : > { %v280_v0 = vld [vmem:[%s729_s1 + $0x178] sm:$0xff]  ;;  %v277_v1 = vld [vmem:[%s729_s1 + $0x160] sm:$0xff]  ;;  %v278_v2 = vld [vmem:[%s729_s1 + $0x168] sm:$0xff]  ;;  %s737_s12 = smov (!%p207_p4, %s510_s12), 1 }
   0xd   : > { %329 = vmatpush.msra.mxu2 %v280_v0  ;;  %v279_v3 = vld [vmem:[%s729_s1 + $0x170] sm:$0xff]  ;;  %v274_v4 = vld [vmem:[%s729_s1 + $0x148] sm:$0xff]  ;;  %289 = vmatpush.msra.mxu0 %v278_v2  ;;  %v276_v6 = vld [vmem:[%s729_s1 + $0x158] sm:$0xff]  ;;  %s467_s25 = sshll.u32 %s737_s12, 3  ;;  %s471_s26 = smul.u32 24, %s737_s12 }
   0xe   : > { %309 = vmatpush.msra.mxu1 %v279_v3  ;;  %v275_v5 = vld [vmem:[%s729_s1 + $0x150] sm:$0xff]  ;;  %v272_v7 = vld [vmem:[%s729_s1 + $0x138] sm:$0xff]  ;;  %v273_v8 = vld [vmem:[%s729_s1 + $0x140] sm:$0xff]  ;;  %s210_s9 = scalar_lea.vmem %s728_s0, %s467_s25 }
   0xf   : > { %330 = vmatpush.msra.mxu2 %v277_v1  ;;  %v271_v9 = vld [vmem:[%s729_s1 + $0x130] sm:$0xff]  ;;  %290 = vmatpush.msra.mxu0 %v275_v5  ;;  %v269_v10 = vld [vmem:[%s729_s1 + $0x120] sm:$0xff]  ;;  %v270_v11 = vld [vmem:[%s729_s1 + $0x128] sm:$0xff]  ;;  %s230_s29 = scalar_lea.vmem %s731_s3, %s471_s26 }
  0x10   : > { %310 = vmatpush.msra.mxu1 %v276_v6  ;;  %v268_v12 = vld [vmem:[%s729_s1 + $0x118] sm:$0xff]  ;;  %v266_v13 = vld [vmem:[%s729_s1 + $0x108] sm:$0xff]  ;;  %v267_v14 = vld [vmem:[%s729_s1 + $0x110] sm:$0xff] }
  0x11   : > { %331 = vmatpush.msra.mxu2 %v274_v4  ;;  %291 = vmatpush.msra.mxu0 %v272_v7  ;;  %v265_v15 = vld [vmem:[%s729_s1 + $0x100] sm:$0xff]  ;;  %v263_v16 = vld [vmem:[%s729_s1 + $0xf0] sm:$0xff]  ;;  %v264_v17 = vld [vmem:[%s729_s1 + $0xf8] sm:$0xff] }
  0x12   : > { %311 = vmatpush.msra.mxu1 %v273_v8  ;;  %v262_v18 = vld [vmem:[%s729_s1 + $0xe8] sm:$0xff]  ;;  %v260_v19 = vld [vmem:[%s729_s1 + $0xd8] sm:$0xff]  ;;  %v261_v20 = vld [vmem:[%s729_s1 + $0xe0] sm:$0xff] }
  0x13   : > { %332 = vmatpush.msra.mxu2 %v271_v9  ;;  %292 = vmatpush.msra.mxu0 %v269_v10  ;;  %v259_v21 = vld [vmem:[%s729_s1 + $0xd0] sm:$0xff]  ;;  %v257_v22 = vld [vmem:[%s729_s1 + $0xc0] sm:$0xff]  ;;  %v258_v23 = vld [vmem:[%s729_s1 + $0xc8] sm:$0xff] }
  0x14   : > { %312 = vmatpush.msra.mxu1 %v270_v11  ;;  %v256_v24 = vld [vmem:[%s729_s1 + $0xb8] sm:$0xff]  ;;  %v254_v25 = vld [vmem:[%s729_s1 + $0xa8] sm:$0xff]  ;;  %v255_v26 = vld [vmem:[%s729_s1 + $0xb0] sm:$0xff] }
  0x15   : > { %333 = vmatpush.msra.mxu2 %v268_v12  ;;  %293 = vmatpush.msra.mxu0 %v266_v13  ;;  %v253_v27 = vld [vmem:[%s729_s1 + $0xa0] sm:$0xff]  ;;  %v251_v28 = vld [vmem:[%s729_s1 + $0x90] sm:$0xff]  ;;  %v252_v29 = vld [vmem:[%s729_s1 + $0x98] sm:$0xff] }
  0x16   : > { %313 = vmatpush.msra.mxu1 %v267_v14  ;;  %v250_v30 = vld [vmem:[%s729_s1 + $0x88] sm:$0xff]  ;;  %v248_v31 = vld [vmem:[%s729_s1 + $0x78] sm:$0xff]  ;;  %v249_v32 = vld [vmem:[%s729_s1 + $0x80] sm:$0xff] }
  0x17   : > { %334 = vmatpush.msra.mxu2 %v265_v15  ;;  %294 = vmatpush.msra.mxu0 %v263_v16  ;;  %v247_v33 = vld [vmem:[%s729_s1 + $0x70] sm:$0xff]  ;;  %v245_v34 = vld [vmem:[%s729_s1 + $0x60] sm:$0xff]  ;;  %v246_v35 = vld [vmem:[%s729_s1 + $0x68] sm:$0xff] }
  0x18   : > { %314 = vmatpush.msra.mxu1 %v264_v17  ;;  %v244_v36 = vld [vmem:[%s729_s1 + $0x58] sm:$0xff]  ;;  %v242_v37 = vld [vmem:[%s729_s1 + $0x48] sm:$0xff]  ;;  %v243_v38 = vld [vmem:[%s729_s1 + $0x50] sm:$0xff] }
  0x19   : > { %335 = vmatpush.msra.mxu2 %v262_v18  ;;  %295 = vmatpush.msra.mxu0 %v260_v19  ;;  %v241_v39 = vld [vmem:[%s729_s1 + $0x40] sm:$0xff]  ;;  %v239_v40 = vld [vmem:[%s729_s1 + $0x30] sm:$0xff]  ;;  %v240_v41 = vld [vmem:[%s729_s1 + $0x38] sm:$0xff] }
  0x1a   : > { %315 = vmatpush.msra.mxu1 %v261_v20  ;;  %v238_v42 = vld [vmem:[%s729_s1 + $0x28] sm:$0xff]  ;;  %v236_v43 = vld [vmem:[%s729_s1 + $0x18] sm:$0xff]  ;;  %v237_v44 = vld [vmem:[%s729_s1 + $0x20] sm:$0xff] }
  0x1b   : > { %336 = vmatpush.msra.mxu2 %v259_v21  ;;  %296 = vmatpush.msra.mxu0 %v257_v22  ;;  %v235_v45 = vld [vmem:[%s729_s1 + $0x10] sm:$0xff]  ;;  %v232_v46 = vld [vmem:[%s210_s9] sm:$0xff]  ;;  %v234_v48 = vld [vmem:[%s729_s1 + $0x8] sm:$0xff] }
  0x1c   : > { %316 = vmatpush.msra.mxu1 %v258_v23  ;;  %v233_v47 = vld [vmem:[%s729_s1] sm:$0xff] }
  0x1d   : > { %337 = vmatpush.msra.mxu2 %v256_v24  ;;  %297 = vmatpush.msra.mxu0 %v254_v25  ;;  %v281_v49 = vld [vmem:[%s730_s2] sm:$0x7] }
  0x1e   : > { %317 = vmatpush.msra.mxu1 %v255_v26  ;;  %v283_v50 = vperm.slane %v281_v49, 0  ;;  %v284_v51 = vperm.slane %v281_v49, 1  ;;  %v285_v56 = vperm.slane %v281_v49, 2 }
  0x1f   : > { %338 = vmatpush.msra.mxu2 %v253_v27  ;;  %298 = vmatpush.msra.mxu0 %v251_v28 }
  0x20   : > { %318 = vmatpush.msra.mxu1 %v252_v29 }
  0x21   : > { %339 = vmatpush.msra.mxu2 %v250_v30  ;;  %299 = vmatpush.msra.mxu0 %v248_v31 }
  0x22   : > { %319 = vmatpush.msra.mxu1 %v249_v32 }
  0x23   : > { %340 = vmatpush.msra.mxu2 %v247_v33  ;;  %300 = vmatpush.msra.mxu0 %v245_v34 }
  0x24   : > { %320 = vmatpush.msra.mxu1 %v246_v35 }
  0x25   : > { %341 = vmatpush.msra.mxu2 %v244_v36  ;;  %301 = vmatpush.msra.mxu0 %v242_v37 }
  0x26   : > { %321 = vmatpush.msra.mxu1 %v243_v38 }
  0x27   : > { %342 = vmatpush.msra.mxu2 %v241_v39  ;;  %302 = vmatpush.msra.mxu0 %v239_v40 }
  0x28   : > { %322 = vmatpush.msra.mxu1 %v240_v41 }
  0x29   : > { %343 = vmatpush.msra.mxu2 %v238_v42  ;;  %303 = vmatpush.msra.mxu0 %v236_v43 }
  0x2a   : > { %323 = vmatpush.msra.mxu1 %v237_v44 }
  0x2b   : > { %344 = vmatpush.msra.mxu2 %v235_v45  ;;  %304 = vmatpush.msra.mxu0 %v233_v47 }
  0x2c   : > { %345 = vmatmul.f32.vlgmr.msra.gmra.mxu2 %v232_v46  ;;  %324 = vmatpush.msra.mxu1 %v234_v48 }
  0x2d   : > { %305 = vmatmul.f32.vlgmr.msra.gmra.mxu0 %v232_v46  ;;  %325 = vmatmul.f32.vlgmr.msra.gmra.mxu1 %v232_v46 }
  0xaa   : > { %v306_v52 = vpop.f32.mrf.mxu0  ;;  %v326_v54 = vpop.f32.mrf.mxu1 }
  0xab   : > { %v307_v53 = vadd.f32 %v306_v52, %v283_v50  ;;  %v327_v55 = vadd.f32 %v326_v54, %v284_v51 }
  0xad   : > { %349 = vst [vmem:[%s230_s29] sm:$0xff] %v307_v53 }
  0xae   : > { %350 = vst [vmem:[%s230_s29 + $0x8] sm:$0xff] %v327_v55 }
  0xaf   : > { %v346_v57 = vpop.f32.mrf.mxu2 }
  0xb0   : > { %v347_v58 = vadd.f32 %v346_v57, %v285_v56 }
  0xb2   : > { %351 = vst [vmem:[%s230_s29 + $0x10] sm:$0xff] %v347_v58 }
  0xb3 PF: > { %s13_s14 = sadd.s32 1, %s518_s14   ;;  %s732_s12 = smov %s514_s13 }
  0xb4   : > { %p10_p5 = scmp.ge.s32.totalorder %s13_s14, 4   ;;  %s733_s13 = smov %s735_s15 }
  0xb6   :  { %12 = sbr.rel (!%p10_p5) target bundleno = 2 (0x2), region = 68 }

// kernel: forward.35
= control target key start
LH: loop header
LB: loop body
LE: loop exit
PB: predicated region body
PF: predicated region fallthrough
CT: control target
= control target key end

     0   :  { %s480_s21 = smov 0   ;;  %s562_s0 = inlined_call_operand.vmem [shape: f32[16,128], index: 0, kind: input, shape index: {}]   ;;  %s563_s1 = inlined_call_operand.vmem [shape: f32[128,128], index: 1, kind: input, shape index: {}]   ;;  %s564_s2 = inlined_call_operand.vmem [shape: f32[1,128], index: 2, kind: input, shape index: {}]   ;;  %s565_s3 = inlined_call_operand.vmem [shape: f32[16,128], index: 3, kind: input, shape index: {}]   ;;  %s566_s4 = inlined_call_operand.vmem [shape: f32[1,128], index: 4, kind: input, shape index: {}]   ;;  %s567_s5 = inlined_call_operand.vmem [shape: f32[1,128], index: 5, kind: input, shape index: {}]   ;;  %s568_s6 = inlined_call_operand.vmem [shape: f32[16,128], index: 6, kind: output, shape index: {}]  }
   0x1 LB: > { %s410_s22 = sadd.s32 4294967295, %s442_s21   ;;  %p414_p0 = scmp.ge.s32.totalorder %s442_s21, 1  ;;  %s442_s21 = sphi %s480_s21, %s16_s21  }
   0x2   : > { %p220_p1 = scmp.lt.s32.totalorder %s442_s21, 3 }
   0x4   : > { %p221_p2 = pnand %p414_p0, %p220_p1 }
   0x5   : > { %p252_p3 = scmp.lt.s32.totalorder (!%p221_p2), %s410_s22, 1 }
   0x6   : > { %224 = sbr.rel (%p221_p2) target bundleno = 440 (0x1b8), region = 44 }
   0xb   : > { %v280_v0 = vld [vmem:[%s563_s1 + $0x78] sm:$0xff]  ;;  %v279_v1 = vld [vmem:[%s563_s1 + $0x70] sm:$0xff]  ;;  %v278_v2 = vld [vmem:[%s563_s1 + $0x68] sm:$0xff]  ;;  %s570_s22 = smov (!%p252_p3, %s410_s22), 1  ;;  %v444_v22 = vmov 128.0  }
   0xc   : > { %285 = vmatpush.msra.mxu0 %v280_v0  ;;  %v277_v3 = vld [vmem:[%s563_s1 + $0x60] sm:$0xff]  ;;  %v276_v4 = vld [vmem:[%s563_s1 + $0x58] sm:$0xff]  ;;  %v275_v5 = vld [vmem:[%s563_s1 + $0x50] sm:$0xff]  ;;  %s527_s27 = sshll.u32 %s570_s22, 3  ;;  %432 = vrcp.f32 %v444_v22 }
   0xd   : > { %v274_v6 = vld [vmem:[%s563_s1 + $0x48] sm:$0xff]  ;;  %v273_v7 = vld [vmem:[%s563_s1 + $0x40] sm:$0xff]  ;;  %v272_v8 = vld [vmem:[%s563_s1 + $0x38] sm:$0xff]  ;;  %s255_s10 = scalar_lea.vmem %s562_s0, %s527_s27  ;;  %s259_s16 = scalar_lea.vmem %s565_s3, %s527_s27 }
   0xe   : > { %286 = vmatpush.msra.mxu0 %v279_v1  ;;  %v271_v9 = vld [vmem:[%s563_s1 + $0x30] sm:$0xff]  ;;  %v270_v10 = vld [vmem:[%s563_s1 + $0x28] sm:$0xff]  ;;  %v269_v11 = vld [vmem:[%s563_s1 + $0x20] sm:$0xff]  ;;  %s263_s25 = scalar_lea.vmem %s568_s6, %s527_s27 }
   0xf   : > { %v268_v12 = vld [vmem:[%s563_s1 + $0x18] sm:$0xff]  ;;  %v267_v13 = vld [vmem:[%s563_s1 + $0x10] sm:$0xff]  ;;  %v266_v14 = vld [vmem:[%s563_s1 + $0x8] sm:$0xff] }
  0x10   : > { %287 = vmatpush.msra.mxu0 %v278_v2  ;;  %v265_v15 = vld [vmem:[%s563_s1] sm:$0xff] }
  0x11   : > { %v264_v16 = vld [vmem:[%s255_s10] sm:$0xff] }
  0x12   : > { %288 = vmatpush.msra.mxu0 %v277_v3  ;;  %v429_v17 = vld [vmem:[%s564_s2] ss:$0 sm:$0xff]  ;;  %v433_v23 = vpop.eup %432 }
  0x13   : > { %v305_v19 = vld [vmem:[%s259_s16] sm:$0xff]  ;;  %v310_v24 = vmul.f32 128.0, %v433_v23  ;;  %vm314_vm0 = vweird.f32 %v433_v23 }
  0x14   : > { %289 = vmatpush.msra.mxu0 %v276_v4  ;;  %v430_v42 = vld [vmem:[%s566_s4] ss:$0 sm:$0xff] }
  0x15   : > { %v311_v25 = vsub.f32 1.0, %v310_v24  ;;  %v431_v44 = vld [vmem:[%s567_s5] ss:$0 sm:$0xff] }
  0x16   : > { %290 = vmatpush.msra.mxu0 %v275_v5 }
  0x17   : > { %v312_v26 = vmul.f32 %v433_v23, %v311_v25 }
  0x18   : > { %291 = vmatpush.msra.mxu0 %v274_v6 }
  0x19   : > { %v313_v27 = vadd.f32 %v433_v23, %v312_v26 }
  0x1a   : > { %292 = vmatpush.msra.mxu0 %v273_v7 }
  0x1b   : > { %v315_v28 = vsel %vm314_vm0, %v433_v23, %v313_v27 }
  0x1c   : > { %293 = vmatpush.msra.mxu0 %v272_v8 }
  0x1e   : > { %294 = vmatpush.msra.mxu0 %v271_v9 }
  0x20   : > { %295 = vmatpush.msra.mxu0 %v270_v10 }
  0x22   : > { %296 = vmatpush.msra.mxu0 %v269_v11 }
  0x24   : > { %297 = vmatpush.msra.mxu0 %v268_v12 }
  0x26   : > { %298 = vmatpush.msra.mxu0 %v267_v13 }
  0x28   : > { %299 = vmatpush.msra.mxu0 %v266_v14 }
  0x2a   : > { %300 = vmatpush.msra.mxu0 %v265_v15 }
  0x2b   : > { %301 = vmatmul.f32.vlgmr.msra.gmra.mxu0 %v264_v16 }
  0xa8   : > { %v302_v18 = vpop.f32.mrf.mxu0 }
  0xa9   : > { %v303_v20 = vadd.f32 %v429_v17, %v302_v18 }
  0xab   : > { %v306_v21 = vadd.f32 %v305_v19, %v303_v20 }
  0xad   : > { %307 = vadd.xlane.f32.xlu0 %v306_v21 }
 0x120   : > { %v308_v29 = vpop.xlane.xlu0 %307 }
 0x121   : > { %v316_v30 = vmul.f32 %v315_v28, %v308_v29 }
 0x123   : > { %v317_v31 = vsub.f32 %v306_v21, %v316_v30 }
 0x125   : > { %v318_v32 = vmul.f32 %v317_v31, %v317_v31 }
 0x127   : > { %319 = vadd.xlane.f32.xlu0 %v318_v32 }
 0x19a   : > { %v320_v33 = vpop.xlane.xlu0 %319 }
 0x19b   : > { %v321_v34 = vmul.f32 %v320_v33, %v315_v28 }
 0x19d   : > { %v322_v35 = vadd.f32 1e-05, %v321_v34 }
 0x19f   : > { %434 = vrsqrt.f32 %v322_v35  ;;  %vm329_vm2 = vweird.f32 %v322_v35 }
 0x1a5   : > { %v435_v36 = vpop.eup %434 }
 0x1a6   : > { %v324_v37 = vmul.f32 %v435_v36, %v322_v35  ;;  %vm330_vm1 = vweird.f32 %v435_v36 }
 0x1a7   : > { %vm331_vm3 = vmor %vm329_vm2, %vm330_vm1 }
 0x1a8   : > { %v325_v38 = vmul.f32 %v435_v36, %v324_v37 }
 0x1aa   : > { %v326_v39 = vmul.f32 0.5, %v325_v38 }
 0x1ac   : > { %v327_v40 = vsub.f32 1.5, %v326_v39 }
 0x1ae   : > { %v328_v41 = vmul.f32 %v435_v36, %v327_v40 }
 0x1b0   : > { %v332_v43 = vsel %vm331_vm3, %v435_v36, %v328_v41 }
 0x1b1   : > { %v333_v45 = vmul.f32 %v332_v43, %v317_v31 }
 0x1b3   : > { %v338_v46 = vmul.f32 %v430_v42, %v333_v45 }
 0x1b5   : > { %v343_v47 = vadd.f32 %v431_v44, %v338_v46 }
 0x1b7   : > { %344 = vst [vmem:[%s263_s25] sm:$0xff] %v343_v47 }
 0x1b8 PF: > { %s16_s21 = sadd.s32 1, %s442_s21  }
 0x1b9   : > { %p13_p4 = scmp.ge.s32.totalorder %s16_s21, 4  }
 0x1bb   :  { %15 = sbr.rel (!%p13_p4) target bundleno = 1 (0x1), region = 77 }

// kernel: forward.49
= control target key start
LH: loop header
LB: loop body
LE: loop exit
PB: predicated region body
PF: predicated region fallthrough
CT: control target
= control target key end

     0   :  { %s502_s12 = smov 0   ;;  %s504_s13 = smov 0   ;;  %s642_s0 = inlined_call_operand.vmem [shape: f32[16,128], index: 0, kind: input, shape index: {}]   ;;  %s643_s1 = inlined_call_operand.vmem [shape: f32[128,256], index: 1, kind: input, shape index: {}]   ;;  %s644_s2 = inlined_call_operand.vmem [shape: f32[1,256], index: 2, kind: input, shape index: {}]   ;;  %s645_s3 = inlined_call_operand.vmem [shape: f32[16,256], index: 3, kind: output, shape index: {}]  }
   0x1   :  { %s506_s14 = smov 0  }
   0x2 LB: > { %s22_s15 = sadd.s32 1, %s476_s13  ;;  %p427_p0 = scmp.ge.s32.totalorder %s480_s14, 1  ;;  %s480_s14 = sphi %s506_s14, %s13_s14   ;;  %s476_s13 = sphi %s504_s13, %s647_s13   ;;  %s472_s12 = sphi %s502_s12, %s646_s12  }
   0x3   : > { %p23_p1 = scmp.ge.s32.totalorder %s22_s15, 2  ;;  %p171_p2 = scmp.lt.s32.totalorder %s480_s14, 3 }
   0x5   : > { %s649_s15 = smov (%p23_p1, %s22_s15), 0  ;;  %p172_p3 = pnand %p427_p0, %p171_p2 }
   0x6   : > { %p207_p4 = scmp.lt.s32.totalorder (!%p172_p3), %s472_s12, 1 }
   0x7   : > { %175 = sbr.rel (%p172_p3) target bundleno = 174 (0xae), region = 32 }
   0xc   : > { %v263_v0 = vld [vmem:[%s643_s1 + $0xf0] sm:$0xff]  ;;  %v264_v1 = vld [vmem:[%s643_s1 + $0xf8] sm:$0xff]  ;;  %v261_v2 = vld [vmem:[%s643_s1 + $0xe0] sm:$0xff]  ;;  %s651_s12 = smov (!%p207_p4, %s472_s12), 1 }
   0xd   : > { %271 = vmatpush.msra.mxu0 %v263_v0  ;;  %291 = vmatpush.msra.mxu1 %v264_v1  ;;  %v262_v3 = vld [vmem:[%s643_s1 + $0xe8] sm:$0xff]  ;;  %v259_v4 = vld [vmem:[%s643_s1 + $0xd0] sm:$0xff]  ;;  %v260_v5 = vld [vmem:[%s643_s1 + $0xd8] sm:$0xff]  ;;  %s428_s22 = sshll.u32 %s651_s12, 3  ;;  %s433_s17 = sshll.u32 %s651_s12, 4 }
   0xe   : > { %v257_v6 = vld [vmem:[%s643_s1 + $0xc0] sm:$0xff]  ;;  %v258_v7 = vld [vmem:[%s643_s1 + $0xc8] sm:$0xff]  ;;  %v255_v8 = vld [vmem:[%s643_s1 + $0xb0] sm:$0xff]  ;;  %s210_s6 = scalar_lea.vmem %s642_s0, %s428_s22  ;;  %s230_s20 = scalar_lea.vmem %s645_s3, %s433_s17 }
   0xf   : > { %272 = vmatpush.msra.mxu0 %v261_v2  ;;  %292 = vmatpush.msra.mxu1 %v262_v3  ;;  %v256_v9 = vld [vmem:[%s643_s1 + $0xb8] sm:$0xff]  ;;  %v253_v10 = vld [vmem:[%s643_s1 + $0xa0] sm:$0xff]  ;;  %v254_v11 = vld [vmem:[%s643_s1 + $0xa8] sm:$0xff] }
  0x10   : > { %v251_v12 = vld [vmem:[%s643_s1 + $0x90] sm:$0xff]  ;;  %v252_v13 = vld [vmem:[%s643_s1 + $0x98] sm:$0xff]  ;;  %v249_v14 = vld [vmem:[%s643_s1 + $0x80] sm:$0xff] }
  0x11   : > { %273 = vmatpush.msra.mxu0 %v259_v4  ;;  %293 = vmatpush.msra.mxu1 %v260_v5  ;;  %v250_v15 = vld [vmem:[%s643_s1 + $0x88] sm:$0xff]  ;;  %v247_v16 = vld [vmem:[%s643_s1 + $0x70] sm:$0xff]  ;;  %v248_v17 = vld [vmem:[%s643_s1 + $0x78] sm:$0xff] }
  0x12   : > { %v245_v18 = vld [vmem:[%s643_s1 + $0x60] sm:$0xff]  ;;  %v246_v19 = vld [vmem:[%s643_s1 + $0x68] sm:$0xff]  ;;  %v243_v20 = vld [vmem:[%s643_s1 + $0x50] sm:$0xff] }
  0x13   : > { %274 = vmatpush.msra.mxu0 %v257_v6  ;;  %294 = vmatpush.msra.mxu1 %v258_v7  ;;  %v244_v21 = vld [vmem:[%s643_s1 + $0x58] sm:$0xff]  ;;  %v241_v22 = vld [vmem:[%s643_s1 + $0x40] sm:$0xff]  ;;  %v242_v23 = vld [vmem:[%s643_s1 + $0x48] sm:$0xff] }
  0x14   : > { %v239_v24 = vld [vmem:[%s643_s1 + $0x30] sm:$0xff]  ;;  %v240_v25 = vld [vmem:[%s643_s1 + $0x38] sm:$0xff]  ;;  %v237_v26 = vld [vmem:[%s643_s1 + $0x20] sm:$0xff] }
  0x15   : > { %275 = vmatpush.msra.mxu0 %v255_v8  ;;  %295 = vmatpush.msra.mxu1 %v256_v9  ;;  %v238_v27 = vld [vmem:[%s643_s1 + $0x28] sm:$0xff]  ;;  %v235_v28 = vld [vmem:[%s643_s1 + $0x10] sm:$0xff]  ;;  %v236_v29 = vld [vmem:[%s643_s1 + $0x18] sm:$0xff] }
  0x16   : > { %v233_v30 = vld [vmem:[%s643_s1] sm:$0xff]  ;;  %v234_v31 = vld [vmem:[%s643_s1 + $0x8] sm:$0xff] }
  0x17   : > { %276 = vmatpush.msra.mxu0 %v253_v10  ;;  %296 = vmatpush.msra.mxu1 %v254_v11  ;;  %v232_v32 = vld [vmem:[%s210_s6] sm:$0xff] }
  0x18   : > { %v265_v33 = vld [vmem:[%s644_s2] sm:$0x3] }
  0x19   : > { %277 = vmatpush.msra.mxu0 %v251_v12  ;;  %297 = vmatpush.msra.mxu1 %v252_v13  ;;  %v267_v34 = vperm.slane %v265_v33, 0  ;;  %v268_v35 = vperm.slane %v265_v33, 1 }
  0x1b   : > { %278 = vmatpush.msra.mxu0 %v249_v14  ;;  %298 = vmatpush.msra.mxu1 %v250_v15 }
  0x1d   : > { %279 = vmatpush.msra.mxu0 %v247_v16  ;;  %299 = vmatpush.msra.mxu1 %v248_v17 }
  0x1f   : > { %280 = vmatpush.msra.mxu0 %v245_v18  ;;  %300 = vmatpush.msra.mxu1 %v246_v19 }
  0x21   : > { %281 = vmatpush.msra.mxu0 %v243_v20  ;;  %301 = vmatpush.msra.mxu1 %v244_v21 }
  0x23   : > { %282 = vmatpush.msra.mxu0 %v241_v22  ;;  %302 = vmatpush.msra.mxu1 %v242_v23 }
  0x25   : > { %283 = vmatpush.msra.mxu0 %v239_v24  ;;  %303 = vmatpush.msra.mxu1 %v240_v25 }
  0x27   : > { %284 = vmatpush.msra.mxu0 %v237_v26  ;;  %304 = vmatpush.msra.mxu1 %v238_v27 }
  0x29   : > { %285 = vmatpush.msra.mxu0 %v235_v28  ;;  %305 = vmatpush.msra.mxu1 %v236_v29 }
  0x2b   : > { %286 = vmatpush.msra.mxu0 %v233_v30  ;;  %306 = vmatpush.msra.mxu1 %v234_v31 }
  0x2c   : > { %287 = vmatmul.f32.vlgmr.msra.gmra.mxu0 %v232_v32  ;;  %307 = vmatmul.f32.vlgmr.msra.gmra.mxu1 %v232_v32 }
  0xa9   : > { %v288_v36 = vpop.f32.mrf.mxu0  ;;  %v308_v37 = vpop.f32.mrf.mxu1 }
  0xaa   : > { %v289_v38 = vadd.f32 %v288_v36, %v267_v34  ;;  %v309_v39 = vadd.f32 %v308_v37, %v268_v35 }
  0xac   : > { %311 = vst [vmem:[%s230_s20] sm:$0xff] %v289_v38 }
  0xad   : > { %312 = vst [vmem:[%s230_s20 + $0x8] sm:$0xff] %v309_v39 }
  0xae PF: > { %s13_s14 = sadd.s32 1, %s480_s14   ;;  %s646_s12 = smov %s476_s13 }
  0xaf   : > { %p10_p5 = scmp.ge.s32.totalorder %s13_s14, 4   ;;  %s647_s13 = smov %s649_s15 }
  0xb1   :  { %12 = sbr.rel (!%p10_p5) target bundleno = 2 (0x2), region = 68 }

// kernel: forward.42
= control target key start
LH: loop header
LB: loop body
LE: loop exit
PB: predicated region body
PF: predicated region fallthrough
CT: control target
= control target key end

     0   :  { %s909_s9 = smov 0   ;;  %s1038_s0 = inlined_call_operand.vmem [shape: f32[2,8,128], index: 0, kind: input, shape index: {}]   ;;  %s1039_s1 = inlined_call_operand.vmem [shape: f32[2,8,256], index: 1, kind: input, shape index: {}]   ;;  %s1040_s2 = inlined_call_operand.vmem [shape: f32[2,8,128], index: 2, kind: output, shape index: {}]  }
   0x1 LB: > { %s796_s10 = sadd.s32 4294967295, %s885_s9   ;;  %p800_p0 = scmp.ge.s32.totalorder %s885_s9, 1  ;;  %s885_s9 = sphi %s909_s9, %s12_s9  }
   0x2   : > { %p121_p1 = scmp.lt.s32.totalorder %s885_s9, 3 }
   0x4   : > { %p122_p2 = pnand %p800_p0, %p121_p1 }
   0x5   : > { %p146_p3 = scmp.lt.s32.totalorder (!%p122_p2), %s796_s10, 1  ;;  %s887_s19 = smov (!%p122_p2), 112  }
   0x6   : > { %125 = sbr.rel (%p122_p2) target bundleno = 1206 (0x4b6), region = 28  ;;  %s888_s20 = smov (!%p122_p2), 96  }
   0x7   : > { %s889_s21 = smov (!%p122_p2), 80   ;;  %s890_s22 = smov (!%p122_p2), 48  }
   0x8   : > { %s891_s23 = smov (!%p122_p2), 64   ;;  %s892_s24 = smov (!%p122_p2), 32  }
   0x9   : > { %s893_s25 = smov (!%p122_p2), 16  }
   0xb   : > { %s1042_s10 = smov (!%p146_p3, %s796_s10), 1  ;;  %vm162_vm0 = vcmask 130048   ;;  %vm190_vm1 = vcmask 64512   ;;  %vm693_vm2 = vcmask 261248   ;;  %vm699_vm3 = vcmask 392448  }
   0xc   : > { %s831_s11 = sshll.u32 %s1042_s10, 4  ;;  %s801_s12 = sshll.u32 %s1042_s10, 3  ;;  %vm705_vm4 = vcmask 523648   ;;  %vm711_vm5 = vcmask 654848   ;;  %vm717_vm6 = vcmask 786048   ;;  %vm723_vm7 = vcmask 917248  }
   0xd   : > { %s924_s15 = scalar_lea.vmem %s1039_s1, %s831_s11  ;;  %s149_s18 = scalar_lea.vmem %s1038_s0, %s801_s12  ;;  %vm729_vm8 = vcmask 1048448  }
   0xe   : > { %v160_v0 = vld [vmem:[%s924_s15] sm:$0xff]  ;;  %v957_v18 = vld [vmem:[%s924_s15 + $0x8] sm:$0xff]  ;;  %s986_s28 = scalar_lea.vmem %s1040_s2, %s801_s12 }
   0xf   : > { %805 = vmatpush.xpose.msk.msra.mxu0 %vm162_vm0, %v160_v0  ;;  %v159_v1 = vld [vmem:[%s149_s18] sm:$0xff]  ;;  %227 = vrot.lane.b32.xlu1 %v160_v0, %s887_s19 }
  0x10   : > { %294 = vrot.lane.b32.xlu2 %v160_v0, %s888_s20  ;;  %220 = vmatpush.msra.mxu1 %v957_v18 }
  0x12   : > { %806 = vmatmul.msk.f32.vlgmr.msra.gmra.mxu0 %vm162_vm0, %v159_v1 }
  0x17   : > { %225 = vrot.lane.b32.xlu1 %v159_v1, %s887_s19 }
  0x18   : > { %360 = vrot.lane.b32.xlu2 %v160_v0, %s889_s21 }
  0x1f   : > { %358 = vrot.lane.b32.xlu1 %v159_v1, %s889_s21 }
  0x20   : > { %426 = vrot.lane.b32.xlu2 %v160_v0, %s891_s23 }
  0x27   : > { %492 = vrot.lane.b32.xlu1 %v160_v0, %s890_s22 }
  0x28   : > { %424 = vrot.lane.b32.xlu2 %v159_v1, %s891_s23 }
  0x2f   : > { %490 = vrot.lane.b32.xlu1 %v159_v1, %s890_s22 }
  0x30   : > { %558 = vrot.lane.b32.xlu2 %v160_v0, %s892_s24 }
  0x37   : > { %556 = vrot.lane.b32.xlu1 %v159_v1, %s892_s24 }
  0x38   : > { %622 = vrot.lane.b32.xlu2 %v159_v1, %s893_s25 }
  0x6a   : > { %v295_v2 = vpop.permute.xlu2 %294 }
  0x6b   : > { %811 = vmatpush.xpose.msk.msrb.mxu1 %vm162_vm0, %v295_v2 }
  0x72   : > { %v361_v3 = vpop.permute.xlu2 %360 }
  0x73   : > { %814 = vmatpush.xpose.msk.msrb.mxu0 %vm162_vm0, %v361_v3 }
  0x7a   : > { %v427_v25 = vpop.permute.xlu2 %426 }
  0x81   : > { %v228_v4 = vpop.permute.xlu1 %227 }
  0x82   : > { %808 = vmatpush.xpose.msk.msra.mxu2 %vm162_vm0, %v228_v4  ;;  %v425_v30 = vpop.permute.xlu2 %424 }
  0x89   : > { %v226_v5 = vpop.permute.xlu1 %225 }
  0x8a   : > { %809 = vmatmul.msk.f32.vlgmr.msra.gmra.mxu2 %vm162_vm0, %v226_v5  ;;  %v559_v33 = vpop.permute.xlu2 %558 }
  0x8f   : > { %v186_v6 = vpop.f32.mrf.mxu0 }
  0x90   : > { %v189_v7 = vmul.f32 0.25, %v186_v6 }
  0x91   : > { %v359_v8 = vpop.permute.xlu1 %358 }
  0x92   : > { %v191_v9 = vsel %vm190_vm1, %v189_v7, -inf  ;;  %815 = vmatmul.msk.f32.vlgmr.msrb.gmra.mxu0 %vm162_vm0, %v359_v8  ;;  %v623_v35 = vpop.permute.xlu2 %622 }
  0x93   : > { %192 = vmax.xlane.f32.xlu0 %v191_v9 }
  0x99   : > { %v493_v10 = vpop.permute.xlu1 %492 }
  0x9a   : > { %820 = vmatpush.xpose.msk.msra.mxu0 %vm162_vm0, %v493_v10 }
  0xa1   : > { %v491_v11 = vpop.permute.xlu1 %490 }
  0xa2   : > { %821 = vmatmul.msk.f32.vlgmr.msra.gmra.mxu0 %vm162_vm0, %v491_v11 }
  0xa7   : > { %292 = vrot.lane.b32.xlu0 %v159_v1, %s888_s20 }
  0xa9   : > { %v557_v46 = vpop.permute.xlu1 %556 }
 0x106   : > { %v193_v12 = vpop.xlane.xlu0 %192 }
 0x107   : > { %v194_v13 = vsub.f32 %v189_v7, %v193_v12 }
 0x109   : > { %v195_v14 = vmul.f32 1.442695, %v194_v13 }
 0x10b   : > { %847 = vpow2.f32 %v195_v14 }
 0x10d   : > { %v250_v21 = vpop.f32.mrf.mxu2 }
 0x10e   : > { %v253_v22 = vmul.f32 0.25, %v250_v21 }
 0x10f   : > { %v383_v17 = vpop.f32.mrf.mxu0 }
 0x110   : > { %v386_v19 = vmul.f32 0.25, %v383_v17  ;;  %v254_v23 = vsel %vm190_vm1, %v253_v22, -inf }
 0x111   : > { %v848_v15 = vpop.eup %847 }
 0x112   : > { %v197_v16 = vsel %vm190_vm1, %v848_v15, 0.0  ;;  %v387_v20 = vsel %vm190_vm1, %v386_v19, -inf }
 0x113   : > { %198 = vadd.xlane.f32.xlu0 %v197_v16  ;;  %388 = vmax.xlane.f32.xlu2 %v387_v20 }
 0x119   : > { %v293_v27 = vpop.permute.xlu0 %292 }
 0x11f   : > { %v515_v24 = vpop.f32.mrf.mxu0 }
 0x120   : > { %v518_v26 = vmul.f32 0.25, %v515_v24 }
 0x122   : > { %v519_v28 = vsel %vm190_vm1, %v518_v26, -inf }
 0x123   : > { %520 = vmax.xlane.f32.xlu2 %v519_v28 }
 0x127   : > { %624 = vrot.lane.b32.xlu0 %v160_v0, %s893_s25 }
 0x151   : > { %255 = vmax.xlane.f32.xlu0 %v254_v23 }
 0x186   : > { %v199_v29 = vpop.xlane.xlu0 %198  ;;  %v389_v36 = vpop.xlane.xlu2 %388 }
 0x187   : > { %849 = vrcp.f32 %v199_v29  ;;  %v390_v39 = vsub.f32 %v386_v19, %v389_v36 }
 0x189   : > { %v391_v41 = vmul.f32 1.442695, %v390_v39 }
 0x18d   : > { %v850_v31 = vpop.eup %849 }
 0x18e   : > { %v201_v32 = vmul.f32 %v850_v31, %v848_v15 }
 0x190   : > { %807 = vmatmul.msk.f32.vlgmr.msra.gmra.mxu1 %vm190_vm1, %v201_v32 }
 0x191   : > { %817 = vmatpush.xpose.msk.msra.mxu1 %vm162_vm0, %v427_v25 }
 0x196   : > { %v521_v47 = vpop.xlane.xlu2 %520 }
 0x197   : > { %v522_v49 = vsub.f32 %v518_v26, %v521_v47 }
 0x198   : > { %812 = vmatmul.msk.f32.vlgmr.msrb.gmra.mxu1 %vm162_vm0, %v293_v27 }
 0x199   : > { %823 = vmatpush.xpose.msk.msrb.mxu1 %vm162_vm0, %v559_v33  ;;  %v625_v34 = vpop.permute.xlu0 %624  ;;  %v523_v50 = vmul.f32 1.442695, %v522_v49 }
 0x19a   : > { %826 = vmatpush.xpose.msk.msrb.mxu0 %vm162_vm0, %v625_v34 }
 0x19d   : > { %827 = vmatmul.msk.f32.vlgmr.msrb.gmra.mxu0 %vm162_vm0, %v623_v35 }
 0x1a0   : > { %818 = vmatmul.msk.f32.vlgmr.msra.gmra.mxu1 %vm162_vm0, %v425_v30 }
 0x1a8   : > { %824 = vmatmul.msk.f32.vlgmr.msrb.gmra.mxu1 %vm162_vm0, %v557_v46 }
 0x1c4   : > { %v256_v37 = vpop.xlane.xlu0 %255 }
 0x1c5   : > { %v257_v38 = vsub.f32 %v253_v22, %v256_v37 }
 0x1c7   : > { %v258_v40 = vmul.f32 1.442695, %v257_v38 }
 0x1c9   : > { %851 = vpow2.f32 %v258_v40 }
 0x1ca   : > { %853 = vpow2.f32 %v391_v41 }
 0x1cb   : > { %855 = vpow2.f32 %v523_v50 }
 0x1cf   : > { %v852_v42 = vpop.eup %851 }
 0x1d0   : > { %v260_v43 = vsel %vm190_vm1, %v852_v42, 0.0  ;;  %v972_v44 = vpop.eup %853 }
 0x1d1   : > { %261 = vadd.xlane.f32.xlu2 %v260_v43  ;;  %v393_v45 = vsel %vm190_vm1, %v972_v44, 0.0  ;;  %v856_v54 = vpop.eup %855 }
 0x1d2   : > { %v525_v57 = vsel %vm190_vm1, %v856_v54, 0.0 }
 0x1d9   : > { %394 = vadd.xlane.f32.xlu2 %v393_v45 }
 0x1f1   : > { %332 = vrot.lane.b32.xlu2 %v957_v18, %s888_s20 }
 0x1f9   : > { %530 = vrot.lane.b32.xlu2 %v957_v18, %s890_s22 }
 0x20d   : > { %v222_v48 = vpop.f32.mrf.mxu1 }
 0x20e   : > { %688 = vst.msk [vmem:[%s986_s28] sm:$0xff] %vm162_vm0, %v222_v48 }
 0x215   : > { %v317_v51 = vpop.f32.mrf.mxu1 }
 0x216   : > { %v320_v52 = vmul.f32 0.25, %v317_v51 }
 0x218   : > { %v321_v53 = vsel %vm190_vm1, %v320_v52, -inf }
 0x219   : > { %322 = vmax.xlane.f32.xlu1 %v321_v53 }
 0x21a   : > { %v647_v58 = vpop.f32.mrf.mxu0 }
 0x21b   : > { %v650_v60 = vmul.f32 0.25, %v647_v58 }
 0x21d   : > { %v449_v55 = vpop.f32.mrf.mxu1  ;;  %v651_v61 = vsel %vm190_vm1, %v650_v60, -inf }
 0x21e   : > { %v452_v56 = vmul.f32 0.25, %v449_v55 }
 0x220   : > { %v453_v59 = vsel %vm190_vm1, %v452_v56, -inf }
 0x221   : > { %454 = vmax.xlane.f32.xlu0 %v453_v59  ;;  %526 = vadd.xlane.f32.xlu1 %v525_v57 }
 0x225   : > { %v581_v7 = vpop.f32.mrf.mxu1 }
 0x226   : > { %v584_v9 = vmul.f32 0.25, %v581_v7 }
 0x228   : > { %v585_v13 = vsel %vm190_vm1, %v584_v9, -inf }
 0x229   : > { %652 = vmax.xlane.f32.xlu0 %v651_v61 }
 0x23d   : > { %266 = vrot.lane.b32.xlu0 %v957_v18, %s887_s19 }
 0x244   : > { %v262_v63 = vpop.xlane.xlu2 %261 }
 0x245   : > { %398 = vrot.lane.b32.xlu0 %v957_v18, %s889_s21 }
 0x24c   : > { %v395_v4 = vpop.xlane.xlu2 %394 }
 0x24d   : > { %464 = vrot.lane.b32.xlu0 %v957_v18, %s891_s23 }
 0x254   : > { %v333_v12 = vpop.permute.xlu2 %332 }
 0x255   : > { %596 = vrot.lane.b32.xlu0 %v957_v18, %s892_s24 }
 0x25c   : > { %v531_v24 = vpop.permute.xlu2 %530 }
 0x28c   : > { %v323_v3 = vpop.xlane.xlu1 %322 }
 0x28d   : > { %v324_v6 = vsub.f32 %v320_v52, %v323_v3 }
 0x28f   : > { %v325_v10 = vmul.f32 1.442695, %v324_v6 }
 0x294   : > { %v455_v62 = vpop.xlane.xlu0 %454  ;;  %v527_v17 = vpop.xlane.xlu1 %526 }
 0x295   : > { %v456_v14 = vsub.f32 %v452_v56, %v455_v62 }
 0x297   : > { %v457_v19 = vmul.f32 1.442695, %v456_v14 }
 0x29c   : > { %v653_v0 = vpop.xlane.xlu0 %652 }
 0x29d   : > { %v654_v1 = vsub.f32 %v650_v60, %v653_v0 }
 0x29f   : > { %v655_v2 = vmul.f32 1.442695, %v654_v1 }
 0x2a1   : > { %857 = vpow2.f32 %v655_v2 }
 0x2a2   : > { %859 = vrcp.f32 %v262_v63 }
 0x2a3   : > { %861 = vrcp.f32 %v395_v4 }
 0x2a4   : > { %863 = vpow2.f32 %v325_v10 }
 0x2a5   : > { %865 = vrcp.f32 %v527_v17 }
 0x2a6   : > { %867 = vpow2.f32 %v457_v19 }
 0x2a7   : > { %v1002_v5 = vpop.eup %857 }
 0x2a8   : > { %v657_v8 = vsel %vm190_vm1, %v1002_v5, 0.0  ;;  %v860_v11 = vpop.eup %859 }
 0x2a9   : > { %658 = vadd.xlane.f32.xlu1 %v657_v8  ;;  %v264_v16 = vmul.f32 %v860_v11, %v852_v42  ;;  %v862_v20 = vpop.eup %861 }
 0x2aa   : > { %v864_v21 = vpop.eup %863  ;;  %v397_v23 = vmul.f32 %v862_v20, %v972_v44 }
 0x2ab   : > { %v327_v25 = vsel %vm190_vm1, %v864_v21, 0.0  ;;  %v866_v26 = vpop.eup %865 }
 0x2ac   : > { %v868_v27 = vpop.eup %867  ;;  %v529_v28 = vmul.f32 %v866_v26, %v856_v54 }
 0x2ad   : > { %v459_v29 = vsel %vm190_vm1, %v868_v27, 0.0 }
 0x2af   : > { %v267_v15 = vpop.permute.xlu0 %266 }
 0x2b0   : > { %287 = vmatpush.msra.mxu3 %v267_v15 }
 0x2b1   : > { %586 = vmax.xlane.f32.xlu1 %v585_v13  ;;  %810 = vmatmul.msk.f32.vlgmr.msra.gmra.mxu3 %vm190_vm1, %v264_v16 }
 0x2b2   : > { %353 = vmatpush.msrb.mxu3 %v333_v12 }
 0x2b7   : > { %v399_v22 = vpop.permute.xlu0 %398 }
 0x2b8   : > { %419 = vmatpush.msrb.mxu2 %v399_v22 }
 0x2b9   : > { %328 = vadd.xlane.f32.xlu1 %v327_v25  ;;  %816 = vmatmul.msk.f32.vlgmr.msrb.gmra.mxu2 %vm190_vm1, %v397_v23 }
 0x2ba   : > { %551 = vmatpush.msra.mxu2 %v531_v24 }
 0x2bf   : > { %v465_v31 = vpop.permute.xlu0 %464 }
 0x2c0   : > { %485 = vmatpush.msra.mxu3 %v465_v31 }
 0x2c1   : > { %460 = vadd.xlane.f32.xlu1 %v459_v29  ;;  %822 = vmatmul.msk.f32.vlgmr.msra.gmra.mxu2 %vm190_vm1, %v529_v28 }
 0x2c7   : > { %v597_v46 = vpop.permute.xlu0 %596 }
 0x31c   : > { %v659_v30 = vpop.xlane.xlu1 %658 }
 0x324   : > { %v587_v32 = vpop.xlane.xlu1 %586 }
 0x325   : > { %v588_v33 = vsub.f32 %v584_v9, %v587_v32 }
 0x327   : > { %v589_v34 = vmul.f32 1.442695, %v588_v33 }
 0x329   : > { %869 = vpow2.f32 %v589_v34 }
 0x32c   : > { %v329_v35 = vpop.xlane.xlu1 %328 }
 0x32d   : > { %871 = vrcp.f32 %v329_v35 }
 0x32f   : > { %v870_v36 = vpop.eup %869 }
 0x330   : > { %v591_v37 = vsel %vm190_vm1, %v870_v36, 0.0 }
 0x331   : > { %592 = vadd.xlane.f32.xlu1 %v591_v37 }
 0x333   : > { %v872_v38 = vpop.eup %871 }
 0x334   : > { %v461_v39 = vpop.xlane.xlu1 %460  ;;  %v289_v40 = vpop.f32.mrf.mxu3  ;;  %v331_v41 = vmul.f32 %v872_v38, %v864_v21 }
 0x335   : > { %873 = vrcp.f32 %v461_v39  ;;  %690 = vrot.lane.b32.xlu2 %v289_v40, %s893_s25 }
 0x336   : > { %813 = vmatmul.msk.f32.vlgmr.msrb.gmra.mxu3 %vm190_vm1, %v331_v41 }
 0x337   : > { %617 = vmatpush.msrb.mxu3 %v597_v46 }
 0x33b   : > { %v874_v42 = vpop.eup %873 }
 0x33c   : > { %v463_v43 = vmul.f32 %v874_v42, %v868_v27  ;;  %v421_v44 = vpop.f32.mrf.mxu2 }
 0x33d   : > { %702 = vrot.lane.b32.xlu2 %v421_v44, %s890_s22 }
 0x33e   : > { %819 = vmatmul.msk.f32.vlgmr.msra.gmra.mxu3 %vm190_vm1, %v463_v43 }
 0x344   : > { %v553_v45 = vpop.f32.mrf.mxu2 }
 0x345   : > { %714 = vrot.lane.b32.xlu2 %v553_v45, %s889_s21 }
 0x34a   : > { %662 = vrot.lane.b32.xlu1 %v957_v18, %s893_s25 }
 0x38f   : > { %v691_v47 = vpop.permute.xlu2 %690 }
 0x390   : > { %694 = vst.msk [vmem:[%s986_s28] sm:$0xff] %vm693_vm2, %v691_v47 }
 0x397   : > { %v703_v55 = vpop.permute.xlu2 %702 }
 0x39f   : > { %v715_v59 = vpop.permute.xlu2 %714 }
 0x3a4   : > { %v593_v48 = vpop.xlane.xlu1 %592 }
 0x3a5   : > { %875 = vrcp.f32 %v593_v48 }
 0x3a6   : > { %877 = vrcp.f32 %v659_v30 }
 0x3ab   : > { %v876_v49 = vpop.eup %875 }
 0x3ac   : > { %v595_v50 = vmul.f32 %v876_v49, %v870_v36  ;;  %v878_v51 = vpop.eup %877 }
 0x3ad   : > { %v661_v18 = vmul.f32 %v878_v51, %v1002_v5 }
 0x3ae   : > { %825 = vmatmul.msk.f32.vlgmr.msrb.gmra.mxu3 %vm190_vm1, %v595_v50 }
 0x3b9   : > { %v355_v52 = vpop.f32.mrf.mxu3 }
 0x3ba   : > { %696 = vrot.lane.b32.xlu0 %v355_v52, %s892_s24 }
 0x3bc   : > { %v663_v53 = vpop.permute.xlu1 %662 }
 0x3bd   : > { %683 = vmatpush.msrb.mxu2 %v663_v53 }
 0x3be   : > { %828 = vmatmul.msk.f32.vlgmr.msrb.gmra.mxu2 %vm190_vm1, %v661_v18 }
 0x3c1   : > { %v487_v54 = vpop.f32.mrf.mxu3 }
 0x3c2   : > { %708 = vrot.lane.b32.xlu0 %v487_v54, %s891_s23 }
 0x42c   : > { %v697_v56 = vpop.permute.xlu0 %696 }
 0x42d   : > { %700 = vst.msk [vmem:[%s986_s28] sm:$0xff] %vm699_vm3, %v697_v56 }
 0x42e   : > { %706 = vst.msk [vmem:[%s986_s28] sm:$0xff] %vm705_vm4, %v703_v55 }
 0x431   : > { %v619_v57 = vpop.f32.mrf.mxu3 }
 0x432   : > { %720 = vrot.lane.b32.xlu0 %v619_v57, %s888_s20 }
 0x434   : > { %v709_v58 = vpop.permute.xlu0 %708 }
 0x435   : > { %712 = vst.msk [vmem:[%s986_s28] sm:$0xff] %vm711_vm5, %v709_v58 }
 0x436   : > { %718 = vst.msk [vmem:[%s986_s28] sm:$0xff] %vm717_vm6, %v715_v59 }
 0x441   : > { %v685_v60 = vpop.f32.mrf.mxu2 }
 0x442   : > { %726 = vrot.lane.b32.xlu1 %v685_v60, %s887_s19 }
 0x4a4   : > { %v721_v61 = vpop.permute.xlu0 %720 }
 0x4a5   : > { %724 = vst.msk [vmem:[%s986_s28] sm:$0xff] %vm723_vm7, %v721_v61 }
 0x4b4   : > { %v727_v62 = vpop.permute.xlu1 %726 }
 0x4b5   : > { %730 = vst.msk [vmem:[%s986_s28] sm:$0xff] %vm729_vm8, %v727_v62 }
 0x4b6 PF: > { %s12_s9 = sadd.s32 1, %s885_s9  }
 0x4b7   : > { %p9_p4 = scmp.ge.s32.totalorder %s12_s9, 4  }
 0x4b9   :  { %11 = sbr.rel (!%p9_p4) target bundleno = 1 (0x1), region = 61 }

// kernel: forward.32
= control target key start
LH: loop header
LB: loop body
LE: loop exit
PB: predicated region body
PF: predicated region fallthrough
CT: control target
= control target key end

     0   :  { %13 = vsyncpa [#allocation4], 0  ;;  %s2307_s0 = inlined_call_operand.vmem [shape: f32[16,128], index: 0, kind: input, shape index: {}, may-alias: {0,5}]   ;;  %s2308_s1 = inlined_call_operand.hbm [shape: f32[128,2048], index: 1, kind: input, shape index: {}]   ;;  %s2309_s2 = inlined_call_operand.hbm [shape: f32[1,2048], index: 2, kind: input, shape index: {}]   ;;  %s2310_s3 = inlined_call_operand.hbm [shape: f32[2048,128], index: 3, kind: input, shape index: {}]   ;;  %s2311_s4 = inlined_call_operand.hbm [shape: f32[1,128], index: 4, kind: input, shape index: {}]   ;;  %s2312_s5 = inlined_call_operand.vmem [shape: f32[16,128], index: 5, kind: input, shape index: {}, may-alias: {0,5}]   ;;  %s2313_s6 = inlined_call_operand.hbm [shape: f32[1,128], index: 6, kind: input, shape index: {}]   ;;  %s2314_s7 = inlined_call_operand.hbm [shape: f32[1,128], index: 7, kind: input, shape index: {}]   ;;  %s2315_s8 = inlined_call_operand.vmem [shape: f32[16,128], index: 8, kind: output, shape index: {}]  }
   0x1   :  { %14 = vsyncpa [#allocation6], 0 }
   0x2   :  { %15 = vsyncpa [#allocation9], 0 }
   0x3   :  { %16 = vsyncpa [#allocation12], 0  ;;  %s2177_s27 = smov 0  }
   0x4 LB: > { %s257_s30 = sshll.u32 %s2309_s2, 4  ;;  %s2186_s9 = sadd.s32 4294967295, %s2120_s27   ;;  %s2120_s27 = sphi %s2177_s27, %s22_s27   ;;  %s258_s30 = int_to_ptr.hbm [resolvable:$true] %s257_s30 }
   0x5   : > { %p1818_p0 = scmp.ge.s32.totalorder %s2120_s27, 1  ;;  %p231_p1 = scmp.lt.s32.totalorder %s2120_s27, 3 }
   0x6   : > { %p1881_p2 = scmp.eq.s32.totalorder %s2186_s9, 0  ;;  %s2122_s11 = smov [#allocation5]  }
   0x7   : > { %p2191_p3 = pnand %p1818_p0, %p231_p1  ;;  %s259_s12 = sshll.u32 %s2122_s11, 4  ;;  %s260_s12 = int_to_ptr.vmem [resolvable:$true] %s259_s12 }
   0x8   : > { %s283_s15 = sshll.u32 %s2311_s4, 4  ;;  %s242_s18 = sshll.u32 %s2308_s1, 4  ;;  %s284_s15 = int_to_ptr.hbm [resolvable:$true] %s283_s15  ;;  %s243_s18 = int_to_ptr.hbm [resolvable:$true] %s242_s18 }
   0x9   : > { %p1862_p4 = pneg %p2191_p3  ;;  %s2123_s20 = smov [#allocation8]  }
   0xa   : > { %s285_s21 = sshll.u32 %s2123_s20, 4  ;;  %s2124_s22 = smov [#allocation3]   ;;  %s286_s21 = int_to_ptr.vmem [resolvable:$true] %s285_s21 }
   0xb   : > { %p2205_p5 = pnand %p1881_p2, %p1862_p4  ;;  %s244_s23 = sshll.u32 %s2124_s22, 4  ;;  %s245_s23 = int_to_ptr.vmem [resolvable:$true] %s244_s23 }
   0xc   : > { %s2125_s24 = smov 2048   ;;  %s2126_s25 = smov 128  }
   0xd   : > { %1868 = dma.hbm_to_vmem [thread:$0]  (!%p2205_p5), %s258_s30, 256, %s260_s12, [#allocation6]  }
   0xe   : > { %1874 = dma.hbm_to_vmem [thread:$0]  (!%p2205_p5), %s284_s15, 16, %s286_s21, [#allocation9]  }
   0xf   : > { %1865 = dma.hbm_to_vmem [thread:$0]  (!%p2205_p5), %s243_s18, 32768, %s245_s23, [#allocation4], %s2125_s24, %s2125_s24, %s2126_s25  }
  0x10   : > { %s268_s29 = sshll.u32 %s2310_s3, 4  ;;  %s2127_s11 = smov [#allocation7]   ;;  %s269_s29 = int_to_ptr.hbm [resolvable:$true] %s268_s29 }
  0x11   : > { %s270_s13 = sshll.u32 %s2127_s11, 4  ;;  %s2128_s30 = smov 8   ;;  %s271_s13 = int_to_ptr.vmem [resolvable:$true] %s270_s13 }
  0x12   : > { %1871 = dma.hbm_to_vmem [thread:$0]  (!%p2205_p5), %s269_s29, 32768, %s271_s13, [#allocation6], %s2126_s25, %s2126_s25, %s2128_s30  }
  0x13   : > { %s295_s15 = sshll.u32 %s2313_s6, 4  ;;  %s2129_s16 = smov [#allocation10]   ;;  %s296_s15 = int_to_ptr.hbm [resolvable:$true] %s295_s15 }
  0x14   : > { %s297_s17 = sshll.u32 %s2129_s16, 4  ;;  %s307_s21 = sshll.u32 %s2314_s7, 4  ;;  %s298_s17 = int_to_ptr.vmem [resolvable:$true] %s297_s17  ;;  %s308_s21 = int_to_ptr.hbm [resolvable:$true] %s307_s21 }
  0x15   : > { %1877 = dma.hbm_to_vmem [thread:$0]  (!%p2205_p5), %s296_s15, 16, %s298_s17, [#allocation9]  }
  0x16   : > { %s2130_s22 = smov [#allocation11]   ;;  %336 = sbr.rel (%p2191_p3) target bundleno = 713 (0x2c9), region = 52 }
  0x17   : > { %s309_s23 = sshll.u32 %s2130_s22, 4  ;;  %s310_s23 = int_to_ptr.vmem [resolvable:$true] %s309_s23 }
  0x18   : > { %1880 = dma.hbm_to_vmem [thread:$0]  (!%p2205_p5), %s308_s21, 16, %s310_s23, [#allocation12]  }
  0x1b   : > { %2103 = dma.done.wait (%p1881_p2), [#allocation4], 32768  }
  0x1c   : > { %2105 = vsyncadd (%p1881_p2), [#allocation4], 4294934528 }
  0x1d   : > { %2107 = dma.done.wait (%p1881_p2), [#allocation6], 33024  }
  0x1e   : > { %2109 = vsyncadd (%p1881_p2), [#allocation6], 4294934272 }
  0x1f   : > { %2111 = dma.done.wait (%p1881_p2), [#allocation9], 32  }
  0x20   : > { %2113 = vsyncadd (%p1881_p2), [#allocation9], 4294967264 }
  0x21   : > { %2115 = dma.done.wait (%p1881_p2), [#allocation12], 16  }
  0x22   : > { %2117 = vsyncadd (%p1881_p2), [#allocation12], 4294967280  ;;  %v651_v0 = vld [vmem:[#allocation3 + $0x780] sm:$0xff]  ;;  %v653_v1 = vld [vmem:[#allocation3 + $0x790] sm:$0xff]  ;;  %p398_p6 = scmp.lt.s32.totalorder %s2186_s9, 1 }
  0x23   : > { %v635_v2 = vld [vmem:[#allocation3 + $0x700] sm:$0xff]  ;;  %703 = vmatpush.msra.mxu0 %v651_v0  ;;  %743 = vmatpush.msra.mxu2 %v653_v1  ;;  %v652_v3 = vld [vmem:[#allocation3 + $0x788] sm:$0xff]  ;;  %v637_v4 = vld [vmem:[#allocation3 + $0x710] sm:$0xff] }
  0x24   : > { %v654_v5 = vld [vmem:[#allocation3 + $0x798] sm:$0xff]  ;;  %723 = vmatpush.msra.mxu1 %v652_v3  ;;  %v619_v6 = vld [vmem:[#allocation3 + $0x680] sm:$0xff]  ;;  %v636_v7 = vld [vmem:[#allocation3 + $0x708] sm:$0xff]  ;;  %s2319_s9 = smov (!%p398_p6, %s2186_s9), 1 }
  0x25   : > { %763 = vmatpush.msra.mxu3 %v654_v5  ;;  %v621_v8 = vld [vmem:[#allocation3 + $0x690] sm:$0xff]  ;;  %704 = vmatpush.msra.mxu0 %v635_v2  ;;  %v638_v9 = vld [vmem:[#allocation3 + $0x718] sm:$0xff]  ;;  %v620_v10 = vld [vmem:[#allocation3 + $0x688] sm:$0xff]  ;;  %s2252_s10 = sshll.u32 %s2319_s9, 3 }
  0x26   : > { %744 = vmatpush.msra.mxu2 %v637_v4  ;;  %724 = vmatpush.msra.mxu1 %v636_v7  ;;  %v603_v11 = vld [vmem:[#allocation3 + $0x600] sm:$0xff]  ;;  %v605_v12 = vld [vmem:[#allocation3 + $0x610] sm:$0xff]  ;;  %v622_v13 = vld [vmem:[#allocation3 + $0x698] sm:$0xff]  ;;  %s401_s25 = scalar_lea.vmem %s2307_s0, %s2252_s10  ;;  %s405_s28 = scalar_lea.vmem %s2312_s5, %s2252_s10 }
  0x27   : > { %764 = vmatpush.msra.mxu3 %v638_v9  ;;  %705 = vmatpush.msra.mxu0 %v619_v6  ;;  %v604_v14 = vld [vmem:[#allocation3 + $0x608] sm:$0xff]  ;;  %v606_v15 = vld [vmem:[#allocation3 + $0x618] sm:$0xff]  ;;  %v587_v16 = vld [vmem:[#allocation3 + $0x580] sm:$0xff]  ;;  %s409_s13 = scalar_lea.vmem %s2315_s8, %s2252_s10 }
  0x28   : > { %745 = vmatpush.msra.mxu2 %v621_v8  ;;  %725 = vmatpush.msra.mxu1 %v620_v10  ;;  %v589_v17 = vld [vmem:[#allocation3 + $0x590] sm:$0xff]  ;;  %v588_v18 = vld [vmem:[#allocation3 + $0x588] sm:$0xff]  ;;  %v590_v19 = vld [vmem:[#allocation3 + $0x598] sm:$0xff] }
  0x29   : > { %765 = vmatpush.msra.mxu3 %v622_v13  ;;  %706 = vmatpush.msra.mxu0 %v603_v11  ;;  %v571_v20 = vld [vmem:[#allocation3 + $0x500] sm:$0xff]  ;;  %v573_v21 = vld [vmem:[#allocation3 + $0x510] sm:$0xff]  ;;  %v572_v22 = vld [vmem:[#allocation3 + $0x508] sm:$0xff] }
  0x2a   : > { %746 = vmatpush.msra.mxu2 %v605_v12  ;;  %726 = vmatpush.msra.mxu1 %v604_v14  ;;  %v574_v23 = vld [vmem:[#allocation3 + $0x518] sm:$0xff]  ;;  %v555_v24 = vld [vmem:[#allocation3 + $0x480] sm:$0xff]  ;;  %v557_v25 = vld [vmem:[#allocation3 + $0x490] sm:$0xff] }
  0x2b   : > { %766 = vmatpush.msra.mxu3 %v606_v15  ;;  %707 = vmatpush.msra.mxu0 %v587_v16  ;;  %v556_v26 = vld [vmem:[#allocation3 + $0x488] sm:$0xff]  ;;  %v558_v27 = vld [vmem:[#allocation3 + $0x498] sm:$0xff]  ;;  %v539_v28 = vld [vmem:[#allocation3 + $0x400] sm:$0xff] }
  0x2c   : > { %747 = vmatpush.msra.mxu2 %v589_v17  ;;  %727 = vmatpush.msra.mxu1 %v588_v18  ;;  %v541_v29 = vld [vmem:[#allocation3 + $0x410] sm:$0xff]  ;;  %v540_v30 = vld [vmem:[#allocation3 + $0x408] sm:$0xff]  ;;  %v542_v31 = vld [vmem:[#allocation3 + $0x418] sm:$0xff] }
  0x2d   : > { %767 = vmatpush.msra.mxu3 %v590_v19  ;;  %708 = vmatpush.msra.mxu0 %v571_v20  ;;  %v523_v32 = vld [vmem:[#allocation3 + $0x380] sm:$0xff]  ;;  %v525_v33 = vld [vmem:[#allocation3 + $0x390] sm:$0xff]  ;;  %v524_v34 = vld [vmem:[#allocation3 + $0x388] sm:$0xff] }
  0x2e   : > { %748 = vmatpush.msra.mxu2 %v573_v21  ;;  %728 = vmatpush.msra.mxu1 %v572_v22  ;;  %v526_v35 = vld [vmem:[#allocation3 + $0x398] sm:$0xff]  ;;  %v507_v36 = vld [vmem:[#allocation3 + $0x300] sm:$0xff]  ;;  %v509_v37 = vld [vmem:[#allocation3 + $0x310] sm:$0xff] }
  0x2f   : > { %768 = vmatpush.msra.mxu3 %v574_v23  ;;  %709 = vmatpush.msra.mxu0 %v555_v24  ;;  %v508_v38 = vld [vmem:[#allocation3 + $0x308] sm:$0xff]  ;;  %v510_v39 = vld [vmem:[#allocation3 + $0x318] sm:$0xff]  ;;  %v491_v40 = vld [vmem:[#allocation3 + $0x280] sm:$0xff] }
  0x30   : > { %749 = vmatpush.msra.mxu2 %v557_v25  ;;  %729 = vmatpush.msra.mxu1 %v556_v26  ;;  %v493_v41 = vld [vmem:[#allocation3 + $0x290] sm:$0xff]  ;;  %v492_v42 = vld [vmem:[#allocation3 + $0x288] sm:$0xff]  ;;  %v494_v43 = vld [vmem:[#allocation3 + $0x298] sm:$0xff] }
  0x31   : > { %769 = vmatpush.msra.mxu3 %v558_v27  ;;  %710 = vmatpush.msra.mxu0 %v539_v28  ;;  %v475_v44 = vld [vmem:[#allocation3 + $0x200] sm:$0xff]  ;;  %v477_v45 = vld [vmem:[#allocation3 + $0x210] sm:$0xff]  ;;  %v476_v46 = vld [vmem:[#allocation3 + $0x208] sm:$0xff] }
  0x32   : > { %750 = vmatpush.msra.mxu2 %v541_v29  ;;  %730 = vmatpush.msra.mxu1 %v540_v30  ;;  %v478_v47 = vld [vmem:[#allocation3 + $0x218] sm:$0xff]  ;;  %v459_v48 = vld [vmem:[#allocation3 + $0x180] sm:$0xff]  ;;  %v461_v49 = vld [vmem:[#allocation3 + $0x190] sm:$0xff] }
  0x33   : > { %770 = vmatpush.msra.mxu3 %v542_v31  ;;  %711 = vmatpush.msra.mxu0 %v523_v32  ;;  %v460_v50 = vld [vmem:[#allocation3 + $0x188] sm:$0xff]  ;;  %v462_v51 = vld [vmem:[#allocation3 + $0x198] sm:$0xff]  ;;  %v443_v52 = vld [vmem:[#allocation3 + $0x100] sm:$0xff] }
  0x34   : > { %751 = vmatpush.msra.mxu2 %v525_v33  ;;  %731 = vmatpush.msra.mxu1 %v524_v34  ;;  %v445_v53 = vld [vmem:[#allocation3 + $0x110] sm:$0xff]  ;;  %v444_v54 = vld [vmem:[#allocation3 + $0x108] sm:$0xff]  ;;  %v446_v55 = vld [vmem:[#allocation3 + $0x118] sm:$0xff] }
  0x35   : > { %771 = vmatpush.msra.mxu3 %v526_v35  ;;  %712 = vmatpush.msra.mxu0 %v507_v36  ;;  %v427_v56 = vld [vmem:[#allocation3 + $0x80] sm:$0xff]  ;;  %v429_v57 = vld [vmem:[#allocation3 + $0x90] sm:$0xff]  ;;  %v428_v58 = vld [vmem:[#allocation3 + $0x88] sm:$0xff] }
  0x36   : > { %752 = vmatpush.msra.mxu2 %v509_v37  ;;  %732 = vmatpush.msra.mxu1 %v508_v38  ;;  %v430_v59 = vld [vmem:[#allocation3 + $0x98] sm:$0xff]  ;;  %v411_v60 = vld [vmem:[#allocation3] sm:$0xff]  ;;  %v413_v61 = vld [vmem:[#allocation3 + $0x10] sm:$0xff] }
  0x37   : > { %772 = vmatpush.msra.mxu3 %v510_v39  ;;  %713 = vmatpush.msra.mxu0 %v491_v40  ;;  %v655_v62 = vld [vmem:[#allocation3 + $0x7a0] sm:$0xff]  ;;  %v657_v63 = vld [vmem:[#allocation3 + $0x7b0] sm:$0xff]  ;;  %v412_v0 = vld [vmem:[#allocation3 + $0x8] sm:$0xff] }
  0x38   : > { %753 = vmatpush.msra.mxu2 %v493_v41  ;;  %733 = vmatpush.msra.mxu1 %v492_v42  ;;  %v414_v1 = vld [vmem:[#allocation3 + $0x18] sm:$0xff]  ;;  %v639_v2 = vld [vmem:[#allocation3 + $0x720] sm:$0xff]  ;;  %v656_v3 = vld [vmem:[#allocation3 + $0x7a8] sm:$0xff] }
  0x39   : > { %773 = vmatpush.msra.mxu3 %v494_v43  ;;  %714 = vmatpush.msra.mxu0 %v475_v44  ;;  %v641_v4 = vld [vmem:[#allocation3 + $0x730] sm:$0xff]  ;;  %v658_v5 = vld [vmem:[#allocation3 + $0x7b8] sm:$0xff]  ;;  %v623_v6 = vld [vmem:[#allocation3 + $0x6a0] sm:$0xff] }
  0x3a   : > { %754 = vmatpush.msra.mxu2 %v477_v45  ;;  %734 = vmatpush.msra.mxu1 %v476_v46  ;;  %v640_v7 = vld [vmem:[#allocation3 + $0x728] sm:$0xff]  ;;  %v625_v8 = vld [vmem:[#allocation3 + $0x6b0] sm:$0xff]  ;;  %v642_v9 = vld [vmem:[#allocation3 + $0x738] sm:$0xff] }
  0x3b   : > { %774 = vmatpush.msra.mxu3 %v478_v47  ;;  %715 = vmatpush.msra.mxu0 %v459_v48  ;;  %v607_v10 = vld [vmem:[#allocation3 + $0x620] sm:$0xff]  ;;  %v624_v11 = vld [vmem:[#allocation3 + $0x6a8] sm:$0xff]  ;;  %v609_v12 = vld [vmem:[#allocation3 + $0x630] sm:$0xff] }
  0x3c   : > { %755 = vmatpush.msra.mxu2 %v461_v49  ;;  %735 = vmatpush.msra.mxu1 %v460_v50  ;;  %v626_v13 = vld [vmem:[#allocation3 + $0x6b8] sm:$0xff]  ;;  %v591_v14 = vld [vmem:[#allocation3 + $0x5a0] sm:$0xff]  ;;  %v608_v15 = vld [vmem:[#allocation3 + $0x628] sm:$0xff] }
  0x3d   : > { %775 = vmatpush.msra.mxu3 %v462_v51  ;;  %716 = vmatpush.msra.mxu0 %v443_v52  ;;  %v593_v16 = vld [vmem:[#allocation3 + $0x5b0] sm:$0xff]  ;;  %v610_v17 = vld [vmem:[#allocation3 + $0x638] sm:$0xff]  ;;  %v575_v18 = vld [vmem:[#allocation3 + $0x520] sm:$0xff] }
  0x3e   : > { %756 = vmatpush.msra.mxu2 %v445_v53  ;;  %736 = vmatpush.msra.mxu1 %v444_v54  ;;  %v592_v19 = vld [vmem:[#allocation3 + $0x5a8] sm:$0xff]  ;;  %v577_v20 = vld [vmem:[#allocation3 + $0x530] sm:$0xff]  ;;  %v594_v21 = vld [vmem:[#allocation3 + $0x5b8] sm:$0xff] }
  0x3f   : > { %776 = vmatpush.msra.mxu3 %v446_v55  ;;  %717 = vmatpush.msra.mxu0 %v427_v56  ;;  %v559_v22 = vld [vmem:[#allocation3 + $0x4a0] sm:$0xff]  ;;  %v576_v23 = vld [vmem:[#allocation3 + $0x528] sm:$0xff]  ;;  %v561_v24 = vld [vmem:[#allocation3 + $0x4b0] sm:$0xff] }
  0x40   : > { %757 = vmatpush.msra.mxu2 %v429_v57  ;;  %737 = vmatpush.msra.mxu1 %v428_v58  ;;  %v578_v25 = vld [vmem:[#allocation3 + $0x538] sm:$0xff]  ;;  %v543_v26 = vld [vmem:[#allocation3 + $0x420] sm:$0xff]  ;;  %v560_v27 = vld [vmem:[#allocation3 + $0x4a8] sm:$0xff] }
  0x41   : > { %777 = vmatpush.msra.mxu3 %v430_v59  ;;  %718 = vmatpush.msra.mxu0 %v411_v60  ;;  %v545_v28 = vld [vmem:[#allocation3 + $0x430] sm:$0xff]  ;;  %v562_v29 = vld [vmem:[#allocation3 + $0x4b8] sm:$0xff]  ;;  %v527_v30 = vld [vmem:[#allocation3 + $0x3a0] sm:$0xff] }
  0x42   : > { %758 = vmatpush.msra.mxu2 %v413_v61  ;;  %738 = vmatpush.msra.mxu1 %v412_v0  ;;  %v544_v31 = vld [vmem:[#allocation3 + $0x428] sm:$0xff]  ;;  %v529_v32 = vld [vmem:[#allocation3 + $0x3b0] sm:$0xff]  ;;  %v546_v33 = vld [vmem:[#allocation3 + $0x438] sm:$0xff] }
  0x43   : > { %783 = vmatpush.msrb.mxu0 %v655_v62  ;;  %778 = vmatpush.msra.mxu3 %v414_v1  ;;  %v511_v34 = vld [vmem:[#allocation3 + $0x320] sm:$0xff]  ;;  %v528_v35 = vld [vmem:[#allocation3 + $0x3a8] sm:$0xff]  ;;  %v513_v36 = vld [vmem:[#allocation3 + $0x330] sm:$0xff] }
  0x44   : > { %823 = vmatpush.msrb.mxu2 %v657_v63  ;;  %803 = vmatpush.msrb.mxu1 %v656_v3  ;;  %v530_v37 = vld [vmem:[#allocation3 + $0x3b8] sm:$0xff]  ;;  %v495_v38 = vld [vmem:[#allocation3 + $0x2a0] sm:$0xff]  ;;  %v512_v39 = vld [vmem:[#allocation3 + $0x328] sm:$0xff] }
  0x45   : > { %784 = vmatpush.msrb.mxu0 %v639_v2  ;;  %843 = vmatpush.msrb.mxu3 %v658_v5  ;;  %v497_v40 = vld [vmem:[#allocation3 + $0x2b0] sm:$0xff]  ;;  %v514_v41 = vld [vmem:[#allocation3 + $0x338] sm:$0xff]  ;;  %v479_v42 = vld [vmem:[#allocation3 + $0x220] sm:$0xff] }
  0x46   : > { %824 = vmatpush.msrb.mxu2 %v641_v4  ;;  %804 = vmatpush.msrb.mxu1 %v640_v7  ;;  %v496_v43 = vld [vmem:[#allocation3 + $0x2a8] sm:$0xff]  ;;  %v481_v44 = vld [vmem:[#allocation3 + $0x230] sm:$0xff]  ;;  %v498_v45 = vld [vmem:[#allocation3 + $0x2b8] sm:$0xff] }
  0x47   : > { %785 = vmatpush.msrb.mxu0 %v623_v6  ;;  %844 = vmatpush.msrb.mxu3 %v642_v9  ;;  %v463_v46 = vld [vmem:[#allocation3 + $0x1a0] sm:$0xff]  ;;  %v480_v47 = vld [vmem:[#allocation3 + $0x228] sm:$0xff]  ;;  %v465_v48 = vld [vmem:[#allocation3 + $0x1b0] sm:$0xff] }
  0x48   : > { %825 = vmatpush.msrb.mxu2 %v625_v8  ;;  %805 = vmatpush.msrb.mxu1 %v624_v11  ;;  %v482_v49 = vld [vmem:[#allocation3 + $0x238] sm:$0xff]  ;;  %v447_v50 = vld [vmem:[#allocation3 + $0x120] sm:$0xff]  ;;  %v464_v51 = vld [vmem:[#allocation3 + $0x1a8] sm:$0xff] }
  0x49   : > { %786 = vmatpush.msrb.mxu0 %v607_v10  ;;  %845 = vmatpush.msrb.mxu3 %v626_v13  ;;  %v449_v52 = vld [vmem:[#allocation3 + $0x130] sm:$0xff]  ;;  %v466_v53 = vld [vmem:[#allocation3 + $0x1b8] sm:$0xff]  ;;  %v431_v54 = vld [vmem:[#allocation3 + $0xa0] sm:$0xff] }
  0x4a   : > { %826 = vmatpush.msrb.mxu2 %v609_v12  ;;  %806 = vmatpush.msrb.mxu1 %v608_v15  ;;  %v448_v55 = vld [vmem:[#allocation3 + $0x128] sm:$0xff]  ;;  %v433_v56 = vld [vmem:[#allocation3 + $0xb0] sm:$0xff]  ;;  %v450_v57 = vld [vmem:[#allocation3 + $0x138] sm:$0xff] }
  0x4b   : > { %787 = vmatpush.msrb.mxu0 %v591_v14  ;;  %846 = vmatpush.msrb.mxu3 %v610_v17  ;;  %v415_v58 = vld [vmem:[#allocation3 + $0x20] sm:$0xff]  ;;  %v432_v59 = vld [vmem:[#allocation3 + $0xa8] sm:$0xff]  ;;  %v417_v60 = vld [vmem:[#allocation3 + $0x30] sm:$0xff] }
  0x4c   : > { %827 = vmatpush.msrb.mxu2 %v593_v16  ;;  %807 = vmatpush.msrb.mxu1 %v592_v19  ;;  %v434_v61 = vld [vmem:[#allocation3 + $0xb8] sm:$0xff]  ;;  %v2258_v62 = vld [vmem:[%s401_s25] sm:$0xff]  ;;  %v661_v0 = vld [vmem:[#allocation3 + $0x7d0] sm:$0xff] }
  0x4d   : > { %788 = vmatpush.msrb.mxu0 %v575_v18  ;;  %847 = vmatpush.msrb.mxu3 %v594_v21  ;;  %v659_v63 = vld [vmem:[#allocation3 + $0x7c0] sm:$0xff]  ;;  %v416_v1 = vld [vmem:[#allocation3 + $0x28] sm:$0xff]  ;;  %v418_v2 = vld [vmem:[#allocation3 + $0x38] sm:$0xff] }
  0x4e   : > { %828 = vmatpush.msrb.mxu2 %v577_v20  ;;  %808 = vmatpush.msrb.mxu1 %v576_v23  ;;  %v643_v3 = vld [vmem:[#allocation3 + $0x740] sm:$0xff]  ;;  %v660_v4 = vld [vmem:[#allocation3 + $0x7c8] sm:$0xff]  ;;  %v645_v5 = vld [vmem:[#allocation3 + $0x750] sm:$0xff] }
  0x4f   : > { %789 = vmatpush.msrb.mxu0 %v559_v22  ;;  %848 = vmatpush.msrb.mxu3 %v578_v25  ;;  %v662_v6 = vld [vmem:[#allocation3 + $0x7d8] sm:$0xff]  ;;  %v627_v7 = vld [vmem:[#allocation3 + $0x6c0] sm:$0xff]  ;;  %v644_v8 = vld [vmem:[#allocation3 + $0x748] sm:$0xff] }
  0x50   : > { %829 = vmatpush.msrb.mxu2 %v561_v24  ;;  %809 = vmatpush.msrb.mxu1 %v560_v27  ;;  %v629_v9 = vld [vmem:[#allocation3 + $0x6d0] sm:$0xff]  ;;  %v646_v10 = vld [vmem:[#allocation3 + $0x758] sm:$0xff]  ;;  %v611_v11 = vld [vmem:[#allocation3 + $0x640] sm:$0xff] }
  0x51   : > { %790 = vmatpush.msrb.mxu0 %v543_v26  ;;  %849 = vmatpush.msrb.mxu3 %v562_v29  ;;  %v628_v12 = vld [vmem:[#allocation3 + $0x6c8] sm:$0xff]  ;;  %v613_v13 = vld [vmem:[#allocation3 + $0x650] sm:$0xff]  ;;  %v630_v14 = vld [vmem:[#allocation3 + $0x6d8] sm:$0xff] }
  0x52   : > { %830 = vmatpush.msrb.mxu2 %v545_v28  ;;  %810 = vmatpush.msrb.mxu1 %v544_v31  ;;  %v595_v15 = vld [vmem:[#allocation3 + $0x5c0] sm:$0xff]  ;;  %v612_v16 = vld [vmem:[#allocation3 + $0x648] sm:$0xff]  ;;  %v597_v17 = vld [vmem:[#allocation3 + $0x5d0] sm:$0xff] }
  0x53   : > { %791 = vmatpush.msrb.mxu0 %v527_v30  ;;  %850 = vmatpush.msrb.mxu3 %v546_v33  ;;  %v614_v18 = vld [vmem:[#allocation3 + $0x658] sm:$0xff]  ;;  %v579_v19 = vld [vmem:[#allocation3 + $0x540] sm:$0xff]  ;;  %v596_v20 = vld [vmem:[#allocation3 + $0x5c8] sm:$0xff] }
  0x54   : > { %831 = vmatpush.msrb.mxu2 %v529_v32  ;;  %811 = vmatpush.msrb.mxu1 %v528_v35  ;;  %v581_v21 = vld [vmem:[#allocation3 + $0x550] sm:$0xff]  ;;  %v598_v22 = vld [vmem:[#allocation3 + $0x5d8] sm:$0xff]  ;;  %v563_v23 = vld [vmem:[#allocation3 + $0x4c0] sm:$0xff] }
  0x55   : > { %792 = vmatpush.msrb.mxu0 %v511_v34  ;;  %851 = vmatpush.msrb.mxu3 %v530_v37  ;;  %v580_v24 = vld [vmem:[#allocation3 + $0x548] sm:$0xff]  ;;  %v565_v25 = vld [vmem:[#allocation3 + $0x4d0] sm:$0xff]  ;;  %v582_v26 = vld [vmem:[#allocation3 + $0x558] sm:$0xff] }
  0x56   : > { %832 = vmatpush.msrb.mxu2 %v513_v36  ;;  %812 = vmatpush.msrb.mxu1 %v512_v39  ;;  %v547_v27 = vld [vmem:[#allocation3 + $0x440] sm:$0xff]  ;;  %v564_v28 = vld [vmem:[#allocation3 + $0x4c8] sm:$0xff]  ;;  %v549_v29 = vld [vmem:[#allocation3 + $0x450] sm:$0xff] }
  0x57   : > { %793 = vmatpush.msrb.mxu0 %v495_v38  ;;  %852 = vmatpush.msrb.mxu3 %v514_v41  ;;  %v566_v30 = vld [vmem:[#allocation3 + $0x4d8] sm:$0xff]  ;;  %v548_v31 = vld [vmem:[#allocation3 + $0x448] sm:$0xff]  ;;  %v531_v32 = vld [vmem:[#allocation3 + $0x3c0] sm:$0xff] }
  0x58   : > { %833 = vmatpush.msrb.mxu2 %v497_v40  ;;  %813 = vmatpush.msrb.mxu1 %v496_v43  ;;  %v533_v33 = vld [vmem:[#allocation3 + $0x3d0] sm:$0xff]  ;;  %v550_v34 = vld [vmem:[#allocation3 + $0x458] sm:$0xff]  ;;  %v515_v35 = vld [vmem:[#allocation3 + $0x340] sm:$0xff] }
  0x59   : > { %794 = vmatpush.msrb.mxu0 %v479_v42  ;;  %853 = vmatpush.msrb.mxu3 %v498_v45  ;;  %v532_v36 = vld [vmem:[#allocation3 + $0x3c8] sm:$0xff]  ;;  %v517_v37 = vld [vmem:[#allocation3 + $0x350] sm:$0xff]  ;;  %v534_v38 = vld [vmem:[#allocation3 + $0x3d8] sm:$0xff] }
  0x5a   : > { %834 = vmatpush.msrb.mxu2 %v481_v44  ;;  %814 = vmatpush.msrb.mxu1 %v480_v47  ;;  %v499_v39 = vld [vmem:[#allocation3 + $0x2c0] sm:$0xff]  ;;  %v516_v40 = vld [vmem:[#allocation3 + $0x348] sm:$0xff]  ;;  %v501_v41 = vld [vmem:[#allocation3 + $0x2d0] sm:$0xff] }
  0x5b   : > { %795 = vmatpush.msrb.mxu0 %v463_v46  ;;  %854 = vmatpush.msrb.mxu3 %v482_v49  ;;  %v518_v42 = vld [vmem:[#allocation3 + $0x358] sm:$0xff]  ;;  %v483_v43 = vld [vmem:[#allocation3 + $0x240] sm:$0xff]  ;;  %v500_v44 = vld [vmem:[#allocation3 + $0x2c8] sm:$0xff] }
  0x5c   : > { %835 = vmatpush.msrb.mxu2 %v465_v48  ;;  %815 = vmatpush.msrb.mxu1 %v464_v51  ;;  %v485_v45 = vld [vmem:[#allocation3 + $0x250] sm:$0xff]  ;;  %v502_v46 = vld [vmem:[#allocation3 + $0x2d8] sm:$0xff]  ;;  %v467_v47 = vld [vmem:[#allocation3 + $0x1c0] sm:$0xff] }
  0x5d   : > { %796 = vmatpush.msrb.mxu0 %v447_v50  ;;  %855 = vmatpush.msrb.mxu3 %v466_v53  ;;  %v484_v48 = vld [vmem:[#allocation3 + $0x248] sm:$0xff]  ;;  %v469_v49 = vld [vmem:[#allocation3 + $0x1d0] sm:$0xff]  ;;  %v486_v50 = vld [vmem:[#allocation3 + $0x258] sm:$0xff] }
  0x5e   : > { %836 = vmatpush.msrb.mxu2 %v449_v52  ;;  %816 = vmatpush.msrb.mxu1 %v448_v55  ;;  %v451_v51 = vld [vmem:[#allocation3 + $0x140] sm:$0xff]  ;;  %v468_v52 = vld [vmem:[#allocation3 + $0x1c8] sm:$0xff]  ;;  %v453_v53 = vld [vmem:[#allocation3 + $0x150] sm:$0xff] }
  0x5f   : > { %797 = vmatpush.msrb.mxu0 %v431_v54  ;;  %856 = vmatpush.msrb.mxu3 %v450_v57  ;;  %v470_v54 = vld [vmem:[#allocation3 + $0x1d8] sm:$0xff]  ;;  %v435_v55 = vld [vmem:[#allocation3 + $0xc0] sm:$0xff]  ;;  %v437_v57 = vld [vmem:[#allocation3 + $0xd0] sm:$0xff] }
  0x60   : > { %837 = vmatpush.msrb.mxu2 %v433_v56  ;;  %817 = vmatpush.msrb.mxu1 %v432_v59  ;;  %v452_v56 = vld [vmem:[#allocation3 + $0x148] sm:$0xff]  ;;  %v419_v59 = vld [vmem:[#allocation3 + $0x40] sm:$0xff] }
  0x61   : > { %798 = vmatpush.msrb.mxu0 %v415_v58  ;;  %857 = vmatpush.msrb.mxu3 %v434_v61  ;;  %v454_v58 = vld [vmem:[#allocation3 + $0x158] sm:$0xff]  ;;  %v421_v61 = vld [vmem:[#allocation3 + $0x50] sm:$0xff] }
  0x62   : > { %838 = vmatpush.msrb.mxu2 %v417_v60  ;;  %719 = vmatmul.f32.vlgmr.msra.gmra.mxu0 %v2258_v62  ;;  %v436_v60 = vld [vmem:[#allocation3 + $0xc8] sm:$0xff] }
  0x63   : > { %759 = vmatmul.f32.vlgmr.msra.gmra.mxu2 %v2258_v62  ;;  %863 = vmatpush.msra.mxu0 %v659_v63  ;;  %v438_v63 = vld [vmem:[#allocation3 + $0xd8] sm:$0xff] }
  0x64   : > { %903 = vmatpush.msra.mxu2 %v661_v0  ;;  %818 = vmatpush.msrb.mxu1 %v416_v1  ;;  %v663_v0 = vld [vmem:[#allocation3 + $0x7e0] sm:$0xff]  ;;  %v665_v1 = vld [vmem:[#allocation3 + $0x7f0] sm:$0xff] }
  0x65   : > { %858 = vmatpush.msrb.mxu3 %v418_v2  ;;  %739 = vmatmul.f32.vlgmr.msra.gmra.mxu1 %v2258_v62  ;;  %v420_v2 = vld [vmem:[#allocation3 + $0x48] sm:$0xff] }
  0x66   : > { %779 = vmatmul.f32.vlgmr.msra.gmra.mxu3 %v2258_v62  ;;  %864 = vmatpush.msra.mxu0 %v643_v3  ;;  %v422_v3 = vld [vmem:[#allocation3 + $0x58] sm:$0xff] }
  0x67   : > { %883 = vmatpush.msra.mxu1 %v660_v4  ;;  %904 = vmatpush.msra.mxu2 %v645_v5  ;;  %v647_v4 = vld [vmem:[#allocation3 + $0x760] sm:$0xff]  ;;  %v664_v5 = vld [vmem:[#allocation3 + $0x7e8] sm:$0xff] }
  0x68   : > { %923 = vmatpush.msra.mxu3 %v662_v6  ;;  %865 = vmatpush.msra.mxu0 %v627_v7  ;;  %v649_v6 = vld [vmem:[#allocation3 + $0x770] sm:$0xff]  ;;  %v666_v7 = vld [vmem:[#allocation3 + $0x7f8] sm:$0xff] }
  0x69   : > { %884 = vmatpush.msra.mxu1 %v644_v8  ;;  %905 = vmatpush.msra.mxu2 %v629_v9  ;;  %v631_v8 = vld [vmem:[#allocation3 + $0x6e0] sm:$0xff]  ;;  %v648_v9 = vld [vmem:[#allocation3 + $0x768] sm:$0xff] }
  0x6a   : > { %924 = vmatpush.msra.mxu3 %v646_v10  ;;  %866 = vmatpush.msra.mxu0 %v611_v11  ;;  %v633_v10 = vld [vmem:[#allocation3 + $0x6f0] sm:$0xff]  ;;  %v650_v11 = vld [vmem:[#allocation3 + $0x778] sm:$0xff] }
  0x6b   : > { %885 = vmatpush.msra.mxu1 %v628_v12  ;;  %906 = vmatpush.msra.mxu2 %v613_v13  ;;  %v615_v12 = vld [vmem:[#allocation3 + $0x660] sm:$0xff]  ;;  %v632_v13 = vld [vmem:[#allocation3 + $0x6e8] sm:$0xff] }
  0x6c   : > { %925 = vmatpush.msra.mxu3 %v630_v14  ;;  %839 = vmatmul.f32.vlgmr.msrb.gmra.mxu2 %v2258_v62  ;;  %v617_v14 = vld [vmem:[#allocation3 + $0x670] sm:$0xff] }
  0x6d   : > { %867 = vmatpush.msra.mxu0 %v595_v15  ;;  %886 = vmatpush.msra.mxu1 %v612_v16  ;;  %v634_v15 = vld [vmem:[#allocation3 + $0x6f8] sm:$0xff]  ;;  %v599_v16 = vld [vmem:[#allocation3 + $0x5e0] sm:$0xff] }
  0x6e   : > { %907 = vmatpush.msra.mxu2 %v597_v17  ;;  %926 = vmatpush.msra.mxu3 %v614_v18  ;;  %v616_v17 = vld [vmem:[#allocation3 + $0x668] sm:$0xff]  ;;  %v601_v18 = vld [vmem:[#allocation3 + $0x5f0] sm:$0xff] }
  0x6f   : > { %868 = vmatpush.msra.mxu0 %v579_v19  ;;  %859 = vmatmul.f32.vlgmr.msrb.gmra.mxu3 %v2258_v62  ;;  %v618_v19 = vld [vmem:[#allocation3 + $0x678] sm:$0xff] }
  0x70   : > { %887 = vmatpush.msra.mxu1 %v596_v20  ;;  %908 = vmatpush.msra.mxu2 %v581_v21  ;;  %v583_v20 = vld [vmem:[#allocation3 + $0x560] sm:$0xff]  ;;  %v600_v21 = vld [vmem:[#allocation3 + $0x5e8] sm:$0xff] }
  0x71   : > { %927 = vmatpush.msra.mxu3 %v598_v22  ;;  %869 = vmatpush.msra.mxu0 %v563_v23  ;;  %v585_v22 = vld [vmem:[#allocation3 + $0x570] sm:$0xff]  ;;  %v602_v23 = vld [vmem:[#allocation3 + $0x5f8] sm:$0xff] }
  0x72   : > { %888 = vmatpush.msra.mxu1 %v580_v24  ;;  %909 = vmatpush.msra.mxu2 %v565_v25  ;;  %v567_v24 = vld [vmem:[#allocation3 + $0x4e0] sm:$0xff]  ;;  %v584_v25 = vld [vmem:[#allocation3 + $0x568] sm:$0xff] }
  0x73   : > { %928 = vmatpush.msra.mxu3 %v582_v26  ;;  %870 = vmatpush.msra.mxu0 %v547_v27  ;;  %v569_v26 = vld [vmem:[#allocation3 + $0x4f0] sm:$0xff]  ;;  %v586_v27 = vld [vmem:[#allocation3 + $0x578] sm:$0xff] }
  0x74   : > { %889 = vmatpush.msra.mxu1 %v564_v28  ;;  %910 = vmatpush.msra.mxu2 %v549_v29  ;;  %v551_v28 = vld [vmem:[#allocation3 + $0x460] sm:$0xff]  ;;  %v568_v29 = vld [vmem:[#allocation3 + $0x4e8] sm:$0xff] }
  0x75   : > { %929 = vmatpush.msra.mxu3 %v566_v30  ;;  %799 = vmatmul.f32.vlgmr.msrb.gmra.mxu0 %v2258_v62  ;;  %v553_v30 = vld [vmem:[#allocation3 + $0x470] sm:$0xff] }
  0x76   : > { %890 = vmatpush.msra.mxu1 %v548_v31  ;;  %871 = vmatpush.msra.mxu0 %v531_v32  ;;  %v570_v31 = vld [vmem:[#allocation3 + $0x4f8] sm:$0xff]  ;;  %v535_v32 = vld [vmem:[#allocation3 + $0x3e0] sm:$0xff] }
  0x77   : > { %911 = vmatpush.msra.mxu2 %v533_v33  ;;  %930 = vmatpush.msra.mxu3 %v550_v34  ;;  %v552_v33 = vld [vmem:[#allocation3 + $0x468] sm:$0xff]  ;;  %v537_v34 = vld [vmem:[#allocation3 + $0x3f0] sm:$0xff] }
  0x78   : > { %819 = vmatmul.f32.vlgmr.msrb.gmra.mxu1 %v2258_v62  ;;  %872 = vmatpush.msra.mxu0 %v515_v35  ;;  %v554_v35 = vld [vmem:[#allocation3 + $0x478] sm:$0xff] }
  0x79   : > { %891 = vmatpush.msra.mxu1 %v532_v36  ;;  %912 = vmatpush.msra.mxu2 %v517_v37  ;;  %v519_v36 = vld [vmem:[#allocation3 + $0x360] sm:$0xff]  ;;  %v536_v37 = vld [vmem:[#allocation3 + $0x3e8] sm:$0xff] }
  0x7a   : > { %931 = vmatpush.msra.mxu3 %v534_v38  ;;  %873 = vmatpush.msra.mxu0 %v499_v39  ;;  %v521_v38 = vld [vmem:[#allocation3 + $0x370] sm:$0xff]  ;;  %v538_v39 = vld [vmem:[#allocation3 + $0x3f8] sm:$0xff] }
  0x7b   : > { %892 = vmatpush.msra.mxu1 %v516_v40  ;;  %913 = vmatpush.msra.mxu2 %v501_v41  ;;  %v503_v40 = vld [vmem:[#allocation3 + $0x2e0] sm:$0xff]  ;;  %v520_v41 = vld [vmem:[#allocation3 + $0x368] sm:$0xff] }
  0x7c   : > { %932 = vmatpush.msra.mxu3 %v518_v42  ;;  %874 = vmatpush.msra.mxu0 %v483_v43  ;;  %v505_v42 = vld [vmem:[#allocation3 + $0x2f0] sm:$0xff]  ;;  %v522_v43 = vld [vmem:[#allocation3 + $0x378] sm:$0xff] }
  0x7d   : > { %893 = vmatpush.msra.mxu1 %v500_v44  ;;  %914 = vmatpush.msra.mxu2 %v485_v45  ;;  %v487_v44 = vld [vmem:[#allocation3 + $0x260] sm:$0xff]  ;;  %v504_v45 = vld [vmem:[#allocation3 + $0x2e8] sm:$0xff] }
  0x7e   : > { %933 = vmatpush.msra.mxu3 %v502_v46  ;;  %875 = vmatpush.msra.mxu0 %v467_v47  ;;  %v489_v46 = vld [vmem:[#allocation3 + $0x270] sm:$0xff]  ;;  %v506_v47 = vld [vmem:[#allocation3 + $0x2f8] sm:$0xff] }
  0x7f   : > { %894 = vmatpush.msra.mxu1 %v484_v48  ;;  %915 = vmatpush.msra.mxu2 %v469_v49  ;;  %v471_v48 = vld [vmem:[#allocation3 + $0x1e0] sm:$0xff]  ;;  %v488_v49 = vld [vmem:[#allocation3 + $0x268] sm:$0xff] }
  0x80   : > { %934 = vmatpush.msra.mxu3 %v486_v50  ;;  %876 = vmatpush.msra.mxu0 %v451_v51  ;;  %v473_v50 = vld [vmem:[#allocation3 + $0x1f0] sm:$0xff]  ;;  %v490_v51 = vld [vmem:[#allocation3 + $0x278] sm:$0xff] }
  0x81   : > { %895 = vmatpush.msra.mxu1 %v468_v52  ;;  %916 = vmatpush.msra.mxu2 %v453_v53  ;;  %v455_v52 = vld [vmem:[#allocation3 + $0x160] sm:$0xff]  ;;  %v472_v53 = vld [vmem:[#allocation3 + $0x1e8] sm:$0xff] }
  0x82   : > { %935 = vmatpush.msra.mxu3 %v470_v54  ;;  %877 = vmatpush.msra.mxu0 %v435_v55  ;;  %v457_v54 = vld [vmem:[#allocation3 + $0x170] sm:$0xff]  ;;  %v474_v55 = vld [vmem:[#allocation3 + $0x1f8] sm:$0xff] }
  0x83   : > { %896 = vmatpush.msra.mxu1 %v452_v56  ;;  %917 = vmatpush.msra.mxu2 %v437_v57  ;;  %v439_v56 = vld [vmem:[#allocation3 + $0xe0] sm:$0xff]  ;;  %v456_v57 = vld [vmem:[#allocation3 + $0x168] sm:$0xff] }
  0x84   : > { %936 = vmatpush.msra.mxu3 %v454_v58  ;;  %878 = vmatpush.msra.mxu0 %v419_v59  ;;  %v441_v58 = vld [vmem:[#allocation3 + $0xf0] sm:$0xff]  ;;  %v458_v59 = vld [vmem:[#allocation3 + $0x178] sm:$0xff] }
  0x85   : > { %897 = vmatpush.msra.mxu1 %v436_v60  ;;  %918 = vmatpush.msra.mxu2 %v421_v61  ;;  %v423_v60 = vld [vmem:[#allocation3 + $0x60] sm:$0xff]  ;;  %v440_v61 = vld [vmem:[#allocation3 + $0xe8] sm:$0xff] }
  0x86   : > { %937 = vmatpush.msra.mxu3 %v438_v63  ;;  %879 = vmatmul.f32.vlgmr.msra.gmra.mxu0 %v2258_v62  ;;  %v425_v63 = vld [vmem:[#allocation3 + $0x70] sm:$0xff] }
  0x87   : > { %919 = vmatmul.f32.vlgmr.msra.gmra.mxu2 %v2258_v62  ;;  %943 = vmatpush.msrb.mxu0 %v663_v0  ;;  %v442_v0 = vld [vmem:[#allocation3 + $0xf8] sm:$0xff] }
  0x88   : > { %983 = vmatpush.msrb.mxu2 %v665_v1  ;;  %898 = vmatpush.msra.mxu1 %v420_v2  ;;  %v424_v1 = vld [vmem:[#allocation3 + $0x68] sm:$0xff]  ;;  %v426_v2 = vld [vmem:[#allocation3 + $0x78] sm:$0xff] }
  0x89   : > { %938 = vmatpush.msra.mxu3 %v422_v3  ;;  %899 = vmatmul.f32.vlgmr.msra.gmra.mxu1 %v2258_v62  ;;  %v1086_v3 = vld [vmem:[#allocation7 + $0x78] sm:$0xff] }
  0x8a   : > { %939 = vmatmul.f32.vlgmr.msra.gmra.mxu3 %v2258_v62  ;;  %944 = vmatpush.msrb.mxu0 %v647_v4  ;;  %v1102_v4 = vld [vmem:[#allocation7 + $0xf8] sm:$0xff] }
  0x8b   : > { %963 = vmatpush.msrb.mxu1 %v664_v5  ;;  %984 = vmatpush.msrb.mxu2 %v649_v6  ;;  %v1118_v5 = vld [vmem:[#allocation7 + $0x178] sm:$0xff] }
  0x8c   : > { %1003 = vmatpush.msrb.mxu3 %v666_v7  ;;  %945 = vmatpush.msrb.mxu0 %v631_v8  ;;  %v1134_v6 = vld [vmem:[#allocation7 + $0x1f8] sm:$0xff]  ;;  %v1085_v7 = vld [vmem:[#allocation7 + $0x70] sm:$0xff] }
  0x8d   : > { %964 = vmatpush.msrb.mxu1 %v648_v9  ;;  %985 = vmatpush.msrb.mxu2 %v633_v10  ;;  %v1101_v8 = vld [vmem:[#allocation7 + $0xf0] sm:$0xff] }
  0x8e   : > { %1004 = vmatpush.msrb.mxu3 %v650_v11  ;;  %946 = vmatpush.msrb.mxu0 %v615_v12  ;;  %v1117_v9 = vld [vmem:[#allocation7 + $0x170] sm:$0xff]  ;;  %v1084_v11 = vld [vmem:[#allocation7 + $0x68] sm:$0xff] }
  0x8f   : > { %965 = vmatpush.msrb.mxu1 %v632_v13  ;;  %986 = vmatpush.msrb.mxu2 %v617_v14  ;;  %v1133_v10 = vld [vmem:[#allocation7 + $0x1f0] sm:$0xff]  ;;  %v1100_v12 = vld [vmem:[#allocation7 + $0xe8] sm:$0xff] }
  0x90   : > { %1005 = vmatpush.msrb.mxu3 %v634_v15  ;;  %947 = vmatpush.msrb.mxu0 %v599_v16  ;;  %v1116_v13 = vld [vmem:[#allocation7 + $0x168] sm:$0xff]  ;;  %v1083_v15 = vld [vmem:[#allocation7 + $0x60] sm:$0xff] }
  0x91   : > { %966 = vmatpush.msrb.mxu1 %v616_v17  ;;  %987 = vmatpush.msrb.mxu2 %v601_v18  ;;  %v1132_v14 = vld [vmem:[#allocation7 + $0x1e8] sm:$0xff]  ;;  %v1099_v16 = vld [vmem:[#allocation7 + $0xe0] sm:$0xff]  ;;  %v1082_v18 = vld [vmem:[#allocation7 + $0x58] sm:$0xff] }
  0x92   : > { %1006 = vmatpush.msrb.mxu3 %v618_v19  ;;  %948 = vmatpush.msrb.mxu0 %v583_v20  ;;  %v1131_v17 = vld [vmem:[#allocation7 + $0x1e0] sm:$0xff]  ;;  %v1098_v19 = vld [vmem:[#allocation7 + $0xd8] sm:$0xff] }
  0x93   : > { %967 = vmatpush.msrb.mxu1 %v600_v21  ;;  %988 = vmatpush.msrb.mxu2 %v585_v22  ;;  %v1114_v20 = vld [vmem:[#allocation7 + $0x158] sm:$0xff]  ;;  %v1081_v22 = vld [vmem:[#allocation7 + $0x50] sm:$0xff] }
  0x94   : > { %1007 = vmatpush.msrb.mxu3 %v602_v23  ;;  %949 = vmatpush.msrb.mxu0 %v567_v24  ;;  %v1130_v21 = vld [vmem:[#allocation7 + $0x1d8] sm:$0xff]  ;;  %v1097_v23 = vld [vmem:[#allocation7 + $0xd0] sm:$0xff] }
  0x95   : > { %968 = vmatpush.msrb.mxu1 %v584_v25  ;;  %989 = vmatpush.msrb.mxu2 %v569_v26  ;;  %v1113_v24 = vld [vmem:[#allocation7 + $0x150] sm:$0xff]  ;;  %v1080_v26 = vld [vmem:[#allocation7 + $0x48] sm:$0xff] }
  0x96   : > { %1008 = vmatpush.msrb.mxu3 %v586_v27  ;;  %950 = vmatpush.msrb.mxu0 %v551_v28  ;;  %v1129_v25 = vld [vmem:[#allocation7 + $0x1d0] sm:$0xff]  ;;  %v1096_v27 = vld [vmem:[#allocation7 + $0xc8] sm:$0xff] }
  0x97   : > { %969 = vmatpush.msrb.mxu1 %v568_v29  ;;  %990 = vmatpush.msrb.mxu2 %v553_v30  ;;  %v1112_v28 = vld [vmem:[#allocation7 + $0x148] sm:$0xff]  ;;  %v1079_v30 = vld [vmem:[#allocation7 + $0x40] sm:$0xff] }
  0x98   : > { %1009 = vmatpush.msrb.mxu3 %v570_v31  ;;  %951 = vmatpush.msrb.mxu0 %v535_v32  ;;  %v1128_v29 = vld [vmem:[#allocation7 + $0x1c8] sm:$0xff]  ;;  %v1095_v31 = vld [vmem:[#allocation7 + $0xc0] sm:$0xff] }
  0x99   : > { %970 = vmatpush.msrb.mxu1 %v552_v33  ;;  %991 = vmatpush.msrb.mxu2 %v537_v34  ;;  %v1111_v32 = vld [vmem:[#allocation7 + $0x140] sm:$0xff]  ;;  %v1078_v34 = vld [vmem:[#allocation7 + $0x38] sm:$0xff] }
  0x9a   : > { %1010 = vmatpush.msrb.mxu3 %v554_v35  ;;  %952 = vmatpush.msrb.mxu0 %v519_v36  ;;  %v1127_v33 = vld [vmem:[#allocation7 + $0x1c0] sm:$0xff]  ;;  %v1094_v35 = vld [vmem:[#allocation7 + $0xb8] sm:$0xff] }
  0x9b   : > { %971 = vmatpush.msrb.mxu1 %v536_v37  ;;  %992 = vmatpush.msrb.mxu2 %v521_v38  ;;  %v1110_v36 = vld [vmem:[#allocation7 + $0x138] sm:$0xff]  ;;  %v1077_v38 = vld [vmem:[#allocation7 + $0x30] sm:$0xff] }
  0x9c   : > { %1011 = vmatpush.msrb.mxu3 %v538_v39  ;;  %953 = vmatpush.msrb.mxu0 %v503_v40  ;;  %v1126_v37 = vld [vmem:[#allocation7 + $0x1b8] sm:$0xff]  ;;  %v1093_v39 = vld [vmem:[#allocation7 + $0xb0] sm:$0xff] }
  0x9d   : > { %972 = vmatpush.msrb.mxu1 %v520_v41  ;;  %993 = vmatpush.msrb.mxu2 %v505_v42  ;;  %v1109_v40 = vld [vmem:[#allocation7 + $0x130] sm:$0xff]  ;;  %v1076_v42 = vld [vmem:[#allocation7 + $0x28] sm:$0xff] }
  0x9e   : > { %1012 = vmatpush.msrb.mxu3 %v522_v43  ;;  %954 = vmatpush.msrb.mxu0 %v487_v44  ;;  %v1125_v41 = vld [vmem:[#allocation7 + $0x1b0] sm:$0xff]  ;;  %v1092_v43 = vld [vmem:[#allocation7 + $0xa8] sm:$0xff] }
  0x9f   : > { %973 = vmatpush.msrb.mxu1 %v504_v45  ;;  %994 = vmatpush.msrb.mxu2 %v489_v46  ;;  %v1108_v44 = vld [vmem:[#allocation7 + $0x128] sm:$0xff]  ;;  %v1075_v46 = vld [vmem:[#allocation7 + $0x20] sm:$0xff] }
  0xa0   : > { %1013 = vmatpush.msrb.mxu3 %v506_v47  ;;  %955 = vmatpush.msrb.mxu0 %v471_v48  ;;  %v1124_v45 = vld [vmem:[#allocation7 + $0x1a8] sm:$0xff]  ;;  %v1091_v47 = vld [vmem:[#allocation7 + $0xa0] sm:$0xff] }
  0xa1   : > { %974 = vmatpush.msrb.mxu1 %v488_v49  ;;  %995 = vmatpush.msrb.mxu2 %v473_v50  ;;  %v1107_v48 = vld [vmem:[#allocation7 + $0x120] sm:$0xff]  ;;  %v1074_v50 = vld [vmem:[#allocation7 + $0x18] sm:$0xff] }
  0xa2   : > { %1014 = vmatpush.msrb.mxu3 %v490_v51  ;;  %956 = vmatpush.msrb.mxu0 %v455_v52  ;;  %v1123_v49 = vld [vmem:[#allocation7 + $0x1a0] sm:$0xff]  ;;  %v1090_v51 = vld [vmem:[#allocation7 + $0x98] sm:$0xff] }
  0xa3   : > { %975 = vmatpush.msrb.mxu1 %v472_v53  ;;  %996 = vmatpush.msrb.mxu2 %v457_v54  ;;  %v1106_v52 = vld [vmem:[#allocation7 + $0x118] sm:$0xff]  ;;  %v1073_v54 = vld [vmem:[#allocation7 + $0x10] sm:$0xff] }
  0xa4   : > { %1015 = vmatpush.msrb.mxu3 %v474_v55  ;;  %957 = vmatpush.msrb.mxu0 %v439_v56  ;;  %v1122_v53 = vld [vmem:[#allocation7 + $0x198] sm:$0xff]  ;;  %v1089_v55 = vld [vmem:[#allocation7 + $0x90] sm:$0xff] }
  0xa5   : > { %976 = vmatpush.msrb.mxu1 %v456_v57  ;;  %997 = vmatpush.msrb.mxu2 %v441_v58  ;;  %v1105_v56 = vld [vmem:[#allocation7 + $0x110] sm:$0xff]  ;;  %v1072_v58 = vld [vmem:[#allocation7 + $0x8] sm:$0xff] }
  0xa6   : > { %1016 = vmatpush.msrb.mxu3 %v458_v59  ;;  %958 = vmatpush.msrb.mxu0 %v423_v60  ;;  %v1121_v57 = vld [vmem:[#allocation7 + $0x190] sm:$0xff]  ;;  %v1088_v59 = vld [vmem:[#allocation7 + $0x88] sm:$0xff] }
  0xa7   : > { %977 = vmatpush.msrb.mxu1 %v440_v61  ;;  %998 = vmatpush.msrb.mxu2 %v425_v63  ;;  %v1104_v60 = vld [vmem:[#allocation7 + $0x108] sm:$0xff]  ;;  %v1071_v63 = vld [vmem:[#allocation7] sm:$0xff] }
  0xa8   : > { %1017 = vmatpush.msrb.mxu3 %v442_v0  ;;  %959 = vmatmul.f32.vlgmr.msrb.gmra.mxu0 %v2258_v62  ;;  %v1120_v61 = vld [vmem:[#allocation7 + $0x188] sm:$0xff]  ;;  %v1087_v0 = vld [vmem:[#allocation7 + $0x80] sm:$0xff] }
  0xa9   : > { %999 = vmatmul.f32.vlgmr.msrb.gmra.mxu2 %v2258_v62  ;;  %978 = vmatpush.msrb.mxu1 %v424_v1  ;;  %v1150_v1 = vld [vmem:[#allocation7 + $0x278] sm:$0xff] }
  0xaa   : > { %1018 = vmatpush.msrb.mxu3 %v426_v2  ;;  %979 = vmatmul.f32.vlgmr.msrb.gmra.mxu1 %v2258_v62  ;;  %v1166_v2 = vld [vmem:[#allocation7 + $0x2f8] sm:$0xff] }
  0xab   : > { %1019 = vmatmul.f32.vlgmr.msrb.gmra.mxu3 %v2258_v62  ;;  %1331 = vmatpush.msra.mxu0 %v1086_v3  ;;  %v1115_v62 = vld [vmem:[#allocation7 + $0x160] sm:$0xff] }
  0xac   : > { %1351 = vmatpush.msra.mxu1 %v1102_v4  ;;  %1371 = vmatpush.msra.mxu2 %v1118_v5  ;;  %v1103_v3 = vld [vmem:[#allocation7 + $0x100] sm:$0xff]  ;;  %v1149_v5 = vld [vmem:[#allocation7 + $0x270] sm:$0xff] }
  0xad   : > { %1391 = vmatpush.msra.mxu3 %v1134_v6  ;;  %1332 = vmatpush.msra.mxu0 %v1085_v7  ;;  %v1119_v4 = vld [vmem:[#allocation7 + $0x180] sm:$0xff]  ;;  %v1165_v6 = vld [vmem:[#allocation7 + $0x2f0] sm:$0xff]  ;;  %v1182_v7 = vld [vmem:[#allocation7 + $0x378] sm:$0xff] }
  0xae   : > { %1352 = vmatpush.msra.mxu1 %v1101_v8  ;;  %1372 = vmatpush.msra.mxu2 %v1117_v9  ;;  %v1198_v8 = vld [vmem:[#allocation7 + $0x3f8] sm:$0xff]  ;;  %v1148_v9 = vld [vmem:[#allocation7 + $0x268] sm:$0xff] }
  0xaf   : > { %1392 = vmatpush.msra.mxu3 %v1133_v10  ;;  %1333 = vmatpush.msra.mxu0 %v1084_v11  ;;  %v1164_v10 = vld [vmem:[#allocation7 + $0x2e8] sm:$0xff]  ;;  %v1181_v11 = vld [vmem:[#allocation7 + $0x370] sm:$0xff] }
  0xb0   : > { %1353 = vmatpush.msra.mxu1 %v1100_v12  ;;  %1373 = vmatpush.msra.mxu2 %v1116_v13  ;;  %v1197_v12 = vld [vmem:[#allocation7 + $0x3f0] sm:$0xff]  ;;  %v1147_v13 = vld [vmem:[#allocation7 + $0x260] sm:$0xff] }
  0xb1   : > { %1393 = vmatpush.msra.mxu3 %v1132_v14  ;;  %1334 = vmatpush.msra.mxu0 %v1083_v15  ;;  %v1163_v14 = vld [vmem:[#allocation7 + $0x2e0] sm:$0xff]  ;;  %v1180_v15 = vld [vmem:[#allocation7 + $0x368] sm:$0xff] }
  0xb2   : > { %1354 = vmatpush.msra.mxu1 %v1099_v16  ;;  %1374 = vmatpush.msra.mxu2 %v1115_v62  ;;  %v1196_v16 = vld [vmem:[#allocation7 + $0x3e8] sm:$0xff]  ;;  %v1146_v62 = vld [vmem:[#allocation7 + $0x258] sm:$0xff] }
  0xb3   : > { %1394 = vmatpush.msra.mxu3 %v1131_v17  ;;  %1335 = vmatpush.msra.mxu0 %v1082_v18  ;;  %v1162_v17 = vld [vmem:[#allocation7 + $0x2d8] sm:$0xff]  ;;  %v1179_v18 = vld [vmem:[#allocation7 + $0x360] sm:$0xff] }
  0xb4   : > { %1355 = vmatpush.msra.mxu1 %v1098_v19  ;;  %1375 = vmatpush.msra.mxu2 %v1114_v20  ;;  %v1195_v19 = vld [vmem:[#allocation7 + $0x3e0] sm:$0xff]  ;;  %v1145_v20 = vld [vmem:[#allocation7 + $0x250] sm:$0xff] }
  0xb5   : > { %1395 = vmatpush.msra.mxu3 %v1130_v21  ;;  %1336 = vmatpush.msra.mxu0 %v1081_v22  ;;  %v1161_v21 = vld [vmem:[#allocation7 + $0x2d0] sm:$0xff]  ;;  %v1178_v22 = vld [vmem:[#allocation7 + $0x358] sm:$0xff] }
  0xb6   : > { %1356 = vmatpush.msra.mxu1 %v1097_v23  ;;  %1376 = vmatpush.msra.mxu2 %v1113_v24  ;;  %v1194_v23 = vld [vmem:[#allocation7 + $0x3d8] sm:$0xff]  ;;  %v1144_v24 = vld [vmem:[#allocation7 + $0x248] sm:$0xff] }
  0xb7   : > { %1396 = vmatpush.msra.mxu3 %v1129_v25  ;;  %1337 = vmatpush.msra.mxu0 %v1080_v26  ;;  %v1160_v25 = vld [vmem:[#allocation7 + $0x2c8] sm:$0xff]  ;;  %v1177_v26 = vld [vmem:[#allocation7 + $0x350] sm:$0xff] }
  0xb8   : > { %1357 = vmatpush.msra.mxu1 %v1096_v27  ;;  %1377 = vmatpush.msra.mxu2 %v1112_v28  ;;  %v1193_v27 = vld [vmem:[#allocation7 + $0x3d0] sm:$0xff]  ;;  %v1143_v28 = vld [vmem:[#allocation7 + $0x240] sm:$0xff] }
  0xb9   : > { %1397 = vmatpush.msra.mxu3 %v1128_v29  ;;  %1338 = vmatpush.msra.mxu0 %v1079_v30  ;;  %v1159_v29 = vld [vmem:[#allocation7 + $0x2c0] sm:$0xff]  ;;  %v1176_v30 = vld [vmem:[#allocation7 + $0x348] sm:$0xff] }
  0xba   : > { %1358 = vmatpush.msra.mxu1 %v1095_v31  ;;  %1378 = vmatpush.msra.mxu2 %v1111_v32  ;;  %v1192_v31 = vld [vmem:[#allocation7 + $0x3c8] sm:$0xff]  ;;  %v1142_v32 = vld [vmem:[#allocation7 + $0x238] sm:$0xff] }
  0xbb   : > { %1398 = vmatpush.msra.mxu3 %v1127_v33  ;;  %1339 = vmatpush.msra.mxu0 %v1078_v34  ;;  %v1158_v33 = vld [vmem:[#allocation7 + $0x2b8] sm:$0xff]  ;;  %v1175_v34 = vld [vmem:[#allocation7 + $0x340] sm:$0xff] }
  0xbc   : > { %1359 = vmatpush.msra.mxu1 %v1094_v35  ;;  %1379 = vmatpush.msra.mxu2 %v1110_v36  ;;  %v1191_v35 = vld [vmem:[#allocation7 + $0x3c0] sm:$0xff]  ;;  %v1141_v36 = vld [vmem:[#allocation7 + $0x230] sm:$0xff] }
  0xbd   : > { %1399 = vmatpush.msra.mxu3 %v1126_v37  ;;  %1340 = vmatpush.msra.mxu0 %v1077_v38  ;;  %v1157_v37 = vld [vmem:[#allocation7 + $0x2b0] sm:$0xff] }
  0xbe   : > { %1360 = vmatpush.msra.mxu1 %v1093_v39  ;;  %1380 = vmatpush.msra.mxu2 %v1109_v40  ;;  %v2276_v38 = vld [vmem:[#allocation5] sm:$0xff]  ;;  %v1174_v39 = vld [vmem:[#allocation7 + $0x338] sm:$0xff] }
  0xbf   : > { %1400 = vmatpush.msra.mxu3 %v1125_v41  ;;  %1341 = vmatpush.msra.mxu0 %v1076_v42  ;;  %v1190_v40 = vld [vmem:[#allocation7 + $0x3b8] sm:$0xff]  ;;  %v1140_v41 = vld [vmem:[#allocation7 + $0x228] sm:$0xff] }
  0xc0   : > { %1361 = vmatpush.msra.mxu1 %v1092_v43  ;;  %1381 = vmatpush.msra.mxu2 %v1108_v44  ;;  %v1156_v42 = vld [vmem:[#allocation7 + $0x2a8] sm:$0xff]  ;;  %v1173_v43 = vld [vmem:[#allocation7 + $0x330] sm:$0xff]  ;;  %v671_v44 = vperm.slane %v2276_v38, 0 }
  0xc1   : > { %1401 = vmatpush.msra.mxu3 %v1124_v45  ;;  %1342 = vmatpush.msra.mxu0 %v1075_v46  ;;  %v1189_v45 = vld [vmem:[#allocation7 + $0x3b0] sm:$0xff]  ;;  %v1139_v46 = vld [vmem:[#allocation7 + $0x220] sm:$0xff] }
  0xc2   : > { %1362 = vmatpush.msra.mxu1 %v1091_v47  ;;  %1382 = vmatpush.msra.mxu2 %v1107_v48  ;;  %v1155_v47 = vld [vmem:[#allocation7 + $0x2a0] sm:$0xff]  ;;  %v1172_v48 = vld [vmem:[#allocation7 + $0x328] sm:$0xff] }
  0xc3   : > { %1402 = vmatpush.msra.mxu3 %v1123_v49  ;;  %1343 = vmatpush.msra.mxu0 %v1074_v50  ;;  %v1188_v49 = vld [vmem:[#allocation7 + $0x3a8] sm:$0xff]  ;;  %v1138_v50 = vld [vmem:[#allocation7 + $0x218] sm:$0xff] }
  0xc4   : > { %1363 = vmatpush.msra.mxu1 %v1090_v51  ;;  %1383 = vmatpush.msra.mxu2 %v1106_v52  ;;  %v1154_v52 = vld [vmem:[#allocation7 + $0x298] sm:$0xff] }
  0xc5   : > { %1403 = vmatpush.msra.mxu3 %v1122_v53  ;;  %1344 = vmatpush.msra.mxu0 %v1073_v54  ;;  %v672_v53 = vperm.slane %v2276_v38, 1 }
  0xc6   : > { %1364 = vmatpush.msra.mxu1 %v1089_v55  ;;  %1384 = vmatpush.msra.mxu2 %v1105_v56  ;;  %v1171_v55 = vld [vmem:[#allocation7 + $0x320] sm:$0xff] }
  0xc7   : > { %1404 = vmatpush.msra.mxu3 %v1121_v57  ;;  %1345 = vmatpush.msra.mxu0 %v1072_v58  ;;  %v1187_v56 = vld [vmem:[#allocation7 + $0x3a0] sm:$0xff]  ;;  %v1137_v57 = vld [vmem:[#allocation7 + $0x210] sm:$0xff] }
  0xc8   : > { %1365 = vmatpush.msra.mxu1 %v1088_v59  ;;  %1385 = vmatpush.msra.mxu2 %v1104_v60  ;;  %v1153_v58 = vld [vmem:[#allocation7 + $0x290] sm:$0xff] }
  0xc9   : > { %1405 = vmatpush.msra.mxu3 %v1120_v61  ;;  %1346 = vmatpush.msra.mxu0 %v1071_v63  ;;  %v1170_v61 = vld [vmem:[#allocation7 + $0x318] sm:$0xff]  ;;  %v673_v63 = vperm.slane %v2276_v38, 2 }
  0xca   : > { %1366 = vmatpush.msra.mxu1 %v1087_v0  ;;  %1386 = vmatpush.msra.mxu2 %v1103_v3  ;;  %v1169_v3 = vld [vmem:[#allocation7 + $0x310] sm:$0xff] }
  0xcb   : > { %1411 = vmatpush.msrb.mxu0 %v1150_v1  ;;  %1406 = vmatpush.msra.mxu3 %v1119_v4  ;;  %v1136_v1 = vld [vmem:[#allocation7 + $0x208] sm:$0xff]  ;;  %v1186_v4 = vld [vmem:[#allocation7 + $0x398] sm:$0xff] }
  0xcc   : > { %1431 = vmatpush.msrb.mxu1 %v1166_v2  ;;  %1451 = vmatpush.msrb.mxu2 %v1182_v7  ;;  %v1152_v2 = vld [vmem:[#allocation7 + $0x288] sm:$0xff] }
  0xcd   : > { %1412 = vmatpush.msrb.mxu0 %v1149_v5  ;;  %1471 = vmatpush.msrb.mxu3 %v1198_v8  ;;  %v1151_v8 = vld [vmem:[#allocation7 + $0x280] sm:$0xff] }
  0xce   : > { %1432 = vmatpush.msrb.mxu1 %v1165_v6  ;;  %1452 = vmatpush.msrb.mxu2 %v1181_v11  ;;  %v1135_v6 = vld [vmem:[#allocation7 + $0x200] sm:$0xff] }
  0xcf   : > { %1413 = vmatpush.msrb.mxu0 %v1148_v9  ;;  %1472 = vmatpush.msrb.mxu3 %v1197_v12  ;;  %v674_v9 = vperm.slane %v2276_v38, 3  ;;  %v1230_v12 = vld [vmem:[#allocation7 + $0x4f8] sm:$0xff] }
  0xd0   : > { %1433 = vmatpush.msrb.mxu1 %v1164_v10  ;;  %1453 = vmatpush.msrb.mxu2 %v1180_v15  ;;  %v1214_v10 = vld [vmem:[#allocation7 + $0x478] sm:$0xff] }
  0xd1   : > { %1414 = vmatpush.msrb.mxu0 %v1147_v13  ;;  %1473 = vmatpush.msrb.mxu3 %v1196_v16  ;;  %v1168_v13 = vld [vmem:[#allocation7 + $0x308] sm:$0xff]  ;;  %v1185_v16 = vld [vmem:[#allocation7 + $0x390] sm:$0xff] }
  0xd2   : > { %1434 = vmatpush.msrb.mxu1 %v1163_v14  ;;  %1454 = vmatpush.msrb.mxu2 %v1179_v18  ;;  %v1213_v14 = vld [vmem:[#allocation7 + $0x470] sm:$0xff]  ;;  %v1167_v18 = vld [vmem:[#allocation7 + $0x300] sm:$0xff] }
  0xd3   : > { %1415 = vmatpush.msrb.mxu0 %v1146_v62  ;;  %1474 = vmatpush.msrb.mxu3 %v1195_v19 }
  0xd4   : > { %1435 = vmatpush.msrb.mxu1 %v1162_v17  ;;  %1455 = vmatpush.msrb.mxu2 %v1178_v22  ;;  %v1229_v17 = vld [vmem:[#allocation7 + $0x4f0] sm:$0xff]  ;;  %v1228_v22 = vld [vmem:[#allocation7 + $0x4e8] sm:$0xff] }
  0xd5   : > { %1416 = vmatpush.msrb.mxu0 %v1145_v20  ;;  %1475 = vmatpush.msrb.mxu3 %v1194_v23  ;;  %v1212_v20 = vld [vmem:[#allocation7 + $0x468] sm:$0xff]  ;;  %v1211_v23 = vld [vmem:[#allocation7 + $0x460] sm:$0xff] }
  0xd6   : > { %1436 = vmatpush.msrb.mxu1 %v1161_v21  ;;  %1456 = vmatpush.msrb.mxu2 %v1177_v26  ;;  %v1184_v21 = vld [vmem:[#allocation7 + $0x388] sm:$0xff] }
  0xd7   : > { %1417 = vmatpush.msrb.mxu0 %v1144_v24  ;;  %1476 = vmatpush.msrb.mxu3 %v1193_v27  ;;  %v1246_v24 = vld [vmem:[#allocation7 + $0x578] sm:$0xff]  ;;  %v1183_v27 = vld [vmem:[#allocation7 + $0x380] sm:$0xff] }
  0xd8   : > { %1437 = vmatpush.msrb.mxu1 %v1160_v25  ;;  %1457 = vmatpush.msrb.mxu2 %v1176_v30  ;;  %v677_v25 = vperm.slane %v2276_v38, 6  ;;  %v1245_v30 = vld [vmem:[#allocation7 + $0x570] sm:$0xff] }
  0xd9   : > { %1418 = vmatpush.msrb.mxu0 %v1143_v28  ;;  %1477 = vmatpush.msrb.mxu3 %v1192_v31  ;;  %v1227_v28 = vld [vmem:[#allocation7 + $0x4e0] sm:$0xff]  ;;  %v1262_v31 = vld [vmem:[#allocation7 + $0x5f8] sm:$0xff] }
  0xda   : > { %1438 = vmatpush.msrb.mxu1 %v1159_v29  ;;  %1458 = vmatpush.msrb.mxu2 %v1175_v34  ;;  %v1210_v29 = vld [vmem:[#allocation7 + $0x458] sm:$0xff]  ;;  %v678_v34 = vperm.slane %v2276_v38, 7 }
  0xdb   : > { %1419 = vmatpush.msrb.mxu0 %v1142_v32  ;;  %1478 = vmatpush.msrb.mxu3 %v1191_v35 }
  0xdc   : > { %1439 = vmatpush.msrb.mxu1 %v1158_v33  ;;  %1459 = vmatpush.msrb.mxu2 %v1174_v39  ;;  %v675_v33 = vperm.slane %v2276_v38, 4  ;;  %v1244_v39 = vld [vmem:[#allocation7 + $0x568] sm:$0xff] }
  0xdd   : > { %1420 = vmatpush.msrb.mxu0 %v1141_v36  ;;  %1479 = vmatpush.msrb.mxu3 %v1190_v40  ;;  %v1209_v36 = vld [vmem:[#allocation7 + $0x450] sm:$0xff] }
  0xde   : > { %1440 = vmatpush.msrb.mxu1 %v1157_v37  ;;  %1460 = vmatpush.msrb.mxu2 %v1173_v43  ;;  %v1226_v37 = vld [vmem:[#allocation7 + $0x4d8] sm:$0xff]  ;;  %v1261_v40 = vld [vmem:[#allocation7 + $0x5f0] sm:$0xff] }
  0xdf   : > { %1421 = vmatpush.msrb.mxu0 %v1140_v41  ;;  %v720_v51 = vpop.f32.mrf.mxu0  ;;  %1480 = vmatpush.msrb.mxu3 %v1189_v45  ;;  %v676_v41 = vperm.slane %v2276_v38, 5  ;;  %v1225_v45 = vld [vmem:[#allocation7 + $0x4d0] sm:$0xff] }
  0xe0   : > { %1441 = vmatpush.msrb.mxu1 %v1156_v42  ;;  %v721_v54 = vadd.f32 %v720_v51, %v671_v44  ;;  %1461 = vmatpush.msrb.mxu2 %v1172_v48  ;;  %v1208_v44 = vld [vmem:[#allocation7 + $0x448] sm:$0xff] }
  0xe1   : > { %1422 = vmatpush.msrb.mxu0 %v1139_v46  ;;  %1481 = vmatpush.msrb.mxu3 %v1188_v49  ;;  %v1243_v49 = vld [vmem:[#allocation7 + $0x560] sm:$0xff] }
  0xe2   : > { %1442 = vmatpush.msrb.mxu1 %v1155_v47  ;;  %v1023_v59 = vmax.f32 %v721_v54, 0.0  ;;  %v740_v60 = vpop.f32.mrf.mxu1  ;;  %1462 = vmatpush.msrb.mxu2 %v1171_v55  ;;  %v1224_v54 = vld [vmem:[#allocation7 + $0x4c8] sm:$0xff]  ;;  %v1242_v55 = vld [vmem:[#allocation7 + $0x558] sm:$0xff] }
  0xe3   : > { %1423 = vmatpush.msrb.mxu0 %v1138_v50  ;;  %v741_v0 = vadd.f32 %v740_v60, %v672_v53  ;;  %1482 = vmatpush.msrb.mxu3 %v1187_v56  ;;  %v1260_v50 = vld [vmem:[#allocation7 + $0x5e8] sm:$0xff]  ;;  %v1223_v60 = vld [vmem:[#allocation7 + $0x4c0] sm:$0xff] }
  0xe4   : > { %1443 = vmatpush.msrb.mxu1 %v1154_v52  ;;  %1463 = vmatpush.msrb.mxu2 %v1170_v61  ;;  %v1207_v52 = vld [vmem:[#allocation7 + $0x440] sm:$0xff]  ;;  %v1241_v61 = vld [vmem:[#allocation7 + $0x550] sm:$0xff] }
  0xe5   : > { %1424 = vmatpush.msrb.mxu0 %v1137_v57  ;;  %v1024_v5 = vmax.f32 %v741_v0, 0.0  ;;  %1483 = vmatpush.msrb.mxu3 %v1186_v4  ;;  %v1259_v57 = vld [vmem:[#allocation7 + $0x5e0] sm:$0xff]  ;;  %v1205_v0 = vld [vmem:[#allocation7 + $0x430] sm:$0xff]  ;;  %v1204_v4 = vld [vmem:[#allocation7 + $0x428] sm:$0xff] }
  0xe6   : > { %1444 = vmatpush.msrb.mxu1 %v1153_v58  ;;  %1347 = vmatmul.f32.vlgmr.msra.gmra.mxu0 %v1023_v59  ;;  %v760_v7 = vpop.f32.mrf.mxu2  ;;  %v1206_v58 = vld [vmem:[#allocation7 + $0x438] sm:$0xff] }
  0xe7   : > { %1425 = vmatpush.msrb.mxu0 %v1136_v1  ;;  %v761_v11 = vadd.f32 %v760_v7, %v673_v63  ;;  %1464 = vmatpush.msrb.mxu2 %v1169_v3  ;;  %v1258_v63 = vld [vmem:[#allocation7 + $0x5d8] sm:$0xff]  ;;  %v1257_v3 = vld [vmem:[#allocation7 + $0x5d0] sm:$0xff]  ;;  %v1256_v7 = vld [vmem:[#allocation7 + $0x5c8] sm:$0xff] }
  0xe8   : > { %1445 = vmatpush.msrb.mxu1 %v1152_v2  ;;  %1484 = vmatpush.msrb.mxu3 %v1185_v16  ;;  %v1222_v1 = vld [vmem:[#allocation7 + $0x4b8] sm:$0xff]  ;;  %v1240_v2 = vld [vmem:[#allocation7 + $0x548] sm:$0xff]  ;;  %v1237_v16 = vld [vmem:[#allocation7 + $0x530] sm:$0xff] }
  0xe9   : > { %1426 = vmatpush.msrb.mxu0 %v1135_v6  ;;  %v780_v15 = vpop.f32.mrf.mxu3  ;;  %1367 = vmatmul.f32.vlgmr.msra.gmra.mxu1 %v1024_v5  ;;  %v1025_v19 = vmax.f32 %v761_v11, 0.0  ;;  %v1221_v5 = vld [vmem:[#allocation7 + $0x4b0] sm:$0xff]  ;;  %v1239_v6 = vld [vmem:[#allocation7 + $0x540] sm:$0xff]  ;;  %v1238_v11 = vld [vmem:[#allocation7 + $0x538] sm:$0xff] }
  0xea   : > { %1446 = vmatpush.msrb.mxu1 %v1151_v8  ;;  %v781_v62 = vadd.f32 %v780_v15, %v674_v9  ;;  %1465 = vmatpush.msrb.mxu2 %v1168_v13  ;;  %v2286_v8 = vld [vmem:[#allocation5 + $0x8] sm:$0xff]  ;;  %v1203_v9 = vld [vmem:[#allocation7 + $0x420] sm:$0xff] }
  0xeb   : > { %1491 = vmatpush.msra.mxu0 %v1214_v10  ;;  %1485 = vmatpush.msrb.mxu3 %v1184_v21  ;;  %v1220_v10 = vld [vmem:[#allocation7 + $0x4a8] sm:$0xff]  ;;  %v1202_v13 = vld [vmem:[#allocation7 + $0x418] sm:$0xff]  ;;  %v679_v15 = vperm.slane %v2286_v8, 0  ;;  %v1253_v21 = vld [vmem:[#allocation7 + $0x5b0] sm:$0xff] }
  0xec   : > { %1511 = vmatpush.msra.mxu1 %v1230_v12  ;;  %1466 = vmatpush.msrb.mxu2 %v1167_v18  ;;  %v1026_v26 = vmax.f32 %v781_v62, 0.0  ;;  %v1255_v12 = vld [vmem:[#allocation7 + $0x5c0] sm:$0xff]  ;;  %v1254_v62 = vld [vmem:[#allocation7 + $0x5b8] sm:$0xff] }
  0xed   : > { %1492 = vmatpush.msra.mxu0 %v1213_v14  ;;  %1387 = vmatmul.f32.vlgmr.msra.gmra.mxu2 %v1025_v19  ;;  %v1219_v14 = vld [vmem:[#allocation7 + $0x4a0] sm:$0xff]  ;;  %v1218_v18 = vld [vmem:[#allocation7 + $0x498] sm:$0xff] }
  0xee   : > { %1512 = vmatpush.msra.mxu1 %v1229_v17  ;;  %1531 = vmatpush.msra.mxu2 %v1246_v24  ;;  %v1201_v17 = vld [vmem:[#allocation7 + $0x410] sm:$0xff]  ;;  %v1200_v24 = vld [vmem:[#allocation7 + $0x408] sm:$0xff] }
  0xef   : > { %1493 = vmatpush.msra.mxu0 %v1212_v20  ;;  %v840_v32 = vpop.f32.mrf.mxu2  ;;  %1486 = vmatpush.msrb.mxu3 %v1183_v27  ;;  %v1236_v20 = vld [vmem:[#allocation7 + $0x528] sm:$0xff] }
  0xf0   : > { %1513 = vmatpush.msra.mxu1 %v1228_v22  ;;  %v841_v35 = vadd.f32 %v840_v32, %v677_v25  ;;  %1407 = vmatmul.f32.vlgmr.msra.gmra.mxu3 %v1026_v26  ;;  %v680_v22 = vperm.slane %v2286_v8, 1  ;;  %v1217_v25 = vld [vmem:[#allocation7 + $0x490] sm:$0xff]  ;;  %v1235_v26 = vld [vmem:[#allocation7 + $0x520] sm:$0xff]  ;;  %v1252_v27 = vld [vmem:[#allocation7 + $0x5a8] sm:$0xff] }
  0xf1   : > { %1494 = vmatpush.msra.mxu0 %v1211_v23  ;;  %1532 = vmatpush.msra.mxu2 %v1245_v30  ;;  %v1216_v30 = vld [vmem:[#allocation7 + $0x488] sm:$0xff] }
  0xf2   : > { %1514 = vmatpush.msra.mxu1 %v1227_v28  ;;  %1551 = vmatpush.msra.mxu3 %v1262_v31  ;;  %v800_v42 = vpop.f32.mrf.mxu0  ;;  %v860_v43 = vpop.f32.mrf.mxu3  ;;  %v1029_v46 = vmax.f32 %v841_v35, 0.0  ;;  %v681_v31 = vperm.slane %v2286_v8, 2  ;;  %v1251_v35 = vld [vmem:[#allocation7 + $0x5a0] sm:$0xff] }
  0xf3   : > { %1495 = vmatpush.msra.mxu0 %v1210_v29  ;;  %v801_v47 = vadd.f32 %v800_v42, %v675_v33  ;;  %v861_v48 = vadd.f32 %v860_v43, %v678_v34  ;;  %1533 = vmatpush.msra.mxu2 %v1244_v39  ;;  %v1199_v29 = vld [vmem:[#allocation7 + $0x400] sm:$0xff]  ;;  %v1234_v34 = vld [vmem:[#allocation7 + $0x518] sm:$0xff]  ;;  %v682_v42 = vperm.slane %v2286_v8, 3 }
  0xf4   : > { %1515 = vmatpush.msra.mxu1 %v1226_v37  ;;  %1552 = vmatpush.msra.mxu3 %v1261_v40  ;;  %v1278_v39 = vld [vmem:[#allocation7 + $0x678] sm:$0xff] }
  0xf5   : > { %1496 = vmatpush.msra.mxu0 %v1209_v36  ;;  %v820_v51 = vpop.f32.mrf.mxu1  ;;  %v1027_v53 = vmax.f32 %v801_v47, 0.0  ;;  %v1030_v56 = vmax.f32 %v861_v48, 0.0  ;;  %1534 = vmatpush.msra.mxu2 %v1243_v49  ;;  %v1215_v36 = vld [vmem:[#allocation7 + $0x480] sm:$0xff]  ;;  %v1232_v48 = vld [vmem:[#allocation7 + $0x508] sm:$0xff]  ;;  %v1249_v49 = vld [vmem:[#allocation7 + $0x590] sm:$0xff] }
  0xf6   : > { %1516 = vmatpush.msra.mxu1 %v1225_v45  ;;  %v821_v38 = vadd.f32 %v820_v51, %v676_v41  ;;  %1553 = vmatpush.msra.mxu3 %v1260_v50  ;;  %v1233_v41 = vld [vmem:[#allocation7 + $0x510] sm:$0xff]  ;;  %v1276_v51 = vld [vmem:[#allocation7 + $0x668] sm:$0xff] }
  0xf7   : > { %1497 = vmatpush.msra.mxu0 %v1208_v44  ;;  %1467 = vmatmul.f32.vlgmr.msrb.gmra.mxu2 %v1029_v46  ;;  %v1250_v44 = vld [vmem:[#allocation7 + $0x598] sm:$0xff]  ;;  %v1277_v45 = vld [vmem:[#allocation7 + $0x670] sm:$0xff] }
  0xf8   : > { %v1028_v59 = vmax.f32 %v821_v38, 0.0  ;;  %1517 = vmatpush.msra.mxu1 %v1224_v54  ;;  %1535 = vmatpush.msra.mxu2 %v1242_v55  ;;  %v1294_v46 = vld [vmem:[#allocation7 + $0x6f8] sm:$0xff]  ;;  %v1231_v38 = vld [vmem:[#allocation7 + $0x500] sm:$0xff]  ;;  %v1248_v54 = vld [vmem:[#allocation7 + $0x588] sm:$0xff] }
  0xf9   : > { %1498 = vmatpush.msra.mxu0 %v1207_v52  ;;  %1554 = vmatpush.msra.mxu3 %v1259_v57  ;;  %v1293_v52 = vld [vmem:[#allocation7 + $0x6f0] sm:$0xff]  ;;  %v1275_v55 = vld [vmem:[#allocation7 + $0x660] sm:$0xff]  ;;  %v1310_v57 = vld [vmem:[#allocation7 + $0x778] sm:$0xff] }
  0xfa   : > { %1427 = vmatmul.f32.vlgmr.msrb.gmra.mxu0 %v1027_v53  ;;  %1487 = vmatmul.f32.vlgmr.msrb.gmra.mxu3 %v1030_v56  ;;  %v1292_v56 = vld [vmem:[#allocation7 + $0x6e8] sm:$0xff] }
  0xfb   : > { %1499 = vmatpush.msra.mxu0 %v1206_v58  ;;  %1518 = vmatpush.msra.mxu1 %v1223_v60  ;;  %v1274_v60 = vld [vmem:[#allocation7 + $0x658] sm:$0xff] }
  0xfc   : > { %1536 = vmatpush.msra.mxu2 %v1241_v61  ;;  %1555 = vmatpush.msra.mxu3 %v1258_v63  ;;  %v1291_v61 = vld [vmem:[#allocation7 + $0x6e0] sm:$0xff]  ;;  %v1309_v63 = vld [vmem:[#allocation7 + $0x770] sm:$0xff] }
  0xfd   : > { %1447 = vmatmul.f32.vlgmr.msrb.gmra.mxu1 %v1028_v59  ;;  %1500 = vmatpush.msra.mxu0 %v1205_v0  ;;  %v1247_v59 = vld [vmem:[#allocation7 + $0x580] sm:$0xff]  ;;  %v1326_v0 = vld [vmem:[#allocation7 + $0x7f8] sm:$0xff] }
  0xfe   : > { %1519 = vmatpush.msra.mxu1 %v1222_v1  ;;  %1537 = vmatpush.msra.mxu2 %v1240_v2  ;;  %v1273_v1 = vld [vmem:[#allocation7 + $0x650] sm:$0xff]  ;;  %v1290_v2 = vld [vmem:[#allocation7 + $0x6d8] sm:$0xff] }
  0xff   : > { %1556 = vmatpush.msra.mxu3 %v1257_v3  ;;  %1501 = vmatpush.msra.mxu0 %v1204_v4  ;;  %v1308_v3 = vld [vmem:[#allocation7 + $0x768] sm:$0xff]  ;;  %v1325_v4 = vld [vmem:[#allocation7 + $0x7f0] sm:$0xff] }
 0x100   : > { %1520 = vmatpush.msra.mxu1 %v1221_v5  ;;  %1538 = vmatpush.msra.mxu2 %v1239_v6  ;;  %v1272_v5 = vld [vmem:[#allocation7 + $0x648] sm:$0xff]  ;;  %v1289_v6 = vld [vmem:[#allocation7 + $0x6d0] sm:$0xff] }
 0x101   : > { %1557 = vmatpush.msra.mxu3 %v1256_v7  ;;  %1502 = vmatpush.msra.mxu0 %v1203_v9  ;;  %v1307_v7 = vld [vmem:[#allocation7 + $0x760] sm:$0xff]  ;;  %v1324_v9 = vld [vmem:[#allocation7 + $0x7e8] sm:$0xff] }
 0x102   : > { %1521 = vmatpush.msra.mxu1 %v1220_v10  ;;  %1539 = vmatpush.msra.mxu2 %v1238_v11  ;;  %v1271_v10 = vld [vmem:[#allocation7 + $0x640] sm:$0xff]  ;;  %v1288_v11 = vld [vmem:[#allocation7 + $0x6c8] sm:$0xff] }
 0x103   : > { %1558 = vmatpush.msra.mxu3 %v1255_v12  ;;  %1503 = vmatpush.msra.mxu0 %v1202_v13  ;;  %v880_v19 = vpop.f32.mrf.mxu0  ;;  %v1306_v12 = vld [vmem:[#allocation7 + $0x758] sm:$0xff]  ;;  %v1323_v13 = vld [vmem:[#allocation7 + $0x7e0] sm:$0xff] }
 0x104   : > { %1522 = vmatpush.msra.mxu1 %v1219_v14  ;;  %1540 = vmatpush.msra.mxu2 %v1237_v16  ;;  %v881_v23 = vadd.f32 %v880_v19, %v679_v15  ;;  %v1270_v14 = vld [vmem:[#allocation7 + $0x638] sm:$0xff]  ;;  %v1287_v15 = vld [vmem:[#allocation7 + $0x6c0] sm:$0xff]  ;;  %v1305_v16 = vld [vmem:[#allocation7 + $0x750] sm:$0xff] }
 0x105   : > { %1559 = vmatpush.msra.mxu3 %v1254_v62  ;;  %1504 = vmatpush.msra.mxu0 %v1201_v17  ;;  %v1322_v62 = vld [vmem:[#allocation7 + $0x7d8] sm:$0xff]  ;;  %v1269_v17 = vld [vmem:[#allocation7 + $0x630] sm:$0xff]  ;;  %v1304_v19 = vld [vmem:[#allocation7 + $0x748] sm:$0xff] }
 0x106   : > { %1523 = vmatpush.msra.mxu1 %v1218_v18  ;;  %1541 = vmatpush.msra.mxu2 %v1236_v20  ;;  %v900_v28 = vpop.f32.mrf.mxu1  ;;  %v1031_v32 = vmax.f32 %v881_v23, 0.0  ;;  %v1286_v18 = vld [vmem:[#allocation7 + $0x6b8] sm:$0xff]  ;;  %v1321_v20 = vld [vmem:[#allocation7 + $0x7d0] sm:$0xff]  ;;  %v1303_v23 = vld [vmem:[#allocation7 + $0x740] sm:$0xff] }
 0x107   : > { %1560 = vmatpush.msra.mxu3 %v1253_v21  ;;  %v901_v33 = vadd.f32 %v900_v28, %v680_v22  ;;  %1505 = vmatpush.msra.mxu0 %v1200_v24  ;;  %v1268_v21 = vld [vmem:[#allocation7 + $0x628] sm:$0xff]  ;;  %v1285_v22 = vld [vmem:[#allocation7 + $0x6b0] sm:$0xff]  ;;  %v1319_v28 = vld [vmem:[#allocation7 + $0x7c0] sm:$0xff] }
 0x108   : > { %1524 = vmatpush.msra.mxu1 %v1217_v25  ;;  %1542 = vmatpush.msra.mxu2 %v1235_v26  ;;  %v1320_v24 = vld [vmem:[#allocation7 + $0x7c8] sm:$0xff]  ;;  %v1267_v25 = vld [vmem:[#allocation7 + $0x620] sm:$0xff] }
 0x109   : > { %1561 = vmatpush.msra.mxu3 %v1252_v27  ;;  %v1032_v37 = vmax.f32 %v901_v33, 0.0  ;;  %1506 = vmatpush.msra.mxu0 %v1199_v29  ;;  %v1284_v26 = vld [vmem:[#allocation7 + $0x6a8] sm:$0xff]  ;;  %v1302_v27 = vld [vmem:[#allocation7 + $0x738] sm:$0xff] }
 0x10a   : > { %1525 = vmatpush.msra.mxu1 %v1216_v30  ;;  %v920_v40 = vpop.f32.mrf.mxu2  ;;  %1543 = vmatpush.msra.mxu2 %v1234_v34  ;;  %v1266_v29 = vld [vmem:[#allocation7 + $0x618] sm:$0xff]  ;;  %v1283_v30 = vld [vmem:[#allocation7 + $0x6a0] sm:$0xff]  ;;  %v1265_v34 = vld [vmem:[#allocation7 + $0x610] sm:$0xff] }
 0x10b   : > { %1562 = vmatpush.msra.mxu3 %v1251_v35  ;;  %v921_v43 = vadd.f32 %v920_v40, %v681_v31  ;;  %1507 = vmatmul.f32.vlgmr.msra.gmra.mxu0 %v1031_v32  ;;  %v683_v31 = vperm.slane %v2286_v8, 4  ;;  %v1301_v32 = vld [vmem:[#allocation7 + $0x730] sm:$0xff]  ;;  %v1318_v33 = vld [vmem:[#allocation7 + $0x7b8] sm:$0xff] }
 0x10c   : > { %1526 = vmatpush.msra.mxu1 %v1215_v36  ;;  %1571 = vmatpush.msrb.mxu0 %v1278_v39  ;;  %v1282_v35 = vld [vmem:[#allocation7 + $0x698] sm:$0xff]  ;;  %v684_v36 = vperm.slane %v2286_v8, 5  ;;  %v1300_v39 = vld [vmem:[#allocation7 + $0x728] sm:$0xff]  ;;  %v1317_v40 = vld [vmem:[#allocation7 + $0x7b0] sm:$0xff] }
 0x10d   : > { %1544 = vmatpush.msra.mxu2 %v1233_v41  ;;  %v940_v47 = vpop.f32.mrf.mxu3  ;;  %1563 = vmatpush.msra.mxu3 %v1250_v44  ;;  %v1033_v53 = vmax.f32 %v921_v43, 0.0  ;;  %v1281_v43 = vld [vmem:[#allocation7 + $0x690] sm:$0xff] }
 0x10e   : > { %1527 = vmatmul.f32.vlgmr.msra.gmra.mxu1 %v1032_v37  ;;  %v941_v50 = vadd.f32 %v940_v47, %v682_v42  ;;  %1572 = vmatpush.msrb.mxu0 %v1277_v45  ;;  %v1264_v42 = vld [vmem:[#allocation7 + $0x608] sm:$0xff]  ;;  %v1299_v45 = vld [vmem:[#allocation7 + $0x720] sm:$0xff] }
 0x10f   : > { %1591 = vmatpush.msrb.mxu1 %v1294_v46  ;;  %1545 = vmatpush.msra.mxu2 %v1232_v48  ;;  %v1316_v46 = vld [vmem:[#allocation7 + $0x7a8] sm:$0xff]  ;;  %v1263_v48 = vld [vmem:[#allocation7 + $0x600] sm:$0xff] }
 0x110   : > { %1564 = vmatpush.msra.mxu3 %v1249_v49  ;;  %1573 = vmatpush.msrb.mxu0 %v1276_v51  ;;  %v1034_v58 = vmax.f32 %v941_v50, 0.0  ;;  %v1280_v49 = vld [vmem:[#allocation7 + $0x688] sm:$0xff]  ;;  %v685_v50 = vperm.slane %v2286_v8, 6 }
 0x111   : > { %1592 = vmatpush.msrb.mxu1 %v1293_v52  ;;  %1546 = vmatpush.msra.mxu2 %v1231_v38  ;;  %v1298_v52 = vld [vmem:[#allocation7 + $0x718] sm:$0xff]  ;;  %v1279_v38 = vld [vmem:[#allocation7 + $0x680] sm:$0xff] }
 0x112   : > { %1565 = vmatpush.msra.mxu3 %v1248_v54  ;;  %1547 = vmatmul.f32.vlgmr.msra.gmra.mxu2 %v1033_v53  ;;  %v1315_v53 = vld [vmem:[#allocation7 + $0x7a0] sm:$0xff]  ;;  %v686_v54 = vperm.slane %v2286_v8, 7 }
 0x113   : > { %1574 = vmatpush.msrb.mxu0 %v1275_v55  ;;  %1593 = vmatpush.msrb.mxu1 %v1292_v56  ;;  %v1295_v8 = vld [vmem:[#allocation7 + $0x700] sm:$0xff] }
 0x114   : > { %1611 = vmatpush.msrb.mxu2 %v1310_v57  ;;  %1566 = vmatpush.msra.mxu3 %v1247_v59  ;;  %v1297_v57 = vld [vmem:[#allocation7 + $0x710] sm:$0xff] }
 0x115   : > { %1575 = vmatpush.msrb.mxu0 %v1274_v60  ;;  %1567 = vmatmul.f32.vlgmr.msra.gmra.mxu3 %v1034_v58  ;;  %v1314_v58 = vld [vmem:[#allocation7 + $0x798] sm:$0xff] }
 0x116   : > { %1594 = vmatpush.msrb.mxu1 %v1291_v61  ;;  %1612 = vmatpush.msrb.mxu2 %v1309_v63  ;;  %v1296_v61 = vld [vmem:[#allocation7 + $0x708] sm:$0xff]  ;;  %v1313_v63 = vld [vmem:[#allocation7 + $0x790] sm:$0xff] }
 0x117   : > { %1631 = vmatpush.msrb.mxu3 %v1326_v0  ;;  %1576 = vmatpush.msrb.mxu0 %v1273_v1 }
 0x118   : > { %1595 = vmatpush.msrb.mxu1 %v1290_v2  ;;  %1613 = vmatpush.msrb.mxu2 %v1308_v3  ;;  %v1312_v2 = vld [vmem:[#allocation7 + $0x788] sm:$0xff] }
 0x119   : > { %1632 = vmatpush.msrb.mxu3 %v1325_v4  ;;  %1577 = vmatpush.msrb.mxu0 %v1272_v5  ;;  %v1311_v4 = vld [vmem:[#allocation7 + $0x780] sm:$0xff] }
 0x11a   : > { %1596 = vmatpush.msrb.mxu1 %v1289_v6  ;;  %1614 = vmatpush.msrb.mxu2 %v1307_v7  ;;  %v1911_v5 = vld [vmem:[#allocation8] ss:$0 sm:$0xff] }
 0x11b   : > { %1633 = vmatpush.msrb.mxu3 %v1324_v9  ;;  %1578 = vmatpush.msrb.mxu0 %v1271_v10 }
 0x11c   : > { %1597 = vmatpush.msrb.mxu1 %v1288_v11  ;;  %1615 = vmatpush.msrb.mxu2 %v1306_v12 }
 0x11d   : > { %1634 = vmatpush.msrb.mxu3 %v1323_v13  ;;  %1579 = vmatpush.msrb.mxu0 %v1270_v14 }
 0x11e   : > { %1598 = vmatpush.msrb.mxu1 %v1287_v15  ;;  %1616 = vmatpush.msrb.mxu2 %v1305_v16 }
 0x11f   : > { %1635 = vmatpush.msrb.mxu3 %v1322_v62  ;;  %1580 = vmatpush.msrb.mxu0 %v1269_v17 }
 0x120   : > { %1599 = vmatpush.msrb.mxu1 %v1286_v18  ;;  %1617 = vmatpush.msrb.mxu2 %v1304_v19 }
 0x121   : > { %1636 = vmatpush.msrb.mxu3 %v1321_v20  ;;  %1581 = vmatpush.msrb.mxu0 %v1268_v21 }
 0x122   : > { %1600 = vmatpush.msrb.mxu1 %v1285_v22  ;;  %1618 = vmatpush.msrb.mxu2 %v1303_v23 }
 0x123   : > { %1637 = vmatpush.msrb.mxu3 %v1320_v24  ;;  %1582 = vmatpush.msrb.mxu0 %v1267_v25 }
 0x124   : > { %1601 = vmatpush.msrb.mxu1 %v1284_v26  ;;  %1619 = vmatpush.msrb.mxu2 %v1302_v27 }
 0x125   : > { %1638 = vmatpush.msrb.mxu3 %v1319_v28  ;;  %1583 = vmatpush.msrb.mxu0 %v1266_v29  ;;  %v960_v37 = vpop.f32.mrf.mxu0 }
 0x126   : > { %1602 = vmatpush.msrb.mxu1 %v1283_v30  ;;  %1620 = vmatpush.msrb.mxu2 %v1301_v32  ;;  %v961_v41 = vadd.f32 %v960_v37, %v683_v31  ;;  %v1651_v37 = vld [vmem:[%s405_s28] sm:$0xff] }
 0x127   : > { %1639 = vmatpush.msrb.mxu3 %v1318_v33  ;;  %1584 = vmatpush.msrb.mxu0 %v1265_v34  ;;  %v980_v44 = vpop.f32.mrf.mxu1 }
 0x128   : > { %1603 = vmatpush.msrb.mxu1 %v1282_v35  ;;  %1621 = vmatpush.msrb.mxu2 %v1300_v39  ;;  %v981_v47 = vadd.f32 %v980_v44, %v684_v36  ;;  %v1035_v51 = vmax.f32 %v961_v41, 0.0  ;;  %v2131_v41 = vmov 128.0  }
 0x129   : > { %1640 = vmatpush.msrb.mxu3 %v1317_v40  ;;  %1585 = vmatpush.msrb.mxu0 %v1264_v42  ;;  %1914 = vrcp.f32 %v2131_v41 }
 0x12a   : > { %1604 = vmatpush.msrb.mxu1 %v1281_v43  ;;  %1622 = vmatpush.msrb.mxu2 %v1299_v45  ;;  %v1036_v55 = vmax.f32 %v981_v47, 0.0 }
 0x12b   : > { %1641 = vmatpush.msrb.mxu3 %v1316_v46  ;;  %1586 = vmatpush.msrb.mxu0 %v1263_v48 }
 0x12c   : > { %1605 = vmatpush.msrb.mxu1 %v1280_v49  ;;  %v1000_v56 = vpop.f32.mrf.mxu2  ;;  %1623 = vmatpush.msrb.mxu2 %v1298_v52 }
 0x12d   : > { %1642 = vmatpush.msrb.mxu3 %v1315_v53  ;;  %v1001_v59 = vadd.f32 %v1000_v56, %v685_v50  ;;  %1587 = vmatmul.f32.vlgmr.msrb.gmra.mxu0 %v1035_v51 }
 0x12e   : > { %1606 = vmatpush.msrb.mxu1 %v1279_v38  ;;  %v1020_v60 = vpop.f32.mrf.mxu3  ;;  %1624 = vmatpush.msrb.mxu2 %v1297_v57 }
 0x12f   : > { %1643 = vmatpush.msrb.mxu3 %v1314_v58  ;;  %v1021_v0 = vadd.f32 %v1020_v60, %v686_v54  ;;  %v1037_v1 = vmax.f32 %v1001_v59, 0.0  ;;  %1607 = vmatmul.f32.vlgmr.msrb.gmra.mxu1 %v1036_v55  ;;  %v1915_v42 = vpop.eup %1914  ;;  %v1912_v60 = vld [vmem:[#allocation10] ss:$0 sm:$0xff] }
 0x130   : > { %1625 = vmatpush.msrb.mxu2 %v1296_v61  ;;  %v1656_v43 = vmul.f32 128.0, %v1915_v42  ;;  %vm1660_vm0 = vweird.f32 %v1915_v42 }
 0x131   : > { %1644 = vmatpush.msrb.mxu3 %v1313_v63  ;;  %v1038_v3 = vmax.f32 %v1021_v0, 0.0  ;;  %v1913_v63 = vld [vmem:[#allocation11] ss:$0 sm:$0xff] }
 0x132   : > { %1626 = vmatpush.msrb.mxu2 %v1295_v8  ;;  %v1657_v44 = vsub.f32 1.0, %v1656_v43 }
 0x133   : > { %1645 = vmatpush.msrb.mxu3 %v1312_v2  ;;  %1627 = vmatmul.f32.vlgmr.msrb.gmra.mxu2 %v1037_v1 }
 0x134   : > { %v1658_v45 = vmul.f32 %v1915_v42, %v1657_v44 }
 0x135   : > { %1646 = vmatpush.msrb.mxu3 %v1311_v4 }
 0x136   : > { %1647 = vmatmul.f32.vlgmr.msrb.gmra.mxu3 %v1038_v3  ;;  %v1659_v46 = vadd.f32 %v1915_v42, %v1658_v45 }
 0x138   : > { %v1661_v47 = vsel %vm1660_vm0, %v1915_v42, %v1659_v46 }
 0x163   : > { %v1348_v6 = vpop.f32.mrf.mxu0 }
 0x164   : > { %v1349_v7 = vadd.f32 %v1911_v5, %v1348_v6 }
 0x166   : > { %v1368_v9 = vpop.f32.mrf.mxu1 }
 0x167   : > { %v1369_v10 = vadd.f32 %v1368_v9, %v1349_v7 }
 0x170   : > { %v1388_v11 = vpop.f32.mrf.mxu2 }
 0x171   : > { %v1389_v12 = vadd.f32 %v1388_v11, %v1369_v10 }
 0x173   : > { %v1408_v13 = vpop.f32.mrf.mxu3 }
 0x174   : > { %v1409_v14 = vadd.f32 %v1408_v13, %v1389_v12 }
 0x177   : > { %v1428_v15 = vpop.f32.mrf.mxu0 }
 0x178   : > { %v1429_v16 = vadd.f32 %v1428_v15, %v1409_v14 }
 0x17a   : > { %v1448_v62 = vpop.f32.mrf.mxu1  ;;  %v1468_v18 = vpop.f32.mrf.mxu2 }
 0x17b   : > { %v1449_v17 = vadd.f32 %v1448_v62, %v1429_v16 }
 0x17d   : > { %v1469_v19 = vadd.f32 %v1468_v18, %v1449_v17  ;;  %v1488_v20 = vpop.f32.mrf.mxu3 }
 0x17f   : > { %v1489_v22 = vadd.f32 %v1488_v20, %v1469_v19 }
 0x188   : > { %v1508_v21 = vpop.f32.mrf.mxu0 }
 0x189   : > { %v1509_v23 = vadd.f32 %v1508_v21, %v1489_v22 }
 0x18b   : > { %v1528_v24 = vpop.f32.mrf.mxu1 }
 0x18c   : > { %v1529_v26 = vadd.f32 %v1528_v24, %v1509_v23 }
 0x195   : > { %v1548_v25 = vpop.f32.mrf.mxu2 }
 0x196   : > { %v1549_v27 = vadd.f32 %v1548_v25, %v1529_v26 }
 0x198   : > { %v1568_v28 = vpop.f32.mrf.mxu3 }
 0x199   : > { %v1569_v30 = vadd.f32 %v1568_v28, %v1549_v27 }
 0x1aa   : > { %v1588_v29 = vpop.f32.mrf.mxu0 }
 0x1ab   : > { %v1589_v31 = vadd.f32 %v1588_v29, %v1569_v30 }
 0x1ac   : > { %v1608_v32 = vpop.f32.mrf.mxu1 }
 0x1ad   : > { %v1609_v33 = vadd.f32 %v1608_v32, %v1589_v31 }
 0x1b6   : > { %v1628_v34 = vpop.f32.mrf.mxu2 }
 0x1b7   : > { %v1629_v35 = vadd.f32 %v1628_v34, %v1609_v33 }
 0x1b9   : > { %v1648_v36 = vpop.f32.mrf.mxu3 }
 0x1ba   : > { %v1649_v39 = vadd.f32 %v1648_v36, %v1629_v35 }
 0x1bc   : > { %v1652_v40 = vadd.f32 %v1651_v37, %v1649_v39 }
 0x1be   : > { %1653 = vadd.xlane.f32.xlu0 %v1652_v40 }
 0x231   : > { %v1654_v48 = vpop.xlane.xlu0 %1653 }
 0x232   : > { %v1662_v49 = vmul.f32 %v1661_v47, %v1654_v48 }
 0x234   : > { %v1663_v50 = vsub.f32 %v1652_v40, %v1662_v49 }
 0x236   : > { %v1664_v51 = vmul.f32 %v1663_v50, %v1663_v50 }
 0x238   : > { %1665 = vadd.xlane.f32.xlu0 %v1664_v51 }
 0x2ab   : > { %v1666_v52 = vpop.xlane.xlu0 %1665 }
 0x2ac   : > { %v1667_v53 = vmul.f32 %v1666_v52, %v1661_v47 }
 0x2ae   : > { %v1668_v38 = vadd.f32 1e-05, %v1667_v53 }
 0x2b0   : > { %1916 = vrsqrt.f32 %v1668_v38  ;;  %vm1675_vm2 = vweird.f32 %v1668_v38 }
 0x2b6   : > { %v1917_v54 = vpop.eup %1916 }
 0x2b7   : > { %v1670_v55 = vmul.f32 %v1917_v54, %v1668_v38  ;;  %vm1676_vm1 = vweird.f32 %v1917_v54 }
 0x2b8   : > { %vm1677_vm3 = vmor %vm1675_vm2, %vm1676_vm1 }
 0x2b9   : > { %v1671_v56 = vmul.f32 %v1917_v54, %v1670_v55 }
 0x2bb   : > { %v1672_v57 = vmul.f32 0.5, %v1671_v56 }
 0x2bd   : > { %v1673_v58 = vsub.f32 1.5, %v1672_v57 }
 0x2bf   : > { %v1674_v59 = vmul.f32 %v1917_v54, %v1673_v58 }
 0x2c1   : > { %v1678_v61 = vsel %vm1677_vm3, %v1917_v54, %v1674_v59 }
 0x2c2   : > { %v1679_v0 = vmul.f32 %v1678_v61, %v1663_v50 }
 0x2c4   : > { %v1684_v1 = vmul.f32 %v1912_v60, %v1679_v0 }
 0x2c6   : > { %v1689_v8 = vadd.f32 %v1913_v63, %v1684_v1 }
 0x2c8   : > { %1690 = vst [vmem:[%s409_s13] sm:$0xff] %v1689_v8 }
 0x2c9 PF: > { %s22_s27 = sadd.s32 1, %s2120_s27  }
 0x2ca   : > { %p19_p7 = scmp.ge.s32.totalorder %s22_s27, 4  }
 0x2cc   :  { %21 = sbr.rel (!%p19_p7) target bundleno = 4 (0x4), region = 110 }
 0x2d1   :  { %1710 = vsyncpa [#allocation4], 1 }
 0x2d2   :  { %1712 = vsyncpa [#allocation4 + $0x1], 1 }
 0x2d3   :  { %1713 = vsyncpa [#allocation6], 1 }
 0x2d4   :  { %1714 = vsyncpa [#allocation9], 1 }
 0x2d5   :  { %1715 = vsyncpa [#allocation12], 1 }

// kernel: forward.43
= control target key start
LH: loop header
LB: loop body
LE: loop exit
PB: predicated region body
PF: predicated region fallthrough
CT: control target
= control target key end

     0   :  { %11 = vsyncpa [#allocation3], 0  ;;  %s798_s0 = inlined_call_operand.vmem [shape: f32[16,128], index: 0, kind: input, shape index: {}]   ;;  %s799_s1 = inlined_call_operand.vmem [shape: f32[128,128], index: 1, kind: input, shape index: {}]   ;;  %s800_s2 = inlined_call_operand.hbm [shape: f32[1,128], index: 2, kind: input, shape index: {}]   ;;  %s801_s3 = inlined_call_operand.vmem [shape: f32[16,128], index: 3, kind: input, shape index: {}]   ;;  %s802_s4 = inlined_call_operand.hbm [shape: f32[1,128], index: 4, kind: input, shape index: {}]   ;;  %s803_s5 = inlined_call_operand.hbm [shape: f32[1,128], index: 5, kind: input, shape index: {}]   ;;  %s804_s6 = inlined_call_operand.vmem [shape: f32[16,128], index: 6, kind: output, shape index: {}]  }
   0x1   :  { %12 = vsyncpa [#allocation5], 0  ;;  %s693_s21 = smov 0  }
   0x2 LB: > { %s212_s24 = sshll.u32 %s802_s4, 4  ;;  %s702_s25 = sadd.s32 4294967295, %s652_s21   ;;  %s652_s21 = sphi %s693_s21, %s18_s21   ;;  %s213_s24 = int_to_ptr.hbm [resolvable:$true] %s212_s24 }
   0x3   : > { %p487_p0 = scmp.ge.s32.totalorder %s652_s21, 1  ;;  %p185_p1 = scmp.lt.s32.totalorder %s652_s21, 3 }
   0x4   : > { %p523_p2 = scmp.eq.s32.totalorder %s702_s25, 0  ;;  %s654_s27 = smov [#allocation4]  }
   0x5   : > { %p707_p3 = pnand %p487_p0, %p185_p1  ;;  %s214_s28 = sshll.u32 %s654_s27, 4  ;;  %s215_s28 = int_to_ptr.vmem [resolvable:$true] %s214_s28 }
   0x6   : > { %s200_s7 = sshll.u32 %s800_s2, 4  ;;  %s224_s10 = sshll.u32 %s803_s5, 4  ;;  %s201_s7 = int_to_ptr.hbm [resolvable:$true] %s200_s7  ;;  %s225_s10 = int_to_ptr.hbm [resolvable:$true] %s224_s10 }
   0x7   : > { %p513_p4 = pneg %p707_p3  ;;  %s655_s11 = smov [#allocation2]  }
   0x8   : > { %s202_s12 = sshll.u32 %s655_s11, 4  ;;  %s656_s13 = smov [#allocation6]   ;;  %s203_s12 = int_to_ptr.vmem [resolvable:$true] %s202_s12 }
   0x9   : > { %p514_p5 = pnand %p523_p2, %p513_p4  ;;  %s226_s14 = sshll.u32 %s656_s13, 4  ;;  %s227_s14 = int_to_ptr.vmem [resolvable:$true] %s226_s14 }
   0xa   : > { %253 = sbr.rel (%p707_p3) target bundleno = 447 (0x1bf), region = 44 }
   0xb   : > { %519 = dma.hbm_to_vmem [thread:$0]  (!%p514_p5), %s213_s24, 16, %s215_s28, [#allocation5]  }
   0xc   : > { %516 = dma.hbm_to_vmem [thread:$0]  (!%p514_p5), %s201_s7, 16, %s203_s12, [#allocation3]  }
   0xd   : > { %522 = dma.hbm_to_vmem [thread:$0]  (!%p514_p5), %s225_s10, 16, %s227_s14, [#allocation5]  }
   0xf   : > { %643 = dma.done.wait (%p523_p2), [#allocation3], 16  }
  0x10   : > { %645 = vsyncadd (%p523_p2), [#allocation3], 4294967280 }
  0x11   : > { %647 = dma.done.wait (%p523_p2), [#allocation5], 32  }
  0x12   : > { %649 = vsyncadd (%p523_p2), [#allocation5], 4294967264  ;;  %v324_v0 = vld [vmem:[%s799_s1 + $0x78] sm:$0xff]  ;;  %v323_v1 = vld [vmem:[%s799_s1 + $0x70] sm:$0xff]  ;;  %p296_p6 = scmp.lt.s32.totalorder %s702_s25, 1  ;;  %v657_v22 = vmov 128.0  }
  0x13   : > { %329 = vmatpush.msra.mxu0 %v324_v0  ;;  %v322_v2 = vld [vmem:[%s799_s1 + $0x68] sm:$0xff]  ;;  %v321_v3 = vld [vmem:[%s799_s1 + $0x60] sm:$0xff]  ;;  %v320_v4 = vld [vmem:[%s799_s1 + $0x58] sm:$0xff]  ;;  %544 = vrcp.f32 %v657_v22 }
  0x14   : > { %v319_v5 = vld [vmem:[%s799_s1 + $0x50] sm:$0xff]  ;;  %v318_v6 = vld [vmem:[%s799_s1 + $0x48] sm:$0xff]  ;;  %v317_v7 = vld [vmem:[%s799_s1 + $0x40] sm:$0xff]  ;;  %s807_s25 = smov (!%p296_p6, %s702_s25), 1 }
  0x15   : > { %330 = vmatpush.msra.mxu0 %v323_v1  ;;  %v316_v8 = vld [vmem:[%s799_s1 + $0x38] sm:$0xff]  ;;  %v315_v9 = vld [vmem:[%s799_s1 + $0x30] sm:$0xff]  ;;  %v314_v10 = vld [vmem:[%s799_s1 + $0x28] sm:$0xff]  ;;  %s772_s19 = sshll.u32 %s807_s25, 3 }
  0x16   : > { %v313_v11 = vld [vmem:[%s799_s1 + $0x20] sm:$0xff]  ;;  %v312_v12 = vld [vmem:[%s799_s1 + $0x18] sm:$0xff]  ;;  %v311_v13 = vld [vmem:[%s799_s1 + $0x10] sm:$0xff]  ;;  %s299_s28 = scalar_lea.vmem %s798_s0, %s772_s19  ;;  %s303_s8 = scalar_lea.vmem %s801_s3, %s772_s19 }
  0x17   : > { %331 = vmatpush.msra.mxu0 %v322_v2  ;;  %v310_v14 = vld [vmem:[%s799_s1 + $0x8] sm:$0xff]  ;;  %v309_v15 = vld [vmem:[%s799_s1] sm:$0xff]  ;;  %s307_s11 = scalar_lea.vmem %s804_s6, %s772_s19 }
  0x18   : > { %v308_v16 = vld [vmem:[%s299_s28] sm:$0xff] }
  0x19   : > { %332 = vmatpush.msra.mxu0 %v321_v3  ;;  %v541_v17 = vld [vmem:[#allocation2] ss:$0 sm:$0xff]  ;;  %v545_v23 = vpop.eup %544  ;;  %v542_v42 = vld [vmem:[#allocation4] ss:$0 sm:$0xff]  ;;  %v543_v44 = vld [vmem:[#allocation6] ss:$0 sm:$0xff] }
  0x1a   : > { %v349_v19 = vld [vmem:[%s303_s8] sm:$0xff]  ;;  %v354_v24 = vmul.f32 128.0, %v545_v23  ;;  %vm358_vm0 = vweird.f32 %v545_v23 }
  0x1b   : > { %333 = vmatpush.msra.mxu0 %v320_v4 }
  0x1c   : > { %v355_v25 = vsub.f32 1.0, %v354_v24 }
  0x1d   : > { %334 = vmatpush.msra.mxu0 %v319_v5 }
  0x1e   : > { %v356_v26 = vmul.f32 %v545_v23, %v355_v25 }
  0x1f   : > { %335 = vmatpush.msra.mxu0 %v318_v6 }
  0x20   : > { %v357_v27 = vadd.f32 %v545_v23, %v356_v26 }
  0x21   : > { %336 = vmatpush.msra.mxu0 %v317_v7 }
  0x22   : > { %v359_v28 = vsel %vm358_vm0, %v545_v23, %v357_v27 }
  0x23   : > { %337 = vmatpush.msra.mxu0 %v316_v8 }
  0x25   : > { %338 = vmatpush.msra.mxu0 %v315_v9 }
  0x27   : > { %339 = vmatpush.msra.mxu0 %v314_v10 }
  0x29   : > { %340 = vmatpush.msra.mxu0 %v313_v11 }
  0x2b   : > { %341 = vmatpush.msra.mxu0 %v312_v12 }
  0x2d   : > { %342 = vmatpush.msra.mxu0 %v311_v13 }
  0x2f   : > { %343 = vmatpush.msra.mxu0 %v310_v14 }
  0x31   : > { %344 = vmatpush.msra.mxu0 %v309_v15 }
  0x32   : > { %345 = vmatmul.f32.vlgmr.msra.gmra.mxu0 %v308_v16 }
  0xaf   : > { %v346_v18 = vpop.f32.mrf.mxu0 }
  0xb0   : > { %v347_v20 = vadd.f32 %v541_v17, %v346_v18 }
  0xb2   : > { %v350_v21 = vadd.f32 %v349_v19, %v347_v20 }
  0xb4   : > { %351 = vadd.xlane.f32.xlu0 %v350_v21 }
 0x127   : > { %v352_v29 = vpop.xlane.xlu0 %351 }
 0x128   : > { %v360_v30 = vmul.f32 %v359_v28, %v352_v29 }
 0x12a   : > { %v361_v31 = vsub.f32 %v350_v21, %v360_v30 }
 0x12c   : > { %v362_v32 = vmul.f32 %v361_v31, %v361_v31 }
 0x12e   : > { %363 = vadd.xlane.f32.xlu0 %v362_v32 }
 0x1a1   : > { %v364_v33 = vpop.xlane.xlu0 %363 }
 0x1a2   : > { %v365_v34 = vmul.f32 %v364_v33, %v359_v28 }
 0x1a4   : > { %v366_v35 = vadd.f32 1e-05, %v365_v34 }
 0x1a6   : > { %546 = vrsqrt.f32 %v366_v35  ;;  %vm373_vm2 = vweird.f32 %v366_v35 }
 0x1ac   : > { %v547_v36 = vpop.eup %546 }
 0x1ad   : > { %v368_v37 = vmul.f32 %v547_v36, %v366_v35  ;;  %vm374_vm1 = vweird.f32 %v547_v36 }
 0x1ae   : > { %vm375_vm3 = vmor %vm373_vm2, %vm374_vm1 }
 0x1af   : > { %v369_v38 = vmul.f32 %v547_v36, %v368_v37 }
 0x1b1   : > { %v370_v39 = vmul.f32 0.5, %v369_v38 }
 0x1b3   : > { %v371_v40 = vsub.f32 1.5, %v370_v39 }
 0x1b5   : > { %v372_v41 = vmul.f32 %v547_v36, %v371_v40 }
 0x1b7   : > { %v376_v43 = vsel %vm375_vm3, %v547_v36, %v372_v41 }
 0x1b8   : > { %v377_v45 = vmul.f32 %v376_v43, %v361_v31 }
 0x1ba   : > { %v382_v46 = vmul.f32 %v542_v42, %v377_v45 }
 0x1bc   : > { %v387_v47 = vadd.f32 %v543_v44, %v382_v46 }
 0x1be   : > { %388 = vst [vmem:[%s307_s11] sm:$0xff] %v387_v47 }
 0x1bf PF: > { %s18_s21 = sadd.s32 1, %s652_s21  }
 0x1c0   : > { %p15_p7 = scmp.ge.s32.totalorder %s18_s21, 4  }
 0x1c2   :  { %17 = sbr.rel (!%p15_p7) target bundleno = 2 (0x2), region = 90 }
 0x1c7   :  { %408 = vsyncpa [#allocation3], 1 }
 0x1c8   :  { %410 = vsyncpa [#allocation3 + $0x1], 1 }
 0x1c9   :  { %411 = vsyncpa [#allocation5], 1 }

// kernel: forward.36
= control target key start
LH: loop header
LB: loop body
LE: loop exit
PB: predicated region body
PF: predicated region fallthrough
CT: control target
= control target key end

     0   :  { %s1744_s27 = smov 0   ;;  %s3368_s0 = inlined_call_operand.vmem [shape: f32[16,128], index: 0, kind: input, shape index: {}, may-alias: {0,5}]   ;;  %s3369_s1 = inlined_call_operand.vmem [shape: f32[128,2048], index: 1, kind: input, shape index: {}]   ;;  %s3370_s2 = inlined_call_operand.vmem [shape: f32[1,2048], index: 2, kind: input, shape index: {}]   ;;  %s3371_s3 = inlined_call_operand.vmem [shape: f32[2048,128], index: 3, kind: input, shape index: {}]   ;;  %s3372_s4 = inlined_call_operand.vmem [shape: f32[1,128], index: 4, kind: input, shape index: {}]   ;;  %s3373_s5 = inlined_call_operand.vmem [shape: f32[16,128], index: 5, kind: input, shape index: {}, may-alias: {0,5}]   ;;  %s3374_s6 = inlined_call_operand.vmem [shape: f32[1,128], index: 6, kind: input, shape index: {}]   ;;  %s3375_s7 = inlined_call_operand.vmem [shape: f32[1,128], index: 7, kind: input, shape index: {}]   ;;  %s3376_s8 = inlined_call_operand.vmem [shape: f32[16,128], index: 8, kind: output, shape index: {}]  }
   0x1 LB: > { %s1664_s28 = sadd.s32 4294967295, %s1696_s27   ;;  %p1668_p0 = scmp.ge.s32.totalorder %s1696_s27, 1  ;;  %s1696_s27 = sphi %s1744_s27, %s18_s27  }
   0x2   : > { %p270_p1 = scmp.lt.s32.totalorder %s1696_s27, 3 }
   0x4   : > { %p271_p2 = pnand %p1668_p0, %p270_p1 }
   0x5   : > { %p2054_p3 = scmp.lt.s32.totalorder (!%p271_p2), %s1664_s28, 1 }
   0x6   : > { %274 = sbr.rel (%p271_p2) target bundleno = 689 (0x2b1), region = 52 }
   0xb   : > { %v559_v0 = vld [vmem:[%s3369_s1 + $0x780] sm:$0xff]  ;;  %v561_v1 = vld [vmem:[%s3369_s1 + $0x790] sm:$0xff]  ;;  %v560_v3 = vld [vmem:[%s3369_s1 + $0x788] sm:$0xff]  ;;  %s3379_s28 = smov (!%p2054_p3, %s1664_s28), 1 }
   0xc   : > { %v543_v2 = vld [vmem:[%s3369_s1 + $0x700] sm:$0xff]  ;;  %611 = vmatpush.msra.mxu0 %v559_v0  ;;  %651 = vmatpush.msra.mxu2 %v561_v1  ;;  %v545_v4 = vld [vmem:[%s3369_s1 + $0x710] sm:$0xff]  ;;  %v562_v5 = vld [vmem:[%s3369_s1 + $0x798] sm:$0xff]  ;;  %s2110_s20 = sshll.u32 %s3379_s28, 3 }
   0xd   : > { %631 = vmatpush.msra.mxu1 %v560_v3  ;;  %671 = vmatpush.msra.mxu3 %v562_v5  ;;  %v527_v6 = vld [vmem:[%s3369_s1 + $0x680] sm:$0xff]  ;;  %v544_v7 = vld [vmem:[%s3369_s1 + $0x708] sm:$0xff]  ;;  %v529_v8 = vld [vmem:[%s3369_s1 + $0x690] sm:$0xff]  ;;  %s309_s14 = scalar_lea.vmem %s3368_s0, %s2110_s20  ;;  %s313_s24 = scalar_lea.vmem %s3373_s5, %s2110_s20 }
   0xe   : > { %612 = vmatpush.msra.mxu0 %v543_v2  ;;  %652 = vmatpush.msra.mxu2 %v545_v4  ;;  %v546_v9 = vld [vmem:[%s3369_s1 + $0x718] sm:$0xff]  ;;  %v528_v10 = vld [vmem:[%s3369_s1 + $0x688] sm:$0xff]  ;;  %v511_v11 = vld [vmem:[%s3369_s1 + $0x600] sm:$0xff]  ;;  %s317_s11 = scalar_lea.vmem %s3376_s8, %s2110_s20 }
   0xf   : > { %632 = vmatpush.msra.mxu1 %v544_v7  ;;  %672 = vmatpush.msra.mxu3 %v546_v9  ;;  %v513_v12 = vld [vmem:[%s3369_s1 + $0x610] sm:$0xff]  ;;  %v530_v13 = vld [vmem:[%s3369_s1 + $0x698] sm:$0xff]  ;;  %v512_v14 = vld [vmem:[%s3369_s1 + $0x608] sm:$0xff] }
  0x10   : > { %613 = vmatpush.msra.mxu0 %v527_v6  ;;  %653 = vmatpush.msra.mxu2 %v529_v8  ;;  %v514_v15 = vld [vmem:[%s3369_s1 + $0x618] sm:$0xff]  ;;  %v495_v16 = vld [vmem:[%s3369_s1 + $0x580] sm:$0xff]  ;;  %v497_v17 = vld [vmem:[%s3369_s1 + $0x590] sm:$0xff] }
  0x11   : > { %633 = vmatpush.msra.mxu1 %v528_v10  ;;  %673 = vmatpush.msra.mxu3 %v530_v13  ;;  %v496_v18 = vld [vmem:[%s3369_s1 + $0x588] sm:$0xff]  ;;  %v498_v19 = vld [vmem:[%s3369_s1 + $0x598] sm:$0xff]  ;;  %v479_v20 = vld [vmem:[%s3369_s1 + $0x500] sm:$0xff] }
  0x12   : > { %614 = vmatpush.msra.mxu0 %v511_v11  ;;  %654 = vmatpush.msra.mxu2 %v513_v12  ;;  %v481_v21 = vld [vmem:[%s3369_s1 + $0x510] sm:$0xff]  ;;  %v480_v22 = vld [vmem:[%s3369_s1 + $0x508] sm:$0xff]  ;;  %v482_v23 = vld [vmem:[%s3369_s1 + $0x518] sm:$0xff] }
  0x13   : > { %634 = vmatpush.msra.mxu1 %v512_v14  ;;  %674 = vmatpush.msra.mxu3 %v514_v15  ;;  %v463_v24 = vld [vmem:[%s3369_s1 + $0x480] sm:$0xff]  ;;  %v465_v25 = vld [vmem:[%s3369_s1 + $0x490] sm:$0xff]  ;;  %v464_v26 = vld [vmem:[%s3369_s1 + $0x488] sm:$0xff] }
  0x14   : > { %615 = vmatpush.msra.mxu0 %v495_v16  ;;  %655 = vmatpush.msra.mxu2 %v497_v17  ;;  %v466_v27 = vld [vmem:[%s3369_s1 + $0x498] sm:$0xff]  ;;  %v447_v28 = vld [vmem:[%s3369_s1 + $0x400] sm:$0xff]  ;;  %v449_v29 = vld [vmem:[%s3369_s1 + $0x410] sm:$0xff] }
  0x15   : > { %635 = vmatpush.msra.mxu1 %v496_v18  ;;  %675 = vmatpush.msra.mxu3 %v498_v19  ;;  %v448_v30 = vld [vmem:[%s3369_s1 + $0x408] sm:$0xff]  ;;  %v450_v31 = vld [vmem:[%s3369_s1 + $0x418] sm:$0xff]  ;;  %v431_v32 = vld [vmem:[%s3369_s1 + $0x380] sm:$0xff] }
  0x16   : > { %616 = vmatpush.msra.mxu0 %v479_v20  ;;  %656 = vmatpush.msra.mxu2 %v481_v21  ;;  %v433_v33 = vld [vmem:[%s3369_s1 + $0x390] sm:$0xff]  ;;  %v432_v34 = vld [vmem:[%s3369_s1 + $0x388] sm:$0xff]  ;;  %v434_v35 = vld [vmem:[%s3369_s1 + $0x398] sm:$0xff] }
  0x17   : > { %636 = vmatpush.msra.mxu1 %v480_v22  ;;  %676 = vmatpush.msra.mxu3 %v482_v23  ;;  %v415_v36 = vld [vmem:[%s3369_s1 + $0x300] sm:$0xff]  ;;  %v417_v37 = vld [vmem:[%s3369_s1 + $0x310] sm:$0xff]  ;;  %v416_v38 = vld [vmem:[%s3369_s1 + $0x308] sm:$0xff] }
  0x18   : > { %617 = vmatpush.msra.mxu0 %v463_v24  ;;  %657 = vmatpush.msra.mxu2 %v465_v25  ;;  %v418_v39 = vld [vmem:[%s3369_s1 + $0x318] sm:$0xff]  ;;  %v399_v40 = vld [vmem:[%s3369_s1 + $0x280] sm:$0xff]  ;;  %v401_v41 = vld [vmem:[%s3369_s1 + $0x290] sm:$0xff] }
  0x19   : > { %637 = vmatpush.msra.mxu1 %v464_v26  ;;  %677 = vmatpush.msra.mxu3 %v466_v27  ;;  %v400_v42 = vld [vmem:[%s3369_s1 + $0x288] sm:$0xff]  ;;  %v402_v43 = vld [vmem:[%s3369_s1 + $0x298] sm:$0xff]  ;;  %v383_v44 = vld [vmem:[%s3369_s1 + $0x200] sm:$0xff] }
  0x1a   : > { %618 = vmatpush.msra.mxu0 %v447_v28  ;;  %658 = vmatpush.msra.mxu2 %v449_v29  ;;  %v385_v45 = vld [vmem:[%s3369_s1 + $0x210] sm:$0xff]  ;;  %v384_v46 = vld [vmem:[%s3369_s1 + $0x208] sm:$0xff]  ;;  %v386_v47 = vld [vmem:[%s3369_s1 + $0x218] sm:$0xff] }
  0x1b   : > { %638 = vmatpush.msra.mxu1 %v448_v30  ;;  %678 = vmatpush.msra.mxu3 %v450_v31  ;;  %v367_v48 = vld [vmem:[%s3369_s1 + $0x180] sm:$0xff]  ;;  %v369_v49 = vld [vmem:[%s3369_s1 + $0x190] sm:$0xff]  ;;  %v368_v50 = vld [vmem:[%s3369_s1 + $0x188] sm:$0xff] }
  0x1c   : > { %619 = vmatpush.msra.mxu0 %v431_v32  ;;  %659 = vmatpush.msra.mxu2 %v433_v33  ;;  %v370_v51 = vld [vmem:[%s3369_s1 + $0x198] sm:$0xff]  ;;  %v351_v52 = vld [vmem:[%s3369_s1 + $0x100] sm:$0xff]  ;;  %v353_v53 = vld [vmem:[%s3369_s1 + $0x110] sm:$0xff] }
  0x1d   : > { %639 = vmatpush.msra.mxu1 %v432_v34  ;;  %679 = vmatpush.msra.mxu3 %v434_v35  ;;  %v352_v54 = vld [vmem:[%s3369_s1 + $0x108] sm:$0xff]  ;;  %v354_v55 = vld [vmem:[%s3369_s1 + $0x118] sm:$0xff]  ;;  %v335_v56 = vld [vmem:[%s3369_s1 + $0x80] sm:$0xff] }
  0x1e   : > { %620 = vmatpush.msra.mxu0 %v415_v36  ;;  %660 = vmatpush.msra.mxu2 %v417_v37  ;;  %v337_v57 = vld [vmem:[%s3369_s1 + $0x90] sm:$0xff]  ;;  %v336_v58 = vld [vmem:[%s3369_s1 + $0x88] sm:$0xff]  ;;  %v338_v59 = vld [vmem:[%s3369_s1 + $0x98] sm:$0xff] }
  0x1f   : > { %640 = vmatpush.msra.mxu1 %v416_v38  ;;  %680 = vmatpush.msra.mxu3 %v418_v39  ;;  %v319_v60 = vld [vmem:[%s3369_s1] sm:$0xff]  ;;  %v321_v61 = vld [vmem:[%s3369_s1 + $0x10] sm:$0xff]  ;;  %v320_v0 = vld [vmem:[%s3369_s1 + $0x8] sm:$0xff] }
  0x20   : > { %621 = vmatpush.msra.mxu0 %v399_v40  ;;  %661 = vmatpush.msra.mxu2 %v401_v41  ;;  %v563_v62 = vld [vmem:[%s3369_s1 + $0x7a0] sm:$0xff]  ;;  %v565_v63 = vld [vmem:[%s3369_s1 + $0x7b0] sm:$0xff]  ;;  %v322_v1 = vld [vmem:[%s3369_s1 + $0x18] sm:$0xff] }
  0x21   : > { %641 = vmatpush.msra.mxu1 %v400_v42  ;;  %681 = vmatpush.msra.mxu3 %v402_v43  ;;  %v547_v2 = vld [vmem:[%s3369_s1 + $0x720] sm:$0xff]  ;;  %v564_v3 = vld [vmem:[%s3369_s1 + $0x7a8] sm:$0xff]  ;;  %v549_v4 = vld [vmem:[%s3369_s1 + $0x730] sm:$0xff] }
  0x22   : > { %622 = vmatpush.msra.mxu0 %v383_v44  ;;  %662 = vmatpush.msra.mxu2 %v385_v45  ;;  %v566_v5 = vld [vmem:[%s3369_s1 + $0x7b8] sm:$0xff]  ;;  %v531_v6 = vld [vmem:[%s3369_s1 + $0x6a0] sm:$0xff]  ;;  %v548_v7 = vld [vmem:[%s3369_s1 + $0x728] sm:$0xff] }
  0x23   : > { %642 = vmatpush.msra.mxu1 %v384_v46  ;;  %682 = vmatpush.msra.mxu3 %v386_v47  ;;  %v533_v8 = vld [vmem:[%s3369_s1 + $0x6b0] sm:$0xff]  ;;  %v550_v9 = vld [vmem:[%s3369_s1 + $0x738] sm:$0xff]  ;;  %v515_v10 = vld [vmem:[%s3369_s1 + $0x620] sm:$0xff] }
  0x24   : > { %623 = vmatpush.msra.mxu0 %v367_v48  ;;  %663 = vmatpush.msra.mxu2 %v369_v49  ;;  %v532_v11 = vld [vmem:[%s3369_s1 + $0x6a8] sm:$0xff]  ;;  %v517_v12 = vld [vmem:[%s3369_s1 + $0x630] sm:$0xff]  ;;  %v534_v13 = vld [vmem:[%s3369_s1 + $0x6b8] sm:$0xff] }
  0x25   : > { %643 = vmatpush.msra.mxu1 %v368_v50  ;;  %683 = vmatpush.msra.mxu3 %v370_v51  ;;  %v499_v14 = vld [vmem:[%s3369_s1 + $0x5a0] sm:$0xff]  ;;  %v516_v15 = vld [vmem:[%s3369_s1 + $0x628] sm:$0xff]  ;;  %v501_v16 = vld [vmem:[%s3369_s1 + $0x5b0] sm:$0xff] }
  0x26   : > { %624 = vmatpush.msra.mxu0 %v351_v52  ;;  %664 = vmatpush.msra.mxu2 %v353_v53  ;;  %v518_v17 = vld [vmem:[%s3369_s1 + $0x638] sm:$0xff]  ;;  %v483_v18 = vld [vmem:[%s3369_s1 + $0x520] sm:$0xff]  ;;  %v500_v19 = vld [vmem:[%s3369_s1 + $0x5a8] sm:$0xff] }
  0x27   : > { %644 = vmatpush.msra.mxu1 %v352_v54  ;;  %684 = vmatpush.msra.mxu3 %v354_v55  ;;  %v485_v20 = vld [vmem:[%s3369_s1 + $0x530] sm:$0xff]  ;;  %v502_v21 = vld [vmem:[%s3369_s1 + $0x5b8] sm:$0xff]  ;;  %v467_v22 = vld [vmem:[%s3369_s1 + $0x4a0] sm:$0xff] }
  0x28   : > { %625 = vmatpush.msra.mxu0 %v335_v56  ;;  %665 = vmatpush.msra.mxu2 %v337_v57  ;;  %v484_v23 = vld [vmem:[%s3369_s1 + $0x528] sm:$0xff]  ;;  %v469_v24 = vld [vmem:[%s3369_s1 + $0x4b0] sm:$0xff]  ;;  %v486_v25 = vld [vmem:[%s3369_s1 + $0x538] sm:$0xff] }
  0x29   : > { %645 = vmatpush.msra.mxu1 %v336_v58  ;;  %685 = vmatpush.msra.mxu3 %v338_v59  ;;  %v451_v26 = vld [vmem:[%s3369_s1 + $0x420] sm:$0xff]  ;;  %v468_v27 = vld [vmem:[%s3369_s1 + $0x4a8] sm:$0xff]  ;;  %v453_v28 = vld [vmem:[%s3369_s1 + $0x430] sm:$0xff] }
  0x2a   : > { %626 = vmatpush.msra.mxu0 %v319_v60  ;;  %666 = vmatpush.msra.mxu2 %v321_v61  ;;  %v470_v29 = vld [vmem:[%s3369_s1 + $0x4b8] sm:$0xff]  ;;  %v435_v30 = vld [vmem:[%s3369_s1 + $0x3a0] sm:$0xff]  ;;  %v452_v31 = vld [vmem:[%s3369_s1 + $0x428] sm:$0xff] }
  0x2b   : > { %646 = vmatpush.msra.mxu1 %v320_v0  ;;  %686 = vmatpush.msra.mxu3 %v322_v1  ;;  %v437_v32 = vld [vmem:[%s3369_s1 + $0x3b0] sm:$0xff]  ;;  %v454_v33 = vld [vmem:[%s3369_s1 + $0x438] sm:$0xff]  ;;  %v419_v34 = vld [vmem:[%s3369_s1 + $0x320] sm:$0xff] }
  0x2c   : > { %691 = vmatpush.msrb.mxu0 %v563_v62  ;;  %731 = vmatpush.msrb.mxu2 %v565_v63  ;;  %v436_v35 = vld [vmem:[%s3369_s1 + $0x3a8] sm:$0xff]  ;;  %v421_v36 = vld [vmem:[%s3369_s1 + $0x330] sm:$0xff]  ;;  %v438_v37 = vld [vmem:[%s3369_s1 + $0x3b8] sm:$0xff] }
  0x2d   : > { %711 = vmatpush.msrb.mxu1 %v564_v3  ;;  %751 = vmatpush.msrb.mxu3 %v566_v5  ;;  %v403_v38 = vld [vmem:[%s3369_s1 + $0x2a0] sm:$0xff]  ;;  %v420_v39 = vld [vmem:[%s3369_s1 + $0x328] sm:$0xff]  ;;  %v405_v40 = vld [vmem:[%s3369_s1 + $0x2b0] sm:$0xff] }
  0x2e   : > { %692 = vmatpush.msrb.mxu0 %v547_v2  ;;  %732 = vmatpush.msrb.mxu2 %v549_v4  ;;  %v422_v41 = vld [vmem:[%s3369_s1 + $0x338] sm:$0xff]  ;;  %v387_v42 = vld [vmem:[%s3369_s1 + $0x220] sm:$0xff]  ;;  %v404_v43 = vld [vmem:[%s3369_s1 + $0x2a8] sm:$0xff] }
  0x2f   : > { %712 = vmatpush.msrb.mxu1 %v548_v7  ;;  %752 = vmatpush.msrb.mxu3 %v550_v9  ;;  %v389_v44 = vld [vmem:[%s3369_s1 + $0x230] sm:$0xff]  ;;  %v406_v45 = vld [vmem:[%s3369_s1 + $0x2b8] sm:$0xff]  ;;  %v371_v46 = vld [vmem:[%s3369_s1 + $0x1a0] sm:$0xff] }
  0x30   : > { %693 = vmatpush.msrb.mxu0 %v531_v6  ;;  %733 = vmatpush.msrb.mxu2 %v533_v8  ;;  %v388_v47 = vld [vmem:[%s3369_s1 + $0x228] sm:$0xff]  ;;  %v373_v48 = vld [vmem:[%s3369_s1 + $0x1b0] sm:$0xff]  ;;  %v390_v49 = vld [vmem:[%s3369_s1 + $0x238] sm:$0xff] }
  0x31   : > { %713 = vmatpush.msrb.mxu1 %v532_v11  ;;  %753 = vmatpush.msrb.mxu3 %v534_v13  ;;  %v355_v50 = vld [vmem:[%s3369_s1 + $0x120] sm:$0xff]  ;;  %v372_v51 = vld [vmem:[%s3369_s1 + $0x1a8] sm:$0xff]  ;;  %v357_v52 = vld [vmem:[%s3369_s1 + $0x130] sm:$0xff] }
  0x32   : > { %694 = vmatpush.msrb.mxu0 %v515_v10  ;;  %734 = vmatpush.msrb.mxu2 %v517_v12  ;;  %v374_v53 = vld [vmem:[%s3369_s1 + $0x1b8] sm:$0xff]  ;;  %v339_v54 = vld [vmem:[%s3369_s1 + $0xa0] sm:$0xff]  ;;  %v356_v55 = vld [vmem:[%s3369_s1 + $0x128] sm:$0xff] }
  0x33   : > { %714 = vmatpush.msrb.mxu1 %v516_v15  ;;  %754 = vmatpush.msrb.mxu3 %v518_v17  ;;  %v341_v56 = vld [vmem:[%s3369_s1 + $0xb0] sm:$0xff]  ;;  %v358_v57 = vld [vmem:[%s3369_s1 + $0x138] sm:$0xff]  ;;  %v323_v58 = vld [vmem:[%s3369_s1 + $0x20] sm:$0xff] }
  0x34   : > { %695 = vmatpush.msrb.mxu0 %v499_v14  ;;  %735 = vmatpush.msrb.mxu2 %v501_v16  ;;  %v340_v59 = vld [vmem:[%s3369_s1 + $0xa8] sm:$0xff]  ;;  %v325_v60 = vld [vmem:[%s3369_s1 + $0x30] sm:$0xff]  ;;  %v342_v61 = vld [vmem:[%s3369_s1 + $0xb8] sm:$0xff] }
  0x35   : > { %715 = vmatpush.msrb.mxu1 %v500_v19  ;;  %755 = vmatpush.msrb.mxu3 %v502_v21  ;;  %v2146_v62 = vld [vmem:[%s309_s14] sm:$0xff]  ;;  %v569_v0 = vld [vmem:[%s3369_s1 + $0x7d0] sm:$0xff]  ;;  %v324_v1 = vld [vmem:[%s3369_s1 + $0x28] sm:$0xff] }
  0x36   : > { %696 = vmatpush.msrb.mxu0 %v483_v18  ;;  %736 = vmatpush.msrb.mxu2 %v485_v20  ;;  %v567_v63 = vld [vmem:[%s3369_s1 + $0x7c0] sm:$0xff]  ;;  %v326_v2 = vld [vmem:[%s3369_s1 + $0x38] sm:$0xff]  ;;  %v568_v4 = vld [vmem:[%s3369_s1 + $0x7c8] sm:$0xff] }
  0x37   : > { %716 = vmatpush.msrb.mxu1 %v484_v23  ;;  %756 = vmatpush.msrb.mxu3 %v486_v25  ;;  %v551_v3 = vld [vmem:[%s3369_s1 + $0x740] sm:$0xff]  ;;  %v553_v5 = vld [vmem:[%s3369_s1 + $0x750] sm:$0xff]  ;;  %v570_v6 = vld [vmem:[%s3369_s1 + $0x7d8] sm:$0xff] }
  0x38   : > { %697 = vmatpush.msrb.mxu0 %v467_v22  ;;  %737 = vmatpush.msrb.mxu2 %v469_v24  ;;  %v535_v7 = vld [vmem:[%s3369_s1 + $0x6c0] sm:$0xff]  ;;  %v552_v8 = vld [vmem:[%s3369_s1 + $0x748] sm:$0xff]  ;;  %v537_v9 = vld [vmem:[%s3369_s1 + $0x6d0] sm:$0xff] }
  0x39   : > { %717 = vmatpush.msrb.mxu1 %v468_v27  ;;  %757 = vmatpush.msrb.mxu3 %v470_v29  ;;  %v554_v10 = vld [vmem:[%s3369_s1 + $0x758] sm:$0xff]  ;;  %v519_v11 = vld [vmem:[%s3369_s1 + $0x640] sm:$0xff]  ;;  %v536_v12 = vld [vmem:[%s3369_s1 + $0x6c8] sm:$0xff] }
  0x3a   : > { %698 = vmatpush.msrb.mxu0 %v451_v26  ;;  %738 = vmatpush.msrb.mxu2 %v453_v28  ;;  %v521_v13 = vld [vmem:[%s3369_s1 + $0x650] sm:$0xff]  ;;  %v538_v14 = vld [vmem:[%s3369_s1 + $0x6d8] sm:$0xff]  ;;  %v503_v15 = vld [vmem:[%s3369_s1 + $0x5c0] sm:$0xff] }
  0x3b   : > { %718 = vmatpush.msrb.mxu1 %v452_v31  ;;  %758 = vmatpush.msrb.mxu3 %v454_v33  ;;  %v520_v16 = vld [vmem:[%s3369_s1 + $0x648] sm:$0xff]  ;;  %v505_v17 = vld [vmem:[%s3369_s1 + $0x5d0] sm:$0xff]  ;;  %v522_v18 = vld [vmem:[%s3369_s1 + $0x658] sm:$0xff] }
  0x3c   : > { %699 = vmatpush.msrb.mxu0 %v435_v30  ;;  %739 = vmatpush.msrb.mxu2 %v437_v32  ;;  %v487_v19 = vld [vmem:[%s3369_s1 + $0x540] sm:$0xff]  ;;  %v504_v20 = vld [vmem:[%s3369_s1 + $0x5c8] sm:$0xff]  ;;  %v489_v21 = vld [vmem:[%s3369_s1 + $0x550] sm:$0xff] }
  0x3d   : > { %719 = vmatpush.msrb.mxu1 %v436_v35  ;;  %759 = vmatpush.msrb.mxu3 %v438_v37  ;;  %v506_v22 = vld [vmem:[%s3369_s1 + $0x5d8] sm:$0xff]  ;;  %v471_v23 = vld [vmem:[%s3369_s1 + $0x4c0] sm:$0xff]  ;;  %v488_v24 = vld [vmem:[%s3369_s1 + $0x548] sm:$0xff] }
  0x3e   : > { %700 = vmatpush.msrb.mxu0 %v419_v34  ;;  %740 = vmatpush.msrb.mxu2 %v421_v36  ;;  %v473_v25 = vld [vmem:[%s3369_s1 + $0x4d0] sm:$0xff]  ;;  %v490_v26 = vld [vmem:[%s3369_s1 + $0x558] sm:$0xff]  ;;  %v455_v27 = vld [vmem:[%s3369_s1 + $0x440] sm:$0xff] }
  0x3f   : > { %720 = vmatpush.msrb.mxu1 %v420_v39  ;;  %760 = vmatpush.msrb.mxu3 %v422_v41  ;;  %v472_v28 = vld [vmem:[%s3369_s1 + $0x4c8] sm:$0xff]  ;;  %v457_v29 = vld [vmem:[%s3369_s1 + $0x450] sm:$0xff]  ;;  %v474_v30 = vld [vmem:[%s3369_s1 + $0x4d8] sm:$0xff] }
  0x40   : > { %701 = vmatpush.msrb.mxu0 %v403_v38  ;;  %741 = vmatpush.msrb.mxu2 %v405_v40  ;;  %v456_v31 = vld [vmem:[%s3369_s1 + $0x448] sm:$0xff]  ;;  %v439_v32 = vld [vmem:[%s3369_s1 + $0x3c0] sm:$0xff]  ;;  %v441_v33 = vld [vmem:[%s3369_s1 + $0x3d0] sm:$0xff] }
  0x41   : > { %721 = vmatpush.msrb.mxu1 %v404_v43  ;;  %761 = vmatpush.msrb.mxu3 %v406_v45  ;;  %v458_v34 = vld [vmem:[%s3369_s1 + $0x458] sm:$0xff]  ;;  %v423_v35 = vld [vmem:[%s3369_s1 + $0x340] sm:$0xff]  ;;  %v440_v36 = vld [vmem:[%s3369_s1 + $0x3c8] sm:$0xff] }
  0x42   : > { %702 = vmatpush.msrb.mxu0 %v387_v42  ;;  %742 = vmatpush.msrb.mxu2 %v389_v44  ;;  %v425_v37 = vld [vmem:[%s3369_s1 + $0x350] sm:$0xff]  ;;  %v442_v38 = vld [vmem:[%s3369_s1 + $0x3d8] sm:$0xff]  ;;  %v407_v39 = vld [vmem:[%s3369_s1 + $0x2c0] sm:$0xff] }
  0x43   : > { %722 = vmatpush.msrb.mxu1 %v388_v47  ;;  %762 = vmatpush.msrb.mxu3 %v390_v49  ;;  %v424_v40 = vld [vmem:[%s3369_s1 + $0x348] sm:$0xff]  ;;  %v409_v41 = vld [vmem:[%s3369_s1 + $0x2d0] sm:$0xff]  ;;  %v426_v42 = vld [vmem:[%s3369_s1 + $0x358] sm:$0xff] }
  0x44   : > { %703 = vmatpush.msrb.mxu0 %v371_v46  ;;  %743 = vmatpush.msrb.mxu2 %v373_v48  ;;  %v391_v43 = vld [vmem:[%s3369_s1 + $0x240] sm:$0xff]  ;;  %v408_v44 = vld [vmem:[%s3369_s1 + $0x2c8] sm:$0xff]  ;;  %v393_v45 = vld [vmem:[%s3369_s1 + $0x250] sm:$0xff] }
  0x45   : > { %723 = vmatpush.msrb.mxu1 %v372_v51  ;;  %763 = vmatpush.msrb.mxu3 %v374_v53  ;;  %v410_v46 = vld [vmem:[%s3369_s1 + $0x2d8] sm:$0xff]  ;;  %v375_v47 = vld [vmem:[%s3369_s1 + $0x1c0] sm:$0xff]  ;;  %v392_v48 = vld [vmem:[%s3369_s1 + $0x248] sm:$0xff] }
  0x46   : > { %704 = vmatpush.msrb.mxu0 %v355_v50  ;;  %744 = vmatpush.msrb.mxu2 %v357_v52  ;;  %v377_v49 = vld [vmem:[%s3369_s1 + $0x1d0] sm:$0xff]  ;;  %v394_v50 = vld [vmem:[%s3369_s1 + $0x258] sm:$0xff]  ;;  %v359_v51 = vld [vmem:[%s3369_s1 + $0x140] sm:$0xff] }
  0x47   : > { %724 = vmatpush.msrb.mxu1 %v356_v55  ;;  %764 = vmatpush.msrb.mxu3 %v358_v57  ;;  %v376_v52 = vld [vmem:[%s3369_s1 + $0x1c8] sm:$0xff]  ;;  %v361_v53 = vld [vmem:[%s3369_s1 + $0x150] sm:$0xff]  ;;  %v343_v55 = vld [vmem:[%s3369_s1 + $0xc0] sm:$0xff] }
  0x48   : > { %705 = vmatpush.msrb.mxu0 %v339_v54  ;;  %745 = vmatpush.msrb.mxu2 %v341_v56  ;;  %v378_v54 = vld [vmem:[%s3369_s1 + $0x1d8] sm:$0xff]  ;;  %v360_v56 = vld [vmem:[%s3369_s1 + $0x148] sm:$0xff]  ;;  %v345_v57 = vld [vmem:[%s3369_s1 + $0xd0] sm:$0xff] }
  0x49   : > { %725 = vmatpush.msrb.mxu1 %v340_v59  ;;  %765 = vmatpush.msrb.mxu3 %v342_v61  ;;  %v327_v59 = vld [vmem:[%s3369_s1 + $0x40] sm:$0xff]  ;;  %v329_v61 = vld [vmem:[%s3369_s1 + $0x50] sm:$0xff] }
  0x4a   : > { %706 = vmatpush.msrb.mxu0 %v323_v58  ;;  %746 = vmatpush.msrb.mxu2 %v325_v60  ;;  %v362_v58 = vld [vmem:[%s3369_s1 + $0x158] sm:$0xff]  ;;  %v344_v60 = vld [vmem:[%s3369_s1 + $0xc8] sm:$0xff] }
  0x4b   : > { %627 = vmatmul.f32.vlgmr.msra.gmra.mxu0 %v2146_v62  ;;  %667 = vmatmul.f32.vlgmr.msra.gmra.mxu2 %v2146_v62 }
  0x4c   : > { %771 = vmatpush.msra.mxu0 %v567_v63  ;;  %811 = vmatpush.msra.mxu2 %v569_v0  ;;  %v346_v63 = vld [vmem:[%s3369_s1 + $0xd8] sm:$0xff]  ;;  %v571_v0 = vld [vmem:[%s3369_s1 + $0x7e0] sm:$0xff] }
  0x4d   : > { %726 = vmatpush.msrb.mxu1 %v324_v1  ;;  %766 = vmatpush.msrb.mxu3 %v326_v2  ;;  %v573_v1 = vld [vmem:[%s3369_s1 + $0x7f0] sm:$0xff]  ;;  %v328_v2 = vld [vmem:[%s3369_s1 + $0x48] sm:$0xff] }
  0x4e   : > { %647 = vmatmul.f32.vlgmr.msra.gmra.mxu1 %v2146_v62  ;;  %687 = vmatmul.f32.vlgmr.msra.gmra.mxu3 %v2146_v62 }
  0x4f   : > { %772 = vmatpush.msra.mxu0 %v551_v3  ;;  %791 = vmatpush.msra.mxu1 %v568_v4  ;;  %v330_v3 = vld [vmem:[%s3369_s1 + $0x58] sm:$0xff]  ;;  %v555_v4 = vld [vmem:[%s3369_s1 + $0x760] sm:$0xff] }
  0x50   : > { %812 = vmatpush.msra.mxu2 %v553_v5  ;;  %831 = vmatpush.msra.mxu3 %v570_v6  ;;  %v572_v5 = vld [vmem:[%s3369_s1 + $0x7e8] sm:$0xff]  ;;  %v557_v6 = vld [vmem:[%s3369_s1 + $0x770] sm:$0xff] }
  0x51   : > { %773 = vmatpush.msra.mxu0 %v535_v7  ;;  %792 = vmatpush.msra.mxu1 %v552_v8  ;;  %v574_v7 = vld [vmem:[%s3369_s1 + $0x7f8] sm:$0xff]  ;;  %v539_v8 = vld [vmem:[%s3369_s1 + $0x6e0] sm:$0xff] }
  0x52   : > { %813 = vmatpush.msra.mxu2 %v537_v9  ;;  %832 = vmatpush.msra.mxu3 %v554_v10  ;;  %v556_v9 = vld [vmem:[%s3369_s1 + $0x768] sm:$0xff]  ;;  %v541_v10 = vld [vmem:[%s3369_s1 + $0x6f0] sm:$0xff] }
  0x53   : > { %774 = vmatpush.msra.mxu0 %v519_v11  ;;  %793 = vmatpush.msra.mxu1 %v536_v12  ;;  %v558_v11 = vld [vmem:[%s3369_s1 + $0x778] sm:$0xff]  ;;  %v523_v12 = vld [vmem:[%s3369_s1 + $0x660] sm:$0xff] }
  0x54   : > { %814 = vmatpush.msra.mxu2 %v521_v13  ;;  %833 = vmatpush.msra.mxu3 %v538_v14  ;;  %v540_v13 = vld [vmem:[%s3369_s1 + $0x6e8] sm:$0xff]  ;;  %v525_v14 = vld [vmem:[%s3369_s1 + $0x670] sm:$0xff] }
  0x55   : > { %747 = vmatmul.f32.vlgmr.msrb.gmra.mxu2 %v2146_v62  ;;  %775 = vmatpush.msra.mxu0 %v503_v15  ;;  %v542_v15 = vld [vmem:[%s3369_s1 + $0x6f8] sm:$0xff] }
  0x56   : > { %794 = vmatpush.msra.mxu1 %v520_v16  ;;  %815 = vmatpush.msra.mxu2 %v505_v17  ;;  %v507_v16 = vld [vmem:[%s3369_s1 + $0x5e0] sm:$0xff]  ;;  %v524_v17 = vld [vmem:[%s3369_s1 + $0x668] sm:$0xff] }
  0x57   : > { %834 = vmatpush.msra.mxu3 %v522_v18  ;;  %776 = vmatpush.msra.mxu0 %v487_v19  ;;  %v509_v18 = vld [vmem:[%s3369_s1 + $0x5f0] sm:$0xff]  ;;  %v526_v19 = vld [vmem:[%s3369_s1 + $0x678] sm:$0xff] }
  0x58   : > { %767 = vmatmul.f32.vlgmr.msrb.gmra.mxu3 %v2146_v62  ;;  %795 = vmatpush.msra.mxu1 %v504_v20  ;;  %v491_v20 = vld [vmem:[%s3369_s1 + $0x560] sm:$0xff] }
  0x59   : > { %816 = vmatpush.msra.mxu2 %v489_v21  ;;  %835 = vmatpush.msra.mxu3 %v506_v22  ;;  %v508_v21 = vld [vmem:[%s3369_s1 + $0x5e8] sm:$0xff]  ;;  %v493_v22 = vld [vmem:[%s3369_s1 + $0x570] sm:$0xff] }
  0x5a   : > { %777 = vmatpush.msra.mxu0 %v471_v23  ;;  %796 = vmatpush.msra.mxu1 %v488_v24  ;;  %v510_v23 = vld [vmem:[%s3369_s1 + $0x5f8] sm:$0xff]  ;;  %v475_v24 = vld [vmem:[%s3369_s1 + $0x4e0] sm:$0xff] }
  0x5b   : > { %817 = vmatpush.msra.mxu2 %v473_v25  ;;  %836 = vmatpush.msra.mxu3 %v490_v26  ;;  %v492_v25 = vld [vmem:[%s3369_s1 + $0x568] sm:$0xff]  ;;  %v477_v26 = vld [vmem:[%s3369_s1 + $0x4f0] sm:$0xff] }
  0x5c   : > { %778 = vmatpush.msra.mxu0 %v455_v27  ;;  %797 = vmatpush.msra.mxu1 %v472_v28  ;;  %v494_v27 = vld [vmem:[%s3369_s1 + $0x578] sm:$0xff]  ;;  %v459_v28 = vld [vmem:[%s3369_s1 + $0x460] sm:$0xff] }
  0x5d   : > { %818 = vmatpush.msra.mxu2 %v457_v29  ;;  %837 = vmatpush.msra.mxu3 %v474_v30  ;;  %v476_v29 = vld [vmem:[%s3369_s1 + $0x4e8] sm:$0xff]  ;;  %v461_v30 = vld [vmem:[%s3369_s1 + $0x470] sm:$0xff] }
  0x5e   : > { %707 = vmatmul.f32.vlgmr.msrb.gmra.mxu0 %v2146_v62  ;;  %798 = vmatpush.msra.mxu1 %v456_v31  ;;  %v478_v31 = vld [vmem:[%s3369_s1 + $0x4f8] sm:$0xff] }
  0x5f   : > { %779 = vmatpush.msra.mxu0 %v439_v32  ;;  %819 = vmatpush.msra.mxu2 %v441_v33  ;;  %v443_v32 = vld [vmem:[%s3369_s1 + $0x3e0] sm:$0xff]  ;;  %v460_v33 = vld [vmem:[%s3369_s1 + $0x468] sm:$0xff] }
  0x60   : > { %838 = vmatpush.msra.mxu3 %v458_v34  ;;  %727 = vmatmul.f32.vlgmr.msrb.gmra.mxu1 %v2146_v62  ;;  %v445_v34 = vld [vmem:[%s3369_s1 + $0x3f0] sm:$0xff] }
  0x61   : > { %780 = vmatpush.msra.mxu0 %v423_v35  ;;  %799 = vmatpush.msra.mxu1 %v440_v36  ;;  %v462_v35 = vld [vmem:[%s3369_s1 + $0x478] sm:$0xff]  ;;  %v427_v36 = vld [vmem:[%s3369_s1 + $0x360] sm:$0xff] }
  0x62   : > { %820 = vmatpush.msra.mxu2 %v425_v37  ;;  %839 = vmatpush.msra.mxu3 %v442_v38  ;;  %v444_v37 = vld [vmem:[%s3369_s1 + $0x3e8] sm:$0xff]  ;;  %v429_v38 = vld [vmem:[%s3369_s1 + $0x370] sm:$0xff] }
  0x63   : > { %781 = vmatpush.msra.mxu0 %v407_v39  ;;  %800 = vmatpush.msra.mxu1 %v424_v40  ;;  %v446_v39 = vld [vmem:[%s3369_s1 + $0x3f8] sm:$0xff]  ;;  %v411_v40 = vld [vmem:[%s3369_s1 + $0x2e0] sm:$0xff] }
  0x64   : > { %821 = vmatpush.msra.mxu2 %v409_v41  ;;  %840 = vmatpush.msra.mxu3 %v426_v42  ;;  %v428_v41 = vld [vmem:[%s3369_s1 + $0x368] sm:$0xff]  ;;  %v413_v42 = vld [vmem:[%s3369_s1 + $0x2f0] sm:$0xff] }
  0x65   : > { %782 = vmatpush.msra.mxu0 %v391_v43  ;;  %801 = vmatpush.msra.mxu1 %v408_v44  ;;  %v430_v43 = vld [vmem:[%s3369_s1 + $0x378] sm:$0xff]  ;;  %v395_v44 = vld [vmem:[%s3369_s1 + $0x260] sm:$0xff] }
  0x66   : > { %822 = vmatpush.msra.mxu2 %v393_v45  ;;  %841 = vmatpush.msra.mxu3 %v410_v46  ;;  %v412_v45 = vld [vmem:[%s3369_s1 + $0x2e8] sm:$0xff]  ;;  %v397_v46 = vld [vmem:[%s3369_s1 + $0x270] sm:$0xff] }
  0x67   : > { %783 = vmatpush.msra.mxu0 %v375_v47  ;;  %802 = vmatpush.msra.mxu1 %v392_v48  ;;  %v414_v47 = vld [vmem:[%s3369_s1 + $0x2f8] sm:$0xff]  ;;  %v379_v48 = vld [vmem:[%s3369_s1 + $0x1e0] sm:$0xff] }
  0x68   : > { %823 = vmatpush.msra.mxu2 %v377_v49  ;;  %842 = vmatpush.msra.mxu3 %v394_v50  ;;  %v396_v49 = vld [vmem:[%s3369_s1 + $0x268] sm:$0xff]  ;;  %v381_v50 = vld [vmem:[%s3369_s1 + $0x1f0] sm:$0xff] }
  0x69   : > { %784 = vmatpush.msra.mxu0 %v359_v51  ;;  %803 = vmatpush.msra.mxu1 %v376_v52  ;;  %v398_v51 = vld [vmem:[%s3369_s1 + $0x278] sm:$0xff]  ;;  %v363_v52 = vld [vmem:[%s3369_s1 + $0x160] sm:$0xff] }
  0x6a   : > { %824 = vmatpush.msra.mxu2 %v361_v53  ;;  %843 = vmatpush.msra.mxu3 %v378_v54  ;;  %v380_v53 = vld [vmem:[%s3369_s1 + $0x1e8] sm:$0xff]  ;;  %v365_v54 = vld [vmem:[%s3369_s1 + $0x170] sm:$0xff] }
  0x6b   : > { %785 = vmatpush.msra.mxu0 %v343_v55  ;;  %804 = vmatpush.msra.mxu1 %v360_v56  ;;  %v382_v55 = vld [vmem:[%s3369_s1 + $0x1f8] sm:$0xff]  ;;  %v347_v56 = vld [vmem:[%s3369_s1 + $0xe0] sm:$0xff] }
  0x6c   : > { %825 = vmatpush.msra.mxu2 %v345_v57  ;;  %844 = vmatpush.msra.mxu3 %v362_v58  ;;  %v364_v57 = vld [vmem:[%s3369_s1 + $0x168] sm:$0xff]  ;;  %v349_v58 = vld [vmem:[%s3369_s1 + $0xf0] sm:$0xff] }
  0x6d   : > { %786 = vmatpush.msra.mxu0 %v327_v59  ;;  %805 = vmatpush.msra.mxu1 %v344_v60  ;;  %v366_v59 = vld [vmem:[%s3369_s1 + $0x178] sm:$0xff]  ;;  %v331_v60 = vld [vmem:[%s3369_s1 + $0x60] sm:$0xff] }
  0x6e   : > { %826 = vmatpush.msra.mxu2 %v329_v61  ;;  %845 = vmatpush.msra.mxu3 %v346_v63  ;;  %v348_v61 = vld [vmem:[%s3369_s1 + $0xe8] sm:$0xff]  ;;  %v333_v63 = vld [vmem:[%s3369_s1 + $0x70] sm:$0xff] }
  0x6f   : > { %787 = vmatmul.f32.vlgmr.msra.gmra.mxu0 %v2146_v62  ;;  %827 = vmatmul.f32.vlgmr.msra.gmra.mxu2 %v2146_v62 }
  0x70   : > { %851 = vmatpush.msrb.mxu0 %v571_v0  ;;  %891 = vmatpush.msrb.mxu2 %v573_v1  ;;  %v350_v0 = vld [vmem:[%s3369_s1 + $0xf8] sm:$0xff]  ;;  %v332_v1 = vld [vmem:[%s3369_s1 + $0x68] sm:$0xff] }
  0x71   : > { %806 = vmatpush.msra.mxu1 %v328_v2  ;;  %846 = vmatpush.msra.mxu3 %v330_v3  ;;  %v334_v2 = vld [vmem:[%s3369_s1 + $0x78] sm:$0xff] }
  0x72   : > { %807 = vmatmul.f32.vlgmr.msra.gmra.mxu1 %v2146_v62  ;;  %847 = vmatmul.f32.vlgmr.msra.gmra.mxu3 %v2146_v62  ;;  %v994_v3 = vld [vmem:[%s3371_s3 + $0x78] sm:$0xff] }
  0x73   : > { %852 = vmatpush.msrb.mxu0 %v555_v4  ;;  %871 = vmatpush.msrb.mxu1 %v572_v5  ;;  %v1010_v4 = vld [vmem:[%s3371_s3 + $0xf8] sm:$0xff] }
  0x74   : > { %892 = vmatpush.msrb.mxu2 %v557_v6  ;;  %911 = vmatpush.msrb.mxu3 %v574_v7  ;;  %v1026_v5 = vld [vmem:[%s3371_s3 + $0x178] sm:$0xff]  ;;  %v993_v7 = vld [vmem:[%s3371_s3 + $0x70] sm:$0xff] }
  0x75   : > { %853 = vmatpush.msrb.mxu0 %v539_v8  ;;  %872 = vmatpush.msrb.mxu1 %v556_v9  ;;  %v1042_v6 = vld [vmem:[%s3371_s3 + $0x1f8] sm:$0xff]  ;;  %v1009_v8 = vld [vmem:[%s3371_s3 + $0xf0] sm:$0xff] }
  0x76   : > { %893 = vmatpush.msrb.mxu2 %v541_v10  ;;  %912 = vmatpush.msrb.mxu3 %v558_v11  ;;  %v1025_v9 = vld [vmem:[%s3371_s3 + $0x170] sm:$0xff]  ;;  %v1008_v11 = vld [vmem:[%s3371_s3 + $0xe8] sm:$0xff] }
  0x77   : > { %854 = vmatpush.msrb.mxu0 %v523_v12  ;;  %873 = vmatpush.msrb.mxu1 %v540_v13  ;;  %v1041_v10 = vld [vmem:[%s3371_s3 + $0x1f0] sm:$0xff]  ;;  %v1024_v12 = vld [vmem:[%s3371_s3 + $0x168] sm:$0xff] }
  0x78   : > { %894 = vmatpush.msrb.mxu2 %v525_v14  ;;  %913 = vmatpush.msrb.mxu3 %v542_v15  ;;  %v1040_v13 = vld [vmem:[%s3371_s3 + $0x1e8] sm:$0xff]  ;;  %v991_v14 = vld [vmem:[%s3371_s3 + $0x60] sm:$0xff] }
  0x79   : > { %855 = vmatpush.msrb.mxu0 %v507_v16  ;;  %874 = vmatpush.msrb.mxu1 %v524_v17  ;;  %v1007_v15 = vld [vmem:[%s3371_s3 + $0xe0] sm:$0xff] }
  0x7a   : > { %895 = vmatpush.msrb.mxu2 %v509_v18  ;;  %914 = vmatpush.msrb.mxu3 %v526_v19  ;;  %v1023_v16 = vld [vmem:[%s3371_s3 + $0x160] sm:$0xff]  ;;  %v990_v18 = vld [vmem:[%s3371_s3 + $0x58] sm:$0xff] }
  0x7b   : > { %856 = vmatpush.msrb.mxu0 %v491_v20  ;;  %875 = vmatpush.msrb.mxu1 %v508_v21  ;;  %v1039_v17 = vld [vmem:[%s3371_s3 + $0x1e0] sm:$0xff]  ;;  %v1006_v19 = vld [vmem:[%s3371_s3 + $0xd8] sm:$0xff] }
  0x7c   : > { %896 = vmatpush.msrb.mxu2 %v493_v22  ;;  %915 = vmatpush.msrb.mxu3 %v510_v23  ;;  %v1022_v20 = vld [vmem:[%s3371_s3 + $0x158] sm:$0xff]  ;;  %v989_v22 = vld [vmem:[%s3371_s3 + $0x50] sm:$0xff] }
  0x7d   : > { %857 = vmatpush.msrb.mxu0 %v475_v24  ;;  %876 = vmatpush.msrb.mxu1 %v492_v25  ;;  %v1038_v21 = vld [vmem:[%s3371_s3 + $0x1d8] sm:$0xff]  ;;  %v1005_v23 = vld [vmem:[%s3371_s3 + $0xd0] sm:$0xff] }
  0x7e   : > { %897 = vmatpush.msrb.mxu2 %v477_v26  ;;  %916 = vmatpush.msrb.mxu3 %v494_v27  ;;  %v1021_v24 = vld [vmem:[%s3371_s3 + $0x150] sm:$0xff]  ;;  %v988_v26 = vld [vmem:[%s3371_s3 + $0x48] sm:$0xff] }
  0x7f   : > { %858 = vmatpush.msrb.mxu0 %v459_v28  ;;  %877 = vmatpush.msrb.mxu1 %v476_v29  ;;  %v1037_v25 = vld [vmem:[%s3371_s3 + $0x1d0] sm:$0xff]  ;;  %v1004_v27 = vld [vmem:[%s3371_s3 + $0xc8] sm:$0xff] }
  0x80   : > { %898 = vmatpush.msrb.mxu2 %v461_v30  ;;  %917 = vmatpush.msrb.mxu3 %v478_v31  ;;  %v1020_v28 = vld [vmem:[%s3371_s3 + $0x148] sm:$0xff]  ;;  %v987_v30 = vld [vmem:[%s3371_s3 + $0x40] sm:$0xff] }
  0x81   : > { %859 = vmatpush.msrb.mxu0 %v443_v32  ;;  %878 = vmatpush.msrb.mxu1 %v460_v33  ;;  %v1036_v29 = vld [vmem:[%s3371_s3 + $0x1c8] sm:$0xff]  ;;  %v1003_v31 = vld [vmem:[%s3371_s3 + $0xc0] sm:$0xff] }
  0x82   : > { %899 = vmatpush.msrb.mxu2 %v445_v34  ;;  %918 = vmatpush.msrb.mxu3 %v462_v35  ;;  %v1019_v32 = vld [vmem:[%s3371_s3 + $0x140] sm:$0xff]  ;;  %v986_v34 = vld [vmem:[%s3371_s3 + $0x38] sm:$0xff] }
  0x83   : > { %860 = vmatpush.msrb.mxu0 %v427_v36  ;;  %879 = vmatpush.msrb.mxu1 %v444_v37  ;;  %v1035_v33 = vld [vmem:[%s3371_s3 + $0x1c0] sm:$0xff]  ;;  %v1002_v35 = vld [vmem:[%s3371_s3 + $0xb8] sm:$0xff] }
  0x84   : > { %900 = vmatpush.msrb.mxu2 %v429_v38  ;;  %919 = vmatpush.msrb.mxu3 %v446_v39  ;;  %v1018_v36 = vld [vmem:[%s3371_s3 + $0x138] sm:$0xff]  ;;  %v985_v38 = vld [vmem:[%s3371_s3 + $0x30] sm:$0xff] }
  0x85   : > { %861 = vmatpush.msrb.mxu0 %v411_v40  ;;  %880 = vmatpush.msrb.mxu1 %v428_v41  ;;  %v1034_v37 = vld [vmem:[%s3371_s3 + $0x1b8] sm:$0xff]  ;;  %v1001_v39 = vld [vmem:[%s3371_s3 + $0xb0] sm:$0xff] }
  0x86   : > { %901 = vmatpush.msrb.mxu2 %v413_v42  ;;  %920 = vmatpush.msrb.mxu3 %v430_v43  ;;  %v1017_v40 = vld [vmem:[%s3371_s3 + $0x130] sm:$0xff]  ;;  %v984_v42 = vld [vmem:[%s3371_s3 + $0x28] sm:$0xff] }
  0x87   : > { %862 = vmatpush.msrb.mxu0 %v395_v44  ;;  %881 = vmatpush.msrb.mxu1 %v412_v45  ;;  %v1033_v41 = vld [vmem:[%s3371_s3 + $0x1b0] sm:$0xff]  ;;  %v1000_v43 = vld [vmem:[%s3371_s3 + $0xa8] sm:$0xff] }
  0x88   : > { %902 = vmatpush.msrb.mxu2 %v397_v46  ;;  %921 = vmatpush.msrb.mxu3 %v414_v47  ;;  %v1016_v44 = vld [vmem:[%s3371_s3 + $0x128] sm:$0xff]  ;;  %v983_v46 = vld [vmem:[%s3371_s3 + $0x20] sm:$0xff] }
  0x89   : > { %863 = vmatpush.msrb.mxu0 %v379_v48  ;;  %882 = vmatpush.msrb.mxu1 %v396_v49  ;;  %v1032_v45 = vld [vmem:[%s3371_s3 + $0x1a8] sm:$0xff]  ;;  %v999_v47 = vld [vmem:[%s3371_s3 + $0xa0] sm:$0xff] }
  0x8a   : > { %903 = vmatpush.msrb.mxu2 %v381_v50  ;;  %922 = vmatpush.msrb.mxu3 %v398_v51  ;;  %v1015_v48 = vld [vmem:[%s3371_s3 + $0x120] sm:$0xff]  ;;  %v982_v50 = vld [vmem:[%s3371_s3 + $0x18] sm:$0xff] }
  0x8b   : > { %864 = vmatpush.msrb.mxu0 %v363_v52  ;;  %883 = vmatpush.msrb.mxu1 %v380_v53  ;;  %v1031_v49 = vld [vmem:[%s3371_s3 + $0x1a0] sm:$0xff]  ;;  %v998_v51 = vld [vmem:[%s3371_s3 + $0x98] sm:$0xff] }
  0x8c   : > { %904 = vmatpush.msrb.mxu2 %v365_v54  ;;  %923 = vmatpush.msrb.mxu3 %v382_v55  ;;  %v1014_v52 = vld [vmem:[%s3371_s3 + $0x118] sm:$0xff]  ;;  %v981_v54 = vld [vmem:[%s3371_s3 + $0x10] sm:$0xff] }
  0x8d   : > { %865 = vmatpush.msrb.mxu0 %v347_v56  ;;  %884 = vmatpush.msrb.mxu1 %v364_v57  ;;  %v1030_v53 = vld [vmem:[%s3371_s3 + $0x198] sm:$0xff]  ;;  %v997_v55 = vld [vmem:[%s3371_s3 + $0x90] sm:$0xff] }
  0x8e   : > { %905 = vmatpush.msrb.mxu2 %v349_v58  ;;  %924 = vmatpush.msrb.mxu3 %v366_v59  ;;  %v1013_v56 = vld [vmem:[%s3371_s3 + $0x110] sm:$0xff]  ;;  %v980_v58 = vld [vmem:[%s3371_s3 + $0x8] sm:$0xff] }
  0x8f   : > { %866 = vmatpush.msrb.mxu0 %v331_v60  ;;  %885 = vmatpush.msrb.mxu1 %v348_v61  ;;  %v1029_v57 = vld [vmem:[%s3371_s3 + $0x190] sm:$0xff]  ;;  %v996_v59 = vld [vmem:[%s3371_s3 + $0x88] sm:$0xff] }
  0x90   : > { %906 = vmatpush.msrb.mxu2 %v333_v63  ;;  %925 = vmatpush.msrb.mxu3 %v350_v0  ;;  %v1012_v60 = vld [vmem:[%s3371_s3 + $0x108] sm:$0xff]  ;;  %v979_v63 = vld [vmem:[%s3371_s3] sm:$0xff] }
  0x91   : > { %867 = vmatmul.f32.vlgmr.msrb.gmra.mxu0 %v2146_v62  ;;  %907 = vmatmul.f32.vlgmr.msrb.gmra.mxu2 %v2146_v62  ;;  %v1028_v61 = vld [vmem:[%s3371_s3 + $0x188] sm:$0xff]  ;;  %v995_v0 = vld [vmem:[%s3371_s3 + $0x80] sm:$0xff] }
  0x92   : > { %886 = vmatpush.msrb.mxu1 %v332_v1  ;;  %926 = vmatpush.msrb.mxu3 %v334_v2  ;;  %v1058_v1 = vld [vmem:[%s3371_s3 + $0x278] sm:$0xff] }
  0x93   : > { %887 = vmatmul.f32.vlgmr.msrb.gmra.mxu1 %v2146_v62  ;;  %927 = vmatmul.f32.vlgmr.msrb.gmra.mxu3 %v2146_v62  ;;  %v992_v62 = vld [vmem:[%s3371_s3 + $0x68] sm:$0xff]  ;;  %v1074_v2 = vld [vmem:[%s3371_s3 + $0x2f8] sm:$0xff] }
  0x94   : > { %1239 = vmatpush.msra.mxu0 %v994_v3  ;;  %1259 = vmatpush.msra.mxu1 %v1010_v4  ;;  %v1011_v3 = vld [vmem:[%s3371_s3 + $0x100] sm:$0xff] }
  0x95   : > { %1279 = vmatpush.msra.mxu2 %v1026_v5  ;;  %1299 = vmatpush.msra.mxu3 %v1042_v6  ;;  %v1027_v4 = vld [vmem:[%s3371_s3 + $0x180] sm:$0xff]  ;;  %v1057_v5 = vld [vmem:[%s3371_s3 + $0x270] sm:$0xff] }
  0x96   : > { %1240 = vmatpush.msra.mxu0 %v993_v7  ;;  %1260 = vmatpush.msra.mxu1 %v1009_v8  ;;  %v1073_v6 = vld [vmem:[%s3371_s3 + $0x2f0] sm:$0xff]  ;;  %v1090_v7 = vld [vmem:[%s3371_s3 + $0x378] sm:$0xff] }
  0x97   : > { %1280 = vmatpush.msra.mxu2 %v1025_v9  ;;  %1300 = vmatpush.msra.mxu3 %v1041_v10  ;;  %v1106_v8 = vld [vmem:[%s3371_s3 + $0x3f8] sm:$0xff]  ;;  %v1056_v9 = vld [vmem:[%s3371_s3 + $0x268] sm:$0xff] }
  0x98   : > { %1241 = vmatpush.msra.mxu0 %v992_v62  ;;  %1261 = vmatpush.msra.mxu1 %v1008_v11  ;;  %v1072_v10 = vld [vmem:[%s3371_s3 + $0x2e8] sm:$0xff]  ;;  %v1089_v62 = vld [vmem:[%s3371_s3 + $0x370] sm:$0xff] }
  0x99   : > { %1281 = vmatpush.msra.mxu2 %v1024_v12  ;;  %1301 = vmatpush.msra.mxu3 %v1040_v13  ;;  %v1105_v11 = vld [vmem:[%s3371_s3 + $0x3f0] sm:$0xff]  ;;  %v1055_v12 = vld [vmem:[%s3371_s3 + $0x260] sm:$0xff] }
  0x9a   : > { %1242 = vmatpush.msra.mxu0 %v991_v14  ;;  %1262 = vmatpush.msra.mxu1 %v1007_v15  ;;  %v1071_v13 = vld [vmem:[%s3371_s3 + $0x2e0] sm:$0xff]  ;;  %v1088_v14 = vld [vmem:[%s3371_s3 + $0x368] sm:$0xff] }
  0x9b   : > { %1282 = vmatpush.msra.mxu2 %v1023_v16  ;;  %1302 = vmatpush.msra.mxu3 %v1039_v17  ;;  %v1104_v15 = vld [vmem:[%s3371_s3 + $0x3e8] sm:$0xff]  ;;  %v1054_v16 = vld [vmem:[%s3371_s3 + $0x258] sm:$0xff] }
  0x9c   : > { %1243 = vmatpush.msra.mxu0 %v990_v18  ;;  %1263 = vmatpush.msra.mxu1 %v1006_v19  ;;  %v1070_v17 = vld [vmem:[%s3371_s3 + $0x2d8] sm:$0xff]  ;;  %v1087_v18 = vld [vmem:[%s3371_s3 + $0x360] sm:$0xff] }
  0x9d   : > { %1283 = vmatpush.msra.mxu2 %v1022_v20  ;;  %1303 = vmatpush.msra.mxu3 %v1038_v21  ;;  %v1103_v19 = vld [vmem:[%s3371_s3 + $0x3e0] sm:$0xff]  ;;  %v1053_v20 = vld [vmem:[%s3371_s3 + $0x250] sm:$0xff] }
  0x9e   : > { %1244 = vmatpush.msra.mxu0 %v989_v22  ;;  %1264 = vmatpush.msra.mxu1 %v1005_v23  ;;  %v1069_v21 = vld [vmem:[%s3371_s3 + $0x2d0] sm:$0xff]  ;;  %v1086_v22 = vld [vmem:[%s3371_s3 + $0x358] sm:$0xff] }
  0x9f   : > { %1284 = vmatpush.msra.mxu2 %v1021_v24  ;;  %1304 = vmatpush.msra.mxu3 %v1037_v25  ;;  %v1102_v23 = vld [vmem:[%s3371_s3 + $0x3d8] sm:$0xff]  ;;  %v1052_v24 = vld [vmem:[%s3371_s3 + $0x248] sm:$0xff] }
  0xa0   : > { %1245 = vmatpush.msra.mxu0 %v988_v26  ;;  %1265 = vmatpush.msra.mxu1 %v1004_v27  ;;  %v1068_v25 = vld [vmem:[%s3371_s3 + $0x2c8] sm:$0xff]  ;;  %v1085_v26 = vld [vmem:[%s3371_s3 + $0x350] sm:$0xff] }
  0xa1   : > { %1285 = vmatpush.msra.mxu2 %v1020_v28  ;;  %1305 = vmatpush.msra.mxu3 %v1036_v29  ;;  %v1101_v27 = vld [vmem:[%s3371_s3 + $0x3d0] sm:$0xff]  ;;  %v1051_v28 = vld [vmem:[%s3371_s3 + $0x240] sm:$0xff] }
  0xa2   : > { %1246 = vmatpush.msra.mxu0 %v987_v30  ;;  %1266 = vmatpush.msra.mxu1 %v1003_v31  ;;  %v1067_v29 = vld [vmem:[%s3371_s3 + $0x2c0] sm:$0xff]  ;;  %v1084_v30 = vld [vmem:[%s3371_s3 + $0x348] sm:$0xff] }
  0xa3   : > { %1286 = vmatpush.msra.mxu2 %v1019_v32  ;;  %1306 = vmatpush.msra.mxu3 %v1035_v33  ;;  %v1100_v31 = vld [vmem:[%s3371_s3 + $0x3c8] sm:$0xff]  ;;  %v1050_v32 = vld [vmem:[%s3371_s3 + $0x238] sm:$0xff] }
  0xa4   : > { %1247 = vmatpush.msra.mxu0 %v986_v34  ;;  %1267 = vmatpush.msra.mxu1 %v1002_v35  ;;  %v1066_v33 = vld [vmem:[%s3371_s3 + $0x2b8] sm:$0xff]  ;;  %v1083_v34 = vld [vmem:[%s3371_s3 + $0x340] sm:$0xff] }
  0xa5   : > { %1287 = vmatpush.msra.mxu2 %v1018_v36  ;;  %1307 = vmatpush.msra.mxu3 %v1034_v37  ;;  %v1099_v35 = vld [vmem:[%s3371_s3 + $0x3c0] sm:$0xff]  ;;  %v1049_v36 = vld [vmem:[%s3371_s3 + $0x230] sm:$0xff] }
  0xa6   : > { %1248 = vmatpush.msra.mxu0 %v985_v38  ;;  %1268 = vmatpush.msra.mxu1 %v1001_v39  ;;  %v1065_v37 = vld [vmem:[%s3371_s3 + $0x2b0] sm:$0xff]  ;;  %v2857_v38 = vld [vmem:[%s3370_s2] sm:$0xff]  ;;  %v1082_v39 = vld [vmem:[%s3371_s3 + $0x338] sm:$0xff] }
  0xa7   : > { %1288 = vmatpush.msra.mxu2 %v1017_v40  ;;  %1308 = vmatpush.msra.mxu3 %v1033_v41  ;;  %v1098_v40 = vld [vmem:[%s3371_s3 + $0x3b8] sm:$0xff]  ;;  %v1048_v41 = vld [vmem:[%s3371_s3 + $0x228] sm:$0xff] }
  0xa8   : > { %1249 = vmatpush.msra.mxu0 %v984_v42  ;;  %1269 = vmatpush.msra.mxu1 %v1000_v43  ;;  %v1064_v42 = vld [vmem:[%s3371_s3 + $0x2a8] sm:$0xff]  ;;  %v1081_v43 = vld [vmem:[%s3371_s3 + $0x330] sm:$0xff] }
  0xa9   : > { %1289 = vmatpush.msra.mxu2 %v1016_v44  ;;  %1309 = vmatpush.msra.mxu3 %v1032_v45  ;;  %v579_v44 = vperm.slane %v2857_v38, 0  ;;  %v1097_v45 = vld [vmem:[%s3371_s3 + $0x3b0] sm:$0xff] }
  0xaa   : > { %1250 = vmatpush.msra.mxu0 %v983_v46  ;;  %1270 = vmatpush.msra.mxu1 %v999_v47  ;;  %v1047_v46 = vld [vmem:[%s3371_s3 + $0x220] sm:$0xff] }
  0xab   : > { %1290 = vmatpush.msra.mxu2 %v1015_v48  ;;  %1310 = vmatpush.msra.mxu3 %v1031_v49  ;;  %v1063_v47 = vld [vmem:[%s3371_s3 + $0x2a0] sm:$0xff]  ;;  %v1080_v48 = vld [vmem:[%s3371_s3 + $0x328] sm:$0xff] }
  0xac   : > { %1251 = vmatpush.msra.mxu0 %v982_v50  ;;  %1271 = vmatpush.msra.mxu1 %v998_v51  ;;  %v1096_v49 = vld [vmem:[%s3371_s3 + $0x3a8] sm:$0xff]  ;;  %v1046_v50 = vld [vmem:[%s3371_s3 + $0x218] sm:$0xff] }
  0xad   : > { %1291 = vmatpush.msra.mxu2 %v1014_v52  ;;  %1311 = vmatpush.msra.mxu3 %v1030_v53  ;;  %v1062_v52 = vld [vmem:[%s3371_s3 + $0x298] sm:$0xff]  ;;  %v580_v53 = vperm.slane %v2857_v38, 1 }
  0xae   : > { %1252 = vmatpush.msra.mxu0 %v981_v54  ;;  %1272 = vmatpush.msra.mxu1 %v997_v55  ;;  %v1079_v55 = vld [vmem:[%s3371_s3 + $0x320] sm:$0xff] }
  0xaf   : > { %1292 = vmatpush.msra.mxu2 %v1013_v56  ;;  %1312 = vmatpush.msra.mxu3 %v1029_v57  ;;  %v1095_v56 = vld [vmem:[%s3371_s3 + $0x3a0] sm:$0xff]  ;;  %v1045_v57 = vld [vmem:[%s3371_s3 + $0x210] sm:$0xff] }
  0xb0   : > { %1253 = vmatpush.msra.mxu0 %v980_v58  ;;  %1273 = vmatpush.msra.mxu1 %v996_v59  ;;  %v1061_v58 = vld [vmem:[%s3371_s3 + $0x290] sm:$0xff] }
  0xb1   : > { %1293 = vmatpush.msra.mxu2 %v1012_v60  ;;  %1313 = vmatpush.msra.mxu3 %v1028_v61  ;;  %v1078_v61 = vld [vmem:[%s3371_s3 + $0x318] sm:$0xff] }
  0xb2   : > { %1254 = vmatpush.msra.mxu0 %v979_v63  ;;  %1274 = vmatpush.msra.mxu1 %v995_v0  ;;  %v581_v63 = vperm.slane %v2857_v38, 2 }
  0xb3   : > { %1294 = vmatpush.msra.mxu2 %v1011_v3  ;;  %1314 = vmatpush.msra.mxu3 %v1027_v4  ;;  %v1077_v3 = vld [vmem:[%s3371_s3 + $0x310] sm:$0xff]  ;;  %v1094_v4 = vld [vmem:[%s3371_s3 + $0x398] sm:$0xff] }
  0xb4   : > { %1319 = vmatpush.msrb.mxu0 %v1058_v1  ;;  %1339 = vmatpush.msrb.mxu1 %v1074_v2  ;;  %v1044_v1 = vld [vmem:[%s3371_s3 + $0x208] sm:$0xff] }
  0xb5   : > { %1359 = vmatpush.msrb.mxu2 %v1090_v7  ;;  %1379 = vmatpush.msrb.mxu3 %v1106_v8  ;;  %v1060_v2 = vld [vmem:[%s3371_s3 + $0x288] sm:$0xff]  ;;  %v1059_v8 = vld [vmem:[%s3371_s3 + $0x280] sm:$0xff] }
  0xb6   : > { %1320 = vmatpush.msrb.mxu0 %v1057_v5  ;;  %1340 = vmatpush.msrb.mxu1 %v1073_v6  ;;  %v1043_v6 = vld [vmem:[%s3371_s3 + $0x200] sm:$0xff] }
  0xb7   : > { %1360 = vmatpush.msrb.mxu2 %v1089_v62  ;;  %1380 = vmatpush.msrb.mxu3 %v1105_v11  ;;  %v1138_v11 = vld [vmem:[%s3371_s3 + $0x4f8] sm:$0xff] }
  0xb8   : > { %1321 = vmatpush.msrb.mxu0 %v1056_v9  ;;  %1341 = vmatpush.msrb.mxu1 %v1072_v10  ;;  %v582_v9 = vperm.slane %v2857_v38, 3  ;;  %v1122_v10 = vld [vmem:[%s3371_s3 + $0x478] sm:$0xff] }
  0xb9   : > { %1361 = vmatpush.msrb.mxu2 %v1088_v14  ;;  %1381 = vmatpush.msrb.mxu3 %v1104_v15  ;;  %v1093_v15 = vld [vmem:[%s3371_s3 + $0x390] sm:$0xff] }
  0xba   : > { %1322 = vmatpush.msrb.mxu0 %v1055_v12  ;;  %1342 = vmatpush.msrb.mxu1 %v1071_v13  ;;  %v1076_v12 = vld [vmem:[%s3371_s3 + $0x308] sm:$0xff]  ;;  %v1121_v13 = vld [vmem:[%s3371_s3 + $0x470] sm:$0xff] }
  0xbb   : > { %1362 = vmatpush.msrb.mxu2 %v1087_v18  ;;  %1382 = vmatpush.msrb.mxu3 %v1103_v19  ;;  %v1075_v18 = vld [vmem:[%s3371_s3 + $0x300] sm:$0xff] }
  0xbc   : > { %1323 = vmatpush.msrb.mxu0 %v1054_v16  ;;  %1343 = vmatpush.msrb.mxu1 %v1070_v17  ;;  %v1137_v17 = vld [vmem:[%s3371_s3 + $0x4f0] sm:$0xff] }
  0xbd   : > { %1363 = vmatpush.msrb.mxu2 %v1086_v22  ;;  %1383 = vmatpush.msrb.mxu3 %v1102_v23  ;;  %v1136_v22 = vld [vmem:[%s3371_s3 + $0x4e8] sm:$0xff]  ;;  %v1119_v23 = vld [vmem:[%s3371_s3 + $0x460] sm:$0xff] }
  0xbe   : > { %1324 = vmatpush.msrb.mxu0 %v1053_v20  ;;  %1344 = vmatpush.msrb.mxu1 %v1069_v21  ;;  %v1120_v20 = vld [vmem:[%s3371_s3 + $0x468] sm:$0xff] }
  0xbf   : > { %1364 = vmatpush.msrb.mxu2 %v1085_v26  ;;  %1384 = vmatpush.msrb.mxu3 %v1101_v27  ;;  %v1092_v21 = vld [vmem:[%s3371_s3 + $0x388] sm:$0xff]  ;;  %v1091_v27 = vld [vmem:[%s3371_s3 + $0x380] sm:$0xff] }
  0xc0   : > { %1325 = vmatpush.msrb.mxu0 %v1052_v24  ;;  %1345 = vmatpush.msrb.mxu1 %v1068_v25  ;;  %v1154_v24 = vld [vmem:[%s3371_s3 + $0x578] sm:$0xff]  ;;  %v585_v25 = vperm.slane %v2857_v38, 6 }
  0xc1   : > { %1365 = vmatpush.msrb.mxu2 %v1084_v30  ;;  %1385 = vmatpush.msrb.mxu3 %v1100_v31  ;;  %v1153_v30 = vld [vmem:[%s3371_s3 + $0x570] sm:$0xff]  ;;  %v1170_v31 = vld [vmem:[%s3371_s3 + $0x5f8] sm:$0xff] }
  0xc2   : > { %1326 = vmatpush.msrb.mxu0 %v1051_v28  ;;  %1346 = vmatpush.msrb.mxu1 %v1067_v29  ;;  %v1135_v28 = vld [vmem:[%s3371_s3 + $0x4e0] sm:$0xff]  ;;  %v1118_v29 = vld [vmem:[%s3371_s3 + $0x458] sm:$0xff] }
  0xc3   : > { %1366 = vmatpush.msrb.mxu2 %v1083_v34  ;;  %1386 = vmatpush.msrb.mxu3 %v1099_v35  ;;  %v586_v34 = vperm.slane %v2857_v38, 7 }
  0xc4   : > { %1327 = vmatpush.msrb.mxu0 %v1050_v32  ;;  %1347 = vmatpush.msrb.mxu1 %v1066_v33  ;;  %v583_v33 = vperm.slane %v2857_v38, 4 }
  0xc5   : > { %1367 = vmatpush.msrb.mxu2 %v1082_v39  ;;  %1387 = vmatpush.msrb.mxu3 %v1098_v40  ;;  %v1152_v39 = vld [vmem:[%s3371_s3 + $0x568] sm:$0xff]  ;;  %v1169_v40 = vld [vmem:[%s3371_s3 + $0x5f0] sm:$0xff] }
  0xc6   : > { %1328 = vmatpush.msrb.mxu0 %v1049_v36  ;;  %1348 = vmatpush.msrb.mxu1 %v1065_v37  ;;  %v1117_v36 = vld [vmem:[%s3371_s3 + $0x450] sm:$0xff]  ;;  %v1134_v37 = vld [vmem:[%s3371_s3 + $0x4d8] sm:$0xff] }
  0xc7   : > { %1368 = vmatpush.msrb.mxu2 %v1081_v43  ;;  %1388 = vmatpush.msrb.mxu3 %v1097_v45  ;;  %v1133_v45 = vld [vmem:[%s3371_s3 + $0x4d0] sm:$0xff] }
  0xc8   : > { %1329 = vmatpush.msrb.mxu0 %v1048_v41  ;;  %1349 = vmatpush.msrb.mxu1 %v1064_v42  ;;  %v628_v51 = vpop.f32.mrf.mxu0  ;;  %v584_v41 = vperm.slane %v2857_v38, 5  ;;  %v1151_v38 = vld [vmem:[%s3371_s3 + $0x560] sm:$0xff] }
  0xc9   : > { %v629_v54 = vadd.f32 %v628_v51, %v579_v44  ;;  %1369 = vmatpush.msrb.mxu2 %v1080_v48  ;;  %1389 = vmatpush.msrb.mxu3 %v1096_v49  ;;  %v1116_v44 = vld [vmem:[%s3371_s3 + $0x448] sm:$0xff]  ;;  %v1115_v51 = vld [vmem:[%s3371_s3 + $0x440] sm:$0xff] }
  0xca   : > { %1330 = vmatpush.msrb.mxu0 %v1047_v46  ;;  %1350 = vmatpush.msrb.mxu1 %v1063_v47  ;;  %v1168_v49 = vld [vmem:[%s3371_s3 + $0x5e8] sm:$0xff] }
  0xcb   : > { %v931_v59 = vmax.f32 %v629_v54, 0.0  ;;  %v648_v60 = vpop.f32.mrf.mxu1  ;;  %1370 = vmatpush.msrb.mxu2 %v1079_v55  ;;  %1390 = vmatpush.msrb.mxu3 %v1095_v56  ;;  %v1132_v54 = vld [vmem:[%s3371_s3 + $0x4c8] sm:$0xff]  ;;  %v1150_v55 = vld [vmem:[%s3371_s3 + $0x558] sm:$0xff] }
  0xcc   : > { %1331 = vmatpush.msrb.mxu0 %v1046_v50  ;;  %1351 = vmatpush.msrb.mxu1 %v1062_v52  ;;  %v649_v0 = vadd.f32 %v648_v60, %v580_v53  ;;  %v1131_v60 = vld [vmem:[%s3371_s3 + $0x4c0] sm:$0xff] }
  0xcd   : > { %1371 = vmatpush.msrb.mxu2 %v1078_v61  ;;  %1255 = vmatmul.f32.vlgmr.msra.gmra.mxu0 %v931_v59  ;;  %v1149_v61 = vld [vmem:[%s3371_s3 + $0x550] sm:$0xff] }
  0xce   : > { %1332 = vmatpush.msrb.mxu0 %v1045_v57  ;;  %1352 = vmatpush.msrb.mxu1 %v1061_v58  ;;  %v932_v5 = vmax.f32 %v649_v0, 0.0  ;;  %v668_v7 = vpop.f32.mrf.mxu2  ;;  %v1167_v57 = vld [vmem:[%s3371_s3 + $0x5e0] sm:$0xff]  ;;  %v1114_v58 = vld [vmem:[%s3371_s3 + $0x438] sm:$0xff]  ;;  %v1113_v0 = vld [vmem:[%s3371_s3 + $0x430] sm:$0xff] }
  0xcf   : > { %v669_v62 = vadd.f32 %v668_v7, %v581_v63  ;;  %1372 = vmatpush.msrb.mxu2 %v1077_v3  ;;  %1391 = vmatpush.msrb.mxu3 %v1094_v4  ;;  %v1166_v63 = vld [vmem:[%s3371_s3 + $0x5d8] sm:$0xff]  ;;  %v1165_v3 = vld [vmem:[%s3371_s3 + $0x5d0] sm:$0xff]  ;;  %v1112_v4 = vld [vmem:[%s3371_s3 + $0x428] sm:$0xff] }
  0xd0   : > { %1333 = vmatpush.msrb.mxu0 %v1044_v1  ;;  %1353 = vmatpush.msrb.mxu1 %v1060_v2  ;;  %v1130_v1 = vld [vmem:[%s3371_s3 + $0x4b8] sm:$0xff]  ;;  %v1148_v2 = vld [vmem:[%s3371_s3 + $0x548] sm:$0xff] }
  0xd1   : > { %v688_v14 = vpop.f32.mrf.mxu3  ;;  %1275 = vmatmul.f32.vlgmr.msra.gmra.mxu1 %v932_v5  ;;  %v933_v19 = vmax.f32 %v669_v62, 0.0  ;;  %1373 = vmatpush.msrb.mxu2 %v1076_v12  ;;  %v1129_v5 = vld [vmem:[%s3371_s3 + $0x4b0] sm:$0xff]  ;;  %v1164_v7 = vld [vmem:[%s3371_s3 + $0x5c8] sm:$0xff]  ;;  %v1146_v62 = vld [vmem:[%s3371_s3 + $0x538] sm:$0xff] }
  0xd2   : > { %1334 = vmatpush.msrb.mxu0 %v1043_v6  ;;  %1354 = vmatpush.msrb.mxu1 %v1059_v8  ;;  %v689_v16 = vadd.f32 %v688_v14, %v582_v9  ;;  %v1147_v6 = vld [vmem:[%s3371_s3 + $0x540] sm:$0xff]  ;;  %v3062_v8 = vld [vmem:[%s3370_s2 + $0x8] sm:$0xff]  ;;  %v1110_v12 = vld [vmem:[%s3371_s3 + $0x418] sm:$0xff] }
  0xd3   : > { %1392 = vmatpush.msrb.mxu3 %v1093_v15  ;;  %1374 = vmatpush.msrb.mxu2 %v1075_v18  ;;  %v1111_v9 = vld [vmem:[%s3371_s3 + $0x420] sm:$0xff]  ;;  %v587_v14 = vperm.slane %v3062_v8, 0  ;;  %v1145_v15 = vld [vmem:[%s3371_s3 + $0x530] sm:$0xff]  ;;  %v1126_v18 = vld [vmem:[%s3371_s3 + $0x498] sm:$0xff] }
  0xd4   : > { %1399 = vmatpush.msra.mxu0 %v1122_v10  ;;  %1419 = vmatpush.msra.mxu1 %v1138_v11  ;;  %v934_v26 = vmax.f32 %v689_v16, 0.0  ;;  %v1128_v10 = vld [vmem:[%s3371_s3 + $0x4a8] sm:$0xff]  ;;  %v1163_v11 = vld [vmem:[%s3371_s3 + $0x5c0] sm:$0xff]  ;;  %v1162_v16 = vld [vmem:[%s3371_s3 + $0x5b8] sm:$0xff] }
  0xd5   : > { %1393 = vmatpush.msrb.mxu3 %v1092_v21  ;;  %1295 = vmatmul.f32.vlgmr.msra.gmra.mxu2 %v933_v19  ;;  %v1161_v21 = vld [vmem:[%s3371_s3 + $0x5b0] sm:$0xff] }
  0xd6   : > { %1400 = vmatpush.msra.mxu0 %v1121_v13  ;;  %1420 = vmatpush.msra.mxu1 %v1137_v17  ;;  %v1127_v13 = vld [vmem:[%s3371_s3 + $0x4a0] sm:$0xff]  ;;  %v1109_v17 = vld [vmem:[%s3371_s3 + $0x410] sm:$0xff] }
  0xd7   : > { %1439 = vmatpush.msra.mxu2 %v1154_v24  ;;  %1394 = vmatpush.msrb.mxu3 %v1091_v27  ;;  %v1108_v24 = vld [vmem:[%s3371_s3 + $0x408] sm:$0xff] }
  0xd8   : > { %1401 = vmatpush.msra.mxu0 %v1120_v20  ;;  %1421 = vmatpush.msra.mxu1 %v1136_v22  ;;  %v748_v32 = vpop.f32.mrf.mxu2  ;;  %v1144_v20 = vld [vmem:[%s3371_s3 + $0x528] sm:$0xff]  ;;  %v588_v22 = vperm.slane %v3062_v8, 1 }
  0xd9   : > { %v749_v35 = vadd.f32 %v748_v32, %v585_v25  ;;  %1315 = vmatmul.f32.vlgmr.msra.gmra.mxu3 %v934_v26  ;;  %1440 = vmatpush.msra.mxu2 %v1153_v30  ;;  %v1125_v25 = vld [vmem:[%s3371_s3 + $0x490] sm:$0xff]  ;;  %v1143_v26 = vld [vmem:[%s3371_s3 + $0x520] sm:$0xff]  ;;  %v1160_v27 = vld [vmem:[%s3371_s3 + $0x5a8] sm:$0xff] }
  0xda   : > { %1402 = vmatpush.msra.mxu0 %v1119_v23  ;;  %1422 = vmatpush.msra.mxu1 %v1135_v28  ;;  %v1124_v30 = vld [vmem:[%s3371_s3 + $0x488] sm:$0xff] }
  0xdb   : > { %1459 = vmatpush.msra.mxu3 %v1170_v31  ;;  %v708_v42 = vpop.f32.mrf.mxu0  ;;  %v768_v43 = vpop.f32.mrf.mxu3  ;;  %v937_v46 = vmax.f32 %v749_v35, 0.0  ;;  %1441 = vmatpush.msra.mxu2 %v1152_v39  ;;  %v589_v31 = vperm.slane %v3062_v8, 2  ;;  %v1159_v35 = vld [vmem:[%s3371_s3 + $0x5a0] sm:$0xff]  ;;  %v1186_v39 = vld [vmem:[%s3371_s3 + $0x678] sm:$0xff] }
  0xdc   : > { %1403 = vmatpush.msra.mxu0 %v1118_v29  ;;  %1423 = vmatpush.msra.mxu1 %v1134_v37  ;;  %v709_v47 = vadd.f32 %v708_v42, %v583_v33  ;;  %v769_v48 = vadd.f32 %v768_v43, %v586_v34  ;;  %v1107_v29 = vld [vmem:[%s3371_s3 + $0x400] sm:$0xff]  ;;  %v1142_v34 = vld [vmem:[%s3371_s3 + $0x518] sm:$0xff]  ;;  %v590_v42 = vperm.slane %v3062_v8, 3 }
  0xdd   : > { %1460 = vmatpush.msra.mxu3 %v1169_v40  ;;  %v728_v50 = vpop.f32.mrf.mxu1  ;;  %1442 = vmatpush.msra.mxu2 %v1151_v38  ;;  %v1157_v38 = vld [vmem:[%s3371_s3 + $0x590] sm:$0xff] }
  0xde   : > { %1404 = vmatpush.msra.mxu0 %v1117_v36  ;;  %v935_v52 = vmax.f32 %v709_v47, 0.0  ;;  %1424 = vmatpush.msra.mxu1 %v1133_v45  ;;  %v729_v53 = vadd.f32 %v728_v50, %v584_v41  ;;  %v938_v56 = vmax.f32 %v769_v48, 0.0  ;;  %v1123_v36 = vld [vmem:[%s3371_s3 + $0x480] sm:$0xff]  ;;  %v1141_v41 = vld [vmem:[%s3371_s3 + $0x510] sm:$0xff]  ;;  %v1140_v48 = vld [vmem:[%s3371_s3 + $0x508] sm:$0xff] }
  0xdf   : > { %1461 = vmatpush.msra.mxu3 %v1168_v49  ;;  %1375 = vmatmul.f32.vlgmr.msrb.gmra.mxu2 %v937_v46  ;;  %v1185_v45 = vld [vmem:[%s3371_s3 + $0x670] sm:$0xff]  ;;  %v1202_v46 = vld [vmem:[%s3371_s3 + $0x6f8] sm:$0xff]  ;;  %v1184_v50 = vld [vmem:[%s3371_s3 + $0x668] sm:$0xff] }
  0xe0   : > { %1405 = vmatpush.msra.mxu0 %v1116_v44  ;;  %v936_v59 = vmax.f32 %v729_v53, 0.0  ;;  %1425 = vmatpush.msra.mxu1 %v1132_v54  ;;  %v1158_v44 = vld [vmem:[%s3371_s3 + $0x598] sm:$0xff]  ;;  %v1139_v53 = vld [vmem:[%s3371_s3 + $0x500] sm:$0xff]  ;;  %v1156_v54 = vld [vmem:[%s3371_s3 + $0x588] sm:$0xff] }
  0xe1   : > { %1443 = vmatpush.msra.mxu2 %v1150_v55  ;;  %1462 = vmatpush.msra.mxu3 %v1167_v57  ;;  %v1183_v55 = vld [vmem:[%s3371_s3 + $0x660] sm:$0xff]  ;;  %v1218_v57 = vld [vmem:[%s3371_s3 + $0x778] sm:$0xff] }
  0xe2   : > { %1406 = vmatpush.msra.mxu0 %v1115_v51  ;;  %1395 = vmatmul.f32.vlgmr.msrb.gmra.mxu3 %v938_v56  ;;  %v1201_v51 = vld [vmem:[%s3371_s3 + $0x6f0] sm:$0xff]  ;;  %v1200_v56 = vld [vmem:[%s3371_s3 + $0x6e8] sm:$0xff] }
  0xe3   : > { %1335 = vmatmul.f32.vlgmr.msrb.gmra.mxu0 %v935_v52  ;;  %1426 = vmatpush.msra.mxu1 %v1131_v60  ;;  %v1182_v60 = vld [vmem:[%s3371_s3 + $0x658] sm:$0xff] }
  0xe4   : > { %1407 = vmatpush.msra.mxu0 %v1114_v58  ;;  %1444 = vmatpush.msra.mxu2 %v1149_v61  ;;  %v1199_v61 = vld [vmem:[%s3371_s3 + $0x6e0] sm:$0xff] }
  0xe5   : > { %1463 = vmatpush.msra.mxu3 %v1166_v63  ;;  %1355 = vmatmul.f32.vlgmr.msrb.gmra.mxu1 %v936_v59  ;;  %v1155_v59 = vld [vmem:[%s3371_s3 + $0x580] sm:$0xff]  ;;  %v1217_v63 = vld [vmem:[%s3371_s3 + $0x770] sm:$0xff] }
  0xe6   : > { %1408 = vmatpush.msra.mxu0 %v1113_v0  ;;  %1427 = vmatpush.msra.mxu1 %v1130_v1  ;;  %v1234_v0 = vld [vmem:[%s3371_s3 + $0x7f8] sm:$0xff]  ;;  %v1181_v1 = vld [vmem:[%s3371_s3 + $0x650] sm:$0xff] }
  0xe7   : > { %1445 = vmatpush.msra.mxu2 %v1148_v2  ;;  %1464 = vmatpush.msra.mxu3 %v1165_v3  ;;  %v1198_v2 = vld [vmem:[%s3371_s3 + $0x6d8] sm:$0xff]  ;;  %v1216_v3 = vld [vmem:[%s3371_s3 + $0x768] sm:$0xff] }
  0xe8   : > { %1409 = vmatpush.msra.mxu0 %v1112_v4  ;;  %1428 = vmatpush.msra.mxu1 %v1129_v5  ;;  %v1233_v4 = vld [vmem:[%s3371_s3 + $0x7f0] sm:$0xff]  ;;  %v1180_v5 = vld [vmem:[%s3371_s3 + $0x648] sm:$0xff] }
  0xe9   : > { %1446 = vmatpush.msra.mxu2 %v1147_v6  ;;  %1465 = vmatpush.msra.mxu3 %v1164_v7  ;;  %v1197_v6 = vld [vmem:[%s3371_s3 + $0x6d0] sm:$0xff]  ;;  %v1215_v7 = vld [vmem:[%s3371_s3 + $0x760] sm:$0xff] }
  0xea   : > { %1410 = vmatpush.msra.mxu0 %v1111_v9  ;;  %1429 = vmatpush.msra.mxu1 %v1128_v10  ;;  %v1232_v9 = vld [vmem:[%s3371_s3 + $0x7e8] sm:$0xff]  ;;  %v1179_v10 = vld [vmem:[%s3371_s3 + $0x640] sm:$0xff] }
  0xeb   : > { %1447 = vmatpush.msra.mxu2 %v1146_v62  ;;  %1466 = vmatpush.msra.mxu3 %v1163_v11  ;;  %v1196_v62 = vld [vmem:[%s3371_s3 + $0x6c8] sm:$0xff]  ;;  %v1214_v11 = vld [vmem:[%s3371_s3 + $0x758] sm:$0xff] }
  0xec   : > { %1411 = vmatpush.msra.mxu0 %v1110_v12  ;;  %1430 = vmatpush.msra.mxu1 %v1127_v13  ;;  %v788_v19 = vpop.f32.mrf.mxu0  ;;  %v1231_v12 = vld [vmem:[%s3371_s3 + $0x7e0] sm:$0xff]  ;;  %v1178_v13 = vld [vmem:[%s3371_s3 + $0x638] sm:$0xff] }
  0xed   : > { %1448 = vmatpush.msra.mxu2 %v1145_v15  ;;  %1467 = vmatpush.msra.mxu3 %v1162_v16  ;;  %v789_v23 = vadd.f32 %v788_v19, %v587_v14  ;;  %v1195_v14 = vld [vmem:[%s3371_s3 + $0x6c0] sm:$0xff]  ;;  %v1213_v15 = vld [vmem:[%s3371_s3 + $0x750] sm:$0xff]  ;;  %v1230_v16 = vld [vmem:[%s3371_s3 + $0x7d8] sm:$0xff] }
  0xee   : > { %1412 = vmatpush.msra.mxu0 %v1109_v17  ;;  %1431 = vmatpush.msra.mxu1 %v1126_v18  ;;  %v1177_v17 = vld [vmem:[%s3371_s3 + $0x630] sm:$0xff]  ;;  %v1194_v18 = vld [vmem:[%s3371_s3 + $0x6b8] sm:$0xff]  ;;  %v1212_v19 = vld [vmem:[%s3371_s3 + $0x748] sm:$0xff] }
  0xef   : > { %1449 = vmatpush.msra.mxu2 %v1144_v20  ;;  %1468 = vmatpush.msra.mxu3 %v1161_v21  ;;  %v808_v28 = vpop.f32.mrf.mxu1  ;;  %v939_v32 = vmax.f32 %v789_v23, 0.0  ;;  %v1229_v20 = vld [vmem:[%s3371_s3 + $0x7d0] sm:$0xff]  ;;  %v1176_v21 = vld [vmem:[%s3371_s3 + $0x628] sm:$0xff]  ;;  %v1211_v23 = vld [vmem:[%s3371_s3 + $0x740] sm:$0xff] }
  0xf0   : > { %v809_v33 = vadd.f32 %v808_v28, %v588_v22  ;;  %1413 = vmatpush.msra.mxu0 %v1108_v24  ;;  %1432 = vmatpush.msra.mxu1 %v1125_v25  ;;  %v1193_v22 = vld [vmem:[%s3371_s3 + $0x6b0] sm:$0xff]  ;;  %v1228_v24 = vld [vmem:[%s3371_s3 + $0x7c8] sm:$0xff]  ;;  %v1175_v25 = vld [vmem:[%s3371_s3 + $0x620] sm:$0xff] }
  0xf1   : > { %1450 = vmatpush.msra.mxu2 %v1143_v26  ;;  %1469 = vmatpush.msra.mxu3 %v1160_v27  ;;  %v1192_v26 = vld [vmem:[%s3371_s3 + $0x6a8] sm:$0xff]  ;;  %v1210_v27 = vld [vmem:[%s3371_s3 + $0x738] sm:$0xff]  ;;  %v1227_v28 = vld [vmem:[%s3371_s3 + $0x7c0] sm:$0xff] }
  0xf2   : > { %v940_v37 = vmax.f32 %v809_v33, 0.0  ;;  %1414 = vmatpush.msra.mxu0 %v1107_v29  ;;  %1433 = vmatpush.msra.mxu1 %v1124_v30  ;;  %v828_v40 = vpop.f32.mrf.mxu2  ;;  %v1174_v29 = vld [vmem:[%s3371_s3 + $0x618] sm:$0xff]  ;;  %v1191_v30 = vld [vmem:[%s3371_s3 + $0x6a0] sm:$0xff] }
  0xf3   : > { %1451 = vmatpush.msra.mxu2 %v1142_v34  ;;  %1470 = vmatpush.msra.mxu3 %v1159_v35  ;;  %v829_v43 = vadd.f32 %v828_v40, %v589_v31  ;;  %v591_v31 = vperm.slane %v3062_v8, 4  ;;  %v1226_v33 = vld [vmem:[%s3371_s3 + $0x7b8] sm:$0xff]  ;;  %v1173_v34 = vld [vmem:[%s3371_s3 + $0x610] sm:$0xff] }
  0xf4   : > { %1415 = vmatmul.f32.vlgmr.msra.gmra.mxu0 %v939_v32  ;;  %1434 = vmatpush.msra.mxu1 %v1123_v36  ;;  %v1209_v32 = vld [vmem:[%s3371_s3 + $0x730] sm:$0xff]  ;;  %v1190_v35 = vld [vmem:[%s3371_s3 + $0x698] sm:$0xff]  ;;  %v592_v36 = vperm.slane %v3062_v8, 5 }
  0xf5   : > { %1479 = vmatpush.msrb.mxu0 %v1186_v39  ;;  %1452 = vmatpush.msra.mxu2 %v1141_v41  ;;  %v848_v47 = vpop.f32.mrf.mxu3  ;;  %v941_v52 = vmax.f32 %v829_v43, 0.0  ;;  %v1208_v39 = vld [vmem:[%s3371_s3 + $0x728] sm:$0xff]  ;;  %v1225_v40 = vld [vmem:[%s3371_s3 + $0x7b0] sm:$0xff] }
  0xf6   : > { %1471 = vmatpush.msra.mxu3 %v1158_v44  ;;  %1435 = vmatmul.f32.vlgmr.msra.gmra.mxu1 %v940_v37  ;;  %v849_v49 = vadd.f32 %v848_v47, %v590_v42  ;;  %v1172_v42 = vld [vmem:[%s3371_s3 + $0x608] sm:$0xff]  ;;  %v1189_v43 = vld [vmem:[%s3371_s3 + $0x690] sm:$0xff] }
  0xf7   : > { %1480 = vmatpush.msrb.mxu0 %v1185_v45  ;;  %1499 = vmatpush.msrb.mxu1 %v1202_v46  ;;  %v1207_v45 = vld [vmem:[%s3371_s3 + $0x720] sm:$0xff]  ;;  %v1224_v46 = vld [vmem:[%s3371_s3 + $0x7a8] sm:$0xff] }
  0xf8   : > { %1453 = vmatpush.msra.mxu2 %v1140_v48  ;;  %1472 = vmatpush.msra.mxu3 %v1157_v38  ;;  %v942_v58 = vmax.f32 %v849_v49, 0.0  ;;  %v1171_v48 = vld [vmem:[%s3371_s3 + $0x600] sm:$0xff]  ;;  %v1188_v38 = vld [vmem:[%s3371_s3 + $0x688] sm:$0xff]  ;;  %v593_v49 = vperm.slane %v3062_v8, 6 }
  0xf9   : > { %1481 = vmatpush.msrb.mxu0 %v1184_v50  ;;  %1500 = vmatpush.msrb.mxu1 %v1201_v51  ;;  %v1206_v51 = vld [vmem:[%s3371_s3 + $0x718] sm:$0xff] }
  0xfa   : > { %1454 = vmatpush.msra.mxu2 %v1139_v53  ;;  %1473 = vmatpush.msra.mxu3 %v1156_v54  ;;  %v1187_v53 = vld [vmem:[%s3371_s3 + $0x680] sm:$0xff]  ;;  %v594_v54 = vperm.slane %v3062_v8, 7  ;;  %v1204_v8 = vld [vmem:[%s3371_s3 + $0x708] sm:$0xff] }
  0xfb   : > { %1455 = vmatmul.f32.vlgmr.msra.gmra.mxu2 %v941_v52  ;;  %1482 = vmatpush.msrb.mxu0 %v1183_v55  ;;  %v1223_v52 = vld [vmem:[%s3371_s3 + $0x7a0] sm:$0xff] }
  0xfc   : > { %1501 = vmatpush.msrb.mxu1 %v1200_v56  ;;  %1519 = vmatpush.msrb.mxu2 %v1218_v57  ;;  %v1205_v57 = vld [vmem:[%s3371_s3 + $0x710] sm:$0xff] }
  0xfd   : > { %1474 = vmatpush.msra.mxu3 %v1155_v59  ;;  %1483 = vmatpush.msrb.mxu0 %v1182_v60 }
  0xfe   : > { %1475 = vmatmul.f32.vlgmr.msra.gmra.mxu3 %v942_v58  ;;  %1502 = vmatpush.msrb.mxu1 %v1199_v61  ;;  %v1222_v58 = vld [vmem:[%s3371_s3 + $0x798] sm:$0xff]  ;;  %v1221_v61 = vld [vmem:[%s3371_s3 + $0x790] sm:$0xff] }
  0xff   : > { %1520 = vmatpush.msrb.mxu2 %v1217_v63  ;;  %1539 = vmatpush.msrb.mxu3 %v1234_v0 }
 0x100   : > { %1484 = vmatpush.msrb.mxu0 %v1181_v1  ;;  %1503 = vmatpush.msrb.mxu1 %v1198_v2  ;;  %v1203_v1 = vld [vmem:[%s3371_s3 + $0x700] sm:$0xff]  ;;  %v1220_v2 = vld [vmem:[%s3371_s3 + $0x788] sm:$0xff] }
 0x101   : > { %1521 = vmatpush.msrb.mxu2 %v1216_v3  ;;  %1540 = vmatpush.msrb.mxu3 %v1233_v4  ;;  %v1219_v4 = vld [vmem:[%s3371_s3 + $0x780] sm:$0xff] }
 0x102   : > { %1485 = vmatpush.msrb.mxu0 %v1180_v5  ;;  %1504 = vmatpush.msrb.mxu1 %v1197_v6  ;;  %v1683_v5 = vld [vmem:[%s3372_s4] ss:$0 sm:$0xff] }
 0x103   : > { %1522 = vmatpush.msrb.mxu2 %v1215_v7  ;;  %1541 = vmatpush.msrb.mxu3 %v1232_v9 }
 0x104   : > { %1486 = vmatpush.msrb.mxu0 %v1179_v10  ;;  %1505 = vmatpush.msrb.mxu1 %v1196_v62 }
 0x105   : > { %1523 = vmatpush.msrb.mxu2 %v1214_v11  ;;  %1542 = vmatpush.msrb.mxu3 %v1231_v12 }
 0x106   : > { %1487 = vmatpush.msrb.mxu0 %v1178_v13  ;;  %1506 = vmatpush.msrb.mxu1 %v1195_v14 }
 0x107   : > { %1524 = vmatpush.msrb.mxu2 %v1213_v15  ;;  %1543 = vmatpush.msrb.mxu3 %v1230_v16 }
 0x108   : > { %1488 = vmatpush.msrb.mxu0 %v1177_v17  ;;  %1507 = vmatpush.msrb.mxu1 %v1194_v18 }
 0x109   : > { %1525 = vmatpush.msrb.mxu2 %v1212_v19  ;;  %1544 = vmatpush.msrb.mxu3 %v1229_v20 }
 0x10a   : > { %1489 = vmatpush.msrb.mxu0 %v1176_v21  ;;  %1508 = vmatpush.msrb.mxu1 %v1193_v22 }
 0x10b   : > { %1526 = vmatpush.msrb.mxu2 %v1211_v23  ;;  %1545 = vmatpush.msrb.mxu3 %v1228_v24 }
 0x10c   : > { %1490 = vmatpush.msrb.mxu0 %v1175_v25  ;;  %1509 = vmatpush.msrb.mxu1 %v1192_v26 }
 0x10d   : > { %1527 = vmatpush.msrb.mxu2 %v1210_v27  ;;  %1546 = vmatpush.msrb.mxu3 %v1227_v28 }
 0x10e   : > { %1491 = vmatpush.msrb.mxu0 %v1174_v29  ;;  %1510 = vmatpush.msrb.mxu1 %v1191_v30  ;;  %v868_v37 = vpop.f32.mrf.mxu0 }
 0x10f   : > { %1528 = vmatpush.msrb.mxu2 %v1209_v32  ;;  %1547 = vmatpush.msrb.mxu3 %v1226_v33  ;;  %v869_v41 = vadd.f32 %v868_v37, %v591_v31  ;;  %v1559_v37 = vld [vmem:[%s313_s24] sm:$0xff] }
 0x110   : > { %1492 = vmatpush.msrb.mxu0 %v1173_v34  ;;  %1511 = vmatpush.msrb.mxu1 %v1190_v35  ;;  %v888_v44 = vpop.f32.mrf.mxu1 }
 0x111   : > { %1529 = vmatpush.msrb.mxu2 %v1208_v39  ;;  %1548 = vmatpush.msrb.mxu3 %v1225_v40  ;;  %v889_v47 = vadd.f32 %v888_v44, %v592_v36  ;;  %v943_v50 = vmax.f32 %v869_v41, 0.0  ;;  %v1698_v41 = vmov 128.0  }
 0x112   : > { %1493 = vmatpush.msrb.mxu0 %v1172_v42  ;;  %1512 = vmatpush.msrb.mxu1 %v1189_v43  ;;  %1686 = vrcp.f32 %v1698_v41 }
 0x113   : > { %1530 = vmatpush.msrb.mxu2 %v1207_v45  ;;  %1549 = vmatpush.msrb.mxu3 %v1224_v46  ;;  %v944_v55 = vmax.f32 %v889_v47, 0.0 }
 0x114   : > { %1494 = vmatpush.msrb.mxu0 %v1171_v48  ;;  %1513 = vmatpush.msrb.mxu1 %v1188_v38  ;;  %v908_v56 = vpop.f32.mrf.mxu2 }
 0x115   : > { %1531 = vmatpush.msrb.mxu2 %v1206_v51  ;;  %1550 = vmatpush.msrb.mxu3 %v1223_v52  ;;  %v909_v59 = vadd.f32 %v908_v56, %v593_v49 }
 0x116   : > { %1495 = vmatmul.f32.vlgmr.msrb.gmra.mxu0 %v943_v50  ;;  %1514 = vmatpush.msrb.mxu1 %v1187_v53  ;;  %v928_v60 = vpop.f32.mrf.mxu3 }
 0x117   : > { %1532 = vmatpush.msrb.mxu2 %v1205_v57  ;;  %1551 = vmatpush.msrb.mxu3 %v1222_v58  ;;  %v929_v63 = vadd.f32 %v928_v60, %v594_v54  ;;  %v945_v0 = vmax.f32 %v909_v59, 0.0  ;;  %v1684_v60 = vld [vmem:[%s3374_s6] ss:$0 sm:$0xff] }
 0x118   : > { %1515 = vmatmul.f32.vlgmr.msrb.gmra.mxu1 %v944_v55  ;;  %v1687_v42 = vpop.eup %1686 }
 0x119   : > { %1533 = vmatpush.msrb.mxu2 %v1204_v8  ;;  %1552 = vmatpush.msrb.mxu3 %v1221_v61  ;;  %v946_v3 = vmax.f32 %v929_v63, 0.0  ;;  %v1564_v43 = vmul.f32 128.0, %v1687_v42  ;;  %vm1568_vm0 = vweird.f32 %v1687_v42  ;;  %v1685_v61 = vld [vmem:[%s3375_s7] ss:$0 sm:$0xff] }
 0x11b   : > { %1534 = vmatpush.msrb.mxu2 %v1203_v1  ;;  %1553 = vmatpush.msrb.mxu3 %v1220_v2  ;;  %v1565_v44 = vsub.f32 1.0, %v1564_v43 }
 0x11c   : > { %1535 = vmatmul.f32.vlgmr.msrb.gmra.mxu2 %v945_v0 }
 0x11d   : > { %1554 = vmatpush.msrb.mxu3 %v1219_v4  ;;  %v1566_v45 = vmul.f32 %v1687_v42, %v1565_v44 }
 0x11e   : > { %1555 = vmatmul.f32.vlgmr.msrb.gmra.mxu3 %v946_v3 }
 0x11f   : > { %v1567_v46 = vadd.f32 %v1687_v42, %v1566_v45 }
 0x121   : > { %v1569_v47 = vsel %vm1568_vm0, %v1687_v42, %v1567_v46 }
 0x14a   : > { %v1256_v6 = vpop.f32.mrf.mxu0 }
 0x14b   : > { %v1257_v7 = vadd.f32 %v1683_v5, %v1256_v6 }
 0x14e   : > { %v1276_v9 = vpop.f32.mrf.mxu1 }
 0x14f   : > { %v1277_v10 = vadd.f32 %v1276_v9, %v1257_v7 }
 0x158   : > { %v1296_v62 = vpop.f32.mrf.mxu2 }
 0x159   : > { %v1297_v11 = vadd.f32 %v1296_v62, %v1277_v10 }
 0x15c   : > { %v1316_v12 = vpop.f32.mrf.mxu3 }
 0x15d   : > { %v1317_v13 = vadd.f32 %v1316_v12, %v1297_v11 }
 0x160   : > { %v1336_v14 = vpop.f32.mrf.mxu0 }
 0x161   : > { %v1337_v15 = vadd.f32 %v1336_v14, %v1317_v13 }
 0x162   : > { %v1356_v16 = vpop.f32.mrf.mxu1  ;;  %v1376_v18 = vpop.f32.mrf.mxu2 }
 0x163   : > { %v1357_v17 = vadd.f32 %v1356_v16, %v1337_v15 }
 0x165   : > { %v1377_v19 = vadd.f32 %v1376_v18, %v1357_v17  ;;  %v1396_v20 = vpop.f32.mrf.mxu3 }
 0x167   : > { %v1397_v22 = vadd.f32 %v1396_v20, %v1377_v19 }
 0x171   : > { %v1416_v21 = vpop.f32.mrf.mxu0 }
 0x172   : > { %v1417_v23 = vadd.f32 %v1416_v21, %v1397_v22 }
 0x173   : > { %v1436_v24 = vpop.f32.mrf.mxu1 }
 0x174   : > { %v1437_v26 = vadd.f32 %v1436_v24, %v1417_v23 }
 0x17e   : > { %v1456_v25 = vpop.f32.mrf.mxu2 }
 0x17f   : > { %v1457_v27 = vadd.f32 %v1456_v25, %v1437_v26 }
 0x181   : > { %v1476_v28 = vpop.f32.mrf.mxu3 }
 0x182   : > { %v1477_v30 = vadd.f32 %v1476_v28, %v1457_v27 }
 0x193   : > { %v1496_v29 = vpop.f32.mrf.mxu0 }
 0x194   : > { %v1497_v31 = vadd.f32 %v1496_v29, %v1477_v30 }
 0x195   : > { %v1516_v32 = vpop.f32.mrf.mxu1 }
 0x196   : > { %v1517_v33 = vadd.f32 %v1516_v32, %v1497_v31 }
 0x19f   : > { %v1536_v34 = vpop.f32.mrf.mxu2 }
 0x1a0   : > { %v1537_v35 = vadd.f32 %v1536_v34, %v1517_v33 }
 0x1a1   : > { %v1556_v36 = vpop.f32.mrf.mxu3 }
 0x1a2   : > { %v1557_v39 = vadd.f32 %v1556_v36, %v1537_v35 }
 0x1a4   : > { %v1560_v40 = vadd.f32 %v1559_v37, %v1557_v39 }
 0x1a6   : > { %1561 = vadd.xlane.f32.xlu0 %v1560_v40 }
 0x219   : > { %v1562_v48 = vpop.xlane.xlu0 %1561 }
 0x21a   : > { %v1570_v38 = vmul.f32 %v1569_v47, %v1562_v48 }
 0x21c   : > { %v1571_v49 = vsub.f32 %v1560_v40, %v1570_v38 }
 0x21e   : > { %v1572_v50 = vmul.f32 %v1571_v49, %v1571_v49 }
 0x220   : > { %1573 = vadd.xlane.f32.xlu0 %v1572_v50 }
 0x293   : > { %v1574_v51 = vpop.xlane.xlu0 %1573 }
 0x294   : > { %v1575_v52 = vmul.f32 %v1574_v51, %v1569_v47 }
 0x296   : > { %v1576_v53 = vadd.f32 1e-05, %v1575_v52 }
 0x298   : > { %1688 = vrsqrt.f32 %v1576_v53  ;;  %vm1583_vm2 = vweird.f32 %v1576_v53 }
 0x29e   : > { %v1689_v54 = vpop.eup %1688 }
 0x29f   : > { %v1578_v55 = vmul.f32 %v1689_v54, %v1576_v53  ;;  %vm1584_vm1 = vweird.f32 %v1689_v54 }
 0x2a0   : > { %vm1585_vm3 = vmor %vm1583_vm2, %vm1584_vm1 }
 0x2a1   : > { %v1579_v56 = vmul.f32 %v1689_v54, %v1578_v55 }
 0x2a3   : > { %v1580_v57 = vmul.f32 0.5, %v1579_v56 }
 0x2a5   : > { %v1581_v58 = vsub.f32 1.5, %v1580_v57 }
 0x2a7   : > { %v1582_v59 = vmul.f32 %v1689_v54, %v1581_v58 }
 0x2a9   : > { %v1586_v8 = vsel %vm1585_vm3, %v1689_v54, %v1582_v59 }
 0x2aa   : > { %v1587_v63 = vmul.f32 %v1586_v8, %v1571_v49 }
 0x2ac   : > { %v1592_v0 = vmul.f32 %v1684_v60, %v1587_v63 }
 0x2ae   : > { %v1597_v1 = vadd.f32 %v1685_v61, %v1592_v0 }
 0x2b0   : > { %1598 = vst [vmem:[%s317_s11] sm:$0xff] %v1597_v1 }
 0x2b1 PF: > { %s18_s27 = sadd.s32 1, %s1696_s27  }
 0x2b2   : > { %p15_p4 = scmp.ge.s32.totalorder %s18_s27, 4  }
 0x2b4   :  { %17 = sbr.rel (!%p15_p4) target bundleno = 1 (0x1), region = 85 }

// kernel: forward.48
= control target key start
LH: loop header
LB: loop body
LE: loop exit
PB: predicated region body
PF: predicated region fallthrough
CT: control target
= control target key end

     0   :  { %s438_s12 = smov 0   ;;  %s440_s13 = smov 0   ;;  %s526_s0 = inlined_call_operand.vmem [shape: f32[16,128], index: 0, kind: input, shape index: {}]   ;;  %s527_s1 = inlined_call_operand.vmem [shape: f32[128,128], index: 1, kind: input, shape index: {}]   ;;  %s528_s2 = inlined_call_operand.vmem [shape: f32[1,128], index: 2, kind: input, shape index: {}]   ;;  %s529_s3 = inlined_call_operand.vmem [shape: f32[16,128], index: 3, kind: output, shape index: {}]  }
   0x1   :  { %s442_s14 = smov 0  }
   0x2 LB: > { %s22_s15 = sadd.s32 1, %s412_s13  ;;  %p364_p0 = scmp.ge.s32.totalorder %s416_s14, 1  ;;  %s416_s14 = sphi %s442_s14, %s13_s14   ;;  %s412_s13 = sphi %s440_s13, %s531_s13   ;;  %s408_s12 = sphi %s438_s12, %s530_s12  }
   0x3   : > { %p23_p1 = scmp.ge.s32.totalorder %s22_s15, 2  ;;  %p167_p2 = scmp.lt.s32.totalorder %s416_s14, 3 }
   0x5   : > { %s533_s15 = smov (%p23_p1, %s22_s15), 0  ;;  %p168_p3 = pnand %p364_p0, %p167_p2 }
   0x6   : > { %p199_p4 = scmp.lt.s32.totalorder (!%p168_p3), %s408_s12, 1 }
   0x7   : > { %171 = sbr.rel (%p168_p3) target bundleno = 173 (0xad), region = 32 }
   0xc   : > { %v233_v0 = vld [vmem:[%s527_s1 + $0x78] sm:$0xff]  ;;  %v232_v1 = vld [vmem:[%s527_s1 + $0x70] sm:$0xff]  ;;  %v231_v2 = vld [vmem:[%s527_s1 + $0x68] sm:$0xff]  ;;  %s535_s12 = smov (!%p199_p4, %s408_s12), 1 }
   0xd   : > { %238 = vmatpush.msra.mxu0 %v233_v0  ;;  %v230_v3 = vld [vmem:[%s527_s1 + $0x60] sm:$0xff]  ;;  %v229_v4 = vld [vmem:[%s527_s1 + $0x58] sm:$0xff]  ;;  %v228_v5 = vld [vmem:[%s527_s1 + $0x50] sm:$0xff]  ;;  %s365_s19 = sshll.u32 %s535_s12, 3 }
   0xe   : > { %v227_v6 = vld [vmem:[%s527_s1 + $0x48] sm:$0xff]  ;;  %v226_v7 = vld [vmem:[%s527_s1 + $0x40] sm:$0xff]  ;;  %v225_v8 = vld [vmem:[%s527_s1 + $0x38] sm:$0xff]  ;;  %s202_s26 = scalar_lea.vmem %s526_s0, %s365_s19  ;;  %s216_s5 = scalar_lea.vmem %s529_s3, %s365_s19 }
   0xf   : > { %239 = vmatpush.msra.mxu0 %v232_v1  ;;  %v224_v9 = vld [vmem:[%s527_s1 + $0x30] sm:$0xff]  ;;  %v223_v10 = vld [vmem:[%s527_s1 + $0x28] sm:$0xff]  ;;  %v222_v11 = vld [vmem:[%s527_s1 + $0x20] sm:$0xff] }
  0x10   : > { %v221_v12 = vld [vmem:[%s527_s1 + $0x18] sm:$0xff]  ;;  %v220_v13 = vld [vmem:[%s527_s1 + $0x10] sm:$0xff]  ;;  %v219_v14 = vld [vmem:[%s527_s1 + $0x8] sm:$0xff] }
  0x11   : > { %240 = vmatpush.msra.mxu0 %v231_v2  ;;  %v218_v15 = vld [vmem:[%s527_s1] sm:$0xff] }
  0x12   : > { %v217_v16 = vld [vmem:[%s202_s26] sm:$0xff] }
  0x13   : > { %241 = vmatpush.msra.mxu0 %v230_v3  ;;  %v393_v17 = vld [vmem:[%s528_s2] ss:$0 sm:$0xff] }
  0x15   : > { %242 = vmatpush.msra.mxu0 %v229_v4 }
  0x17   : > { %243 = vmatpush.msra.mxu0 %v228_v5 }
  0x19   : > { %244 = vmatpush.msra.mxu0 %v227_v6 }
  0x1b   : > { %245 = vmatpush.msra.mxu0 %v226_v7 }
  0x1d   : > { %246 = vmatpush.msra.mxu0 %v225_v8 }
  0x1f   : > { %247 = vmatpush.msra.mxu0 %v224_v9 }
  0x21   : > { %248 = vmatpush.msra.mxu0 %v223_v10 }
  0x23   : > { %249 = vmatpush.msra.mxu0 %v222_v11 }
  0x25   : > { %250 = vmatpush.msra.mxu0 %v221_v12 }
  0x27   : > { %251 = vmatpush.msra.mxu0 %v220_v13 }
  0x29   : > { %252 = vmatpush.msra.mxu0 %v219_v14 }
  0x2b   : > { %253 = vmatpush.msra.mxu0 %v218_v15 }
  0x2c   : > { %254 = vmatmul.f32.vlgmr.msra.gmra.mxu0 %v217_v16 }
  0xa9   : > { %v255_v18 = vpop.f32.mrf.mxu0 }
  0xaa   : > { %v256_v19 = vadd.f32 %v393_v17, %v255_v18 }
  0xac   : > { %258 = vst [vmem:[%s216_s5] sm:$0xff] %v256_v19 }
  0xad PF: > { %s13_s14 = sadd.s32 1, %s416_s14   ;;  %s530_s12 = smov %s412_s13 }
  0xae   : > { %p10_p5 = scmp.ge.s32.totalorder %s13_s14, 4   ;;  %s531_s13 = smov %s533_s15 }
  0xb0   :  { %12 = sbr.rel (!%p10_p5) target bundleno = 2 (0x2), region = 68 }

// kernel: forward.53
= control target key start
LH: loop header
LB: loop body
LE: loop exit
PB: predicated region body
PF: predicated region fallthrough
CT: control target
= control target key end

     0   :  { %s439_s12 = smov 0   ;;  %s441_s13 = smov 0   ;;  %s527_s0 = inlined_call_operand.vmem [shape: f32[16,128], index: 0, kind: input, shape index: {}]   ;;  %s528_s1 = inlined_call_operand.vmem [shape: f32[128,62], index: 1, kind: input, shape index: {}]   ;;  %s529_s2 = inlined_call_operand.vmem [shape: f32[1,62], index: 2, kind: input, shape index: {}]   ;;  %s530_s3 = inlined_call_operand.vmem [shape: f32[16,62], index: 3, kind: output, shape index: {}]  }
   0x1   :  { %s443_s14 = smov 0  }
   0x2 LB: > { %s22_s15 = sadd.s32 1, %s413_s13  ;;  %p365_p0 = scmp.ge.s32.totalorder %s417_s14, 1  ;;  %s417_s14 = sphi %s443_s14, %s13_s14   ;;  %s413_s13 = sphi %s441_s13, %s532_s13   ;;  %s409_s12 = sphi %s439_s12, %s531_s12  }
   0x3   : > { %p23_p1 = scmp.ge.s32.totalorder %s22_s15, 2  ;;  %p167_p2 = scmp.lt.s32.totalorder %s417_s14, 3 }
   0x5   : > { %s534_s15 = smov (%p23_p1, %s22_s15), 0  ;;  %p168_p3 = pnand %p365_p0, %p167_p2 }
   0x6   : > { %p199_p4 = scmp.lt.s32.totalorder (!%p168_p3), %s409_s12, 1 }
   0x7   : > { %171 = sbr.rel (%p168_p3) target bundleno = 173 (0xad), region = 32 }
   0xc   : > { %v233_v0 = vld [vmem:[%s528_s1 + $0x78] sm:$0xff]  ;;  %v232_v1 = vld [vmem:[%s528_s1 + $0x70] sm:$0xff]  ;;  %v231_v2 = vld [vmem:[%s528_s1 + $0x68] sm:$0xff]  ;;  %s536_s12 = smov (!%p199_p4, %s409_s12), 1  ;;  %vm258_vm0 = vcmask 506880  }
   0xd   : > { %238 = vmatpush.msra.mxu0 %v233_v0  ;;  %v230_v3 = vld [vmem:[%s528_s1 + $0x60] sm:$0xff]  ;;  %v229_v4 = vld [vmem:[%s528_s1 + $0x58] sm:$0xff]  ;;  %v228_v5 = vld [vmem:[%s528_s1 + $0x50] sm:$0xff]  ;;  %s366_s19 = sshll.u32 %s536_s12, 3 }
   0xe   : > { %v227_v6 = vld [vmem:[%s528_s1 + $0x48] sm:$0xff]  ;;  %v226_v7 = vld [vmem:[%s528_s1 + $0x40] sm:$0xff]  ;;  %v225_v8 = vld [vmem:[%s528_s1 + $0x38] sm:$0xff]  ;;  %s202_s26 = scalar_lea.vmem %s527_s0, %s366_s19  ;;  %s216_s5 = scalar_lea.vmem %s530_s3, %s366_s19 }
   0xf   : > { %239 = vmatpush.msra.mxu0 %v232_v1  ;;  %v224_v9 = vld [vmem:[%s528_s1 + $0x30] sm:$0xff]  ;;  %v223_v10 = vld [vmem:[%s528_s1 + $0x28] sm:$0xff]  ;;  %v222_v11 = vld [vmem:[%s528_s1 + $0x20] sm:$0xff] }
  0x10   : > { %v221_v12 = vld [vmem:[%s528_s1 + $0x18] sm:$0xff]  ;;  %v220_v13 = vld [vmem:[%s528_s1 + $0x10] sm:$0xff]  ;;  %v219_v14 = vld [vmem:[%s528_s1 + $0x8] sm:$0xff] }
  0x11   : > { %240 = vmatpush.msra.mxu0 %v231_v2  ;;  %v218_v15 = vld [vmem:[%s528_s1] sm:$0xff] }
  0x12   : > { %v217_v16 = vld [vmem:[%s202_s26] sm:$0xff] }
  0x13   : > { %241 = vmatpush.msra.mxu0 %v230_v3  ;;  %v394_v17 = vld [vmem:[%s529_s2] ss:$0 sm:$0xff] }
  0x15   : > { %242 = vmatpush.msra.mxu0 %v229_v4 }
  0x17   : > { %243 = vmatpush.msra.mxu0 %v228_v5 }
  0x19   : > { %244 = vmatpush.msra.mxu0 %v227_v6 }
  0x1b   : > { %245 = vmatpush.msra.mxu0 %v226_v7 }
  0x1d   : > { %246 = vmatpush.msra.mxu0 %v225_v8 }
  0x1f   : > { %247 = vmatpush.msra.mxu0 %v224_v9 }
  0x21   : > { %248 = vmatpush.msra.mxu0 %v223_v10 }
  0x23   : > { %249 = vmatpush.msra.mxu0 %v222_v11 }
  0x25   : > { %250 = vmatpush.msra.mxu0 %v221_v12 }
  0x27   : > { %251 = vmatpush.msra.mxu0 %v220_v13 }
  0x29   : > { %252 = vmatpush.msra.mxu0 %v219_v14 }
  0x2b   : > { %253 = vmatpush.msra.mxu0 %v218_v15 }
  0x2c   : > { %254 = vmatmul.f32.vlgmr.msra.gmra.mxu0 %v217_v16 }
  0xa9   : > { %v255_v18 = vpop.f32.mrf.mxu0 }
  0xaa   : > { %v256_v19 = vadd.f32 %v394_v17, %v255_v18 }
  0xac   : > { %259 = vst.msk [vmem:[%s216_s5] sm:$0xff] %vm258_vm0, %v256_v19 }
  0xad PF: > { %s13_s14 = sadd.s32 1, %s417_s14   ;;  %s531_s12 = smov %s413_s13 }
  0xae   : > { %p10_p5 = scmp.ge.s32.totalorder %s13_s14, 4   ;;  %s532_s13 = smov %s534_s15 }
  0xb0   :  { %12 = sbr.rel (!%p10_p5) target bundleno = 2 (0x2), region = 68 }

// kernel: forward.44
= control target key start
LH: loop header
LB: loop body
LE: loop exit
PB: predicated region body
PF: predicated region fallthrough
CT: control target
= control target key end

     0   :  { %13 = vsyncpa [#allocation4], 0  ;;  %s3596_s0 = inlined_call_operand.vmem [shape: f32[16,128], index: 0, kind: input, shape index: {}, may-alias: {0,5}]   ;;  %s3597_s1 = inlined_call_operand.vmem [shape: f32[128,2048], index: 1, kind: input, shape index: {}]   ;;  %s3598_s2 = inlined_call_operand.vmem [shape: f32[1,2048], index: 2, kind: input, shape index: {}]   ;;  %s3599_s3 = inlined_call_operand.vmem [shape: f32[2048,128], index: 3, kind: input, shape index: {}]   ;;  %s3600_s4 = inlined_call_operand.hbm [shape: f32[1,128], index: 4, kind: input, shape index: {}]   ;;  %s3601_s5 = inlined_call_operand.vmem [shape: f32[16,128], index: 5, kind: input, shape index: {}, may-alias: {0,5}]   ;;  %s3602_s6 = inlined_call_operand.hbm [shape: f32[1,128], index: 6, kind: input, shape index: {}]   ;;  %s3603_s7 = inlined_call_operand.hbm [shape: f32[1,128], index: 7, kind: input, shape index: {}]   ;;  %s3604_s8 = inlined_call_operand.vmem [shape: f32[16,128], index: 8, kind: output, shape index: {}]  }
   0x1   :  { %14 = vsyncpa [#allocation6], 0  ;;  %s1957_s27 = smov 0  }
   0x2 LB: > { %s262_s30 = sshll.u32 %s3602_s6, 4  ;;  %s1966_s9 = sadd.s32 4294967295, %s1906_s27   ;;  %s1906_s27 = sphi %s1957_s27, %s20_s27   ;;  %s263_s30 = int_to_ptr.hbm [resolvable:$true] %s262_s30 }
   0x3   : > { %p1741_p0 = scmp.ge.s32.totalorder %s1906_s27, 1  ;;  %p229_p1 = scmp.lt.s32.totalorder %s1906_s27, 3 }
   0x4   : > { %p1777_p2 = scmp.eq.s32.totalorder %s1966_s9, 0  ;;  %s1908_s11 = smov [#allocation5]  }
   0x5   : > { %p1971_p3 = pnand %p1741_p0, %p229_p1  ;;  %s264_s12 = sshll.u32 %s1908_s11, 4  ;;  %s265_s12 = int_to_ptr.vmem [resolvable:$true] %s264_s12 }
   0x6   : > { %s250_s15 = sshll.u32 %s3600_s4, 4  ;;  %s274_s18 = sshll.u32 %s3603_s7, 4  ;;  %s251_s15 = int_to_ptr.hbm [resolvable:$true] %s250_s15  ;;  %s275_s18 = int_to_ptr.hbm [resolvable:$true] %s274_s18 }
   0x7   : > { %p1767_p4 = pneg %p1971_p3  ;;  %s1909_s19 = smov [#allocation3]  }
   0x8   : > { %s252_s20 = sshll.u32 %s1909_s19, 4  ;;  %s1910_s21 = smov [#allocation7]   ;;  %s253_s20 = int_to_ptr.vmem [resolvable:$true] %s252_s20 }
   0x9   : > { %p1768_p5 = pnand %p1777_p2, %p1767_p4  ;;  %s276_s22 = sshll.u32 %s1910_s21, 4  ;;  %s277_s22 = int_to_ptr.vmem [resolvable:$true] %s276_s22 }
   0xa   : > { %303 = sbr.rel (%p1971_p3) target bundleno = 697 (0x2b9), region = 52 }
   0xb   : > { %1773 = dma.hbm_to_vmem [thread:$0]  (!%p1768_p5), %s263_s30, 16, %s265_s12, [#allocation6]  }
   0xc   : > { %1770 = dma.hbm_to_vmem [thread:$0]  (!%p1768_p5), %s251_s15, 16, %s253_s20, [#allocation4]  }
   0xd   : > { %1776 = dma.hbm_to_vmem [thread:$0]  (!%p1768_p5), %s275_s18, 16, %s277_s22, [#allocation6]  }
   0xf   : > { %1897 = dma.done.wait (%p1777_p2), [#allocation4], 16  }
  0x10   : > { %1899 = vsyncadd (%p1777_p2), [#allocation4], 4294967280 }
  0x11   : > { %1901 = dma.done.wait (%p1777_p2), [#allocation6], 32  }
  0x12   : > { %1903 = vsyncadd (%p1777_p2), [#allocation6], 4294967264  ;;  %v603_v0 = vld [vmem:[%s3597_s1 + $0x780] sm:$0xff]  ;;  %v605_v1 = vld [vmem:[%s3597_s1 + $0x790] sm:$0xff]  ;;  %p350_p6 = scmp.lt.s32.totalorder %s1966_s9, 1 }
  0x13   : > { %v587_v2 = vld [vmem:[%s3597_s1 + $0x700] sm:$0xff]  ;;  %655 = vmatpush.msra.mxu0 %v603_v0  ;;  %695 = vmatpush.msra.mxu2 %v605_v1  ;;  %v604_v3 = vld [vmem:[%s3597_s1 + $0x788] sm:$0xff]  ;;  %v589_v4 = vld [vmem:[%s3597_s1 + $0x710] sm:$0xff] }
  0x14   : > { %v606_v5 = vld [vmem:[%s3597_s1 + $0x798] sm:$0xff]  ;;  %675 = vmatpush.msra.mxu1 %v604_v3  ;;  %v571_v6 = vld [vmem:[%s3597_s1 + $0x680] sm:$0xff]  ;;  %v588_v7 = vld [vmem:[%s3597_s1 + $0x708] sm:$0xff]  ;;  %s3607_s9 = smov (!%p350_p6, %s1966_s9), 1 }
  0x15   : > { %715 = vmatpush.msra.mxu3 %v606_v5  ;;  %v573_v8 = vld [vmem:[%s3597_s1 + $0x690] sm:$0xff]  ;;  %656 = vmatpush.msra.mxu0 %v587_v2  ;;  %v590_v9 = vld [vmem:[%s3597_s1 + $0x718] sm:$0xff]  ;;  %v572_v10 = vld [vmem:[%s3597_s1 + $0x688] sm:$0xff]  ;;  %s2347_s15 = sshll.u32 %s3607_s9, 3 }
  0x16   : > { %696 = vmatpush.msra.mxu2 %v589_v4  ;;  %676 = vmatpush.msra.mxu1 %v588_v7  ;;  %v555_v11 = vld [vmem:[%s3597_s1 + $0x600] sm:$0xff]  ;;  %v557_v12 = vld [vmem:[%s3597_s1 + $0x610] sm:$0xff]  ;;  %v574_v13 = vld [vmem:[%s3597_s1 + $0x698] sm:$0xff]  ;;  %s353_s30 = scalar_lea.vmem %s3596_s0, %s2347_s15  ;;  %s357_s17 = scalar_lea.vmem %s3601_s5, %s2347_s15 }
  0x17   : > { %716 = vmatpush.msra.mxu3 %v590_v9  ;;  %657 = vmatpush.msra.mxu0 %v571_v6  ;;  %v556_v14 = vld [vmem:[%s3597_s1 + $0x608] sm:$0xff]  ;;  %v558_v15 = vld [vmem:[%s3597_s1 + $0x618] sm:$0xff]  ;;  %v539_v16 = vld [vmem:[%s3597_s1 + $0x580] sm:$0xff]  ;;  %s361_s20 = scalar_lea.vmem %s3604_s8, %s2347_s15 }
  0x18   : > { %697 = vmatpush.msra.mxu2 %v573_v8  ;;  %677 = vmatpush.msra.mxu1 %v572_v10  ;;  %v541_v17 = vld [vmem:[%s3597_s1 + $0x590] sm:$0xff]  ;;  %v540_v18 = vld [vmem:[%s3597_s1 + $0x588] sm:$0xff]  ;;  %v542_v19 = vld [vmem:[%s3597_s1 + $0x598] sm:$0xff] }
  0x19   : > { %717 = vmatpush.msra.mxu3 %v574_v13  ;;  %658 = vmatpush.msra.mxu0 %v555_v11  ;;  %v523_v20 = vld [vmem:[%s3597_s1 + $0x500] sm:$0xff]  ;;  %v525_v21 = vld [vmem:[%s3597_s1 + $0x510] sm:$0xff]  ;;  %v524_v22 = vld [vmem:[%s3597_s1 + $0x508] sm:$0xff] }
  0x1a   : > { %698 = vmatpush.msra.mxu2 %v557_v12  ;;  %678 = vmatpush.msra.mxu1 %v556_v14  ;;  %v526_v23 = vld [vmem:[%s3597_s1 + $0x518] sm:$0xff]  ;;  %v507_v24 = vld [vmem:[%s3597_s1 + $0x480] sm:$0xff]  ;;  %v509_v25 = vld [vmem:[%s3597_s1 + $0x490] sm:$0xff] }
  0x1b   : > { %718 = vmatpush.msra.mxu3 %v558_v15  ;;  %659 = vmatpush.msra.mxu0 %v539_v16  ;;  %v508_v26 = vld [vmem:[%s3597_s1 + $0x488] sm:$0xff]  ;;  %v510_v27 = vld [vmem:[%s3597_s1 + $0x498] sm:$0xff]  ;;  %v491_v28 = vld [vmem:[%s3597_s1 + $0x400] sm:$0xff] }
  0x1c   : > { %699 = vmatpush.msra.mxu2 %v541_v17  ;;  %679 = vmatpush.msra.mxu1 %v540_v18  ;;  %v493_v29 = vld [vmem:[%s3597_s1 + $0x410] sm:$0xff]  ;;  %v492_v30 = vld [vmem:[%s3597_s1 + $0x408] sm:$0xff]  ;;  %v494_v31 = vld [vmem:[%s3597_s1 + $0x418] sm:$0xff] }
  0x1d   : > { %719 = vmatpush.msra.mxu3 %v542_v19  ;;  %660 = vmatpush.msra.mxu0 %v523_v20  ;;  %v475_v32 = vld [vmem:[%s3597_s1 + $0x380] sm:$0xff]  ;;  %v477_v33 = vld [vmem:[%s3597_s1 + $0x390] sm:$0xff]  ;;  %v476_v34 = vld [vmem:[%s3597_s1 + $0x388] sm:$0xff] }
  0x1e   : > { %700 = vmatpush.msra.mxu2 %v525_v21  ;;  %680 = vmatpush.msra.mxu1 %v524_v22  ;;  %v478_v35 = vld [vmem:[%s3597_s1 + $0x398] sm:$0xff]  ;;  %v459_v36 = vld [vmem:[%s3597_s1 + $0x300] sm:$0xff]  ;;  %v461_v37 = vld [vmem:[%s3597_s1 + $0x310] sm:$0xff] }
  0x1f   : > { %720 = vmatpush.msra.mxu3 %v526_v23  ;;  %661 = vmatpush.msra.mxu0 %v507_v24  ;;  %v460_v38 = vld [vmem:[%s3597_s1 + $0x308] sm:$0xff]  ;;  %v462_v39 = vld [vmem:[%s3597_s1 + $0x318] sm:$0xff]  ;;  %v443_v40 = vld [vmem:[%s3597_s1 + $0x280] sm:$0xff] }
  0x20   : > { %701 = vmatpush.msra.mxu2 %v509_v25  ;;  %681 = vmatpush.msra.mxu1 %v508_v26  ;;  %v445_v41 = vld [vmem:[%s3597_s1 + $0x290] sm:$0xff]  ;;  %v444_v42 = vld [vmem:[%s3597_s1 + $0x288] sm:$0xff]  ;;  %v446_v43 = vld [vmem:[%s3597_s1 + $0x298] sm:$0xff] }
  0x21   : > { %721 = vmatpush.msra.mxu3 %v510_v27  ;;  %662 = vmatpush.msra.mxu0 %v491_v28  ;;  %v427_v44 = vld [vmem:[%s3597_s1 + $0x200] sm:$0xff]  ;;  %v429_v45 = vld [vmem:[%s3597_s1 + $0x210] sm:$0xff]  ;;  %v428_v46 = vld [vmem:[%s3597_s1 + $0x208] sm:$0xff] }
  0x22   : > { %702 = vmatpush.msra.mxu2 %v493_v29  ;;  %682 = vmatpush.msra.mxu1 %v492_v30  ;;  %v430_v47 = vld [vmem:[%s3597_s1 + $0x218] sm:$0xff]  ;;  %v411_v48 = vld [vmem:[%s3597_s1 + $0x180] sm:$0xff]  ;;  %v413_v49 = vld [vmem:[%s3597_s1 + $0x190] sm:$0xff] }
  0x23   : > { %722 = vmatpush.msra.mxu3 %v494_v31  ;;  %663 = vmatpush.msra.mxu0 %v475_v32  ;;  %v412_v50 = vld [vmem:[%s3597_s1 + $0x188] sm:$0xff]  ;;  %v414_v51 = vld [vmem:[%s3597_s1 + $0x198] sm:$0xff]  ;;  %v395_v52 = vld [vmem:[%s3597_s1 + $0x100] sm:$0xff] }
  0x24   : > { %703 = vmatpush.msra.mxu2 %v477_v33  ;;  %683 = vmatpush.msra.mxu1 %v476_v34  ;;  %v397_v53 = vld [vmem:[%s3597_s1 + $0x110] sm:$0xff]  ;;  %v396_v54 = vld [vmem:[%s3597_s1 + $0x108] sm:$0xff]  ;;  %v398_v55 = vld [vmem:[%s3597_s1 + $0x118] sm:$0xff] }
  0x25   : > { %723 = vmatpush.msra.mxu3 %v478_v35  ;;  %664 = vmatpush.msra.mxu0 %v459_v36  ;;  %v379_v56 = vld [vmem:[%s3597_s1 + $0x80] sm:$0xff]  ;;  %v381_v57 = vld [vmem:[%s3597_s1 + $0x90] sm:$0xff]  ;;  %v380_v58 = vld [vmem:[%s3597_s1 + $0x88] sm:$0xff] }
  0x26   : > { %704 = vmatpush.msra.mxu2 %v461_v37  ;;  %684 = vmatpush.msra.mxu1 %v460_v38  ;;  %v382_v59 = vld [vmem:[%s3597_s1 + $0x98] sm:$0xff]  ;;  %v363_v60 = vld [vmem:[%s3597_s1] sm:$0xff]  ;;  %v365_v61 = vld [vmem:[%s3597_s1 + $0x10] sm:$0xff] }
  0x27   : > { %724 = vmatpush.msra.mxu3 %v462_v39  ;;  %665 = vmatpush.msra.mxu0 %v443_v40  ;;  %v607_v62 = vld [vmem:[%s3597_s1 + $0x7a0] sm:$0xff]  ;;  %v609_v63 = vld [vmem:[%s3597_s1 + $0x7b0] sm:$0xff]  ;;  %v364_v0 = vld [vmem:[%s3597_s1 + $0x8] sm:$0xff] }
  0x28   : > { %705 = vmatpush.msra.mxu2 %v445_v41  ;;  %685 = vmatpush.msra.mxu1 %v444_v42  ;;  %v366_v1 = vld [vmem:[%s3597_s1 + $0x18] sm:$0xff]  ;;  %v591_v2 = vld [vmem:[%s3597_s1 + $0x720] sm:$0xff]  ;;  %v608_v3 = vld [vmem:[%s3597_s1 + $0x7a8] sm:$0xff] }
  0x29   : > { %725 = vmatpush.msra.mxu3 %v446_v43  ;;  %666 = vmatpush.msra.mxu0 %v427_v44  ;;  %v593_v4 = vld [vmem:[%s3597_s1 + $0x730] sm:$0xff]  ;;  %v610_v5 = vld [vmem:[%s3597_s1 + $0x7b8] sm:$0xff]  ;;  %v575_v6 = vld [vmem:[%s3597_s1 + $0x6a0] sm:$0xff] }
  0x2a   : > { %706 = vmatpush.msra.mxu2 %v429_v45  ;;  %686 = vmatpush.msra.mxu1 %v428_v46  ;;  %v592_v7 = vld [vmem:[%s3597_s1 + $0x728] sm:$0xff]  ;;  %v577_v8 = vld [vmem:[%s3597_s1 + $0x6b0] sm:$0xff]  ;;  %v594_v9 = vld [vmem:[%s3597_s1 + $0x738] sm:$0xff] }
  0x2b   : > { %726 = vmatpush.msra.mxu3 %v430_v47  ;;  %667 = vmatpush.msra.mxu0 %v411_v48  ;;  %v559_v10 = vld [vmem:[%s3597_s1 + $0x620] sm:$0xff]  ;;  %v576_v11 = vld [vmem:[%s3597_s1 + $0x6a8] sm:$0xff]  ;;  %v561_v12 = vld [vmem:[%s3597_s1 + $0x630] sm:$0xff] }
  0x2c   : > { %707 = vmatpush.msra.mxu2 %v413_v49  ;;  %687 = vmatpush.msra.mxu1 %v412_v50  ;;  %v578_v13 = vld [vmem:[%s3597_s1 + $0x6b8] sm:$0xff]  ;;  %v543_v14 = vld [vmem:[%s3597_s1 + $0x5a0] sm:$0xff]  ;;  %v560_v15 = vld [vmem:[%s3597_s1 + $0x628] sm:$0xff] }
  0x2d   : > { %727 = vmatpush.msra.mxu3 %v414_v51  ;;  %668 = vmatpush.msra.mxu0 %v395_v52  ;;  %v545_v16 = vld [vmem:[%s3597_s1 + $0x5b0] sm:$0xff]  ;;  %v562_v17 = vld [vmem:[%s3597_s1 + $0x638] sm:$0xff]  ;;  %v527_v18 = vld [vmem:[%s3597_s1 + $0x520] sm:$0xff] }
  0x2e   : > { %708 = vmatpush.msra.mxu2 %v397_v53  ;;  %688 = vmatpush.msra.mxu1 %v396_v54  ;;  %v544_v19 = vld [vmem:[%s3597_s1 + $0x5a8] sm:$0xff]  ;;  %v529_v20 = vld [vmem:[%s3597_s1 + $0x530] sm:$0xff]  ;;  %v546_v21 = vld [vmem:[%s3597_s1 + $0x5b8] sm:$0xff] }
  0x2f   : > { %728 = vmatpush.msra.mxu3 %v398_v55  ;;  %669 = vmatpush.msra.mxu0 %v379_v56  ;;  %v511_v22 = vld [vmem:[%s3597_s1 + $0x4a0] sm:$0xff]  ;;  %v528_v23 = vld [vmem:[%s3597_s1 + $0x528] sm:$0xff]  ;;  %v513_v24 = vld [vmem:[%s3597_s1 + $0x4b0] sm:$0xff] }
  0x30   : > { %709 = vmatpush.msra.mxu2 %v381_v57  ;;  %689 = vmatpush.msra.mxu1 %v380_v58  ;;  %v530_v25 = vld [vmem:[%s3597_s1 + $0x538] sm:$0xff]  ;;  %v495_v26 = vld [vmem:[%s3597_s1 + $0x420] sm:$0xff]  ;;  %v512_v27 = vld [vmem:[%s3597_s1 + $0x4a8] sm:$0xff] }
  0x31   : > { %729 = vmatpush.msra.mxu3 %v382_v59  ;;  %670 = vmatpush.msra.mxu0 %v363_v60  ;;  %v497_v28 = vld [vmem:[%s3597_s1 + $0x430] sm:$0xff]  ;;  %v514_v29 = vld [vmem:[%s3597_s1 + $0x4b8] sm:$0xff]  ;;  %v479_v30 = vld [vmem:[%s3597_s1 + $0x3a0] sm:$0xff] }
  0x32   : > { %710 = vmatpush.msra.mxu2 %v365_v61  ;;  %690 = vmatpush.msra.mxu1 %v364_v0  ;;  %v496_v31 = vld [vmem:[%s3597_s1 + $0x428] sm:$0xff]  ;;  %v481_v32 = vld [vmem:[%s3597_s1 + $0x3b0] sm:$0xff]  ;;  %v498_v33 = vld [vmem:[%s3597_s1 + $0x438] sm:$0xff] }
  0x33   : > { %735 = vmatpush.msrb.mxu0 %v607_v62  ;;  %730 = vmatpush.msra.mxu3 %v366_v1  ;;  %v463_v34 = vld [vmem:[%s3597_s1 + $0x320] sm:$0xff]  ;;  %v480_v35 = vld [vmem:[%s3597_s1 + $0x3a8] sm:$0xff]  ;;  %v465_v36 = vld [vmem:[%s3597_s1 + $0x330] sm:$0xff] }
  0x34   : > { %775 = vmatpush.msrb.mxu2 %v609_v63  ;;  %755 = vmatpush.msrb.mxu1 %v608_v3  ;;  %v482_v37 = vld [vmem:[%s3597_s1 + $0x3b8] sm:$0xff]  ;;  %v447_v38 = vld [vmem:[%s3597_s1 + $0x2a0] sm:$0xff]  ;;  %v464_v39 = vld [vmem:[%s3597_s1 + $0x328] sm:$0xff] }
  0x35   : > { %736 = vmatpush.msrb.mxu0 %v591_v2  ;;  %795 = vmatpush.msrb.mxu3 %v610_v5  ;;  %v449_v40 = vld [vmem:[%s3597_s1 + $0x2b0] sm:$0xff]  ;;  %v466_v41 = vld [vmem:[%s3597_s1 + $0x338] sm:$0xff]  ;;  %v431_v42 = vld [vmem:[%s3597_s1 + $0x220] sm:$0xff] }
  0x36   : > { %776 = vmatpush.msrb.mxu2 %v593_v4  ;;  %756 = vmatpush.msrb.mxu1 %v592_v7  ;;  %v448_v43 = vld [vmem:[%s3597_s1 + $0x2a8] sm:$0xff]  ;;  %v433_v44 = vld [vmem:[%s3597_s1 + $0x230] sm:$0xff]  ;;  %v450_v45 = vld [vmem:[%s3597_s1 + $0x2b8] sm:$0xff] }
  0x37   : > { %737 = vmatpush.msrb.mxu0 %v575_v6  ;;  %796 = vmatpush.msrb.mxu3 %v594_v9  ;;  %v415_v46 = vld [vmem:[%s3597_s1 + $0x1a0] sm:$0xff]  ;;  %v432_v47 = vld [vmem:[%s3597_s1 + $0x228] sm:$0xff]  ;;  %v417_v48 = vld [vmem:[%s3597_s1 + $0x1b0] sm:$0xff] }
  0x38   : > { %777 = vmatpush.msrb.mxu2 %v577_v8  ;;  %757 = vmatpush.msrb.mxu1 %v576_v11  ;;  %v434_v49 = vld [vmem:[%s3597_s1 + $0x238] sm:$0xff]  ;;  %v399_v50 = vld [vmem:[%s3597_s1 + $0x120] sm:$0xff]  ;;  %v416_v51 = vld [vmem:[%s3597_s1 + $0x1a8] sm:$0xff] }
  0x39   : > { %738 = vmatpush.msrb.mxu0 %v559_v10  ;;  %797 = vmatpush.msrb.mxu3 %v578_v13  ;;  %v401_v52 = vld [vmem:[%s3597_s1 + $0x130] sm:$0xff]  ;;  %v418_v53 = vld [vmem:[%s3597_s1 + $0x1b8] sm:$0xff]  ;;  %v383_v54 = vld [vmem:[%s3597_s1 + $0xa0] sm:$0xff] }
  0x3a   : > { %778 = vmatpush.msrb.mxu2 %v561_v12  ;;  %758 = vmatpush.msrb.mxu1 %v560_v15  ;;  %v400_v55 = vld [vmem:[%s3597_s1 + $0x128] sm:$0xff]  ;;  %v385_v56 = vld [vmem:[%s3597_s1 + $0xb0] sm:$0xff]  ;;  %v402_v57 = vld [vmem:[%s3597_s1 + $0x138] sm:$0xff] }
  0x3b   : > { %739 = vmatpush.msrb.mxu0 %v543_v14  ;;  %798 = vmatpush.msrb.mxu3 %v562_v17  ;;  %v367_v58 = vld [vmem:[%s3597_s1 + $0x20] sm:$0xff]  ;;  %v384_v59 = vld [vmem:[%s3597_s1 + $0xa8] sm:$0xff]  ;;  %v369_v60 = vld [vmem:[%s3597_s1 + $0x30] sm:$0xff] }
  0x3c   : > { %779 = vmatpush.msrb.mxu2 %v545_v16  ;;  %759 = vmatpush.msrb.mxu1 %v544_v19  ;;  %v386_v61 = vld [vmem:[%s3597_s1 + $0xb8] sm:$0xff]  ;;  %v2383_v62 = vld [vmem:[%s353_s30] sm:$0xff]  ;;  %v613_v0 = vld [vmem:[%s3597_s1 + $0x7d0] sm:$0xff] }
  0x3d   : > { %740 = vmatpush.msrb.mxu0 %v527_v18  ;;  %799 = vmatpush.msrb.mxu3 %v546_v21  ;;  %v611_v63 = vld [vmem:[%s3597_s1 + $0x7c0] sm:$0xff]  ;;  %v368_v1 = vld [vmem:[%s3597_s1 + $0x28] sm:$0xff]  ;;  %v370_v2 = vld [vmem:[%s3597_s1 + $0x38] sm:$0xff] }
  0x3e   : > { %780 = vmatpush.msrb.mxu2 %v529_v20  ;;  %760 = vmatpush.msrb.mxu1 %v528_v23  ;;  %v595_v3 = vld [vmem:[%s3597_s1 + $0x740] sm:$0xff]  ;;  %v612_v4 = vld [vmem:[%s3597_s1 + $0x7c8] sm:$0xff]  ;;  %v597_v5 = vld [vmem:[%s3597_s1 + $0x750] sm:$0xff] }
  0x3f   : > { %741 = vmatpush.msrb.mxu0 %v511_v22  ;;  %800 = vmatpush.msrb.mxu3 %v530_v25  ;;  %v614_v6 = vld [vmem:[%s3597_s1 + $0x7d8] sm:$0xff]  ;;  %v579_v7 = vld [vmem:[%s3597_s1 + $0x6c0] sm:$0xff]  ;;  %v596_v8 = vld [vmem:[%s3597_s1 + $0x748] sm:$0xff] }
  0x40   : > { %781 = vmatpush.msrb.mxu2 %v513_v24  ;;  %761 = vmatpush.msrb.mxu1 %v512_v27  ;;  %v581_v9 = vld [vmem:[%s3597_s1 + $0x6d0] sm:$0xff]  ;;  %v598_v10 = vld [vmem:[%s3597_s1 + $0x758] sm:$0xff]  ;;  %v563_v11 = vld [vmem:[%s3597_s1 + $0x640] sm:$0xff] }
  0x41   : > { %742 = vmatpush.msrb.mxu0 %v495_v26  ;;  %801 = vmatpush.msrb.mxu3 %v514_v29  ;;  %v580_v12 = vld [vmem:[%s3597_s1 + $0x6c8] sm:$0xff]  ;;  %v565_v13 = vld [vmem:[%s3597_s1 + $0x650] sm:$0xff]  ;;  %v582_v14 = vld [vmem:[%s3597_s1 + $0x6d8] sm:$0xff] }
  0x42   : > { %782 = vmatpush.msrb.mxu2 %v497_v28  ;;  %762 = vmatpush.msrb.mxu1 %v496_v31  ;;  %v547_v15 = vld [vmem:[%s3597_s1 + $0x5c0] sm:$0xff]  ;;  %v564_v16 = vld [vmem:[%s3597_s1 + $0x648] sm:$0xff]  ;;  %v549_v17 = vld [vmem:[%s3597_s1 + $0x5d0] sm:$0xff] }
  0x43   : > { %743 = vmatpush.msrb.mxu0 %v479_v30  ;;  %802 = vmatpush.msrb.mxu3 %v498_v33  ;;  %v566_v18 = vld [vmem:[%s3597_s1 + $0x658] sm:$0xff]  ;;  %v531_v19 = vld [vmem:[%s3597_s1 + $0x540] sm:$0xff]  ;;  %v548_v20 = vld [vmem:[%s3597_s1 + $0x5c8] sm:$0xff] }
  0x44   : > { %783 = vmatpush.msrb.mxu2 %v481_v32  ;;  %763 = vmatpush.msrb.mxu1 %v480_v35  ;;  %v533_v21 = vld [vmem:[%s3597_s1 + $0x550] sm:$0xff]  ;;  %v550_v22 = vld [vmem:[%s3597_s1 + $0x5d8] sm:$0xff]  ;;  %v515_v23 = vld [vmem:[%s3597_s1 + $0x4c0] sm:$0xff] }
  0x45   : > { %744 = vmatpush.msrb.mxu0 %v463_v34  ;;  %803 = vmatpush.msrb.mxu3 %v482_v37  ;;  %v532_v24 = vld [vmem:[%s3597_s1 + $0x548] sm:$0xff]  ;;  %v517_v25 = vld [vmem:[%s3597_s1 + $0x4d0] sm:$0xff]  ;;  %v534_v26 = vld [vmem:[%s3597_s1 + $0x558] sm:$0xff] }
  0x46   : > { %784 = vmatpush.msrb.mxu2 %v465_v36  ;;  %764 = vmatpush.msrb.mxu1 %v464_v39  ;;  %v499_v27 = vld [vmem:[%s3597_s1 + $0x440] sm:$0xff]  ;;  %v516_v28 = vld [vmem:[%s3597_s1 + $0x4c8] sm:$0xff]  ;;  %v501_v29 = vld [vmem:[%s3597_s1 + $0x450] sm:$0xff] }
  0x47   : > { %745 = vmatpush.msrb.mxu0 %v447_v38  ;;  %804 = vmatpush.msrb.mxu3 %v466_v41  ;;  %v518_v30 = vld [vmem:[%s3597_s1 + $0x4d8] sm:$0xff]  ;;  %v500_v31 = vld [vmem:[%s3597_s1 + $0x448] sm:$0xff]  ;;  %v483_v32 = vld [vmem:[%s3597_s1 + $0x3c0] sm:$0xff] }
  0x48   : > { %785 = vmatpush.msrb.mxu2 %v449_v40  ;;  %765 = vmatpush.msrb.mxu1 %v448_v43  ;;  %v485_v33 = vld [vmem:[%s3597_s1 + $0x3d0] sm:$0xff]  ;;  %v502_v34 = vld [vmem:[%s3597_s1 + $0x458] sm:$0xff]  ;;  %v467_v35 = vld [vmem:[%s3597_s1 + $0x340] sm:$0xff] }
  0x49   : > { %746 = vmatpush.msrb.mxu0 %v431_v42  ;;  %805 = vmatpush.msrb.mxu3 %v450_v45  ;;  %v484_v36 = vld [vmem:[%s3597_s1 + $0x3c8] sm:$0xff]  ;;  %v469_v37 = vld [vmem:[%s3597_s1 + $0x350] sm:$0xff]  ;;  %v486_v38 = vld [vmem:[%s3597_s1 + $0x3d8] sm:$0xff] }
  0x4a   : > { %786 = vmatpush.msrb.mxu2 %v433_v44  ;;  %766 = vmatpush.msrb.mxu1 %v432_v47  ;;  %v451_v39 = vld [vmem:[%s3597_s1 + $0x2c0] sm:$0xff]  ;;  %v468_v40 = vld [vmem:[%s3597_s1 + $0x348] sm:$0xff]  ;;  %v453_v41 = vld [vmem:[%s3597_s1 + $0x2d0] sm:$0xff] }
  0x4b   : > { %747 = vmatpush.msrb.mxu0 %v415_v46  ;;  %806 = vmatpush.msrb.mxu3 %v434_v49  ;;  %v470_v42 = vld [vmem:[%s3597_s1 + $0x358] sm:$0xff]  ;;  %v435_v43 = vld [vmem:[%s3597_s1 + $0x240] sm:$0xff]  ;;  %v452_v44 = vld [vmem:[%s3597_s1 + $0x2c8] sm:$0xff] }
  0x4c   : > { %787 = vmatpush.msrb.mxu2 %v417_v48  ;;  %767 = vmatpush.msrb.mxu1 %v416_v51  ;;  %v437_v45 = vld [vmem:[%s3597_s1 + $0x250] sm:$0xff]  ;;  %v454_v46 = vld [vmem:[%s3597_s1 + $0x2d8] sm:$0xff]  ;;  %v419_v47 = vld [vmem:[%s3597_s1 + $0x1c0] sm:$0xff] }
  0x4d   : > { %748 = vmatpush.msrb.mxu0 %v399_v50  ;;  %807 = vmatpush.msrb.mxu3 %v418_v53  ;;  %v436_v48 = vld [vmem:[%s3597_s1 + $0x248] sm:$0xff]  ;;  %v421_v49 = vld [vmem:[%s3597_s1 + $0x1d0] sm:$0xff]  ;;  %v438_v50 = vld [vmem:[%s3597_s1 + $0x258] sm:$0xff] }
  0x4e   : > { %788 = vmatpush.msrb.mxu2 %v401_v52  ;;  %768 = vmatpush.msrb.mxu1 %v400_v55  ;;  %v403_v51 = vld [vmem:[%s3597_s1 + $0x140] sm:$0xff]  ;;  %v420_v52 = vld [vmem:[%s3597_s1 + $0x1c8] sm:$0xff]  ;;  %v405_v53 = vld [vmem:[%s3597_s1 + $0x150] sm:$0xff] }
  0x4f   : > { %749 = vmatpush.msrb.mxu0 %v383_v54  ;;  %808 = vmatpush.msrb.mxu3 %v402_v57  ;;  %v422_v54 = vld [vmem:[%s3597_s1 + $0x1d8] sm:$0xff]  ;;  %v387_v55 = vld [vmem:[%s3597_s1 + $0xc0] sm:$0xff]  ;;  %v389_v57 = vld [vmem:[%s3597_s1 + $0xd0] sm:$0xff] }
  0x50   : > { %789 = vmatpush.msrb.mxu2 %v385_v56  ;;  %769 = vmatpush.msrb.mxu1 %v384_v59  ;;  %v404_v56 = vld [vmem:[%s3597_s1 + $0x148] sm:$0xff]  ;;  %v371_v59 = vld [vmem:[%s3597_s1 + $0x40] sm:$0xff] }
  0x51   : > { %750 = vmatpush.msrb.mxu0 %v367_v58  ;;  %809 = vmatpush.msrb.mxu3 %v386_v61  ;;  %v406_v58 = vld [vmem:[%s3597_s1 + $0x158] sm:$0xff]  ;;  %v373_v61 = vld [vmem:[%s3597_s1 + $0x50] sm:$0xff] }
  0x52   : > { %790 = vmatpush.msrb.mxu2 %v369_v60  ;;  %671 = vmatmul.f32.vlgmr.msra.gmra.mxu0 %v2383_v62  ;;  %v388_v60 = vld [vmem:[%s3597_s1 + $0xc8] sm:$0xff] }
  0x53   : > { %711 = vmatmul.f32.vlgmr.msra.gmra.mxu2 %v2383_v62  ;;  %815 = vmatpush.msra.mxu0 %v611_v63  ;;  %v390_v63 = vld [vmem:[%s3597_s1 + $0xd8] sm:$0xff] }
  0x54   : > { %855 = vmatpush.msra.mxu2 %v613_v0  ;;  %770 = vmatpush.msrb.mxu1 %v368_v1  ;;  %v615_v0 = vld [vmem:[%s3597_s1 + $0x7e0] sm:$0xff]  ;;  %v617_v1 = vld [vmem:[%s3597_s1 + $0x7f0] sm:$0xff] }
  0x55   : > { %810 = vmatpush.msrb.mxu3 %v370_v2  ;;  %691 = vmatmul.f32.vlgmr.msra.gmra.mxu1 %v2383_v62  ;;  %v372_v2 = vld [vmem:[%s3597_s1 + $0x48] sm:$0xff] }
  0x56   : > { %731 = vmatmul.f32.vlgmr.msra.gmra.mxu3 %v2383_v62  ;;  %816 = vmatpush.msra.mxu0 %v595_v3  ;;  %v374_v3 = vld [vmem:[%s3597_s1 + $0x58] sm:$0xff] }
  0x57   : > { %835 = vmatpush.msra.mxu1 %v612_v4  ;;  %856 = vmatpush.msra.mxu2 %v597_v5  ;;  %v599_v4 = vld [vmem:[%s3597_s1 + $0x760] sm:$0xff]  ;;  %v616_v5 = vld [vmem:[%s3597_s1 + $0x7e8] sm:$0xff] }
  0x58   : > { %875 = vmatpush.msra.mxu3 %v614_v6  ;;  %817 = vmatpush.msra.mxu0 %v579_v7  ;;  %v601_v6 = vld [vmem:[%s3597_s1 + $0x770] sm:$0xff]  ;;  %v618_v7 = vld [vmem:[%s3597_s1 + $0x7f8] sm:$0xff] }
  0x59   : > { %836 = vmatpush.msra.mxu1 %v596_v8  ;;  %857 = vmatpush.msra.mxu2 %v581_v9  ;;  %v583_v8 = vld [vmem:[%s3597_s1 + $0x6e0] sm:$0xff]  ;;  %v600_v9 = vld [vmem:[%s3597_s1 + $0x768] sm:$0xff] }
  0x5a   : > { %876 = vmatpush.msra.mxu3 %v598_v10  ;;  %818 = vmatpush.msra.mxu0 %v563_v11  ;;  %v585_v10 = vld [vmem:[%s3597_s1 + $0x6f0] sm:$0xff]  ;;  %v602_v11 = vld [vmem:[%s3597_s1 + $0x778] sm:$0xff] }
  0x5b   : > { %837 = vmatpush.msra.mxu1 %v580_v12  ;;  %858 = vmatpush.msra.mxu2 %v565_v13  ;;  %v567_v12 = vld [vmem:[%s3597_s1 + $0x660] sm:$0xff]  ;;  %v584_v13 = vld [vmem:[%s3597_s1 + $0x6e8] sm:$0xff] }
  0x5c   : > { %877 = vmatpush.msra.mxu3 %v582_v14  ;;  %791 = vmatmul.f32.vlgmr.msrb.gmra.mxu2 %v2383_v62  ;;  %v569_v14 = vld [vmem:[%s3597_s1 + $0x670] sm:$0xff] }
  0x5d   : > { %819 = vmatpush.msra.mxu0 %v547_v15  ;;  %838 = vmatpush.msra.mxu1 %v564_v16  ;;  %v586_v15 = vld [vmem:[%s3597_s1 + $0x6f8] sm:$0xff]  ;;  %v551_v16 = vld [vmem:[%s3597_s1 + $0x5e0] sm:$0xff] }
  0x5e   : > { %859 = vmatpush.msra.mxu2 %v549_v17  ;;  %878 = vmatpush.msra.mxu3 %v566_v18  ;;  %v568_v17 = vld [vmem:[%s3597_s1 + $0x668] sm:$0xff]  ;;  %v553_v18 = vld [vmem:[%s3597_s1 + $0x5f0] sm:$0xff] }
  0x5f   : > { %820 = vmatpush.msra.mxu0 %v531_v19  ;;  %811 = vmatmul.f32.vlgmr.msrb.gmra.mxu3 %v2383_v62  ;;  %v570_v19 = vld [vmem:[%s3597_s1 + $0x678] sm:$0xff] }
  0x60   : > { %839 = vmatpush.msra.mxu1 %v548_v20  ;;  %860 = vmatpush.msra.mxu2 %v533_v21  ;;  %v535_v20 = vld [vmem:[%s3597_s1 + $0x560] sm:$0xff]  ;;  %v552_v21 = vld [vmem:[%s3597_s1 + $0x5e8] sm:$0xff] }
  0x61   : > { %879 = vmatpush.msra.mxu3 %v550_v22  ;;  %821 = vmatpush.msra.mxu0 %v515_v23  ;;  %v537_v22 = vld [vmem:[%s3597_s1 + $0x570] sm:$0xff]  ;;  %v554_v23 = vld [vmem:[%s3597_s1 + $0x5f8] sm:$0xff] }
  0x62   : > { %840 = vmatpush.msra.mxu1 %v532_v24  ;;  %861 = vmatpush.msra.mxu2 %v517_v25  ;;  %v519_v24 = vld [vmem:[%s3597_s1 + $0x4e0] sm:$0xff]  ;;  %v536_v25 = vld [vmem:[%s3597_s1 + $0x568] sm:$0xff] }
  0x63   : > { %880 = vmatpush.msra.mxu3 %v534_v26  ;;  %822 = vmatpush.msra.mxu0 %v499_v27  ;;  %v521_v26 = vld [vmem:[%s3597_s1 + $0x4f0] sm:$0xff]  ;;  %v538_v27 = vld [vmem:[%s3597_s1 + $0x578] sm:$0xff] }
  0x64   : > { %841 = vmatpush.msra.mxu1 %v516_v28  ;;  %862 = vmatpush.msra.mxu2 %v501_v29  ;;  %v503_v28 = vld [vmem:[%s3597_s1 + $0x460] sm:$0xff]  ;;  %v520_v29 = vld [vmem:[%s3597_s1 + $0x4e8] sm:$0xff] }
  0x65   : > { %881 = vmatpush.msra.mxu3 %v518_v30  ;;  %751 = vmatmul.f32.vlgmr.msrb.gmra.mxu0 %v2383_v62  ;;  %v505_v30 = vld [vmem:[%s3597_s1 + $0x470] sm:$0xff] }
  0x66   : > { %842 = vmatpush.msra.mxu1 %v500_v31  ;;  %823 = vmatpush.msra.mxu0 %v483_v32  ;;  %v522_v31 = vld [vmem:[%s3597_s1 + $0x4f8] sm:$0xff]  ;;  %v487_v32 = vld [vmem:[%s3597_s1 + $0x3e0] sm:$0xff] }
  0x67   : > { %863 = vmatpush.msra.mxu2 %v485_v33  ;;  %882 = vmatpush.msra.mxu3 %v502_v34  ;;  %v504_v33 = vld [vmem:[%s3597_s1 + $0x468] sm:$0xff]  ;;  %v489_v34 = vld [vmem:[%s3597_s1 + $0x3f0] sm:$0xff] }
  0x68   : > { %771 = vmatmul.f32.vlgmr.msrb.gmra.mxu1 %v2383_v62  ;;  %824 = vmatpush.msra.mxu0 %v467_v35  ;;  %v506_v35 = vld [vmem:[%s3597_s1 + $0x478] sm:$0xff] }
  0x69   : > { %843 = vmatpush.msra.mxu1 %v484_v36  ;;  %864 = vmatpush.msra.mxu2 %v469_v37  ;;  %v471_v36 = vld [vmem:[%s3597_s1 + $0x360] sm:$0xff]  ;;  %v488_v37 = vld [vmem:[%s3597_s1 + $0x3e8] sm:$0xff] }
  0x6a   : > { %883 = vmatpush.msra.mxu3 %v486_v38  ;;  %825 = vmatpush.msra.mxu0 %v451_v39  ;;  %v473_v38 = vld [vmem:[%s3597_s1 + $0x370] sm:$0xff]  ;;  %v490_v39 = vld [vmem:[%s3597_s1 + $0x3f8] sm:$0xff] }
  0x6b   : > { %844 = vmatpush.msra.mxu1 %v468_v40  ;;  %865 = vmatpush.msra.mxu2 %v453_v41  ;;  %v455_v40 = vld [vmem:[%s3597_s1 + $0x2e0] sm:$0xff]  ;;  %v472_v41 = vld [vmem:[%s3597_s1 + $0x368] sm:$0xff] }
  0x6c   : > { %884 = vmatpush.msra.mxu3 %v470_v42  ;;  %826 = vmatpush.msra.mxu0 %v435_v43  ;;  %v457_v42 = vld [vmem:[%s3597_s1 + $0x2f0] sm:$0xff]  ;;  %v474_v43 = vld [vmem:[%s3597_s1 + $0x378] sm:$0xff] }
  0x6d   : > { %845 = vmatpush.msra.mxu1 %v452_v44  ;;  %866 = vmatpush.msra.mxu2 %v437_v45  ;;  %v439_v44 = vld [vmem:[%s3597_s1 + $0x260] sm:$0xff]  ;;  %v456_v45 = vld [vmem:[%s3597_s1 + $0x2e8] sm:$0xff] }
  0x6e   : > { %885 = vmatpush.msra.mxu3 %v454_v46  ;;  %827 = vmatpush.msra.mxu0 %v419_v47  ;;  %v441_v46 = vld [vmem:[%s3597_s1 + $0x270] sm:$0xff]  ;;  %v458_v47 = vld [vmem:[%s3597_s1 + $0x2f8] sm:$0xff] }
  0x6f   : > { %846 = vmatpush.msra.mxu1 %v436_v48  ;;  %867 = vmatpush.msra.mxu2 %v421_v49  ;;  %v423_v48 = vld [vmem:[%s3597_s1 + $0x1e0] sm:$0xff]  ;;  %v440_v49 = vld [vmem:[%s3597_s1 + $0x268] sm:$0xff] }
  0x70   : > { %886 = vmatpush.msra.mxu3 %v438_v50  ;;  %828 = vmatpush.msra.mxu0 %v403_v51  ;;  %v425_v50 = vld [vmem:[%s3597_s1 + $0x1f0] sm:$0xff]  ;;  %v442_v51 = vld [vmem:[%s3597_s1 + $0x278] sm:$0xff] }
  0x71   : > { %847 = vmatpush.msra.mxu1 %v420_v52  ;;  %868 = vmatpush.msra.mxu2 %v405_v53  ;;  %v407_v52 = vld [vmem:[%s3597_s1 + $0x160] sm:$0xff]  ;;  %v424_v53 = vld [vmem:[%s3597_s1 + $0x1e8] sm:$0xff] }
  0x72   : > { %887 = vmatpush.msra.mxu3 %v422_v54  ;;  %829 = vmatpush.msra.mxu0 %v387_v55  ;;  %v409_v54 = vld [vmem:[%s3597_s1 + $0x170] sm:$0xff]  ;;  %v426_v55 = vld [vmem:[%s3597_s1 + $0x1f8] sm:$0xff] }
  0x73   : > { %848 = vmatpush.msra.mxu1 %v404_v56  ;;  %869 = vmatpush.msra.mxu2 %v389_v57  ;;  %v391_v56 = vld [vmem:[%s3597_s1 + $0xe0] sm:$0xff]  ;;  %v408_v57 = vld [vmem:[%s3597_s1 + $0x168] sm:$0xff] }
  0x74   : > { %888 = vmatpush.msra.mxu3 %v406_v58  ;;  %830 = vmatpush.msra.mxu0 %v371_v59  ;;  %v393_v58 = vld [vmem:[%s3597_s1 + $0xf0] sm:$0xff]  ;;  %v410_v59 = vld [vmem:[%s3597_s1 + $0x178] sm:$0xff] }
  0x75   : > { %849 = vmatpush.msra.mxu1 %v388_v60  ;;  %870 = vmatpush.msra.mxu2 %v373_v61  ;;  %v375_v60 = vld [vmem:[%s3597_s1 + $0x60] sm:$0xff]  ;;  %v392_v61 = vld [vmem:[%s3597_s1 + $0xe8] sm:$0xff] }
  0x76   : > { %889 = vmatpush.msra.mxu3 %v390_v63  ;;  %831 = vmatmul.f32.vlgmr.msra.gmra.mxu0 %v2383_v62  ;;  %v377_v63 = vld [vmem:[%s3597_s1 + $0x70] sm:$0xff] }
  0x77   : > { %871 = vmatmul.f32.vlgmr.msra.gmra.mxu2 %v2383_v62  ;;  %895 = vmatpush.msrb.mxu0 %v615_v0  ;;  %v394_v0 = vld [vmem:[%s3597_s1 + $0xf8] sm:$0xff] }
  0x78   : > { %935 = vmatpush.msrb.mxu2 %v617_v1  ;;  %850 = vmatpush.msra.mxu1 %v372_v2  ;;  %v376_v1 = vld [vmem:[%s3597_s1 + $0x68] sm:$0xff]  ;;  %v378_v2 = vld [vmem:[%s3597_s1 + $0x78] sm:$0xff] }
  0x79   : > { %890 = vmatpush.msra.mxu3 %v374_v3  ;;  %851 = vmatmul.f32.vlgmr.msra.gmra.mxu1 %v2383_v62  ;;  %v1038_v3 = vld [vmem:[%s3599_s3 + $0x78] sm:$0xff] }
  0x7a   : > { %891 = vmatmul.f32.vlgmr.msra.gmra.mxu3 %v2383_v62  ;;  %896 = vmatpush.msrb.mxu0 %v599_v4  ;;  %v1054_v4 = vld [vmem:[%s3599_s3 + $0xf8] sm:$0xff] }
  0x7b   : > { %915 = vmatpush.msrb.mxu1 %v616_v5  ;;  %936 = vmatpush.msrb.mxu2 %v601_v6  ;;  %v1070_v5 = vld [vmem:[%s3599_s3 + $0x178] sm:$0xff] }
  0x7c   : > { %955 = vmatpush.msrb.mxu3 %v618_v7  ;;  %897 = vmatpush.msrb.mxu0 %v583_v8  ;;  %v1086_v6 = vld [vmem:[%s3599_s3 + $0x1f8] sm:$0xff]  ;;  %v1037_v7 = vld [vmem:[%s3599_s3 + $0x70] sm:$0xff] }
  0x7d   : > { %916 = vmatpush.msrb.mxu1 %v600_v9  ;;  %937 = vmatpush.msrb.mxu2 %v585_v10  ;;  %v1053_v8 = vld [vmem:[%s3599_s3 + $0xf0] sm:$0xff] }
  0x7e   : > { %956 = vmatpush.msrb.mxu3 %v602_v11  ;;  %898 = vmatpush.msrb.mxu0 %v567_v12  ;;  %v1069_v9 = vld [vmem:[%s3599_s3 + $0x170] sm:$0xff]  ;;  %v1052_v11 = vld [vmem:[%s3599_s3 + $0xe8] sm:$0xff] }
  0x7f   : > { %917 = vmatpush.msrb.mxu1 %v584_v13  ;;  %938 = vmatpush.msrb.mxu2 %v569_v14  ;;  %v1085_v10 = vld [vmem:[%s3599_s3 + $0x1f0] sm:$0xff]  ;;  %v1068_v12 = vld [vmem:[%s3599_s3 + $0x168] sm:$0xff]  ;;  %v1035_v14 = vld [vmem:[%s3599_s3 + $0x60] sm:$0xff] }
  0x80   : > { %957 = vmatpush.msrb.mxu3 %v586_v15  ;;  %899 = vmatpush.msrb.mxu0 %v551_v16  ;;  %v1084_v13 = vld [vmem:[%s3599_s3 + $0x1e8] sm:$0xff]  ;;  %v1051_v15 = vld [vmem:[%s3599_s3 + $0xe0] sm:$0xff] }
  0x81   : > { %918 = vmatpush.msrb.mxu1 %v568_v17  ;;  %939 = vmatpush.msrb.mxu2 %v553_v18  ;;  %v1067_v16 = vld [vmem:[%s3599_s3 + $0x160] sm:$0xff]  ;;  %v1034_v18 = vld [vmem:[%s3599_s3 + $0x58] sm:$0xff] }
  0x82   : > { %958 = vmatpush.msrb.mxu3 %v570_v19  ;;  %900 = vmatpush.msrb.mxu0 %v535_v20  ;;  %v1083_v17 = vld [vmem:[%s3599_s3 + $0x1e0] sm:$0xff]  ;;  %v1050_v19 = vld [vmem:[%s3599_s3 + $0xd8] sm:$0xff] }
  0x83   : > { %919 = vmatpush.msrb.mxu1 %v552_v21  ;;  %940 = vmatpush.msrb.mxu2 %v537_v22  ;;  %v1066_v20 = vld [vmem:[%s3599_s3 + $0x158] sm:$0xff]  ;;  %v1033_v22 = vld [vmem:[%s3599_s3 + $0x50] sm:$0xff] }
  0x84   : > { %959 = vmatpush.msrb.mxu3 %v554_v23  ;;  %901 = vmatpush.msrb.mxu0 %v519_v24  ;;  %v1082_v21 = vld [vmem:[%s3599_s3 + $0x1d8] sm:$0xff]  ;;  %v1049_v23 = vld [vmem:[%s3599_s3 + $0xd0] sm:$0xff] }
  0x85   : > { %920 = vmatpush.msrb.mxu1 %v536_v25  ;;  %941 = vmatpush.msrb.mxu2 %v521_v26  ;;  %v1065_v24 = vld [vmem:[%s3599_s3 + $0x150] sm:$0xff]  ;;  %v1032_v26 = vld [vmem:[%s3599_s3 + $0x48] sm:$0xff] }
  0x86   : > { %960 = vmatpush.msrb.mxu3 %v538_v27  ;;  %902 = vmatpush.msrb.mxu0 %v503_v28  ;;  %v1081_v25 = vld [vmem:[%s3599_s3 + $0x1d0] sm:$0xff]  ;;  %v1048_v27 = vld [vmem:[%s3599_s3 + $0xc8] sm:$0xff] }
  0x87   : > { %921 = vmatpush.msrb.mxu1 %v520_v29  ;;  %942 = vmatpush.msrb.mxu2 %v505_v30  ;;  %v1064_v28 = vld [vmem:[%s3599_s3 + $0x148] sm:$0xff]  ;;  %v1031_v30 = vld [vmem:[%s3599_s3 + $0x40] sm:$0xff] }
  0x88   : > { %961 = vmatpush.msrb.mxu3 %v522_v31  ;;  %903 = vmatpush.msrb.mxu0 %v487_v32  ;;  %v1080_v29 = vld [vmem:[%s3599_s3 + $0x1c8] sm:$0xff]  ;;  %v1047_v31 = vld [vmem:[%s3599_s3 + $0xc0] sm:$0xff] }
  0x89   : > { %922 = vmatpush.msrb.mxu1 %v504_v33  ;;  %943 = vmatpush.msrb.mxu2 %v489_v34  ;;  %v1063_v32 = vld [vmem:[%s3599_s3 + $0x140] sm:$0xff]  ;;  %v1030_v34 = vld [vmem:[%s3599_s3 + $0x38] sm:$0xff] }
  0x8a   : > { %962 = vmatpush.msrb.mxu3 %v506_v35  ;;  %904 = vmatpush.msrb.mxu0 %v471_v36  ;;  %v1079_v33 = vld [vmem:[%s3599_s3 + $0x1c0] sm:$0xff]  ;;  %v1046_v35 = vld [vmem:[%s3599_s3 + $0xb8] sm:$0xff] }
  0x8b   : > { %923 = vmatpush.msrb.mxu1 %v488_v37  ;;  %944 = vmatpush.msrb.mxu2 %v473_v38  ;;  %v1062_v36 = vld [vmem:[%s3599_s3 + $0x138] sm:$0xff]  ;;  %v1029_v38 = vld [vmem:[%s3599_s3 + $0x30] sm:$0xff] }
  0x8c   : > { %963 = vmatpush.msrb.mxu3 %v490_v39  ;;  %905 = vmatpush.msrb.mxu0 %v455_v40  ;;  %v1078_v37 = vld [vmem:[%s3599_s3 + $0x1b8] sm:$0xff]  ;;  %v1045_v39 = vld [vmem:[%s3599_s3 + $0xb0] sm:$0xff] }
  0x8d   : > { %924 = vmatpush.msrb.mxu1 %v472_v41  ;;  %945 = vmatpush.msrb.mxu2 %v457_v42  ;;  %v1061_v40 = vld [vmem:[%s3599_s3 + $0x130] sm:$0xff]  ;;  %v1028_v42 = vld [vmem:[%s3599_s3 + $0x28] sm:$0xff] }
  0x8e   : > { %964 = vmatpush.msrb.mxu3 %v474_v43  ;;  %906 = vmatpush.msrb.mxu0 %v439_v44  ;;  %v1077_v41 = vld [vmem:[%s3599_s3 + $0x1b0] sm:$0xff]  ;;  %v1044_v43 = vld [vmem:[%s3599_s3 + $0xa8] sm:$0xff] }
  0x8f   : > { %925 = vmatpush.msrb.mxu1 %v456_v45  ;;  %946 = vmatpush.msrb.mxu2 %v441_v46  ;;  %v1060_v44 = vld [vmem:[%s3599_s3 + $0x128] sm:$0xff]  ;;  %v1027_v46 = vld [vmem:[%s3599_s3 + $0x20] sm:$0xff] }
  0x90   : > { %965 = vmatpush.msrb.mxu3 %v458_v47  ;;  %907 = vmatpush.msrb.mxu0 %v423_v48  ;;  %v1076_v45 = vld [vmem:[%s3599_s3 + $0x1a8] sm:$0xff]  ;;  %v1043_v47 = vld [vmem:[%s3599_s3 + $0xa0] sm:$0xff] }
  0x91   : > { %926 = vmatpush.msrb.mxu1 %v440_v49  ;;  %947 = vmatpush.msrb.mxu2 %v425_v50  ;;  %v1059_v48 = vld [vmem:[%s3599_s3 + $0x120] sm:$0xff]  ;;  %v1026_v50 = vld [vmem:[%s3599_s3 + $0x18] sm:$0xff] }
  0x92   : > { %966 = vmatpush.msrb.mxu3 %v442_v51  ;;  %908 = vmatpush.msrb.mxu0 %v407_v52  ;;  %v1075_v49 = vld [vmem:[%s3599_s3 + $0x1a0] sm:$0xff]  ;;  %v1042_v51 = vld [vmem:[%s3599_s3 + $0x98] sm:$0xff] }
  0x93   : > { %927 = vmatpush.msrb.mxu1 %v424_v53  ;;  %948 = vmatpush.msrb.mxu2 %v409_v54  ;;  %v1058_v52 = vld [vmem:[%s3599_s3 + $0x118] sm:$0xff]  ;;  %v1025_v54 = vld [vmem:[%s3599_s3 + $0x10] sm:$0xff] }
  0x94   : > { %967 = vmatpush.msrb.mxu3 %v426_v55  ;;  %909 = vmatpush.msrb.mxu0 %v391_v56  ;;  %v1074_v53 = vld [vmem:[%s3599_s3 + $0x198] sm:$0xff]  ;;  %v1041_v55 = vld [vmem:[%s3599_s3 + $0x90] sm:$0xff] }
  0x95   : > { %928 = vmatpush.msrb.mxu1 %v408_v57  ;;  %949 = vmatpush.msrb.mxu2 %v393_v58  ;;  %v1057_v56 = vld [vmem:[%s3599_s3 + $0x110] sm:$0xff]  ;;  %v1024_v58 = vld [vmem:[%s3599_s3 + $0x8] sm:$0xff] }
  0x96   : > { %968 = vmatpush.msrb.mxu3 %v410_v59  ;;  %910 = vmatpush.msrb.mxu0 %v375_v60  ;;  %v1073_v57 = vld [vmem:[%s3599_s3 + $0x190] sm:$0xff]  ;;  %v1040_v59 = vld [vmem:[%s3599_s3 + $0x88] sm:$0xff] }
  0x97   : > { %929 = vmatpush.msrb.mxu1 %v392_v61  ;;  %950 = vmatpush.msrb.mxu2 %v377_v63  ;;  %v1056_v60 = vld [vmem:[%s3599_s3 + $0x108] sm:$0xff]  ;;  %v1023_v63 = vld [vmem:[%s3599_s3] sm:$0xff] }
  0x98   : > { %969 = vmatpush.msrb.mxu3 %v394_v0  ;;  %911 = vmatmul.f32.vlgmr.msrb.gmra.mxu0 %v2383_v62  ;;  %v1072_v61 = vld [vmem:[%s3599_s3 + $0x188] sm:$0xff]  ;;  %v1039_v0 = vld [vmem:[%s3599_s3 + $0x80] sm:$0xff] }
  0x99   : > { %951 = vmatmul.f32.vlgmr.msrb.gmra.mxu2 %v2383_v62  ;;  %930 = vmatpush.msrb.mxu1 %v376_v1  ;;  %v1102_v1 = vld [vmem:[%s3599_s3 + $0x278] sm:$0xff] }
  0x9a   : > { %970 = vmatpush.msrb.mxu3 %v378_v2  ;;  %931 = vmatmul.f32.vlgmr.msrb.gmra.mxu1 %v2383_v62  ;;  %v1118_v2 = vld [vmem:[%s3599_s3 + $0x2f8] sm:$0xff] }
  0x9b   : > { %971 = vmatmul.f32.vlgmr.msrb.gmra.mxu3 %v2383_v62  ;;  %1283 = vmatpush.msra.mxu0 %v1038_v3  ;;  %v1036_v62 = vld [vmem:[%s3599_s3 + $0x68] sm:$0xff]  ;;  %v1055_v3 = vld [vmem:[%s3599_s3 + $0x100] sm:$0xff] }
  0x9c   : > { %1303 = vmatpush.msra.mxu1 %v1054_v4  ;;  %1323 = vmatpush.msra.mxu2 %v1070_v5  ;;  %v1071_v4 = vld [vmem:[%s3599_s3 + $0x180] sm:$0xff]  ;;  %v1101_v5 = vld [vmem:[%s3599_s3 + $0x270] sm:$0xff] }
  0x9d   : > { %1343 = vmatpush.msra.mxu3 %v1086_v6  ;;  %1284 = vmatpush.msra.mxu0 %v1037_v7  ;;  %v1117_v6 = vld [vmem:[%s3599_s3 + $0x2f0] sm:$0xff]  ;;  %v1134_v7 = vld [vmem:[%s3599_s3 + $0x378] sm:$0xff] }
  0x9e   : > { %1304 = vmatpush.msra.mxu1 %v1053_v8  ;;  %1324 = vmatpush.msra.mxu2 %v1069_v9  ;;  %v1150_v8 = vld [vmem:[%s3599_s3 + $0x3f8] sm:$0xff]  ;;  %v1100_v9 = vld [vmem:[%s3599_s3 + $0x268] sm:$0xff] }
  0x9f   : > { %1344 = vmatpush.msra.mxu3 %v1085_v10  ;;  %1285 = vmatpush.msra.mxu0 %v1036_v62  ;;  %v1116_v10 = vld [vmem:[%s3599_s3 + $0x2e8] sm:$0xff]  ;;  %v1133_v62 = vld [vmem:[%s3599_s3 + $0x370] sm:$0xff] }
  0xa0   : > { %1305 = vmatpush.msra.mxu1 %v1052_v11  ;;  %1325 = vmatpush.msra.mxu2 %v1068_v12  ;;  %v1149_v11 = vld [vmem:[%s3599_s3 + $0x3f0] sm:$0xff]  ;;  %v1099_v12 = vld [vmem:[%s3599_s3 + $0x260] sm:$0xff] }
  0xa1   : > { %1345 = vmatpush.msra.mxu3 %v1084_v13  ;;  %1286 = vmatpush.msra.mxu0 %v1035_v14  ;;  %v1115_v13 = vld [vmem:[%s3599_s3 + $0x2e0] sm:$0xff]  ;;  %v1132_v14 = vld [vmem:[%s3599_s3 + $0x368] sm:$0xff] }
  0xa2   : > { %1306 = vmatpush.msra.mxu1 %v1051_v15  ;;  %1326 = vmatpush.msra.mxu2 %v1067_v16  ;;  %v1148_v15 = vld [vmem:[%s3599_s3 + $0x3e8] sm:$0xff]  ;;  %v1098_v16 = vld [vmem:[%s3599_s3 + $0x258] sm:$0xff] }
  0xa3   : > { %1346 = vmatpush.msra.mxu3 %v1083_v17  ;;  %1287 = vmatpush.msra.mxu0 %v1034_v18  ;;  %v1114_v17 = vld [vmem:[%s3599_s3 + $0x2d8] sm:$0xff]  ;;  %v1131_v18 = vld [vmem:[%s3599_s3 + $0x360] sm:$0xff] }
  0xa4   : > { %1307 = vmatpush.msra.mxu1 %v1050_v19  ;;  %1327 = vmatpush.msra.mxu2 %v1066_v20  ;;  %v1147_v19 = vld [vmem:[%s3599_s3 + $0x3e0] sm:$0xff]  ;;  %v1097_v20 = vld [vmem:[%s3599_s3 + $0x250] sm:$0xff] }
  0xa5   : > { %1347 = vmatpush.msra.mxu3 %v1082_v21  ;;  %1288 = vmatpush.msra.mxu0 %v1033_v22  ;;  %v1113_v21 = vld [vmem:[%s3599_s3 + $0x2d0] sm:$0xff]  ;;  %v1130_v22 = vld [vmem:[%s3599_s3 + $0x358] sm:$0xff] }
  0xa6   : > { %1308 = vmatpush.msra.mxu1 %v1049_v23  ;;  %1328 = vmatpush.msra.mxu2 %v1065_v24  ;;  %v1146_v23 = vld [vmem:[%s3599_s3 + $0x3d8] sm:$0xff]  ;;  %v1096_v24 = vld [vmem:[%s3599_s3 + $0x248] sm:$0xff] }
  0xa7   : > { %1348 = vmatpush.msra.mxu3 %v1081_v25  ;;  %1289 = vmatpush.msra.mxu0 %v1032_v26  ;;  %v1112_v25 = vld [vmem:[%s3599_s3 + $0x2c8] sm:$0xff]  ;;  %v1129_v26 = vld [vmem:[%s3599_s3 + $0x350] sm:$0xff] }
  0xa8   : > { %1309 = vmatpush.msra.mxu1 %v1048_v27  ;;  %1329 = vmatpush.msra.mxu2 %v1064_v28  ;;  %v1145_v27 = vld [vmem:[%s3599_s3 + $0x3d0] sm:$0xff]  ;;  %v1095_v28 = vld [vmem:[%s3599_s3 + $0x240] sm:$0xff] }
  0xa9   : > { %1349 = vmatpush.msra.mxu3 %v1080_v29  ;;  %1290 = vmatpush.msra.mxu0 %v1031_v30  ;;  %v1111_v29 = vld [vmem:[%s3599_s3 + $0x2c0] sm:$0xff]  ;;  %v1128_v30 = vld [vmem:[%s3599_s3 + $0x348] sm:$0xff] }
  0xaa   : > { %1310 = vmatpush.msra.mxu1 %v1047_v31  ;;  %1330 = vmatpush.msra.mxu2 %v1063_v32  ;;  %v1144_v31 = vld [vmem:[%s3599_s3 + $0x3c8] sm:$0xff]  ;;  %v1094_v32 = vld [vmem:[%s3599_s3 + $0x238] sm:$0xff] }
  0xab   : > { %1350 = vmatpush.msra.mxu3 %v1079_v33  ;;  %1291 = vmatpush.msra.mxu0 %v1030_v34  ;;  %v1110_v33 = vld [vmem:[%s3599_s3 + $0x2b8] sm:$0xff]  ;;  %v1127_v34 = vld [vmem:[%s3599_s3 + $0x340] sm:$0xff] }
  0xac   : > { %1311 = vmatpush.msra.mxu1 %v1046_v35  ;;  %1331 = vmatpush.msra.mxu2 %v1062_v36  ;;  %v1143_v35 = vld [vmem:[%s3599_s3 + $0x3c0] sm:$0xff]  ;;  %v1093_v36 = vld [vmem:[%s3599_s3 + $0x230] sm:$0xff] }
  0xad   : > { %1351 = vmatpush.msra.mxu3 %v1078_v37  ;;  %1292 = vmatpush.msra.mxu0 %v1029_v38  ;;  %v1109_v37 = vld [vmem:[%s3599_s3 + $0x2b0] sm:$0xff]  ;;  %v3094_v38 = vld [vmem:[%s3598_s2] sm:$0xff] }
  0xae   : > { %1312 = vmatpush.msra.mxu1 %v1045_v39  ;;  %1332 = vmatpush.msra.mxu2 %v1061_v40  ;;  %v1126_v39 = vld [vmem:[%s3599_s3 + $0x338] sm:$0xff] }
  0xaf   : > { %1352 = vmatpush.msra.mxu3 %v1077_v41  ;;  %1293 = vmatpush.msra.mxu0 %v1028_v42  ;;  %v1142_v40 = vld [vmem:[%s3599_s3 + $0x3b8] sm:$0xff]  ;;  %v1092_v41 = vld [vmem:[%s3599_s3 + $0x228] sm:$0xff] }
  0xb0   : > { %1313 = vmatpush.msra.mxu1 %v1044_v43  ;;  %1333 = vmatpush.msra.mxu2 %v1060_v44  ;;  %v1108_v42 = vld [vmem:[%s3599_s3 + $0x2a8] sm:$0xff]  ;;  %v1125_v43 = vld [vmem:[%s3599_s3 + $0x330] sm:$0xff]  ;;  %v623_v44 = vperm.slane %v3094_v38, 0 }
  0xb1   : > { %1353 = vmatpush.msra.mxu3 %v1076_v45  ;;  %1294 = vmatpush.msra.mxu0 %v1027_v46  ;;  %v1141_v45 = vld [vmem:[%s3599_s3 + $0x3b0] sm:$0xff]  ;;  %v1091_v46 = vld [vmem:[%s3599_s3 + $0x220] sm:$0xff] }
  0xb2   : > { %1314 = vmatpush.msra.mxu1 %v1043_v47  ;;  %1334 = vmatpush.msra.mxu2 %v1059_v48  ;;  %v1107_v47 = vld [vmem:[%s3599_s3 + $0x2a0] sm:$0xff]  ;;  %v1124_v48 = vld [vmem:[%s3599_s3 + $0x328] sm:$0xff] }
  0xb3   : > { %1354 = vmatpush.msra.mxu3 %v1075_v49  ;;  %1295 = vmatpush.msra.mxu0 %v1026_v50  ;;  %v1140_v49 = vld [vmem:[%s3599_s3 + $0x3a8] sm:$0xff]  ;;  %v1090_v50 = vld [vmem:[%s3599_s3 + $0x218] sm:$0xff] }
  0xb4   : > { %1315 = vmatpush.msra.mxu1 %v1042_v51  ;;  %1335 = vmatpush.msra.mxu2 %v1058_v52  ;;  %v1106_v52 = vld [vmem:[%s3599_s3 + $0x298] sm:$0xff] }
  0xb5   : > { %1355 = vmatpush.msra.mxu3 %v1074_v53  ;;  %1296 = vmatpush.msra.mxu0 %v1025_v54  ;;  %v624_v53 = vperm.slane %v3094_v38, 1 }
  0xb6   : > { %1316 = vmatpush.msra.mxu1 %v1041_v55  ;;  %1336 = vmatpush.msra.mxu2 %v1057_v56  ;;  %v1123_v55 = vld [vmem:[%s3599_s3 + $0x320] sm:$0xff] }
  0xb7   : > { %1356 = vmatpush.msra.mxu3 %v1073_v57  ;;  %1297 = vmatpush.msra.mxu0 %v1024_v58  ;;  %v1139_v56 = vld [vmem:[%s3599_s3 + $0x3a0] sm:$0xff]  ;;  %v1089_v57 = vld [vmem:[%s3599_s3 + $0x210] sm:$0xff] }
  0xb8   : > { %1317 = vmatpush.msra.mxu1 %v1040_v59  ;;  %1337 = vmatpush.msra.mxu2 %v1056_v60  ;;  %v1105_v58 = vld [vmem:[%s3599_s3 + $0x290] sm:$0xff] }
  0xb9   : > { %1357 = vmatpush.msra.mxu3 %v1072_v61  ;;  %1298 = vmatpush.msra.mxu0 %v1023_v63  ;;  %v1122_v61 = vld [vmem:[%s3599_s3 + $0x318] sm:$0xff]  ;;  %v625_v63 = vperm.slane %v3094_v38, 2 }
  0xba   : > { %1318 = vmatpush.msra.mxu1 %v1039_v0  ;;  %1338 = vmatpush.msra.mxu2 %v1055_v3  ;;  %v1121_v3 = vld [vmem:[%s3599_s3 + $0x310] sm:$0xff] }
  0xbb   : > { %1363 = vmatpush.msrb.mxu0 %v1102_v1  ;;  %1358 = vmatpush.msra.mxu3 %v1071_v4  ;;  %v1088_v1 = vld [vmem:[%s3599_s3 + $0x208] sm:$0xff]  ;;  %v1138_v4 = vld [vmem:[%s3599_s3 + $0x398] sm:$0xff] }
  0xbc   : > { %1383 = vmatpush.msrb.mxu1 %v1118_v2  ;;  %1403 = vmatpush.msrb.mxu2 %v1134_v7  ;;  %v1104_v2 = vld [vmem:[%s3599_s3 + $0x288] sm:$0xff] }
  0xbd   : > { %1364 = vmatpush.msrb.mxu0 %v1101_v5  ;;  %1423 = vmatpush.msrb.mxu3 %v1150_v8  ;;  %v1103_v8 = vld [vmem:[%s3599_s3 + $0x280] sm:$0xff] }
  0xbe   : > { %1384 = vmatpush.msrb.mxu1 %v1117_v6  ;;  %1404 = vmatpush.msrb.mxu2 %v1133_v62  ;;  %v1087_v6 = vld [vmem:[%s3599_s3 + $0x200] sm:$0xff] }
  0xbf   : > { %1365 = vmatpush.msrb.mxu0 %v1100_v9  ;;  %1424 = vmatpush.msrb.mxu3 %v1149_v11  ;;  %v626_v9 = vperm.slane %v3094_v38, 3  ;;  %v1182_v11 = vld [vmem:[%s3599_s3 + $0x4f8] sm:$0xff] }
  0xc0   : > { %1385 = vmatpush.msrb.mxu1 %v1116_v10  ;;  %1405 = vmatpush.msrb.mxu2 %v1132_v14  ;;  %v1166_v10 = vld [vmem:[%s3599_s3 + $0x478] sm:$0xff] }
  0xc1   : > { %1366 = vmatpush.msrb.mxu0 %v1099_v12  ;;  %1425 = vmatpush.msrb.mxu3 %v1148_v15  ;;  %v1120_v12 = vld [vmem:[%s3599_s3 + $0x308] sm:$0xff]  ;;  %v1137_v15 = vld [vmem:[%s3599_s3 + $0x390] sm:$0xff] }
  0xc2   : > { %1386 = vmatpush.msrb.mxu1 %v1115_v13  ;;  %1406 = vmatpush.msrb.mxu2 %v1131_v18  ;;  %v1165_v13 = vld [vmem:[%s3599_s3 + $0x470] sm:$0xff]  ;;  %v1119_v18 = vld [vmem:[%s3599_s3 + $0x300] sm:$0xff] }
  0xc3   : > { %1367 = vmatpush.msrb.mxu0 %v1098_v16  ;;  %1426 = vmatpush.msrb.mxu3 %v1147_v19 }
  0xc4   : > { %1387 = vmatpush.msrb.mxu1 %v1114_v17  ;;  %1407 = vmatpush.msrb.mxu2 %v1130_v22  ;;  %v1181_v17 = vld [vmem:[%s3599_s3 + $0x4f0] sm:$0xff]  ;;  %v1180_v22 = vld [vmem:[%s3599_s3 + $0x4e8] sm:$0xff] }
  0xc5   : > { %1368 = vmatpush.msrb.mxu0 %v1097_v20  ;;  %1427 = vmatpush.msrb.mxu3 %v1146_v23  ;;  %v1164_v20 = vld [vmem:[%s3599_s3 + $0x468] sm:$0xff]  ;;  %v1163_v23 = vld [vmem:[%s3599_s3 + $0x460] sm:$0xff] }
  0xc6   : > { %1388 = vmatpush.msrb.mxu1 %v1113_v21  ;;  %1408 = vmatpush.msrb.mxu2 %v1129_v26  ;;  %v1136_v21 = vld [vmem:[%s3599_s3 + $0x388] sm:$0xff] }
  0xc7   : > { %1369 = vmatpush.msrb.mxu0 %v1096_v24  ;;  %1428 = vmatpush.msrb.mxu3 %v1145_v27  ;;  %v1198_v24 = vld [vmem:[%s3599_s3 + $0x578] sm:$0xff]  ;;  %v1135_v27 = vld [vmem:[%s3599_s3 + $0x380] sm:$0xff] }
  0xc8   : > { %1389 = vmatpush.msrb.mxu1 %v1112_v25  ;;  %1409 = vmatpush.msrb.mxu2 %v1128_v30  ;;  %v629_v25 = vperm.slane %v3094_v38, 6  ;;  %v1197_v30 = vld [vmem:[%s3599_s3 + $0x570] sm:$0xff] }
  0xc9   : > { %1370 = vmatpush.msrb.mxu0 %v1095_v28  ;;  %1429 = vmatpush.msrb.mxu3 %v1144_v31  ;;  %v1179_v28 = vld [vmem:[%s3599_s3 + $0x4e0] sm:$0xff]  ;;  %v1214_v31 = vld [vmem:[%s3599_s3 + $0x5f8] sm:$0xff] }
  0xca   : > { %1390 = vmatpush.msrb.mxu1 %v1111_v29  ;;  %1410 = vmatpush.msrb.mxu2 %v1127_v34  ;;  %v1162_v29 = vld [vmem:[%s3599_s3 + $0x458] sm:$0xff]  ;;  %v630_v34 = vperm.slane %v3094_v38, 7 }
  0xcb   : > { %1371 = vmatpush.msrb.mxu0 %v1094_v32  ;;  %1430 = vmatpush.msrb.mxu3 %v1143_v35 }
  0xcc   : > { %1391 = vmatpush.msrb.mxu1 %v1110_v33  ;;  %1411 = vmatpush.msrb.mxu2 %v1126_v39  ;;  %v627_v33 = vperm.slane %v3094_v38, 4  ;;  %v1196_v39 = vld [vmem:[%s3599_s3 + $0x568] sm:$0xff] }
  0xcd   : > { %1372 = vmatpush.msrb.mxu0 %v1093_v36  ;;  %1431 = vmatpush.msrb.mxu3 %v1142_v40  ;;  %v1161_v36 = vld [vmem:[%s3599_s3 + $0x450] sm:$0xff] }
  0xce   : > { %1392 = vmatpush.msrb.mxu1 %v1109_v37  ;;  %1412 = vmatpush.msrb.mxu2 %v1125_v43  ;;  %v1178_v37 = vld [vmem:[%s3599_s3 + $0x4d8] sm:$0xff]  ;;  %v1213_v40 = vld [vmem:[%s3599_s3 + $0x5f0] sm:$0xff] }
  0xcf   : > { %1373 = vmatpush.msrb.mxu0 %v1092_v41  ;;  %v672_v51 = vpop.f32.mrf.mxu0  ;;  %1432 = vmatpush.msrb.mxu3 %v1141_v45  ;;  %v628_v41 = vperm.slane %v3094_v38, 5  ;;  %v1177_v45 = vld [vmem:[%s3599_s3 + $0x4d0] sm:$0xff]  ;;  %v1195_v38 = vld [vmem:[%s3599_s3 + $0x560] sm:$0xff] }
  0xd0   : > { %1393 = vmatpush.msrb.mxu1 %v1108_v42  ;;  %v673_v54 = vadd.f32 %v672_v51, %v623_v44  ;;  %1413 = vmatpush.msrb.mxu2 %v1124_v48  ;;  %v1160_v44 = vld [vmem:[%s3599_s3 + $0x448] sm:$0xff]  ;;  %v1159_v51 = vld [vmem:[%s3599_s3 + $0x440] sm:$0xff] }
  0xd1   : > { %1374 = vmatpush.msrb.mxu0 %v1091_v46  ;;  %1433 = vmatpush.msrb.mxu3 %v1140_v49  ;;  %v1212_v49 = vld [vmem:[%s3599_s3 + $0x5e8] sm:$0xff] }
  0xd2   : > { %1394 = vmatpush.msrb.mxu1 %v1107_v47  ;;  %v975_v59 = vmax.f32 %v673_v54, 0.0  ;;  %v692_v60 = vpop.f32.mrf.mxu1  ;;  %1414 = vmatpush.msrb.mxu2 %v1123_v55  ;;  %v1176_v54 = vld [vmem:[%s3599_s3 + $0x4c8] sm:$0xff]  ;;  %v1194_v55 = vld [vmem:[%s3599_s3 + $0x558] sm:$0xff] }
  0xd3   : > { %1375 = vmatpush.msrb.mxu0 %v1090_v50  ;;  %v693_v0 = vadd.f32 %v692_v60, %v624_v53  ;;  %1434 = vmatpush.msrb.mxu3 %v1139_v56  ;;  %v1175_v60 = vld [vmem:[%s3599_s3 + $0x4c0] sm:$0xff] }
  0xd4   : > { %1395 = vmatpush.msrb.mxu1 %v1106_v52  ;;  %1415 = vmatpush.msrb.mxu2 %v1122_v61  ;;  %v1193_v61 = vld [vmem:[%s3599_s3 + $0x550] sm:$0xff] }
  0xd5   : > { %1376 = vmatpush.msrb.mxu0 %v1089_v57  ;;  %v976_v5 = vmax.f32 %v693_v0, 0.0  ;;  %1435 = vmatpush.msrb.mxu3 %v1138_v4  ;;  %v1211_v57 = vld [vmem:[%s3599_s3 + $0x5e0] sm:$0xff]  ;;  %v1157_v0 = vld [vmem:[%s3599_s3 + $0x430] sm:$0xff]  ;;  %v1156_v4 = vld [vmem:[%s3599_s3 + $0x428] sm:$0xff] }
  0xd6   : > { %1396 = vmatpush.msrb.mxu1 %v1105_v58  ;;  %1299 = vmatmul.f32.vlgmr.msra.gmra.mxu0 %v975_v59  ;;  %v712_v7 = vpop.f32.mrf.mxu2  ;;  %v1158_v58 = vld [vmem:[%s3599_s3 + $0x438] sm:$0xff] }
  0xd7   : > { %1377 = vmatpush.msrb.mxu0 %v1088_v1  ;;  %v713_v62 = vadd.f32 %v712_v7, %v625_v63  ;;  %1416 = vmatpush.msrb.mxu2 %v1121_v3  ;;  %v1210_v63 = vld [vmem:[%s3599_s3 + $0x5d8] sm:$0xff]  ;;  %v1209_v3 = vld [vmem:[%s3599_s3 + $0x5d0] sm:$0xff]  ;;  %v1208_v7 = vld [vmem:[%s3599_s3 + $0x5c8] sm:$0xff] }
  0xd8   : > { %1397 = vmatpush.msrb.mxu1 %v1104_v2  ;;  %1436 = vmatpush.msrb.mxu3 %v1137_v15  ;;  %v1174_v1 = vld [vmem:[%s3599_s3 + $0x4b8] sm:$0xff]  ;;  %v1192_v2 = vld [vmem:[%s3599_s3 + $0x548] sm:$0xff]  ;;  %v1189_v15 = vld [vmem:[%s3599_s3 + $0x530] sm:$0xff] }
  0xd9   : > { %1378 = vmatpush.msrb.mxu0 %v1087_v6  ;;  %v732_v14 = vpop.f32.mrf.mxu3  ;;  %1319 = vmatmul.f32.vlgmr.msra.gmra.mxu1 %v976_v5  ;;  %v977_v19 = vmax.f32 %v713_v62, 0.0  ;;  %v1173_v5 = vld [vmem:[%s3599_s3 + $0x4b0] sm:$0xff]  ;;  %v1191_v6 = vld [vmem:[%s3599_s3 + $0x540] sm:$0xff]  ;;  %v1190_v62 = vld [vmem:[%s3599_s3 + $0x538] sm:$0xff] }
  0xda   : > { %1398 = vmatpush.msrb.mxu1 %v1103_v8  ;;  %v733_v16 = vadd.f32 %v732_v14, %v626_v9  ;;  %1417 = vmatpush.msrb.mxu2 %v1120_v12  ;;  %v3299_v8 = vld [vmem:[%s3598_s2 + $0x8] sm:$0xff]  ;;  %v1155_v9 = vld [vmem:[%s3599_s3 + $0x420] sm:$0xff]  ;;  %v1154_v12 = vld [vmem:[%s3599_s3 + $0x418] sm:$0xff] }
  0xdb   : > { %1443 = vmatpush.msra.mxu0 %v1166_v10  ;;  %1437 = vmatpush.msrb.mxu3 %v1136_v21  ;;  %v1172_v10 = vld [vmem:[%s3599_s3 + $0x4a8] sm:$0xff]  ;;  %v631_v14 = vperm.slane %v3299_v8, 0  ;;  %v1205_v21 = vld [vmem:[%s3599_s3 + $0x5b0] sm:$0xff] }
  0xdc   : > { %1463 = vmatpush.msra.mxu1 %v1182_v11  ;;  %1418 = vmatpush.msrb.mxu2 %v1119_v18  ;;  %v978_v26 = vmax.f32 %v733_v16, 0.0  ;;  %v1207_v11 = vld [vmem:[%s3599_s3 + $0x5c0] sm:$0xff]  ;;  %v1206_v16 = vld [vmem:[%s3599_s3 + $0x5b8] sm:$0xff] }
  0xdd   : > { %1444 = vmatpush.msra.mxu0 %v1165_v13  ;;  %1339 = vmatmul.f32.vlgmr.msra.gmra.mxu2 %v977_v19  ;;  %v1171_v13 = vld [vmem:[%s3599_s3 + $0x4a0] sm:$0xff]  ;;  %v1170_v18 = vld [vmem:[%s3599_s3 + $0x498] sm:$0xff] }
  0xde   : > { %1464 = vmatpush.msra.mxu1 %v1181_v17  ;;  %1483 = vmatpush.msra.mxu2 %v1198_v24  ;;  %v1153_v17 = vld [vmem:[%s3599_s3 + $0x410] sm:$0xff]  ;;  %v1152_v24 = vld [vmem:[%s3599_s3 + $0x408] sm:$0xff] }
  0xdf   : > { %1445 = vmatpush.msra.mxu0 %v1164_v20  ;;  %v792_v32 = vpop.f32.mrf.mxu2  ;;  %1438 = vmatpush.msrb.mxu3 %v1135_v27  ;;  %v1188_v20 = vld [vmem:[%s3599_s3 + $0x528] sm:$0xff] }
  0xe0   : > { %1465 = vmatpush.msra.mxu1 %v1180_v22  ;;  %v793_v35 = vadd.f32 %v792_v32, %v629_v25  ;;  %1359 = vmatmul.f32.vlgmr.msra.gmra.mxu3 %v978_v26  ;;  %v632_v22 = vperm.slane %v3299_v8, 1  ;;  %v1169_v25 = vld [vmem:[%s3599_s3 + $0x490] sm:$0xff]  ;;  %v1187_v26 = vld [vmem:[%s3599_s3 + $0x520] sm:$0xff]  ;;  %v1204_v27 = vld [vmem:[%s3599_s3 + $0x5a8] sm:$0xff] }
  0xe1   : > { %1446 = vmatpush.msra.mxu0 %v1163_v23  ;;  %1484 = vmatpush.msra.mxu2 %v1197_v30  ;;  %v1168_v30 = vld [vmem:[%s3599_s3 + $0x488] sm:$0xff] }
  0xe2   : > { %1466 = vmatpush.msra.mxu1 %v1179_v28  ;;  %1503 = vmatpush.msra.mxu3 %v1214_v31  ;;  %v752_v42 = vpop.f32.mrf.mxu0  ;;  %v812_v43 = vpop.f32.mrf.mxu3  ;;  %v981_v46 = vmax.f32 %v793_v35, 0.0  ;;  %v633_v31 = vperm.slane %v3299_v8, 2  ;;  %v1203_v35 = vld [vmem:[%s3599_s3 + $0x5a0] sm:$0xff] }
  0xe3   : > { %1447 = vmatpush.msra.mxu0 %v1162_v29  ;;  %v753_v47 = vadd.f32 %v752_v42, %v627_v33  ;;  %v813_v48 = vadd.f32 %v812_v43, %v630_v34  ;;  %1485 = vmatpush.msra.mxu2 %v1196_v39  ;;  %v1151_v29 = vld [vmem:[%s3599_s3 + $0x400] sm:$0xff]  ;;  %v1186_v34 = vld [vmem:[%s3599_s3 + $0x518] sm:$0xff]  ;;  %v634_v42 = vperm.slane %v3299_v8, 3 }
  0xe4   : > { %1467 = vmatpush.msra.mxu1 %v1178_v37  ;;  %1504 = vmatpush.msra.mxu3 %v1213_v40  ;;  %v1230_v39 = vld [vmem:[%s3599_s3 + $0x678] sm:$0xff] }
  0xe5   : > { %1448 = vmatpush.msra.mxu0 %v1161_v36  ;;  %v772_v50 = vpop.f32.mrf.mxu1  ;;  %v979_v52 = vmax.f32 %v753_v47, 0.0  ;;  %v982_v56 = vmax.f32 %v813_v48, 0.0  ;;  %1486 = vmatpush.msra.mxu2 %v1195_v38  ;;  %v1167_v36 = vld [vmem:[%s3599_s3 + $0x480] sm:$0xff]  ;;  %v1184_v48 = vld [vmem:[%s3599_s3 + $0x508] sm:$0xff]  ;;  %v1201_v38 = vld [vmem:[%s3599_s3 + $0x590] sm:$0xff] }
  0xe6   : > { %1468 = vmatpush.msra.mxu1 %v1177_v45  ;;  %v773_v53 = vadd.f32 %v772_v50, %v628_v41  ;;  %1505 = vmatpush.msra.mxu3 %v1212_v49  ;;  %v1185_v41 = vld [vmem:[%s3599_s3 + $0x510] sm:$0xff]  ;;  %v1228_v50 = vld [vmem:[%s3599_s3 + $0x668] sm:$0xff] }
  0xe7   : > { %1449 = vmatpush.msra.mxu0 %v1160_v44  ;;  %1419 = vmatmul.f32.vlgmr.msrb.gmra.mxu2 %v981_v46  ;;  %v1202_v44 = vld [vmem:[%s3599_s3 + $0x598] sm:$0xff]  ;;  %v1229_v45 = vld [vmem:[%s3599_s3 + $0x670] sm:$0xff] }
  0xe8   : > { %v980_v59 = vmax.f32 %v773_v53, 0.0  ;;  %1469 = vmatpush.msra.mxu1 %v1176_v54  ;;  %1487 = vmatpush.msra.mxu2 %v1194_v55  ;;  %v1246_v46 = vld [vmem:[%s3599_s3 + $0x6f8] sm:$0xff]  ;;  %v1183_v53 = vld [vmem:[%s3599_s3 + $0x500] sm:$0xff]  ;;  %v1200_v54 = vld [vmem:[%s3599_s3 + $0x588] sm:$0xff] }
  0xe9   : > { %1450 = vmatpush.msra.mxu0 %v1159_v51  ;;  %1506 = vmatpush.msra.mxu3 %v1211_v57  ;;  %v1245_v51 = vld [vmem:[%s3599_s3 + $0x6f0] sm:$0xff]  ;;  %v1227_v55 = vld [vmem:[%s3599_s3 + $0x660] sm:$0xff]  ;;  %v1262_v57 = vld [vmem:[%s3599_s3 + $0x778] sm:$0xff] }
  0xea   : > { %1379 = vmatmul.f32.vlgmr.msrb.gmra.mxu0 %v979_v52  ;;  %1439 = vmatmul.f32.vlgmr.msrb.gmra.mxu3 %v982_v56  ;;  %v1244_v56 = vld [vmem:[%s3599_s3 + $0x6e8] sm:$0xff] }
  0xeb   : > { %1451 = vmatpush.msra.mxu0 %v1158_v58  ;;  %1470 = vmatpush.msra.mxu1 %v1175_v60  ;;  %v1226_v60 = vld [vmem:[%s3599_s3 + $0x658] sm:$0xff] }
  0xec   : > { %1488 = vmatpush.msra.mxu2 %v1193_v61  ;;  %1507 = vmatpush.msra.mxu3 %v1210_v63  ;;  %v1243_v61 = vld [vmem:[%s3599_s3 + $0x6e0] sm:$0xff]  ;;  %v1261_v63 = vld [vmem:[%s3599_s3 + $0x770] sm:$0xff] }
  0xed   : > { %1399 = vmatmul.f32.vlgmr.msrb.gmra.mxu1 %v980_v59  ;;  %1452 = vmatpush.msra.mxu0 %v1157_v0  ;;  %v1199_v59 = vld [vmem:[%s3599_s3 + $0x580] sm:$0xff]  ;;  %v1278_v0 = vld [vmem:[%s3599_s3 + $0x7f8] sm:$0xff] }
  0xee   : > { %1471 = vmatpush.msra.mxu1 %v1174_v1  ;;  %1489 = vmatpush.msra.mxu2 %v1192_v2  ;;  %v1225_v1 = vld [vmem:[%s3599_s3 + $0x650] sm:$0xff]  ;;  %v1242_v2 = vld [vmem:[%s3599_s3 + $0x6d8] sm:$0xff] }
  0xef   : > { %1508 = vmatpush.msra.mxu3 %v1209_v3  ;;  %1453 = vmatpush.msra.mxu0 %v1156_v4  ;;  %v1260_v3 = vld [vmem:[%s3599_s3 + $0x768] sm:$0xff]  ;;  %v1277_v4 = vld [vmem:[%s3599_s3 + $0x7f0] sm:$0xff] }
  0xf0   : > { %1472 = vmatpush.msra.mxu1 %v1173_v5  ;;  %1490 = vmatpush.msra.mxu2 %v1191_v6  ;;  %v1224_v5 = vld [vmem:[%s3599_s3 + $0x648] sm:$0xff]  ;;  %v1241_v6 = vld [vmem:[%s3599_s3 + $0x6d0] sm:$0xff] }
  0xf1   : > { %1509 = vmatpush.msra.mxu3 %v1208_v7  ;;  %1454 = vmatpush.msra.mxu0 %v1155_v9  ;;  %v1259_v7 = vld [vmem:[%s3599_s3 + $0x760] sm:$0xff]  ;;  %v1276_v9 = vld [vmem:[%s3599_s3 + $0x7e8] sm:$0xff] }
  0xf2   : > { %1473 = vmatpush.msra.mxu1 %v1172_v10  ;;  %1491 = vmatpush.msra.mxu2 %v1190_v62  ;;  %v1223_v10 = vld [vmem:[%s3599_s3 + $0x640] sm:$0xff]  ;;  %v1240_v62 = vld [vmem:[%s3599_s3 + $0x6c8] sm:$0xff] }
  0xf3   : > { %1510 = vmatpush.msra.mxu3 %v1207_v11  ;;  %1455 = vmatpush.msra.mxu0 %v1154_v12  ;;  %v832_v19 = vpop.f32.mrf.mxu0  ;;  %v1258_v11 = vld [vmem:[%s3599_s3 + $0x758] sm:$0xff]  ;;  %v1275_v12 = vld [vmem:[%s3599_s3 + $0x7e0] sm:$0xff] }
  0xf4   : > { %1474 = vmatpush.msra.mxu1 %v1171_v13  ;;  %1492 = vmatpush.msra.mxu2 %v1189_v15  ;;  %v833_v23 = vadd.f32 %v832_v19, %v631_v14  ;;  %v1222_v13 = vld [vmem:[%s3599_s3 + $0x638] sm:$0xff]  ;;  %v1239_v14 = vld [vmem:[%s3599_s3 + $0x6c0] sm:$0xff]  ;;  %v1257_v15 = vld [vmem:[%s3599_s3 + $0x750] sm:$0xff] }
  0xf5   : > { %1511 = vmatpush.msra.mxu3 %v1206_v16  ;;  %1456 = vmatpush.msra.mxu0 %v1153_v17  ;;  %v1274_v16 = vld [vmem:[%s3599_s3 + $0x7d8] sm:$0xff]  ;;  %v1221_v17 = vld [vmem:[%s3599_s3 + $0x630] sm:$0xff]  ;;  %v1256_v19 = vld [vmem:[%s3599_s3 + $0x748] sm:$0xff] }
  0xf6   : > { %1475 = vmatpush.msra.mxu1 %v1170_v18  ;;  %1493 = vmatpush.msra.mxu2 %v1188_v20  ;;  %v852_v28 = vpop.f32.mrf.mxu1  ;;  %v983_v32 = vmax.f32 %v833_v23, 0.0  ;;  %v1238_v18 = vld [vmem:[%s3599_s3 + $0x6b8] sm:$0xff]  ;;  %v1273_v20 = vld [vmem:[%s3599_s3 + $0x7d0] sm:$0xff]  ;;  %v1255_v23 = vld [vmem:[%s3599_s3 + $0x740] sm:$0xff] }
  0xf7   : > { %1512 = vmatpush.msra.mxu3 %v1205_v21  ;;  %v853_v33 = vadd.f32 %v852_v28, %v632_v22  ;;  %1457 = vmatpush.msra.mxu0 %v1152_v24  ;;  %v1220_v21 = vld [vmem:[%s3599_s3 + $0x628] sm:$0xff]  ;;  %v1237_v22 = vld [vmem:[%s3599_s3 + $0x6b0] sm:$0xff]  ;;  %v1271_v28 = vld [vmem:[%s3599_s3 + $0x7c0] sm:$0xff] }
  0xf8   : > { %1476 = vmatpush.msra.mxu1 %v1169_v25  ;;  %1494 = vmatpush.msra.mxu2 %v1187_v26  ;;  %v1272_v24 = vld [vmem:[%s3599_s3 + $0x7c8] sm:$0xff]  ;;  %v1219_v25 = vld [vmem:[%s3599_s3 + $0x620] sm:$0xff] }
  0xf9   : > { %1513 = vmatpush.msra.mxu3 %v1204_v27  ;;  %v984_v37 = vmax.f32 %v853_v33, 0.0  ;;  %1458 = vmatpush.msra.mxu0 %v1151_v29  ;;  %v1236_v26 = vld [vmem:[%s3599_s3 + $0x6a8] sm:$0xff]  ;;  %v1254_v27 = vld [vmem:[%s3599_s3 + $0x738] sm:$0xff] }
  0xfa   : > { %1477 = vmatpush.msra.mxu1 %v1168_v30  ;;  %v872_v40 = vpop.f32.mrf.mxu2  ;;  %1495 = vmatpush.msra.mxu2 %v1186_v34  ;;  %v1218_v29 = vld [vmem:[%s3599_s3 + $0x618] sm:$0xff]  ;;  %v1235_v30 = vld [vmem:[%s3599_s3 + $0x6a0] sm:$0xff]  ;;  %v1217_v34 = vld [vmem:[%s3599_s3 + $0x610] sm:$0xff] }
  0xfb   : > { %1514 = vmatpush.msra.mxu3 %v1203_v35  ;;  %v873_v43 = vadd.f32 %v872_v40, %v633_v31  ;;  %1459 = vmatmul.f32.vlgmr.msra.gmra.mxu0 %v983_v32  ;;  %v635_v31 = vperm.slane %v3299_v8, 4  ;;  %v1253_v32 = vld [vmem:[%s3599_s3 + $0x730] sm:$0xff]  ;;  %v1270_v33 = vld [vmem:[%s3599_s3 + $0x7b8] sm:$0xff] }
  0xfc   : > { %1478 = vmatpush.msra.mxu1 %v1167_v36  ;;  %1523 = vmatpush.msrb.mxu0 %v1230_v39  ;;  %v1234_v35 = vld [vmem:[%s3599_s3 + $0x698] sm:$0xff]  ;;  %v636_v36 = vperm.slane %v3299_v8, 5  ;;  %v1252_v39 = vld [vmem:[%s3599_s3 + $0x728] sm:$0xff]  ;;  %v1269_v40 = vld [vmem:[%s3599_s3 + $0x7b0] sm:$0xff] }
  0xfd   : > { %1496 = vmatpush.msra.mxu2 %v1185_v41  ;;  %v892_v47 = vpop.f32.mrf.mxu3  ;;  %1515 = vmatpush.msra.mxu3 %v1202_v44  ;;  %v985_v52 = vmax.f32 %v873_v43, 0.0  ;;  %v1233_v43 = vld [vmem:[%s3599_s3 + $0x690] sm:$0xff] }
  0xfe   : > { %1479 = vmatmul.f32.vlgmr.msra.gmra.mxu1 %v984_v37  ;;  %v893_v49 = vadd.f32 %v892_v47, %v634_v42  ;;  %1524 = vmatpush.msrb.mxu0 %v1229_v45  ;;  %v1216_v42 = vld [vmem:[%s3599_s3 + $0x608] sm:$0xff]  ;;  %v1251_v45 = vld [vmem:[%s3599_s3 + $0x720] sm:$0xff] }
  0xff   : > { %1543 = vmatpush.msrb.mxu1 %v1246_v46  ;;  %1497 = vmatpush.msra.mxu2 %v1184_v48  ;;  %v1268_v46 = vld [vmem:[%s3599_s3 + $0x7a8] sm:$0xff]  ;;  %v1215_v48 = vld [vmem:[%s3599_s3 + $0x600] sm:$0xff] }
 0x100   : > { %1516 = vmatpush.msra.mxu3 %v1201_v38  ;;  %1525 = vmatpush.msrb.mxu0 %v1228_v50  ;;  %v986_v58 = vmax.f32 %v893_v49, 0.0  ;;  %v1232_v38 = vld [vmem:[%s3599_s3 + $0x688] sm:$0xff]  ;;  %v637_v49 = vperm.slane %v3299_v8, 6 }
 0x101   : > { %1544 = vmatpush.msrb.mxu1 %v1245_v51  ;;  %1498 = vmatpush.msra.mxu2 %v1183_v53  ;;  %v1250_v51 = vld [vmem:[%s3599_s3 + $0x718] sm:$0xff]  ;;  %v1231_v53 = vld [vmem:[%s3599_s3 + $0x680] sm:$0xff] }
 0x102   : > { %1517 = vmatpush.msra.mxu3 %v1200_v54  ;;  %1499 = vmatmul.f32.vlgmr.msra.gmra.mxu2 %v985_v52  ;;  %v1267_v52 = vld [vmem:[%s3599_s3 + $0x7a0] sm:$0xff]  ;;  %v638_v54 = vperm.slane %v3299_v8, 7  ;;  %v1248_v8 = vld [vmem:[%s3599_s3 + $0x708] sm:$0xff] }
 0x103   : > { %1526 = vmatpush.msrb.mxu0 %v1227_v55  ;;  %1545 = vmatpush.msrb.mxu1 %v1244_v56 }
 0x104   : > { %1563 = vmatpush.msrb.mxu2 %v1262_v57  ;;  %1518 = vmatpush.msra.mxu3 %v1199_v59  ;;  %v1249_v57 = vld [vmem:[%s3599_s3 + $0x710] sm:$0xff] }
 0x105   : > { %1527 = vmatpush.msrb.mxu0 %v1226_v60  ;;  %1519 = vmatmul.f32.vlgmr.msra.gmra.mxu3 %v986_v58  ;;  %v1266_v58 = vld [vmem:[%s3599_s3 + $0x798] sm:$0xff] }
 0x106   : > { %1546 = vmatpush.msrb.mxu1 %v1243_v61  ;;  %1564 = vmatpush.msrb.mxu2 %v1261_v63  ;;  %v1265_v61 = vld [vmem:[%s3599_s3 + $0x790] sm:$0xff] }
 0x107   : > { %1583 = vmatpush.msrb.mxu3 %v1278_v0  ;;  %1528 = vmatpush.msrb.mxu0 %v1225_v1  ;;  %v1247_v1 = vld [vmem:[%s3599_s3 + $0x700] sm:$0xff] }
 0x108   : > { %1547 = vmatpush.msrb.mxu1 %v1242_v2  ;;  %1565 = vmatpush.msrb.mxu2 %v1260_v3  ;;  %v1264_v2 = vld [vmem:[%s3599_s3 + $0x788] sm:$0xff] }
 0x109   : > { %1584 = vmatpush.msrb.mxu3 %v1277_v4  ;;  %1529 = vmatpush.msrb.mxu0 %v1224_v5  ;;  %v1263_v4 = vld [vmem:[%s3599_s3 + $0x780] sm:$0xff] }
 0x10a   : > { %1548 = vmatpush.msrb.mxu1 %v1241_v6  ;;  %1566 = vmatpush.msrb.mxu2 %v1259_v7  ;;  %v1795_v5 = vld [vmem:[#allocation3] ss:$0 sm:$0xff] }
 0x10b   : > { %1585 = vmatpush.msrb.mxu3 %v1276_v9  ;;  %1530 = vmatpush.msrb.mxu0 %v1223_v10 }
 0x10c   : > { %1549 = vmatpush.msrb.mxu1 %v1240_v62  ;;  %1567 = vmatpush.msrb.mxu2 %v1258_v11 }
 0x10d   : > { %1586 = vmatpush.msrb.mxu3 %v1275_v12  ;;  %1531 = vmatpush.msrb.mxu0 %v1222_v13 }
 0x10e   : > { %1550 = vmatpush.msrb.mxu1 %v1239_v14  ;;  %1568 = vmatpush.msrb.mxu2 %v1257_v15 }
 0x10f   : > { %1587 = vmatpush.msrb.mxu3 %v1274_v16  ;;  %1532 = vmatpush.msrb.mxu0 %v1221_v17 }
 0x110   : > { %1551 = vmatpush.msrb.mxu1 %v1238_v18  ;;  %1569 = vmatpush.msrb.mxu2 %v1256_v19 }
 0x111   : > { %1588 = vmatpush.msrb.mxu3 %v1273_v20  ;;  %1533 = vmatpush.msrb.mxu0 %v1220_v21 }
 0x112   : > { %1552 = vmatpush.msrb.mxu1 %v1237_v22  ;;  %1570 = vmatpush.msrb.mxu2 %v1255_v23 }
 0x113   : > { %1589 = vmatpush.msrb.mxu3 %v1272_v24  ;;  %1534 = vmatpush.msrb.mxu0 %v1219_v25 }
 0x114   : > { %1553 = vmatpush.msrb.mxu1 %v1236_v26  ;;  %1571 = vmatpush.msrb.mxu2 %v1254_v27 }
 0x115   : > { %1590 = vmatpush.msrb.mxu3 %v1271_v28  ;;  %1535 = vmatpush.msrb.mxu0 %v1218_v29  ;;  %v912_v37 = vpop.f32.mrf.mxu0 }
 0x116   : > { %1554 = vmatpush.msrb.mxu1 %v1235_v30  ;;  %1572 = vmatpush.msrb.mxu2 %v1253_v32  ;;  %v913_v41 = vadd.f32 %v912_v37, %v635_v31  ;;  %v1603_v37 = vld [vmem:[%s357_s17] sm:$0xff] }
 0x117   : > { %1591 = vmatpush.msrb.mxu3 %v1270_v33  ;;  %1536 = vmatpush.msrb.mxu0 %v1217_v34  ;;  %v932_v44 = vpop.f32.mrf.mxu1 }
 0x118   : > { %1555 = vmatpush.msrb.mxu1 %v1234_v35  ;;  %1573 = vmatpush.msrb.mxu2 %v1252_v39  ;;  %v933_v47 = vadd.f32 %v932_v44, %v636_v36  ;;  %v987_v50 = vmax.f32 %v913_v41, 0.0  ;;  %v1911_v41 = vmov 128.0  }
 0x119   : > { %1592 = vmatpush.msrb.mxu3 %v1269_v40  ;;  %1537 = vmatpush.msrb.mxu0 %v1216_v42  ;;  %1798 = vrcp.f32 %v1911_v41 }
 0x11a   : > { %1556 = vmatpush.msrb.mxu1 %v1233_v43  ;;  %1574 = vmatpush.msrb.mxu2 %v1251_v45  ;;  %v988_v55 = vmax.f32 %v933_v47, 0.0 }
 0x11b   : > { %1593 = vmatpush.msrb.mxu3 %v1268_v46  ;;  %1538 = vmatpush.msrb.mxu0 %v1215_v48 }
 0x11c   : > { %1557 = vmatpush.msrb.mxu1 %v1232_v38  ;;  %v952_v56 = vpop.f32.mrf.mxu2  ;;  %1575 = vmatpush.msrb.mxu2 %v1250_v51 }
 0x11d   : > { %1594 = vmatpush.msrb.mxu3 %v1267_v52  ;;  %v953_v59 = vadd.f32 %v952_v56, %v637_v49  ;;  %1539 = vmatmul.f32.vlgmr.msrb.gmra.mxu0 %v987_v50 }
 0x11e   : > { %1558 = vmatpush.msrb.mxu1 %v1231_v53  ;;  %v972_v60 = vpop.f32.mrf.mxu3  ;;  %1576 = vmatpush.msrb.mxu2 %v1249_v57 }
 0x11f   : > { %1595 = vmatpush.msrb.mxu3 %v1266_v58  ;;  %v973_v63 = vadd.f32 %v972_v60, %v638_v54  ;;  %v989_v0 = vmax.f32 %v953_v59, 0.0  ;;  %1559 = vmatmul.f32.vlgmr.msrb.gmra.mxu1 %v988_v55  ;;  %v1799_v42 = vpop.eup %1798  ;;  %v1796_v60 = vld [vmem:[#allocation5] ss:$0 sm:$0xff] }
 0x120   : > { %1577 = vmatpush.msrb.mxu2 %v1248_v8  ;;  %v1608_v43 = vmul.f32 128.0, %v1799_v42  ;;  %vm1612_vm0 = vweird.f32 %v1799_v42 }
 0x121   : > { %1596 = vmatpush.msrb.mxu3 %v1265_v61  ;;  %v990_v3 = vmax.f32 %v973_v63, 0.0  ;;  %v1797_v61 = vld [vmem:[#allocation7] ss:$0 sm:$0xff] }
 0x122   : > { %1578 = vmatpush.msrb.mxu2 %v1247_v1  ;;  %v1609_v44 = vsub.f32 1.0, %v1608_v43 }
 0x123   : > { %1597 = vmatpush.msrb.mxu3 %v1264_v2  ;;  %1579 = vmatmul.f32.vlgmr.msrb.gmra.mxu2 %v989_v0 }
 0x124   : > { %v1610_v45 = vmul.f32 %v1799_v42, %v1609_v44 }
 0x125   : > { %1598 = vmatpush.msrb.mxu3 %v1263_v4 }
 0x126   : > { %1599 = vmatmul.f32.vlgmr.msrb.gmra.mxu3 %v990_v3  ;;  %v1611_v46 = vadd.f32 %v1799_v42, %v1610_v45 }
 0x128   : > { %v1613_v47 = vsel %vm1612_vm0, %v1799_v42, %v1611_v46 }
 0x153   : > { %v1300_v6 = vpop.f32.mrf.mxu0 }
 0x154   : > { %v1301_v7 = vadd.f32 %v1795_v5, %v1300_v6 }
 0x156   : > { %v1320_v9 = vpop.f32.mrf.mxu1 }
 0x157   : > { %v1321_v10 = vadd.f32 %v1320_v9, %v1301_v7 }
 0x160   : > { %v1340_v62 = vpop.f32.mrf.mxu2 }
 0x161   : > { %v1341_v11 = vadd.f32 %v1340_v62, %v1321_v10 }
 0x163   : > { %v1360_v12 = vpop.f32.mrf.mxu3 }
 0x164   : > { %v1361_v13 = vadd.f32 %v1360_v12, %v1341_v11 }
 0x167   : > { %v1380_v14 = vpop.f32.mrf.mxu0 }
 0x168   : > { %v1381_v15 = vadd.f32 %v1380_v14, %v1361_v13 }
 0x16a   : > { %v1400_v16 = vpop.f32.mrf.mxu1  ;;  %v1420_v18 = vpop.f32.mrf.mxu2 }
 0x16b   : > { %v1401_v17 = vadd.f32 %v1400_v16, %v1381_v15 }
 0x16d   : > { %v1421_v19 = vadd.f32 %v1420_v18, %v1401_v17  ;;  %v1440_v20 = vpop.f32.mrf.mxu3 }
 0x16f   : > { %v1441_v22 = vadd.f32 %v1440_v20, %v1421_v19 }
 0x178   : > { %v1460_v21 = vpop.f32.mrf.mxu0 }
 0x179   : > { %v1461_v23 = vadd.f32 %v1460_v21, %v1441_v22 }
 0x17b   : > { %v1480_v24 = vpop.f32.mrf.mxu1 }
 0x17c   : > { %v1481_v26 = vadd.f32 %v1480_v24, %v1461_v23 }
 0x185   : > { %v1500_v25 = vpop.f32.mrf.mxu2 }
 0x186   : > { %v1501_v27 = vadd.f32 %v1500_v25, %v1481_v26 }
 0x188   : > { %v1520_v28 = vpop.f32.mrf.mxu3 }
 0x189   : > { %v1521_v30 = vadd.f32 %v1520_v28, %v1501_v27 }
 0x19a   : > { %v1540_v29 = vpop.f32.mrf.mxu0 }
 0x19b   : > { %v1541_v31 = vadd.f32 %v1540_v29, %v1521_v30 }
 0x19c   : > { %v1560_v32 = vpop.f32.mrf.mxu1 }
 0x19d   : > { %v1561_v33 = vadd.f32 %v1560_v32, %v1541_v31 }
 0x1a6   : > { %v1580_v34 = vpop.f32.mrf.mxu2 }
 0x1a7   : > { %v1581_v35 = vadd.f32 %v1580_v34, %v1561_v33 }
 0x1a9   : > { %v1600_v36 = vpop.f32.mrf.mxu3 }
 0x1aa   : > { %v1601_v39 = vadd.f32 %v1600_v36, %v1581_v35 }
 0x1ac   : > { %v1604_v40 = vadd.f32 %v1603_v37, %v1601_v39 }
 0x1ae   : > { %1605 = vadd.xlane.f32.xlu0 %v1604_v40 }
 0x221   : > { %v1606_v48 = vpop.xlane.xlu0 %1605 }
 0x222   : > { %v1614_v38 = vmul.f32 %v1613_v47, %v1606_v48 }
 0x224   : > { %v1615_v49 = vsub.f32 %v1604_v40, %v1614_v38 }
 0x226   : > { %v1616_v50 = vmul.f32 %v1615_v49, %v1615_v49 }
 0x228   : > { %1617 = vadd.xlane.f32.xlu0 %v1616_v50 }
 0x29b   : > { %v1618_v51 = vpop.xlane.xlu0 %1617 }
 0x29c   : > { %v1619_v52 = vmul.f32 %v1618_v51, %v1613_v47 }
 0x29e   : > { %v1620_v53 = vadd.f32 1e-05, %v1619_v52 }
 0x2a0   : > { %1800 = vrsqrt.f32 %v1620_v53  ;;  %vm1627_vm2 = vweird.f32 %v1620_v53 }
 0x2a6   : > { %v1801_v54 = vpop.eup %1800 }
 0x2a7   : > { %v1622_v55 = vmul.f32 %v1801_v54, %v1620_v53  ;;  %vm1628_vm1 = vweird.f32 %v1801_v54 }
 0x2a8   : > { %vm1629_vm3 = vmor %vm1627_vm2, %vm1628_vm1 }
 0x2a9   : > { %v1623_v56 = vmul.f32 %v1801_v54, %v1622_v55 }
 0x2ab   : > { %v1624_v57 = vmul.f32 0.5, %v1623_v56 }
 0x2ad   : > { %v1625_v58 = vsub.f32 1.5, %v1624_v57 }
 0x2af   : > { %v1626_v59 = vmul.f32 %v1801_v54, %v1625_v58 }
 0x2b1   : > { %v1630_v8 = vsel %vm1629_vm3, %v1801_v54, %v1626_v59 }
 0x2b2   : > { %v1631_v63 = vmul.f32 %v1630_v8, %v1615_v49 }
 0x2b4   : > { %v1636_v0 = vmul.f32 %v1796_v60, %v1631_v63 }
 0x2b6   : > { %v1641_v1 = vadd.f32 %v1797_v61, %v1636_v0 }
 0x2b8   : > { %1642 = vst [vmem:[%s361_s20] sm:$0xff] %v1641_v1 }
 0x2b9 PF: > { %s20_s27 = sadd.s32 1, %s1906_s27  }
 0x2ba   : > { %p17_p7 = scmp.ge.s32.totalorder %s20_s27, 4  }
 0x2bc   :  { %19 = sbr.rel (!%p17_p7) target bundleno = 2 (0x2), region = 98 }
 0x2c1   :  { %1662 = vsyncpa [#allocation4], 1 }
 0x2c2   :  { %1664 = vsyncpa [#allocation4 + $0x1], 1 }
 0x2c3   :  { %1665 = vsyncpa [#allocation6], 1 }

</bundles_post_ra>
